<compile_context>
chip_gen: v5e
topology: v5e:2x2
jax: 0.10.0
libtpu: 0.0.40
codegen_flags: <defaults>
</compile_context>

<pallas_src>
import jax
import jax.numpy as jnp
from jax.experimental import pallas as pl
from jax.experimental.pallas import tpu as pltpu

# Pin matmul precision so the XLA-side GEMMs (hoisted projection, reference) and the
# in-kernel MXU dots agree to ~f32 accuracy on real TPUs as well as in interpret mode.
jax.config.update("jax_default_matmul_precision", "highest")


def _round_up(n, m):
    return (n + m - 1) // m * m


def _lstmsnp_recurrence_kernel(gx_ref, gox_ref, wu_ref, wl_ref, bl_ref, out_ref, u_ref):
    """Sequential LSTM-SNP recurrence over one (batch-tile, time-chunk) block.

    gx_ref : (T_CHUNK, B_TILE, 3*Hp) bf16  x @ [W_ir|W_ic|W_ia]^T + (b_i + b_u), gates [r|c|a]
    gox_ref: (B_TILE, Hp)            f32   final-step o-gate x-projection (+ biases)
    wu_ref : (Hp, 4*Hp)              f32   recurrent weights, gate order [r|c|a|o]
    wl_ref : (Hp, Op)                f32   output-head weight (pre-transposed)
    bl_ref : (1, Op)                 f32   output-head bias
    out_ref: (B_TILE, Op)            f32   written ONLY on the last time chunk; its block
                                           index is constant over the time axis, so no
                                           intermediate writeback occurs.  Do not change
                                           the out index_map without revisiting this.
    u_ref  : (B_TILE, Hp)            f32   recurrent state, persists across time chunks
    """
    t_chunk = gx_ref.shape[0]
    hp = wu_ref.shape[0]
    t_blk = pl.program_id(1)

    @pl.when(t_blk == 0)
    def _():
        u_ref[...] = jnp.zeros_like(u_ref)

    def step(i, u):
        # r, c, a gates only -- the o gate is dead work except at the final timestep.
        pre = gx_ref[i].astype(jnp.float32) + jnp.dot(
            u, wu_ref[:, : 3 * hp], preferred_element_type=jnp.float32)
        r = jax.nn.sigmoid(pre[:, :hp])
        c = jax.nn.sigmoid(pre[:, hp:2 * hp])
        a = jnp.tanh(pre[:, 2 * hp:])
        return r * u - c * a

    # Single loop carry (u only); the last step of the chunk is peeled out of the loop so
    # the state *before* it (u_prev) is available to the epilogue without a duplicate
    # carried copy living through the whole loop.
    u0 = u_ref[...]
    unroll = max(1, min(t_chunk - 1, 8))       # bounded partial unroll
    u_prev = jax.lax.fori_loop(0, t_chunk - 1, step, u0, unroll=unroll)
    u_ref[...] = step(t_chunk - 1, u_prev)     # peeled final step of this chunk

    @pl.when(t_blk == pl.num_programs(1) - 1)
    def _():
        # Final timestep only: a_T (recomputed from u_prev, one extra Hp-column matmul per
        # whole sequence) and o_T -> h_T = o_T * a_T -> linear head.
        pre_a = gx_ref[t_chunk - 1][:, 2 * hp:].astype(jnp.float32) + jnp.dot(
            u_prev, wu_ref[:, 2 * hp:3 * hp], preferred_element_type=jnp.float32)
        pre_o = gox_ref[...] + jnp.dot(
            u_prev, wu_ref[:, 3 * hp:], preferred_element_type=jnp.float32)
        a_t = jnp.tanh(pre_a)
        o_t = jax.nn.sigmoid(pre_o)
        h_t = o_t * a_t                        # dropout p=0.0 -> identity
        out_ref[...] = (jnp.dot(h_t, wl_ref[...], preferred_element_type=jnp.float32)
                        + bl_ref[...]).astype(out_ref.dtype)


def lstmsnp_forward(x, params, *, t_chunk=None, b_tile=None):
    """x: (bs, seq_len, input_size) f32 -> (bs, output_size) f32."""
    bs, seq_len, input_size = x.shape
    hidden = params["W_ur"].shape[0]
    out_size = params["W_lin"].shape[0]

    hp = _round_up(hidden, 128)      # lane-aligned gate slices
    bsp = _round_up(bs, 16)          # sublane-aligned batch (16 is clean for bf16 packing too)
    op = _round_up(out_size, 128)    # unmasked vst on the output

    # ---- tile-size selection from an explicit VMEM budget ----------------------------
    if b_tile is None:
        if bsp < 32:
            b_tile = bsp
        else:
            # >= 2 tiles on the leading "parallel" axis (2nd TensorCore on v7x), but keep
            # tiles large (<= 256 rows) for MXU M-occupancy on v6e/v7x.
            target = min(256, bsp // 2)
            b_tile, d = 16, 16
            while d <= bsp:
                if bsp % d == 0 and d <= target:
                    b_tile = d
                d += 16
    if t_chunk is None:
        # Largest divisor of seq_len whose bf16 gx block fits the per-buffer budget
        # (x2 for double-buffering still fits comfortably inside v7x's 64 MiB VMEM).
        budget = 8 << 20
        t_chunk = 1
        for t in range(seq_len, 0, -1):
            if seq_len % t == 0 and t * b_tile * 3 * hp * 2 <= budget:
                t_chunk = t
                break
    assert seq_len % t_chunk == 0 and bsp % b_tile == 0

    def pad2(w, r, c):
        return jnp.pad(w, ((0, r - w.shape[0]), (0, c - w.shape[1])))

    def pad1(v, n):
        return jnp.pad(v, (0, n - v.shape[0]))

    # Streamed pre-activations use gate order [r | c | a]; the recurrent weights append
    # the o column: [r | c | a | o] so every kernel slice is a 128-lane-aligned block.
    wi_rca = jnp.concatenate(
        [pad2(params["W_ir"].T, input_size, hp),
         pad2(params["W_ic"].T, input_size, hp),
         pad2(params["W_ia"].T, input_size, hp)], axis=1)                       # (I, 3*hp)
    b_rca = jnp.concatenate(
        [pad1(params["b_ir"] + params["b_ur"], hp),
         pad1(params["b_ic"] + params["b_uc"], hp),
         pad1(params["b_ia"] + params["b_ua"], hp)])                            # (3*hp,)
    wu_p = jnp.concatenate(
        [pad2(params["W_ur"].T, hp, hp), pad2(params["W_uc"].T, hp, hp),
         pad2(params["W_ua"].T, hp, hp), pad2(params["W_uo"].T, hp, hp)], axis=1)  # (hp, 4*hp)
    wl_p = pad2(params["W_lin"].T, hp, op)
    bl_p = pad1(params["b_lin"], op).reshape(1, op)

    x_p = jnp.pad(x, ((0, bsp - bs), (0, 0), (0, 0)))

    # Hoisted, time-invariant projection: ONE sequence-wide f32 GEMM.  x (small) is
    # transposed up front so gx is produced directly in (t, b, gates) layout -- no
    # HBM->HBM transpose of the big gx intermediate.  gx is stored bf16 (streaming dtype
    # only; all in-kernel arithmetic is f32).
    x_t = jnp.transpose(x_p, (1, 0, 2))                                          # (seq, bsp, I)
    gx = (jnp.einsum("tbi,ig->tbg", x_t, wi_rca) + b_rca).astype(jnp.bfloat16)

    # o-gate x-projection, needed only at the final timestep: tiny (bsp, hp) GEMM.
    go_x = (jnp.dot(x_p[:, -1, :], pad2(params["W_io"].T, input_size, hp))
            + pad1(params["b_io"] + params["b_uo"], hp))                         # (bsp, hp) f32

    # ---- explicit VMEM budget for the compiler ----------------------------------------
    gx_blk = t_chunk * b_tile * 3 * hp * 2      # bf16, double-buffered by the pipeline
    gox_blk = b_tile * hp * 4
    wu_blk = hp * 4 * hp * 4
    wl_blk = hp * op * 4
    bl_blk = op * 4
    out_blk = b_tile * op * 4
    scratch_b = b_tile * hp * 4
    vmem_need = 2 * (gx_blk + gox_blk + wu_blk + wl_blk + bl_blk + out_blk) + scratch_b
    vmem_limit = int(min(64 << 20, max(2 * vmem_need, 8 << 20)))

    out_p = pl.pallas_call(
        _lstmsnp_recurrence_kernel,
        out_shape=jax.ShapeDtypeStruct((bsp, op), jnp.float32),
        grid_spec=pltpu.PrefetchScalarGridSpec(
            num_scalar_prefetch=0,
            grid=(bsp // b_tile, seq_len // t_chunk),       # (batch tiles, time chunks)
            in_specs=[
                pl.BlockSpec((t_chunk, b_tile, 3 * hp), lambda b, t: (t, b, 0)),
                pl.BlockSpec((b_tile, hp), lambda b, t: (b, 0)),
                # Constant-index weight blocks.  For very large hidden sizes these would
                # additionally want pipeline_mode=pl.Buffered(1) (no double-buffering)
                # and/or fp8 weights on v7x; omitted here for compile safety.
                pl.BlockSpec((hp, 4 * hp), lambda b, t: (0, 0)),
                pl.BlockSpec((hp, op), lambda b, t: (0, 0)),
                pl.BlockSpec((1, op), lambda b, t: (0, 0)),
            ],
            out_specs=pl.BlockSpec((b_tile, op), lambda b, t: (b, 0)),
            scratch_shapes=[pltpu.VMEM((b_tile, hp), jnp.float32)],
        ),
        compiler_params=pltpu.CompilerParams(
            dimension_semantics=("parallel", "arbitrary"),
            vmem_limit_bytes=vmem_limit),
    )(gx, go_x, wu_p, wl_p, bl_p)

    return out_p[:bs, :out_size]


def lstmsnp_reference(x, params):
    """Pure-JAX f32 reference of the same forward.  The r/c/a x-projections (with folded
    gate biases) are rounded once to bf16, mirroring the kernel's bf16 streaming of gx;
    everything else stays f32."""
    def bf16_round(v):
        return v.astype(jnp.bfloat16).astype(jnp.float32)

    bs, seq_len, _ = x.shape
    hidden = params["W_ur"].shape[0]
    u = jnp.zeros((bs, hidden), jnp.float32)
    h = jnp.zeros((bs, hidden), jnp.float32)
    for t in range(seq_len):
        xt = x[:, t, :]
        pre_r = bf16_round(xt @ params["W_ir"].T + params["b_ir"] + params["b_ur"]) \
            + u @ params["W_ur"].T
        pre_c = bf16_round(xt @ params["W_ic"].T + params["b_ic"] + params["b_uc"]) \
            + u @ params["W_uc"].T
        pre_a = bf16_round(xt @ params["W_ia"].T + params["b_ia"] + params["b_ua"]) \
            + u @ params["W_ua"].T
        pre_o = (xt @ params["W_io"].T + params["b_io"] + params["b_uo"]
                 + u @ params["W_uo"].T)
        r = jax.nn.sigmoid(pre_r)
        c = jax.nn.sigmoid(pre_c)
        o = jax.nn.sigmoid(pre_o)
        a = jnp.tanh(pre_a)
        u = r * u - c * a
        h = o * a                     # dropout(p=0.0) == identity
    return h @ params["W_lin"].T + params["b_lin"]


def _xavier_uniform(key, shape):
    fan_out, fan_in = shape
    limit = jnp.sqrt(6.0 / (fan_in + fan_out))
    return jax.random.uniform(key, shape, jnp.float32, -limit, limit)


if __name__ == "__main__":
    bs, seq_len, input_size, hidden, out_size = 2, 8, 4, 32, 8

    key = jax.random.PRNGKey(0)
    keys = jax.random.split(key, 12)

    x = jax.random.normal(keys[0], (bs, seq_len, input_size), jnp.float32)

    params = {
        # Cell weights: xavier_uniform matrices, zero biases (init_weights()).
        "W_ir": _xavier_uniform(keys[1], (hidden, input_size)),
        "W_ic": _xavier_uniform(keys[2], (hidden, input_size)),
        "W_io": _xavier_uniform(keys[3], (hidden, input_size)),
        "W_ia": _xavier_uniform(keys[4], (hidden, input_size)),
        "W_ur": _xavier_uniform(keys[5], (hidden, hidden)),
        "W_uc": _xavier_uniform(keys[6], (hidden, hidden)),
        "W_uo": _xavier_uniform(keys[7], (hidden, hidden)),
        "W_ua": _xavier_uniform(keys[8], (hidden, hidden)),
        # Final linear readout (deterministic synthetic init).
        "W_lin": _xavier_uniform(keys[9], (out_size, hidden)),
        "b_lin": jax.random.uniform(keys[10], (out_size,), jnp.float32, -0.1, 0.1),
    }
    for name in ("b_ir", "b_ur", "b_ic", "b_uc", "b_io", "b_uo", "b_ia", "b_ua"):
        params[name] = jnp.zeros((hidden,), jnp.float32)

    out = lstmsnp_forward(x, params)
    out = jax.block_until_ready(out)

    ref = lstmsnp_reference(x, params)
    assert out.shape == (bs, out_size)
    max_err = float(jnp.max(jnp.abs(out - ref)))
    assert max_err < 2e-3, f"mismatch vs reference: max_err={max_err}"

    # TODO(synk): dropout_rate=0.0 -> identity; training-mode dropout (p>0) would need
    # pltpu.prng_seed / pltpu.prng_random_bits inside the kernel and is not implemented.
    print("KERNEL_OK")
</pallas_src>

<mosaic_0001>
module attributes {stable_mosaic.version = 11 : i64} {
  func.func @_lstmsnp_recurrence_kernel(%arg0: i32, %arg1: i32, %arg2: memref<8x16x384xbf16, #tpu.memory_space<vmem>>, %arg3: memref<16x128xf32, #tpu.memory_space<vmem>>, %arg4: memref<128x512xf32, #tpu.memory_space<vmem>>, %arg5: memref<128x128xf32, #tpu.memory_space<vmem>>, %arg6: memref<1x128xf32, #tpu.memory_space<vmem>>, %arg7: memref<16x128xf32, #tpu.memory_space<vmem>>, %arg8: memref<16x128xf32, #tpu.memory_space<vmem>>) attributes {dimension_semantics = [#tpu.dimension_semantics<parallel>, #tpu.dimension_semantics<arbitrary>], iteration_bounds = array<i64: 1, 1>, scalar_prefetch = 0 : i64, scratch_operands = 1 : i64, tpu.core_type = #tpu.core_type<tc>, window_params = [{transform_indices = @transform_0, window_bounds = array<i64: 8, 16, 384>}, {transform_indices = @transform_1, window_bounds = array<i64: 16, 128>}, {pipeline_mode = #tpu.pipeline_mode<synchronous>, transform_indices = @transform_2, window_bounds = array<i64: 128, 512>}, {pipeline_mode = #tpu.pipeline_mode<synchronous>, transform_indices = @transform_3, window_bounds = array<i64: 128, 128>}, {pipeline_mode = #tpu.pipeline_mode<synchronous>, transform_indices = @transform_4, window_bounds = array<i64: 1, 128>}, {transform_indices = @transform_5, window_bounds = array<i64: 16, 128>}]} {
    %c0_i32 = arith.constant 0 : i32
    %0 = arith.cmpi eq, %arg1, %c0_i32 : i32
    %1 = arith.extui %0 : i1 to i32
    %c0_i32_0 = arith.constant 0 : i32
    %2 = arith.cmpi ne, %1, %c0_i32_0 : i32
    scf.if %2 {
      %cst_62 = arith.constant 0.000000e+00 : f32
      %199 = vector.broadcast %cst_62 : f32 to vector<16x128xf32>
      %c0_63 = arith.constant 0 : index
      %c0_64 = arith.constant 0 : index
      %200 = vector.load %arg8[%c0_63, %c0_64] : memref<16x128xf32, #tpu.memory_space<vmem>>, vector<16x128xf32>
      tpu.vector_store %arg8[%c0_63, %c0_64], %199 {strides = array<i32>} : memref<16x128xf32, #tpu.memory_space<vmem>>, vector<16x128xf32>,
    } else {
    }
    %c0 = arith.constant 0 : index
    %c0_1 = arith.constant 0 : index
    %3 = vector.load %arg8[%c0, %c0_1] : memref<16x128xf32, #tpu.memory_space<vmem>>, vector<16x128xf32>
    %c0_i32_2 = arith.constant 0 : i32
    %4 = arith.index_cast %c0_i32_2 : i32 to index
    %c0_3 = arith.constant 0 : index
    %c0_4 = arith.constant 0 : index
    %5 = vector.load %arg2[%4, %c0_3, %c0_4] : memref<8x16x384xbf16, #tpu.memory_space<vmem>>, vector<1x16x384xbf16>
    %6 = vector.shape_cast %5 : vector<1x16x384xbf16> to vector<16x384xbf16>
    %7 = arith.extf %6 : vector<16x384xbf16> to vector<16x384xf32>
    %c0_5 = arith.constant 0 : index
    %c0_6 = arith.constant 0 : index
    %8 = vector.load %arg4[%c0_5, %c0_6] : memref<128x512xf32, #tpu.memory_space<vmem>>, vector<128x384xf32>
    %cst = arith.constant dense<0.000000e+00> : vector<16x384xf32>
    %9 = tpu.matmul %3, %8, %cst {dimension_numbers = #tpu.dot_dimension_numbers<[1], [0], [0], [1], [0, 0, 1, 1], [], []>, precision = #tpu.contract_precision<fp32>} : vector<16x128xf32>, vector<128x384xf32>, vector<16x384xf32> -> vector<16x384xf32>
    %10 = arith.addf %7, %9 : vector<16x384xf32>
    %11 = vector.extract_strided_slice %10 {offsets = [0, 0], sizes = [16, 128], strides = [1, 1]} : vector<16x384xf32> to vector<16x128xf32>
    %12 = arith.negf %11 : vector<16x128xf32>
    %13 = math.exp %12 : vector<16x128xf32>
    %cst_7 = arith.constant 1.000000e+00 : f32
    %14 = vector.broadcast %cst_7 : f32 to vector<16x128xf32>
    %15 = arith.addf %14, %13 : vector<16x128xf32>
    %16 = arith.divf %14, %15 : vector<16x128xf32>
    %17 = vector.extract_strided_slice %10 {offsets = [0, 128], sizes = [16, 128], strides = [1, 1]} : vector<16x384xf32> to vector<16x128xf32>
    %18 = arith.negf %17 : vector<16x128xf32>
    %19 = math.exp %18 : vector<16x128xf32>
    %cst_8 = arith.constant 1.000000e+00 : f32
    %20 = vector.broadcast %cst_8 : f32 to vector<16x128xf32>
    %21 = arith.addf %20, %19 : vector<16x128xf32>
    %22 = arith.divf %20, %21 : vector<16x128xf32>
    %23 = vector.extract_strided_slice %10 {offsets = [0, 256], sizes = [16, 128], strides = [1, 1]} : vector<16x384xf32> to vector<16x128xf32>
    %24 = math.tanh %23 : vector<16x128xf32>
    %25 = arith.mulf %16, %3 : vector<16x128xf32>
    %26 = arith.mulf %22, %24 : vector<16x128xf32>
    %27 = arith.subf %25, %26 : vector<16x128xf32>
    %c1_i32 = arith.constant 1 : i32
    %28 = arith.index_cast %c1_i32 : i32 to index
    %c0_9 = arith.constant 0 : index
    %c0_10 = arith.constant 0 : index
    %29 = vector.load %arg2[%28, %c0_9, %c0_10] : memref<8x16x384xbf16, #tpu.memory_space<vmem>>, vector<1x16x384xbf16>
    %30 = vector.shape_cast %29 : vector<1x16x384xbf16> to vector<16x384xbf16>
    %31 = arith.extf %30 : vector<16x384xbf16> to vector<16x384xf32>
    %c0_11 = arith.constant 0 : index
    %c0_12 = arith.constant 0 : index
    %32 = vector.load %arg4[%c0_11, %c0_12] : memref<128x512xf32, #tpu.memory_space<vmem>>, vector<128x384xf32>
    %cst_13 = arith.constant dense<0.000000e+00> : vector<16x384xf32>
    %33 = tpu.matmul %27, %32, %cst_13 {dimension_numbers = #tpu.dot_dimension_numbers<[1], [0], [0], [1], [0, 0, 1, 1], [], []>, precision = #tpu.contract_precision<fp32>} : vector<16x128xf32>, vector<128x384xf32>, vector<16x384xf32> -> vector<16x384xf32>
    %34 = arith.addf %31, %33 : vector<16x384xf32>
    %35 = vector.extract_strided_slice %34 {offsets = [0, 0], sizes = [16, 128], strides = [1, 1]} : vector<16x384xf32> to vector<16x128xf32>
    %36 = arith.negf %35 : vector<16x128xf32>
    %37 = math.exp %36 : vector<16x128xf32>
    %cst_14 = arith.constant 1.000000e+00 : f32
    %38 = vector.broadcast %cst_14 : f32 to vector<16x128xf32>
    %39 = arith.addf %38, %37 : vector<16x128xf32>
    %40 = arith.divf %38, %39 : vector<16x128xf32>
    %41 = vector.extract_strided_slice %34 {offsets = [0, 128], sizes = [16, 128], strides = [1, 1]} : vector<16x384xf32> to vector<16x128xf32>
    %42 = arith.negf %41 : vector<16x128xf32>
    %43 = math.exp %42 : vector<16x128xf32>
    %cst_15 = arith.constant 1.000000e+00 : f32
    %44 = vector.broadcast %cst_15 : f32 to vector<16x128xf32>
    %45 = arith.addf %44, %43 : vector<16x128xf32>
    %46 = arith.divf %44, %45 : vector<16x128xf32>
    %47 = vector.extract_strided_slice %34 {offsets = [0, 256], sizes = [16, 128], strides = [1, 1]} : vector<16x384xf32> to vector<16x128xf32>
    %48 = math.tanh %47 : vector<16x128xf32>
    %49 = arith.mulf %40, %27 : vector<16x128xf32>
    %50 = arith.mulf %46, %48 : vector<16x128xf32>
    %51 = arith.subf %49, %50 : vector<16x128xf32>
    %c2_i32 = arith.constant 2 : i32
    %52 = arith.index_cast %c2_i32 : i32 to index
    %c0_16 = arith.constant 0 : index
    %c0_17 = arith.constant 0 : index
    %53 = vector.load %arg2[%52, %c0_16, %c0_17] : memref<8x16x384xbf16, #tpu.memory_space<vmem>>, vector<1x16x384xbf16>
    %54 = vector.shape_cast %53 : vector<1x16x384xbf16> to vector<16x384xbf16>
    %55 = arith.extf %54 : vector<16x384xbf16> to vector<16x384xf32>
    %c0_18 = arith.constant 0 : index
    %c0_19 = arith.constant 0 : index
    %56 = vector.load %arg4[%c0_18, %c0_19] : memref<128x512xf32, #tpu.memory_space<vmem>>, vector<128x384xf32>
    %cst_20 = arith.constant dense<0.000000e+00> : vector<16x384xf32>
    %57 = tpu.matmul %51, %56, %cst_20 {dimension_numbers = #tpu.dot_dimension_numbers<[1], [0], [0], [1], [0, 0, 1, 1], [], []>, precision = #tpu.contract_precision<fp32>} : vector<16x128xf32>, vector<128x384xf32>, vector<16x384xf32> -> vector<16x384xf32>
    %58 = arith.addf %55, %57 : vector<16x384xf32>
    %59 = vector.extract_strided_slice %58 {offsets = [0, 0], sizes = [16, 128], strides = [1, 1]} : vector<16x384xf32> to vector<16x128xf32>
    %60 = arith.negf %59 : vector<16x128xf32>
    %61 = math.exp %60 : vector<16x128xf32>
    %cst_21 = arith.constant 1.000000e+00 : f32
    %62 = vector.broadcast %cst_21 : f32 to vector<16x128xf32>
    %63 = arith.addf %62, %61 : vector<16x128xf32>
    %64 = arith.divf %62, %63 : vector<16x128xf32>
    %65 = vector.extract_strided_slice %58 {offsets = [0, 128], sizes = [16, 128], strides = [1, 1]} : vector<16x384xf32> to vector<16x128xf32>
    %66 = arith.negf %65 : vector<16x128xf32>
    %67 = math.exp %66 : vector<16x128xf32>
    %cst_22 = arith.constant 1.000000e+00 : f32
    %68 = vector.broadcast %cst_22 : f32 to vector<16x128xf32>
    %69 = arith.addf %68, %67 : vector<16x128xf32>
    %70 = arith.divf %68, %69 : vector<16x128xf32>
    %71 = vector.extract_strided_slice %58 {offsets = [0, 256], sizes = [16, 128], strides = [1, 1]} : vector<16x384xf32> to vector<16x128xf32>
    %72 = math.tanh %71 : vector<16x128xf32>
    %73 = arith.mulf %64, %51 : vector<16x128xf32>
    %74 = arith.mulf %70, %72 : vector<16x128xf32>
    %75 = arith.subf %73, %74 : vector<16x128xf32>
    %c3_i32 = arith.constant 3 : i32
    %76 = arith.index_cast %c3_i32 : i32 to index
    %c0_23 = arith.constant 0 : index
    %c0_24 = arith.constant 0 : index
    %77 = vector.load %arg2[%76, %c0_23, %c0_24] : memref<8x16x384xbf16, #tpu.memory_space<vmem>>, vector<1x16x384xbf16>
    %78 = vector.shape_cast %77 : vector<1x16x384xbf16> to vector<16x384xbf16>
    %79 = arith.extf %78 : vector<16x384xbf16> to vector<16x384xf32>
    %c0_25 = arith.constant 0 : index
    %c0_26 = arith.constant 0 : index
    %80 = vector.load %arg4[%c0_25, %c0_26] : memref<128x512xf32, #tpu.memory_space<vmem>>, vector<128x384xf32>
    %cst_27 = arith.constant dense<0.000000e+00> : vector<16x384xf32>
    %81 = tpu.matmul %75, %80, %cst_27 {dimension_numbers = #tpu.dot_dimension_numbers<[1], [0], [0], [1], [0, 0, 1, 1], [], []>, precision = #tpu.contract_precision<fp32>} : vector<16x128xf32>, vector<128x384xf32>, vector<16x384xf32> -> vector<16x384xf32>
    %82 = arith.addf %79, %81 : vector<16x384xf32>
    %83 = vector.extract_strided_slice %82 {offsets = [0, 0], sizes = [16, 128], strides = [1, 1]} : vector<16x384xf32> to vector<16x128xf32>
    %84 = arith.negf %83 : vector<16x128xf32>
    %85 = math.exp %84 : vector<16x128xf32>
    %cst_28 = arith.constant 1.000000e+00 : f32
    %86 = vector.broadcast %cst_28 : f32 to vector<16x128xf32>
    %87 = arith.addf %86, %85 : vector<16x128xf32>
    %88 = arith.divf %86, %87 : vector<16x128xf32>
    %89 = vector.extract_strided_slice %82 {offsets = [0, 128], sizes = [16, 128], strides = [1, 1]} : vector<16x384xf32> to vector<16x128xf32>
    %90 = arith.negf %89 : vector<16x128xf32>
    %91 = math.exp %90 : vector<16x128xf32>
    %cst_29 = arith.constant 1.000000e+00 : f32
    %92 = vector.broadcast %cst_29 : f32 to vector<16x128xf32>
    %93 = arith.addf %92, %91 : vector<16x128xf32>
    %94 = arith.divf %92, %93 : vector<16x128xf32>
    %95 = vector.extract_strided_slice %82 {offsets = [0, 256], sizes = [16, 128], strides = [1, 1]} : vector<16x384xf32> to vector<16x128xf32>
    %96 = math.tanh %95 : vector<16x128xf32>
    %97 = arith.mulf %88, %75 : vector<16x128xf32>
    %98 = arith.mulf %94, %96 : vector<16x128xf32>
    %99 = arith.subf %97, %98 : vector<16x128xf32>
    %c4_i32 = arith.constant 4 : i32
    %100 = arith.index_cast %c4_i32 : i32 to index
    %c0_30 = arith.constant 0 : index
    %c0_31 = arith.constant 0 : index
    %101 = vector.load %arg2[%100, %c0_30, %c0_31] : memref<8x16x384xbf16, #tpu.memory_space<vmem>>, vector<1x16x384xbf16>
    %102 = vector.shape_cast %101 : vector<1x16x384xbf16> to vector<16x384xbf16>
    %103 = arith.extf %102 : vector<16x384xbf16> to vector<16x384xf32>
    %c0_32 = arith.constant 0 : index
    %c0_33 = arith.constant 0 : index
    %104 = vector.load %arg4[%c0_32, %c0_33] : memref<128x512xf32, #tpu.memory_space<vmem>>, vector<128x384xf32>
    %cst_34 = arith.constant dense<0.000000e+00> : vector<16x384xf32>
    %105 = tpu.matmul %99, %104, %cst_34 {dimension_numbers = #tpu.dot_dimension_numbers<[1], [0], [0], [1], [0, 0, 1, 1], [], []>, precision = #tpu.contract_precision<fp32>} : vector<16x128xf32>, vector<128x384xf32>, vector<16x384xf32> -> vector<16x384xf32>
    %106 = arith.addf %103, %105 : vector<16x384xf32>
    %107 = vector.extract_strided_slice %106 {offsets = [0, 0], sizes = [16, 128], strides = [1, 1]} : vector<16x384xf32> to vector<16x128xf32>
    %108 = arith.negf %107 : vector<16x128xf32>
    %109 = math.exp %108 : vector<16x128xf32>
    %cst_35 = arith.constant 1.000000e+00 : f32
    %110 = vector.broadcast %cst_35 : f32 to vector<16x128xf32>
    %111 = arith.addf %110, %109 : vector<16x128xf32>
    %112 = arith.divf %110, %111 : vector<16x128xf32>
    %113 = vector.extract_strided_slice %106 {offsets = [0, 128], sizes = [16, 128], strides = [1, 1]} : vector<16x384xf32> to vector<16x128xf32>
    %114 = arith.negf %113 : vector<16x128xf32>
    %115 = math.exp %114 : vector<16x128xf32>
    %cst_36 = arith.constant 1.000000e+00 : f32
    %116 = vector.broadcast %cst_36 : f32 to vector<16x128xf32>
    %117 = arith.addf %116, %115 : vector<16x128xf32>
    %118 = arith.divf %116, %117 : vector<16x128xf32>
    %119 = vector.extract_strided_slice %106 {offsets = [0, 256], sizes = [16, 128], strides = [1, 1]} : vector<16x384xf32> to vector<16x128xf32>
    %120 = math.tanh %119 : vector<16x128xf32>
    %121 = arith.mulf %112, %99 : vector<16x128xf32>
    %122 = arith.mulf %118, %120 : vector<16x128xf32>
    %123 = arith.subf %121, %122 : vector<16x128xf32>
    %c5_i32 = arith.constant 5 : i32
    %124 = arith.index_cast %c5_i32 : i32 to index
    %c0_37 = arith.constant 0 : index
    %c0_38 = arith.constant 0 : index
    %125 = vector.load %arg2[%124, %c0_37, %c0_38] : memref<8x16x384xbf16, #tpu.memory_space<vmem>>, vector<1x16x384xbf16>
    %126 = vector.shape_cast %125 : vector<1x16x384xbf16> to vector<16x384xbf16>
    %127 = arith.extf %126 : vector<16x384xbf16> to vector<16x384xf32>
    %c0_39 = arith.constant 0 : index
    %c0_40 = arith.constant 0 : index
    %128 = vector.load %arg4[%c0_39, %c0_40] : memref<128x512xf32, #tpu.memory_space<vmem>>, vector<128x384xf32>
    %cst_41 = arith.constant dense<0.000000e+00> : vector<16x384xf32>
    %129 = tpu.matmul %123, %128, %cst_41 {dimension_numbers = #tpu.dot_dimension_numbers<[1], [0], [0], [1], [0, 0, 1, 1], [], []>, precision = #tpu.contract_precision<fp32>} : vector<16x128xf32>, vector<128x384xf32>, vector<16x384xf32> -> vector<16x384xf32>
    %130 = arith.addf %127, %129 : vector<16x384xf32>
    %131 = vector.extract_strided_slice %130 {offsets = [0, 0], sizes = [16, 128], strides = [1, 1]} : vector<16x384xf32> to vector<16x128xf32>
    %132 = arith.negf %131 : vector<16x128xf32>
    %133 = math.exp %132 : vector<16x128xf32>
    %cst_42 = arith.constant 1.000000e+00 : f32
    %134 = vector.broadcast %cst_42 : f32 to vector<16x128xf32>
    %135 = arith.addf %134, %133 : vector<16x128xf32>
    %136 = arith.divf %134, %135 : vector<16x128xf32>
    %137 = vector.extract_strided_slice %130 {offsets = [0, 128], sizes = [16, 128], strides = [1, 1]} : vector<16x384xf32> to vector<16x128xf32>
    %138 = arith.negf %137 : vector<16x128xf32>
    %139 = math.exp %138 : vector<16x128xf32>
    %cst_43 = arith.constant 1.000000e+00 : f32
    %140 = vector.broadcast %cst_43 : f32 to vector<16x128xf32>
    %141 = arith.addf %140, %139 : vector<16x128xf32>
    %142 = arith.divf %140, %141 : vector<16x128xf32>
    %143 = vector.extract_strided_slice %130 {offsets = [0, 256], sizes = [16, 128], strides = [1, 1]} : vector<16x384xf32> to vector<16x128xf32>
    %144 = math.tanh %143 : vector<16x128xf32>
    %145 = arith.mulf %136, %123 : vector<16x128xf32>
    %146 = arith.mulf %142, %144 : vector<16x128xf32>
    %147 = arith.subf %145, %146 : vector<16x128xf32>
    %c6_i32 = arith.constant 6 : i32
    %148 = arith.index_cast %c6_i32 : i32 to index
    %c0_44 = arith.constant 0 : index
    %c0_45 = arith.constant 0 : index
    %149 = vector.load %arg2[%148, %c0_44, %c0_45] : memref<8x16x384xbf16, #tpu.memory_space<vmem>>, vector<1x16x384xbf16>
    %150 = vector.shape_cast %149 : vector<1x16x384xbf16> to vector<16x384xbf16>
    %151 = arith.extf %150 : vector<16x384xbf16> to vector<16x384xf32>
    %c0_46 = arith.constant 0 : index
    %c0_47 = arith.constant 0 : index
    %152 = vector.load %arg4[%c0_46, %c0_47] : memref<128x512xf32, #tpu.memory_space<vmem>>, vector<128x384xf32>
    %cst_48 = arith.constant dense<0.000000e+00> : vector<16x384xf32>
    %153 = tpu.matmul %147, %152, %cst_48 {dimension_numbers = #tpu.dot_dimension_numbers<[1], [0], [0], [1], [0, 0, 1, 1], [], []>, precision = #tpu.contract_precision<fp32>} : vector<16x128xf32>, vector<128x384xf32>, vector<16x384xf32> -> vector<16x384xf32>
    %154 = arith.addf %151, %153 : vector<16x384xf32>
    %155 = vector.extract_strided_slice %154 {offsets = [0, 0], sizes = [16, 128], strides = [1, 1]} : vector<16x384xf32> to vector<16x128xf32>
    %156 = arith.negf %155 : vector<16x128xf32>
    %157 = math.exp %156 : vector<16x128xf32>
    %cst_49 = arith.constant 1.000000e+00 : f32
    %158 = vector.broadcast %cst_49 : f32 to vector<16x128xf32>
    %159 = arith.addf %158, %157 : vector<16x128xf32>
    %160 = arith.divf %158, %159 : vector<16x128xf32>
    %161 = vector.extract_strided_slice %154 {offsets = [0, 128], sizes = [16, 128], strides = [1, 1]} : vector<16x384xf32> to vector<16x128xf32>
    %162 = arith.negf %161 : vector<16x128xf32>
    %163 = math.exp %162 : vector<16x128xf32>
    %cst_50 = arith.constant 1.000000e+00 : f32
    %164 = vector.broadcast %cst_50 : f32 to vector<16x128xf32>
    %165 = arith.addf %164, %163 : vector<16x128xf32>
    %166 = arith.divf %164, %165 : vector<16x128xf32>
    %167 = vector.extract_strided_slice %154 {offsets = [0, 256], sizes = [16, 128], strides = [1, 1]} : vector<16x384xf32> to vector<16x128xf32>
    %168 = math.tanh %167 : vector<16x128xf32>
    %169 = arith.mulf %160, %147 : vector<16x128xf32>
    %170 = arith.mulf %166, %168 : vector<16x128xf32>
    %171 = arith.subf %169, %170 : vector<16x128xf32>
    %c7_i32 = arith.constant 7 : i32
    %c7 = arith.constant 7 : index
    %c0_51 = arith.constant 0 : index
    %c0_52 = arith.constant 0 : index
    %172 = vector.load %arg2[%c7, %c0_51, %c0_52] : memref<8x16x384xbf16, #tpu.memory_space<vmem>>, vector<1x16x384xbf16>
    %173 = vector.shape_cast %172 : vector<1x16x384xbf16> to vector<16x384xbf16>
    %174 = arith.extf %173 : vector<16x384xbf16> to vector<16x384xf32>
    %c0_53 = arith.constant 0 : index
    %c0_54 = arith.constant 0 : index
    %175 = vector.load %arg4[%c0_53, %c0_54] : memref<128x512xf32, #tpu.memory_space<vmem>>, vector<128x384xf32>
    %cst_55 = arith.constant dense<0.000000e+00> : vector<16x384xf32>
    %176 = tpu.matmul %171, %175, %cst_55 {dimension_numbers = #tpu.dot_dimension_numbers<[1], [0], [0], [1], [0, 0, 1, 1], [], []>, precision = #tpu.contract_precision<fp32>} : vector<16x128xf32>, vector<128x384xf32>, vector<16x384xf32> -> vector<16x384xf32>
    %177 = arith.addf %174, %176 : vector<16x384xf32>
    %178 = vector.extract_strided_slice %177 {offsets = [0, 0], sizes = [16, 128], strides = [1, 1]} : vector<16x384xf32> to vector<16x128xf32>
    %179 = arith.negf %178 : vector<16x128xf32>
    %180 = math.exp %179 : vector<16x128xf32>
    %cst_56 = arith.constant 1.000000e+00 : f32
    %181 = vector.broadcast %cst_56 : f32 to vector<16x128xf32>
    %182 = arith.addf %181, %180 : vector<16x128xf32>
    %183 = arith.divf %181, %182 : vector<16x128xf32>
    %184 = vector.extract_strided_slice %177 {offsets = [0, 128], sizes = [16, 128], strides = [1, 1]} : vector<16x384xf32> to vector<16x128xf32>
    %185 = arith.negf %184 : vector<16x128xf32>
    %186 = math.exp %185 : vector<16x128xf32>
    %cst_57 = arith.constant 1.000000e+00 : f32
    %187 = vector.broadcast %cst_57 : f32 to vector<16x128xf32>
    %188 = arith.addf %187, %186 : vector<16x128xf32>
    %189 = arith.divf %187, %188 : vector<16x128xf32>
    %190 = vector.extract_strided_slice %177 {offsets = [0, 256], sizes = [16, 128], strides = [1, 1]} : vector<16x384xf32> to vector<16x128xf32>
    %191 = math.tanh %190 : vector<16x128xf32>
    %192 = arith.mulf %183, %171 : vector<16x128xf32>
    %193 = arith.mulf %189, %191 : vector<16x128xf32>
    %194 = arith.subf %192, %193 : vector<16x128xf32>
    %c0_58 = arith.constant 0 : index
    %c0_59 = arith.constant 0 : index
    %195 = vector.load %arg8[%c0_58, %c0_59] : memref<16x128xf32, #tpu.memory_space<vmem>>, vector<16x128xf32>
    tpu.vector_store %arg8[%c0_58, %c0_59], %194 {strides = array<i32>} : memref<16x128xf32, #tpu.memory_space<vmem>>, vector<16x128xf32>,
    %c0_i32_60 = arith.constant 0 : i32
    %196 = arith.cmpi eq, %arg1, %c0_i32_60 : i32
    %197 = arith.extui %196 : i1 to i32
    %c0_i32_61 = arith.constant 0 : i32
    %198 = arith.cmpi ne, %197, %c0_i32_61 : i32
    scf.if %198 {
      %c7_62 = arith.constant 7 : index
      %c0_63 = arith.constant 0 : index
      %c0_64 = arith.constant 0 : index
      %199 = vector.load %arg2[%c7_62, %c0_63, %c0_64] : memref<8x16x384xbf16, #tpu.memory_space<vmem>>, vector<1x16x384xbf16>
      %200 = vector.shape_cast %199 : vector<1x16x384xbf16> to vector<16x384xbf16>
      %201 = vector.extract_strided_slice %200 {offsets = [0, 256], sizes = [16, 128], strides = [1, 1]} : vector<16x384xbf16> to vector<16x128xbf16>
      %202 = arith.extf %201 : vector<16x128xbf16> to vector<16x128xf32>
      %c0_65 = arith.constant 0 : index
      %c256 = arith.constant 256 : index
      %203 = vector.load %arg4[%c0_65, %c256] : memref<128x512xf32, #tpu.memory_space<vmem>>, vector<128x128xf32>
      %cst_66 = arith.constant dense<0.000000e+00> : vector<16x128xf32>
      %204 = tpu.matmul %171, %203, %cst_66 {dimension_numbers = #tpu.dot_dimension_numbers<[1], [0], [0], [1], [0, 0, 1, 1], [], []>, precision = #tpu.contract_precision<fp32>} : vector<16x128xf32>, vector<128x128xf32>, vector<16x128xf32> -> vector<16x128xf32>
      %205 = arith.addf %202, %204 : vector<16x128xf32>
      %c0_67 = arith.constant 0 : index
      %c0_68 = arith.constant 0 : index
      %206 = vector.load %arg3[%c0_67, %c0_68] : memref<16x128xf32, #tpu.memory_space<vmem>>, vector<16x128xf32>
      %c0_69 = arith.constant 0 : index
      %c384 = arith.constant 384 : index
      %207 = vector.load %arg4[%c0_69, %c384] : memref<128x512xf32, #tpu.memory_space<vmem>>, vector<128x128xf32>
      %cst_70 = arith.constant dense<0.000000e+00> : vector<16x128xf32>
      %208 = tpu.matmul %171, %207, %cst_70 {dimension_numbers = #tpu.dot_dimension_numbers<[1], [0], [0], [1], [0, 0, 1, 1], [], []>, precision = #tpu.contract_precision<fp32>} : vector<16x128xf32>, vector<128x128xf32>, vector<16x128xf32> -> vector<16x128xf32>
      %209 = arith.addf %206, %208 : vector<16x128xf32>
      %210 = math.tanh %205 : vector<16x128xf32>
      %211 = arith.negf %209 : vector<16x128xf32>
      %212 = math.exp %211 : vector<16x128xf32>
      %cst_71 = arith.constant 1.000000e+00 : f32
      %213 = vector.broadcast %cst_71 : f32 to vector<16x128xf32>
      %214 = arith.addf %213, %212 : vector<16x128xf32>
      %215 = arith.divf %213, %214 : vector<16x128xf32>
      %216 = arith.mulf %215, %210 : vector<16x128xf32>
      %c0_72 = arith.constant 0 : index
      %c0_73 = arith.constant 0 : index
      %217 = vector.load %arg5[%c0_72, %c0_73] : memref<128x128xf32, #tpu.memory_space<vmem>>, vector<128x128xf32>
      %cst_74 = arith.constant dense<0.000000e+00> : vector<16x128xf32>
      %218 = tpu.matmul %216, %217, %cst_74 {dimension_numbers = #tpu.dot_dimension_numbers<[1], [0], [0], [1], [0, 0, 1, 1], [], []>, precision = #tpu.contract_precision<fp32>} : vector<16x128xf32>, vector<128x128xf32>, vector<16x128xf32> -> vector<16x128xf32>
      %c0_75 = arith.constant 0 : index
      %c0_76 = arith.constant 0 : index
      %219 = vector.load %arg6[%c0_75, %c0_76] : memref<1x128xf32, #tpu.memory_space<vmem>>, vector<1x128xf32>
      %220 = vector.broadcast %219 : vector<1x128xf32> to vector<16x128xf32>
      %221 = arith.addf %218, %220 : vector<16x128xf32>
      %c0_77 = arith.constant 0 : index
      %c0_78 = arith.constant 0 : index
      %222 = vector.load %arg7[%c0_77, %c0_78] : memref<16x128xf32, #tpu.memory_space<vmem>>, vector<16x128xf32>
      tpu.vector_store %arg7[%c0_77, %c0_78], %221 {strides = array<i32>} : memref<16x128xf32, #tpu.memory_space<vmem>>, vector<16x128xf32>,
    } else {
    }
    return
  }
  func.func @transform_0(%arg0: i32, %arg1: i32) -> (i32, i32, i32) {
    %c0_i32 = arith.constant 0 : i32
    %c0_i32_0 = arith.constant 0 : i32
    return %arg1, %arg0, %c0_i32 : i32, i32, i32
  }
  func.func @transform_1(%arg0: i32, %arg1: i32) -> (i32, i32) {
    %c0_i32 = arith.constant 0 : i32
    %c0_i32_0 = arith.constant 0 : i32
    return %arg0, %c0_i32 : i32, i32
  }
  func.func @transform_2(%arg0: i32, %arg1: i32) -> (i32, i32) {
    %c0_i32 = arith.constant 0 : i32
    %c0_i32_0 = arith.constant 0 : i32
    %c0_i32_1 = arith.constant 0 : i32
    return %c0_i32, %c0_i32_0 : i32, i32
  }
  func.func @transform_3(%arg0: i32, %arg1: i32) -> (i32, i32) {
    %c0_i32 = arith.constant 0 : i32
    %c0_i32_0 = arith.constant 0 : i32
    %c0_i32_1 = arith.constant 0 : i32
    return %c0_i32, %c0_i32_0 : i32, i32
  }
  func.func @transform_4(%arg0: i32, %arg1: i32) -> (i32, i32) {
    %c0_i32 = arith.constant 0 : i32
    %c0_i32_0 = arith.constant 0 : i32
    %c0_i32_1 = arith.constant 0 : i32
    return %c0_i32, %c0_i32_0 : i32, i32
  }
  func.func @transform_5(%arg0: i32, %arg1: i32) -> (i32, i32) {
    %c0_i32 = arith.constant 0 : i32
    %c0_i32_0 = arith.constant 0 : i32
    return %arg0, %c0_i32 : i32, i32
  }
}

</mosaic_0001>

<bundles_post_ra>
// kernel: tpu_custom_call.1
= control target key start
LH: loop header
LB: loop body
LE: loop exit
PB: predicated region body
PF: predicated region fallthrough
CT: control target
= control target key end

     0   :  { %10 = vsyncpa [#allocation4], 0  ;;  %s16123_s0 = inlined_call_operand.hbm [shape: bf16[8,16,384], index: 0, kind: input, shape index: {}]   ;;  %s16124_s1 = inlined_call_operand.hbm [shape: f32[16,128], index: 1, kind: input, shape index: {}]   ;;  %s16125_s2 = inlined_call_operand.hbm [shape: f32[128,512], index: 2, kind: input, shape index: {}]   ;;  %s16126_s3 = inlined_call_operand.hbm [shape: f32[128,128], index: 3, kind: input, shape index: {}]   ;;  %s16127_s4 = inlined_call_operand.vmem [shape: f32[1,128], index: 4, kind: input, shape index: {}]   ;;  %s16128_s5 = inlined_call_operand.hbm [shape: f32[16,128], index: 5, kind: output, shape index: {}]  }
   0x1   :  { %11 = vsyncpa [#allocation7], 0 }
   0x2   :  { %12 = vsyncpa [#allocation10], 0  ;;  %s31_s20 = sshll.u32 %s16124_s1, 4  ;;  %s32_s20 = int_to_ptr.hbm [resolvable:$true] %s31_s20 }
   0x3   :  { %13 = vsyncpa [#allocation5], 0  ;;  %s11482_s21 = smov [#allocation6]   ;;  %s18_s25 = sshll.u32 %s16123_s0, 4  ;;  %s19_s25 = int_to_ptr.hbm [resolvable:$true] %s18_s25 }
   0x4   :  { %s33_s22 = sshll.u32 %s11482_s21, 4  ;;  %s11483_s26 = smov 128   ;;  %s34_s22 = int_to_ptr.vmem [resolvable:$true] %s33_s22 }
   0x5   :  { %s11484_s27 = smov 8   ;;  %s11485_s28 = smov [#allocation3]  }
   0x6   :  { %39 = dma.hbm_to_vmem [thread:$0]  %s32_s20, 256, %s34_s22, [#allocation7], %s11483_s26, %s11483_s26, %s11484_s27  }
   0x7   :  { %s20_s29 = sshll.u32 %s11485_s28, 4  ;;  %s11486_s1 = smov 192   ;;  %s21_s29 = int_to_ptr.vmem [resolvable:$true] %s20_s29 }
   0x8   :  { %s11487_s30 = smov 12   ;;  %s44_s8 = sshll.u32 %s16125_s2, 4  ;;  %s45_s8 = int_to_ptr.hbm [resolvable:$true] %s44_s8 }
   0x9   :  { %26 = dma.hbm_to_vmem [thread:$0]  %s19_s25, 3072, %s21_s29, [#allocation4], %s11486_s1, %s11486_s1, %s11487_s30  }
   0xa   :  { %s11488_s9 = smov [#allocation8]   ;;  %s57_s12 = sshll.u32 %s16126_s3, 4  ;;  %s58_s12 = int_to_ptr.hbm [resolvable:$true] %s57_s12 }
   0xb   :  { %s46_s0 = sshll.u32 %s11488_s9, 4  ;;  %s11489_s13 = smov 512   ;;  %s47_s0 = int_to_ptr.vmem [resolvable:$true] %s46_s0 }
   0xc   :  { %s11490_s14 = smov 32   ;;  %s11491_s15 = smov [#allocation9]  }
   0xd   :  { %52 = dma.hbm_to_vmem [thread:$0]  %s45_s8, 8192, %s47_s0, [#allocation7], %s11489_s13, %s11489_s13, %s11490_s14  }
   0xe   :  { %s59_s16 = sshll.u32 %s11491_s15, 4  ;;  %s60_s16 = int_to_ptr.vmem [resolvable:$true] %s59_s16 }
   0xf   :  { %65 = dma.hbm_to_vmem [thread:$0]  %s58_s12, 2048, %s60_s16, [#allocation10], %s11483_s26, %s11483_s26, %s11484_s27  }
  0x10   :  { %11474 = dma.done.wait [#allocation4], 3072  }
  0x11   :  { %11475 = vsyncadd [#allocation4], 4294964224 }
  0x12   :  { %11476 = dma.done.wait [#allocation7], 8448  }
  0x13   :  { %11477 = vsyncadd [#allocation7], 4294958848 }
  0x14   :  { %11478 = dma.done.wait [#allocation10], 2048  }
  0x15   :  { %11479 = vsyncadd [#allocation10], 4294965248  ;;  %v147_v0 = vld [vmem:[#allocation8 + $0x1e0] sm:$0xff]  ;;  %v148_v61 = vld [vmem:[#allocation8 + $0x1e8] sm:$0xff]  ;;  %s11493_s17 = smov [#allocation11]   ;;  %s11108_s20 = sshll.u32 %s16128_s5, 4  ;;  %s11109_s20 = int_to_ptr.hbm [resolvable:$true] %s11108_s20 }
  0x16   :  { %v144_v1 = vld [vmem:[#allocation8 + $0x1c0] sm:$0xff]  ;;  %v11542_v3 = vand.u32 4294901760, %v147_v0 }
  0x17   :  { %v141_v2 = vld [vmem:[#allocation8 + $0x1a0] sm:$0xff]  ;;  %v11544_v4 = vand.u32 4294901760, %v144_v1 }
  0x18   :  { %16727 = vst [vmem:[#allocation16_spill] sm:$0xff] %v11542_v3  ;;  %v11546_v5 = vand.u32 4294901760, %v141_v2  ;;  %v138_v6 = vld [vmem:[#allocation8 + $0x180] sm:$0xff]  ;;  %151 = vmatpush.msra.mxu0 %v11542_v3  ;;  %v11556_v14 = vsub.f32 %v147_v0, %v11542_v3  ;;  %364 = vmatpush.msra.mxu3 %v11542_v3 }
  0x19   :  { %16728 = vst [vmem:[#allocation17_spill] sm:$0xff] %v11544_v4  ;;  %v135_v7 = vld [vmem:[#allocation8 + $0x160] sm:$0xff]  ;;  %v11548_v9 = vand.u32 4294901760, %v138_v6  ;;  %v11559_v15 = vsub.f32 %v144_v1, %v11544_v4 }
  0x1a   :  { %16729 = vst [vmem:[#allocation18_spill] sm:$0xff] %v11546_v5  ;;  %v132_v8 = vld [vmem:[#allocation8 + $0x140] sm:$0xff]  ;;  %v11550_v10 = vand.u32 4294901760, %v135_v7  ;;  %v11562_v16 = vsub.f32 %v141_v2, %v11546_v5  ;;  %153 = vmatpush.msra.mxu0 %v11544_v4  ;;  %v11575_v21 = vand.u32 4294901760, %v11556_v14  ;;  %306 = vmatpush.msra.mxu2 %v11556_v14  ;;  %v145_v2 = vld [vmem:[#allocation8 + $0x1c8] sm:$0xff] }
  0x1b   :  { %16730 = vst [vmem:[#allocation19_spill] sm:$0xff] %v11548_v9  ;;  %v11552_v11 = vand.u32 4294901760, %v132_v8  ;;  %v129_v12 = vld [vmem:[#allocation8 + $0x120] sm:$0xff]  ;;  %v11568_v19 = vsub.f32 %v138_v6, %v11548_v9  ;;  %v11578_v22 = vand.u32 4294901760, %v11559_v15  ;;  %366 = vmatpush.msra.mxu3 %v11544_v4 }
  0x1c   :  { %16731 = vst [vmem:[#allocation20_spill] sm:$0xff] %v11550_v10  ;;  %v126_v13 = vld [vmem:[#allocation8 + $0x100] sm:$0xff]  ;;  %v11565_v18 = vand.u32 4294901760, %v129_v12  ;;  %v11571_v20 = vsub.f32 %v135_v7, %v11550_v10  ;;  %v11581_v23 = vand.u32 4294901760, %v11562_v16  ;;  %155 = vmatpush.msra.mxu0 %v11546_v5  ;;  %v202_v29 = vsub.f32 %v11556_v14, %v11575_v21  ;;  %309 = vmatpush.msra.mxu2 %v11559_v15 }
  0x1d   :  { %16732 = vst [vmem:[#allocation21_spill] sm:$0xff] %v11552_v11  ;;  %v123_v17 = vld [vmem:[#allocation8 + $0xe0] sm:$0xff]  ;;  %v11583_v24 = vand.u32 4294901760, %v126_v13  ;;  %v11587_v26 = vand.u32 4294901760, %v11568_v19  ;;  %v11592_v28 = vsub.f32 %v132_v8, %v11552_v11  ;;  %v208_v30 = vsub.f32 %v11559_v15, %v11578_v22  ;;  %368 = vmatpush.msra.mxu3 %v11546_v5 }
  0x1e   :  { %16733 = vst [vmem:[#allocation22_spill] sm:$0xff] %v11556_v14  ;;  %v120_v25 = vld [vmem:[#allocation8 + $0xc0] sm:$0xff]  ;;  %v11589_v27 = vand.u32 4294901760, %v123_v17  ;;  %v214_v31 = vsub.f32 %v11562_v16, %v11581_v23  ;;  %v11603_v32 = vand.u32 4294901760, %v11571_v20  ;;  %v11611_v36 = vsub.f32 %v129_v12, %v11565_v18  ;;  %157 = vmatpush.msra.mxu0 %v11548_v9  ;;  %312 = vmatpush.msra.mxu2 %v11562_v16 }
  0x1f   :  { %16734 = vst [vmem:[#allocation23_spill] sm:$0xff] %v11559_v15  ;;  %v220_v33 = vsub.f32 %v11568_v19, %v11587_v26  ;;  %v11608_v34 = vand.u32 4294901760, %v120_v25  ;;  %v117_v35 = vld [vmem:[#allocation8 + $0xa0] sm:$0xff]  ;;  %v11615_v37 = vand.u32 4294901760, %v202_v29  ;;  %v11617_v38 = vand.u32 4294901760, %v208_v30  ;;  %370 = vmatpush.msra.mxu3 %v11548_v9 }
  0x20   :  { %16735 = vst [vmem:[#allocation24_spill] sm:$0xff] %v11562_v16  ;;  %v11620_v39 = vand.u32 4294901760, %v11592_v28  ;;  %v114_v40 = vld [vmem:[#allocation8 + $0x80] sm:$0xff]  ;;  %v11624_v41 = vsub.f32 %v126_v13, %v11583_v24  ;;  %v11627_v42 = vand.u32 4294901760, %v11611_v36  ;;  %159 = vmatpush.msra.mxu0 %v11550_v10  ;;  %v11632_v43 = vand.u32 4294901760, %v214_v31  ;;  %315 = vmatpush.msra.mxu2 %v11568_v19 }
  0x21   :  { %16736 = vst [vmem:[#allocation25_spill] sm:$0xff] %v11565_v18  ;;  %204 = vmatpush.msra.mxu1 %v11615_v37  ;;  %v226_v44 = vsub.f32 %v11571_v20, %v11603_v32  ;;  %v11636_v45 = vand.u32 4294901760, %v117_v35  ;;  %v11639_v46 = vsub.f32 %v123_v17, %v11589_v27  ;;  %v11641_v47 = vand.u32 4294901760, %v114_v40  ;;  %v111_v48 = vld [vmem:[#allocation8 + $0x60] sm:$0xff]  ;;  %372 = vmatpush.msra.mxu3 %v11550_v10 }
  0x22   :  { %16737 = vst [vmem:[#allocation26_spill] sm:$0xff] %v11568_v19  ;;  %161 = vmatpush.msra.mxu0 %v11552_v11  ;;  %v11647_v49 = vand.u32 4294901760, %v220_v33  ;;  %v232_v50 = vsub.f32 %v11592_v28, %v11620_v39  ;;  %v11652_v51 = vand.u32 4294901760, %v11624_v41  ;;  %v108_v52 = vld [vmem:[#allocation8 + $0x40] sm:$0xff]  ;;  %v11655_v53 = vsub.f32 %v120_v25, %v11608_v34  ;;  %318 = vmatpush.msra.mxu2 %v11571_v20 }
  0x23   :  { %16738 = vst [vmem:[#allocation27_spill] sm:$0xff] %v11571_v20  ;;  %210 = vmatpush.msra.mxu1 %v11617_v38  ;;  %v238_v54 = vsub.f32 %v11611_v36, %v11627_v42  ;;  %374 = vmatpush.msra.mxu3 %v11552_v11  ;;  %v11663_v55 = vand.u32 4294901760, %v226_v44  ;;  %v11665_v56 = vand.u32 4294901760, %v111_v48  ;;  %v11668_v57 = vand.u32 4294901760, %v11639_v46  ;;  %v105_v58 = vld [vmem:[#allocation8 + $0x20] sm:$0xff] }
  0x24   :  { %16739 = vst [vmem:[#allocation28_spill] sm:$0xff] %v11575_v21  ;;  %163 = vmatpush.msra.mxu0 %v11565_v18  ;;  %v11671_v59 = vsub.f32 %v117_v35, %v11636_v45  ;;  %v11673_v60 = vand.u32 4294901760, %v108_v52  ;;  %321 = vmatpush.msra.mxu2 %v11592_v28  ;;  %v11679_v62 = vand.u32 4294901760, %v232_v50  ;;  %v244_v63 = vsub.f32 %v11624_v41, %v11652_v51  ;;  %v102_v8 = vld [vmem:[#allocation8] sm:$0xff] }
  0x25   :  { %16740 = vst [vmem:[#allocation29_spill] sm:$0xff] %v11578_v22  ;;  %216 = vmatpush.msra.mxu1 %v11632_v43  ;;  %376 = vmatpush.msra.mxu3 %v11565_v18  ;;  %v11684_v0 = vand.u32 4294901760, %v11655_v53  ;;  %v11687_v1 = vsub.f32 %v114_v40, %v11641_v47  ;;  %v11689_v6 = vand.u32 4294901760, %v238_v54  ;;  %v11691_v7 = vand.u32 4294901760, %v105_v58 }
  0x26   :  { %16741 = vst [vmem:[#allocation30_spill] sm:$0xff] %v11581_v23  ;;  %165 = vmatpush.msra.mxu0 %v11583_v24  ;;  %324 = vmatpush.msra.mxu2 %v11611_v36  ;;  %v250_v12 = vsub.f32 %v11639_v46, %v11668_v57  ;;  %v11700_v13 = vand.u32 4294901760, %v11671_v59  ;;  %v11703_v17 = vsub.f32 %v111_v48, %v11665_v56  ;;  %v11705_v25 = vand.u32 4294901760, %v148_v61  ;;  %v142_v48 = vld [vmem:[#allocation8 + $0x1a8] sm:$0xff] }
  0x27   :  { %16742 = vst [vmem:[#allocation31_spill] sm:$0xff] %v11583_v24  ;;  %222 = vmatpush.msra.mxu1 %v11647_v49  ;;  %378 = vmatpush.msra.mxu3 %v11583_v24  ;;  %v11709_v29 = vsub.f32 %v108_v52, %v11673_v60  ;;  %v11712_v30 = vand.u32 4294901760, %v145_v2  ;;  %v11716_v31 = vand.u32 4294901760, %v244_v63  ;;  %v256_v33 = vsub.f32 %v11655_v53, %v11684_v0 }
  0x28   :  { %16743 = vst [vmem:[#allocation32_spill] sm:$0xff] %v11587_v26  ;;  %167 = vmatpush.msra.mxu0 %v11589_v27  ;;  %327 = vmatpush.msra.mxu2 %v11624_v41  ;;  %v11720_v35 = vand.u32 4294901760, %v102_v8  ;;  %v11723_v40 = vand.u32 4294901760, %v11687_v1  ;;  %v11728_v44 = vsub.f32 %v148_v61, %v11705_v25  ;;  %v11732_v50 = vand.u32 4294901760, %v250_v12  ;;  %v139_v12 = vld [vmem:[#allocation8 + $0x188] sm:$0xff] }
  0x29   :  { %16744 = vst [vmem:[#allocation33_spill] sm:$0xff] %v11589_v27  ;;  %228 = vmatpush.msra.mxu1 %v11663_v55  ;;  %380 = vmatpush.msra.mxu3 %v11589_v27  ;;  %v262_v52 = vsub.f32 %v11671_v59, %v11700_v13  ;;  %v11737_v54 = vand.u32 4294901760, %v11703_v17  ;;  %v11740_v63 = vsub.f32 %v105_v58, %v11691_v7 }
  0x2a   :  { %16745 = vst [vmem:[#allocation34_spill] sm:$0xff] %v11592_v28  ;;  %169 = vmatpush.msra.mxu0 %v11608_v34  ;;  %330 = vmatpush.msra.mxu2 %v11639_v46  ;;  %v11748_v61 = vsub.f32 %v145_v2, %v11712_v30  ;;  %v268_v58 = vsub.f32 %v11687_v1, %v11723_v40  ;;  %v11759_v28 = vand.u32 4294901760, %v142_v48  ;;  %v11764_v2 = vand.u32 4294901760, %v11728_v44 }
  0x2b   :  { %16746 = vst [vmem:[#allocation35_spill] sm:$0xff] %v11603_v32  ;;  %234 = vmatpush.msra.mxu1 %v11679_v62  ;;  %382 = vmatpush.msra.mxu3 %v11608_v34  ;;  %v11773_v20 = vand.u32 4294901760, %v11740_v63 }
  0x2c   :  { %16747 = vst [vmem:[#allocation36_spill] sm:$0xff] %v11608_v34  ;;  %171 = vmatpush.msra.mxu0 %v11636_v45  ;;  %333 = vmatpush.msra.mxu2 %v11655_v53  ;;  %v11782_v19 = vand.u32 4294901760, %v11748_v61 }
  0x2d   :  { %16748 = vst [vmem:[#allocation37_spill] sm:$0xff] %v11611_v36  ;;  %240 = vmatpush.msra.mxu1 %v11689_v6  ;;  %384 = vmatpush.msra.mxu3 %v11636_v45  ;;  %v11757_v36 = vsub.f32 %v102_v8, %v11720_v35  ;;  %v274_v8 = vsub.f32 %v11703_v17, %v11737_v54 }
  0x2e   :  { %16749 = vst [vmem:[#allocation38_spill] sm:$0xff] %v11615_v37  ;;  %173 = vmatpush.msra.mxu0 %v11641_v47  ;;  %336 = vmatpush.msra.mxu2 %v11671_v59 }
  0x2f   :  { %16750 = vst [vmem:[#allocation39_spill] sm:$0xff] %v11617_v38  ;;  %246 = vmatpush.msra.mxu1 %v11716_v31  ;;  %386 = vmatpush.msra.mxu3 %v11641_v47 }
  0x30   :  { %16751 = vst [vmem:[#allocation40_spill] sm:$0xff] %v11620_v39  ;;  %175 = vmatpush.msra.mxu0 %v11665_v56  ;;  %339 = vmatpush.msra.mxu2 %v11687_v1 }
  0x31   :  { %16752 = vst [vmem:[#allocation41_spill] sm:$0xff] %v11624_v41  ;;  %v11752_v41 = vand.u32 4294901760, %v256_v33  ;;  %252 = vmatpush.msra.mxu1 %v11732_v50  ;;  %v11768_v33 = vand.u32 4294901760, %v262_v52  ;;  %388 = vmatpush.msra.mxu3 %v11665_v56  ;;  %v11786_v52 = vand.u32 4294901760, %v268_v58  ;;  %v11802_v58 = vand.u32 4294901760, %v274_v8 }
  0x32   :  { %16753 = vst [vmem:[#allocation42_spill] sm:$0xff] %v11627_v42  ;;  %177 = vmatpush.msra.mxu0 %v11673_v60  ;;  %342 = vmatpush.msra.mxu2 %v11703_v17 }
  0x33   :  { %16754 = vst [vmem:[#allocation43_spill] sm:$0xff] %v11632_v43  ;;  %258 = vmatpush.msra.mxu1 %v11752_v41  ;;  %390 = vmatpush.msra.mxu3 %v11673_v60  ;;  %v112_v43 = vld [vmem:[#allocation8 + $0x68] sm:$0xff] }
  0x34   :  { %16755 = vst [vmem:[#allocation44_spill] sm:$0xff] %v11636_v45  ;;  %179 = vmatpush.msra.mxu0 %v11691_v7  ;;  %345 = vmatpush.msra.mxu2 %v11709_v29 }
  0x35   :  { %16756 = vst [vmem:[#allocation45_spill] sm:$0xff] %v11639_v46  ;;  %v11743_v46 = vand.u32 4294901760, %v11709_v29  ;;  %264 = vmatpush.msra.mxu1 %v11768_v33  ;;  %392 = vmatpush.msra.mxu3 %v11691_v7 }
  0x36   :  { %16757 = vst [vmem:[#allocation46_spill] sm:$0xff] %v11641_v47  ;;  %181 = vmatpush.msra.mxu0 %v11720_v35  ;;  %348 = vmatpush.msra.mxu2 %v11740_v63 }
  0x37   :  { %16758 = vst [vmem:[#allocation47_spill] sm:$0xff] %v11647_v49  ;;  %270 = vmatpush.msra.mxu1 %v11786_v52  ;;  %394 = vmatpush.msra.mxu3 %v11720_v35 }
  0x38   :  { %16759 = vst [vmem:[#allocation48_spill] sm:$0xff] %v11652_v51  ;;  %411 = vmatpush.msrb.mxu0 %v11575_v21  ;;  %351 = vmatpush.msra.mxu2 %v11757_v36 }
  0x39   :  { %16760 = vst [vmem:[#allocation49_spill] sm:$0xff] %v11655_v53  ;;  %v136_v53 = vld [vmem:[#allocation8 + $0x168] sm:$0xff]  ;;  %276 = vmatpush.msra.mxu1 %v11802_v58 }
  0x3a   :  { %16761 = vst [vmem:[#allocation50_spill] sm:$0xff] %v11663_v55  ;;  %v11794_v16 = vand.u32 4294901760, %v136_v53  ;;  %v130_v55 = vld [vmem:[#allocation8 + $0x128] sm:$0xff]  ;;  %415 = vmatpush.msrb.mxu0 %v11578_v22  ;;  %523 = vmatpush.msrb.mxu2 %v11705_v25 }
  0x3b   :  { %16762 = vst [vmem:[#allocation51_spill] sm:$0xff] %v11665_v56 }
  0x3c   :  { %16763 = vst [vmem:[#allocation52_spill] sm:$0xff] %v11668_v57  ;;  %419 = vmatpush.msrb.mxu0 %v11581_v23  ;;  %525 = vmatpush.msrb.mxu2 %v11712_v30  ;;  %v121_v23 = vld [vmem:[#allocation8 + $0xc8] sm:$0xff] }
  0x3d   :  { %16764 = vst [vmem:[#allocation53_spill] sm:$0xff] %v11671_v59  ;;  %v280_v59 = vsub.f32 %v11709_v29, %v11743_v46 }
  0x3e   :  { %16765 = vst [vmem:[#allocation54_spill] sm:$0xff] %v11673_v60  ;;  %423 = vmatpush.msrb.mxu0 %v11587_v26  ;;  %527 = vmatpush.msrb.mxu2 %v11759_v28 }
  0x3f   :  { %16766 = vst [vmem:[#allocation55_spill] sm:$0xff] %v11679_v62  ;;  %v133_v62 = vld [vmem:[#allocation8 + $0x148] sm:$0xff]  ;;  %v11815_v8 = vand.u32 4294901760, %v280_v59 }
  0x40   :  { %16767 = vst [vmem:[#allocation56_spill] sm:$0xff] %v11684_v0  ;;  %v11836_v14 = vand.u32 4294901760, %v133_v62  ;;  %427 = vmatpush.msrb.mxu0 %v11603_v32  ;;  %v118_v32 = vld [vmem:[#allocation8 + $0xa8] sm:$0xff] }
  0x41   :  { %16768 = vst [vmem:[#allocation57_spill] sm:$0xff] %v11687_v1  ;;  %v574_v1 = vsub.f32 %v11728_v44, %v11764_v2  ;;  %282 = vmatpush.msra.mxu1 %v11815_v8 }
  0x42   :  { %16769 = vst [vmem:[#allocation58_spill] sm:$0xff] %v11689_v6  ;;  %v11792_v6 = vsub.f32 %v142_v48, %v11759_v28  ;;  %v11860_v22 = vsub.f32 %v133_v62, %v11836_v14  ;;  %431 = vmatpush.msrb.mxu0 %v11620_v39 }
  0x43   :  { %16770 = vst [vmem:[#allocation59_spill] sm:$0xff] %v11691_v7  ;;  %v11827_v15 = vand.u32 4294901760, %v574_v1  ;;  %v127_v1 = vld [vmem:[#allocation8 + $0x108] sm:$0xff] }
  0x44   :  { %16771 = vst [vmem:[#allocation60_spill] sm:$0xff] %v11700_v13  ;;  %435 = vmatpush.msrb.mxu0 %v11627_v42  ;;  %v16821_v42 = vmov 0.0  }
  0x45   :  { %16772 = vst [vmem:[#allocation61_spill] sm:$0xff] %v11703_v17  ;;  %v580_v17 = vsub.f32 %v11748_v61, %v11782_v19  ;;  %576 = vmatpush.msrb.mxu3 %v11827_v15  ;;  %354 = vmatmul.f32.vlgmr.msra.gmra.mxu2 %v16821_v42 }
  0x46   :  { %16773 = vst [vmem:[#allocation62_spill] sm:$0xff] %v11709_v29  ;;  %v11823_v29 = vsub.f32 %v136_v53, %v11794_v16  ;;  %439 = vmatpush.msrb.mxu0 %v11652_v51  ;;  %398 = vmatmul.f32.vlgmr.msra.gmra.mxu3 %v16821_v42 }
  0x47   :  { %16774 = vst [vmem:[#allocation63_spill] sm:$0xff] %v11716_v31  ;;  %v11775_v31 = vand.u32 4294901760, %v139_v12  ;;  %v11840_v53 = vand.u32 4294901760, %v580_v17  ;;  %v124_v17 = vld [vmem:[#allocation8 + $0xe8] sm:$0xff] }
  0x48   :  { %16775 = vst [vmem:[#allocation64_spill] sm:$0xff] %v11720_v35  ;;  %v11875_v49 = vand.u32 4294901760, %v124_v17  ;;  %443 = vmatpush.msrb.mxu0 %v11668_v57  ;;  %v11944_v57 = vand.u32 4294901760, %v112_v43 }
  0x49   :  { %16776 = vst [vmem:[#allocation65_spill] sm:$0xff] %v11723_v40  ;;  %v11807_v48 = vsub.f32 %v139_v12, %v11775_v31  ;;  %v11820_v12 = vand.u32 4294901760, %v11792_v6  ;;  %582 = vmatpush.msrb.mxu3 %v11840_v53  ;;  %529 = vmatpush.msrb.mxu2 %v11775_v31 }
  0x4a   :  { %16777 = vst [vmem:[#allocation66_spill] sm:$0xff] %v11728_v44  ;;  %447 = vmatpush.msrb.mxu0 %v11684_v0 }
  0x4b   :  { %16778 = vst [vmem:[#allocation67_spill] sm:$0xff] %v11732_v50  ;;  %v11789_v50 = vand.u32 4294901760, %v11757_v36  ;;  %531 = vmatpush.msrb.mxu2 %v11794_v16 }
  0x4c   :  { %16779 = vst [vmem:[#allocation68_spill] sm:$0xff] %v11737_v54  ;;  %451 = vmatpush.msrb.mxu0 %v11700_v13  ;;  %v11971_v13 = vsub.f32 %v112_v43, %v11944_v57 }
  0x4d   :  { %16780 = vst [vmem:[#allocation69_spill] sm:$0xff] %v11740_v63  ;;  %533 = vmatpush.msrb.mxu2 %v11836_v14 }
  0x4e   :  { %16781 = vst [vmem:[#allocation70_spill] sm:$0xff] %v11743_v46  ;;  %455 = vmatpush.msrb.mxu0 %v11723_v40  ;;  %359 = vmatmul.f32.gmra.mxu2 %v16821_v42 }
  0x4f   :  { %16782 = vst [vmem:[#allocation71_spill] sm:$0xff] %v11748_v61  ;;  %404 = vmatmul.f32.gmra.mxu3 %v16821_v42 }
  0x50   :  { %16783 = vst [vmem:[#allocation72_spill] sm:$0xff] %v11752_v41  ;;  %v286_v41 = vsub.f32 %v11740_v63, %v11773_v20  ;;  %v11849_v63 = vand.u32 4294901760, %v11823_v29  ;;  %459 = vmatpush.msrb.mxu0 %v11737_v54 }
  0x51   :  { %16784 = vst [vmem:[#allocation73_spill] sm:$0xff] %v11757_v36 }
  0x52   :  { %16785 = vst [vmem:[#allocation74_spill] sm:$0xff] %v11764_v2  ;;  %v11830_v59 = vand.u32 4294901760, %v286_v41  ;;  %v586_v41 = vsub.f32 %v11792_v6, %v11820_v12  ;;  %463 = vmatpush.msrb.mxu0 %v11743_v46 }
  0x53   :  { %16786 = vst [vmem:[#allocation75_spill] sm:$0xff] %v11768_v33  ;;  %v292_v33 = vsub.f32 %v11757_v36, %v11789_v50  ;;  %v11862_v36 = vand.u32 4294901760, %v127_v1 }
  0x54   :  { %16787 = vst [vmem:[#allocation76_spill] sm:$0xff] %v11773_v20  ;;  %288 = vmatpush.msra.mxu1 %v11830_v59  ;;  %467 = vmatpush.msrb.mxu0 %v11773_v20 }
  0x55   :  { %16788 = vst [vmem:[#allocation77_spill] sm:$0xff] %v11782_v19  ;;  %v11843_v21 = vand.u32 4294901760, %v292_v33  ;;  %v11887_v26 = vsub.f32 %v127_v1, %v11862_v36  ;;  %v115_v1 = vld [vmem:[#allocation8 + $0x88] sm:$0xff] }
  0x56   :  { %16789 = vst [vmem:[#allocation78_spill] sm:$0xff] %v11786_v52  ;;  %v11834_v52 = vand.u32 4294901760, %v11807_v48  ;;  %471 = vmatpush.msrb.mxu0 %v11789_v50 }
  0x57   :  { %16790 = vst [vmem:[#allocation79_spill] sm:$0xff] %v11789_v50  ;;  %294 = vmatpush.msra.mxu1 %v11843_v21  ;;  %v122_v50 = vld [vmem:[#allocation8 + $0xd0] sm:$0xff] }
  0x58   :  { %16791 = vst [vmem:[#allocation80_spill] sm:$0xff] %v11792_v6  ;;  %v592_v33 = vsub.f32 %v11807_v48, %v11834_v52 }
  0x59   :  { %16792 = vst [vmem:[#allocation81_spill] sm:$0xff] %v11794_v16  ;;  %482 = vmatpush.msrb.mxu1 %v11542_v3  ;;  %v106_v3 = vld [vmem:[#allocation8 + $0x28] sm:$0xff] }
  0x5a   :  { %16793 = vst [vmem:[#allocation82_spill] sm:$0xff] %v11802_v58  ;;  %v11851_v58 = vand.u32 4294901760, %v130_v55  ;;  %v11982_v40 = vand.u32 4294901760, %v106_v3 }
  0x5b   :  { %16794 = vst [vmem:[#allocation83_spill] sm:$0xff] %v11807_v48  ;;  %484 = vmatpush.msrb.mxu1 %v11544_v4  ;;  %v11926_v4 = vand.u32 4294901760, %v115_v1 }
  0x5c   :  { %16795 = vst [vmem:[#allocation84_spill] sm:$0xff] %v11815_v8  ;;  %v598_v8 = vsub.f32 %v11823_v29, %v11849_v63  ;;  %v11873_v62 = vsub.f32 %v130_v55, %v11851_v58  ;;  %v11889_v55 = vand.u32 4294901760, %v121_v23  ;;  %535 = vmatpush.msrb.mxu2 %v11851_v58  ;;  %v12007_v46 = vsub.f32 %v106_v3, %v11982_v40 }
  0x5d   :  { %16796 = vst [vmem:[#allocation85_spill] sm:$0xff] %v11820_v12  ;;  %486 = vmatpush.msrb.mxu1 %v11546_v5  ;;  %v11953_v38 = vsub.f32 %v115_v1, %v11926_v4 }
  0x5e   :  { %16797 = vst [vmem:[#allocation86_spill] sm:$0xff] %v11823_v29  ;;  %537 = vmatpush.msrb.mxu2 %v11862_v36 }
  0x5f   :  { %16798 = vst [vmem:[#allocation87_spill] sm:$0xff] %v11827_v15  ;;  %v16199_v15 = vmov 0.0   ;;  %488 = vmatpush.msrb.mxu1 %v11548_v9 }
  0x60   :  { %16799 = vst [vmem:[#allocation88_spill] sm:$0xff] %v11830_v59  ;;  %187 = vmatmul.f32.vlgmr.msra.gmra.mxu0 %v16199_v15  ;;  %v11868_v59 = vand.u32 4294901760, %v586_v41  ;;  %296 = vmatmul.f32.vlgmr.msra.gmra.mxu1 %v16199_v15  ;;  %v11884_v41 = vand.u32 4294901760, %v11860_v22  ;;  %v11895_v15 = vand.u32 4294901760, %v598_v8  ;;  %v11910_v8 = vand.u32 4294901760, %v11887_v26 }
  0x61   :  { %16800 = vst [vmem:[#allocation89_spill] sm:$0xff] %v11834_v52  ;;  %490 = vmatpush.msrb.mxu1 %v11550_v10  ;;  %539 = vmatpush.msrb.mxu2 %v11875_v49 }
  0x62   :  { %16801 = vst [vmem:[#allocation90_spill] sm:$0xff] %v11836_v14  ;;  %588 = vmatpush.msrb.mxu3 %v11868_v59  ;;  %v604_v39 = vsub.f32 %v11860_v22, %v11884_v41  ;;  %v616_v51 = vsub.f32 %v11887_v26, %v11910_v8  ;;  %678 = vmatpush.msra.mxu0 %v11728_v44 }
  0x63   :  { %16802 = vst [vmem:[#allocation91_spill] sm:$0xff] %v11840_v53  ;;  %v11881_v53 = vand.u32 4294901760, %v592_v33  ;;  %v11898_v33 = vand.u32 4294901760, %v11873_v62  ;;  %492 = vmatpush.msrb.mxu1 %v11552_v11  ;;  %541 = vmatpush.msrb.mxu2 %v11889_v55 }
  0x64   :  { %16803 = vst [vmem:[#allocation92_spill] sm:$0xff] %v11843_v21  ;;  %v11901_v21 = vsub.f32 %v124_v17, %v11875_v49  ;;  %v11915_v17 = vsub.f32 %v121_v23, %v11889_v55  ;;  %v11932_v23 = vand.u32 4294901760, %v604_v39  ;;  %v11959_v0 = vand.u32 4294901760, %v616_v51  ;;  %681 = vmatpush.msra.mxu0 %v11748_v61 }
  0x65   :  { %16804 = vst [vmem:[#allocation93_spill] sm:$0xff] %v11849_v63  ;;  %594 = vmatpush.msrb.mxu3 %v11881_v53  ;;  %494 = vmatpush.msrb.mxu1 %v11565_v18  ;;  %v103_v18 = vld [vmem:[#allocation8 + $0x8] sm:$0xff] }
  0x66   :  { %16805 = vst [vmem:[#allocation94_spill] sm:$0xff] %v11851_v58  ;;  %v11924_v5 = vand.u32 4294901760, %v11901_v21  ;;  %684 = vmatpush.msra.mxu0 %v11792_v6 }
  0x67   :  { %16806 = vst [vmem:[#allocation95_spill] sm:$0xff] %v11860_v22  ;;  %600 = vmatpush.msrb.mxu3 %v11895_v15  ;;  %496 = vmatpush.msrb.mxu1 %v11583_v24 }
  0x68   :  { %16807 = vst [vmem:[#allocation96_spill] sm:$0xff] %v11862_v36  ;;  %195 = vmatmul.f32.gmra.mxu0 %v16821_v42  ;;  %v622_v10 = vsub.f32 %v11901_v21, %v11924_v5  ;;  %300 = vmatmul.f32.gmra.mxu1 %v16821_v42 }
  0x69   :  { %16808 = vst [vmem:[#allocation97_spill] sm:$0xff] %v11868_v59  ;;  %v11912_v59 = vand.u32 4294901760, %v118_v32  ;;  %606 = vmatpush.msrb.mxu3 %v11932_v23  ;;  %498 = vmatpush.msrb.mxu1 %v11589_v27  ;;  %v11998_v27 = vand.u32 4294901760, %v103_v18 }
  0x6a   :  { %16809 = vst [vmem:[#allocation98_spill] sm:$0xff] %v11873_v62  ;;  %v11975_v51 = vand.u32 4294901760, %v622_v10  ;;  %687 = vmatpush.msra.mxu0 %v11807_v48 }
  0x6b   :  { %16810 = vst [vmem:[#allocation99_spill] sm:$0xff] %v11875_v49  ;;  %v11940_v9 = vsub.f32 %v118_v32, %v11912_v59  ;;  %v109_v32 = vld [vmem:[#allocation8 + $0x48] sm:$0xff]  ;;  %500 = vmatpush.msrb.mxu1 %v11608_v34  ;;  %543 = vmatpush.msrb.mxu2 %v11912_v59 }
  0x6c   :  { %16811 = vst [vmem:[#allocation100_spill] sm:$0xff] %v11881_v53  ;;  %v610_v53 = vsub.f32 %v11873_v62, %v11898_v33  ;;  %v11968_v1 = vand.u32 4294901760, %v109_v32  ;;  %690 = vmatpush.msra.mxu0 %v11823_v29 }
  0x6d   :  { %16812 = vst [vmem:[#allocation101_spill] sm:$0xff] %v11884_v41  ;;  %v11964_v11 = vand.u32 4294901760, %v11940_v9  ;;  %502 = vmatpush.msrb.mxu1 %v11636_v45  ;;  %545 = vmatpush.msrb.mxu2 %v11926_v4 }
  0x6e   :  { %16813 = vst [vmem:[#allocation102_spill] sm:$0xff] %v11887_v26  ;;  %v11948_v39 = vand.u32 4294901760, %v610_v53  ;;  %v11996_v54 = vsub.f32 %v109_v32, %v11968_v1  ;;  %693 = vmatpush.msra.mxu0 %v11860_v22 }
  0x6f   :  { %16814 = vst [vmem:[#allocation103_spill] sm:$0xff] %v11889_v55  ;;  %v634_v10 = vsub.f32 %v11940_v9, %v11964_v11  ;;  %504 = vmatpush.msrb.mxu1 %v11641_v47  ;;  %547 = vmatpush.msrb.mxu2 %v11944_v57 }
  0x70   :  { %16815 = vst [vmem:[#allocation104_spill] sm:$0xff] %v11895_v15  ;;  %v11937_v15 = vand.u32 4294901760, %v11915_v17  ;;  %612 = vmatpush.msrb.mxu3 %v11948_v39  ;;  %v12018_v20 = vand.u32 4294901760, %v11996_v54  ;;  %473 = vmatmul.f32.vlgmr.msrb.gmra.mxu0 %v16821_v42 }
  0x71   :  { %16816 = vst [vmem:[#allocation105_spill] sm:$0xff] %v11898_v33  ;;  %v12011_v32 = vand.u32 4294901760, %v634_v10  ;;  %506 = vmatpush.msrb.mxu1 %v11665_v56  ;;  %v12030_v10 = vand.u32 4294901760, %v12007_v46  ;;  %549 = vmatpush.msrb.mxu2 %v11968_v1 }
  0x72   :  { %16817 = vst [vmem:[#allocation106_spill] sm:$0xff] %v11901_v21  ;;  %v628_v53 = vsub.f32 %v11915_v17, %v11937_v15  ;;  %618 = vmatpush.msrb.mxu3 %v11959_v0  ;;  %696 = vmatpush.msra.mxu0 %v11873_v62 }
  0x73   :  { %16818 = vst [vmem:[#allocation107_spill] sm:$0xff] %v11910_v8  ;;  %508 = vmatpush.msrb.mxu1 %v11673_v60  ;;  %v658_v61 = vsub.f32 %v12007_v46, %v12030_v10  ;;  %551 = vmatpush.msrb.mxu2 %v11982_v40 }
  0x74   :  { %16819 = vst [vmem:[#allocation108_spill] sm:$0xff] %v11912_v59  ;;  %v11986_v43 = vand.u32 4294901760, %v628_v53  ;;  %624 = vmatpush.msrb.mxu3 %v11975_v51  ;;  %699 = vmatpush.msra.mxu0 %v11887_v26  ;;  %v140_v26 = vld [vmem:[#allocation8 + $0x190] sm:$0xff] }
  0x75   :  { %16820 = vst [vmem:[#allocation109_spill] sm:$0xff] %v11915_v17  ;;  %510 = vmatpush.msrb.mxu1 %v11691_v7  ;;  %v12061_v48 = vand.u32 4294901760, %v658_v61  ;;  %553 = vmatpush.msrb.mxu2 %v11998_v27  ;;  %v12112_v22 = vand.u32 4294901760, %v140_v26 }
  0x76   :  { %16822 = vst [vmem:[#allocation110_spill] sm:$0xff] %v11924_v5  ;;  %630 = vmatpush.msrb.mxu3 %v11986_v43  ;;  %702 = vmatpush.msra.mxu0 %v11901_v21  ;;  %v146_v21 = vld [vmem:[#allocation8 + $0x1d0] sm:$0xff] }
  0x77   :  { %16823 = vst [vmem:[#allocation111_spill] sm:$0xff] %v11926_v4  ;;  %512 = vmatpush.msrb.mxu1 %v11720_v35  ;;  %783 = vmatpush.msra.mxu2 %v11764_v2  ;;  %v125_v2 = vld [vmem:[#allocation8 + $0xf0] sm:$0xff] }
  0x78   :  { %16824 = vst [vmem:[#allocation112_spill] sm:$0xff] %v11932_v23  ;;  %v11978_v23 = vand.u32 4294901760, %v11953_v38  ;;  %636 = vmatpush.msrb.mxu3 %v12011_v32  ;;  %514 = vmatmul.f32.vlgmr.msrb.gmra.mxu1 %v16821_v42 }
  0x79   :  { %16825 = vst [vmem:[#allocation113_spill] sm:$0xff] %v11937_v15  ;;  %736 = vmatpush.msra.mxu1 %v11705_v25  ;;  %787 = vmatpush.msra.mxu2 %v11782_v19 }
  0x7a   :  { %16826 = vst [vmem:[#allocation114_spill] sm:$0xff] %v11940_v9  ;;  %v640_v53 = vsub.f32 %v11953_v38, %v11978_v23  ;;  %705 = vmatpush.msra.mxu0 %v11915_v17  ;;  %v143_v17 = vld [vmem:[#allocation8 + $0x1b0] sm:$0xff]  ;;  %559 = vmatmul.f32.vlgmr.msrb.gmra.mxu2 %v16821_v42 }
  0x7b   :  { %16827 = vst [vmem:[#allocation115_spill] sm:$0xff] %v11944_v57  ;;  %738 = vmatpush.msra.mxu1 %v11712_v30  ;;  %791 = vmatpush.msra.mxu2 %v11820_v12  ;;  %v12106_v62 = vand.u32 4294901760, %v143_v17 }
  0x7c   :  { %16828 = vst [vmem:[#allocation116_spill] sm:$0xff] %v11948_v39  ;;  %v11993_v39 = vand.u32 4294901760, %v11971_v13  ;;  %v12025_v3 = vand.u32 4294901760, %v640_v53  ;;  %v652_v53 = vsub.f32 %v11996_v54, %v12018_v20  ;;  %708 = vmatpush.msra.mxu0 %v11940_v9  ;;  %v12097_v9 = vand.u32 4294901760, %v146_v21 }
  0x7d   :  { %16829 = vst [vmem:[#allocation117_spill] sm:$0xff] %v11953_v38  ;;  %740 = vmatpush.msra.mxu1 %v11759_v28  ;;  %795 = vmatpush.msra.mxu2 %v11834_v52 }
  0x7e   :  { %16830 = vst [vmem:[#allocation118_spill] sm:$0xff] %v11959_v0  ;;  %v12021_v0 = vsub.f32 %v103_v18, %v11998_v27  ;;  %642 = vmatpush.msrb.mxu3 %v12025_v3  ;;  %477 = vmatmul.f32.gmra.mxu0 %v16821_v42 }
  0x7f   :  { %16831 = vst [vmem:[#allocation119_spill] sm:$0xff] %v11964_v11  ;;  %742 = vmatpush.msra.mxu1 %v11775_v31  ;;  %711 = vmatpush.msra.mxu0 %v11953_v38 }
  0x80   :  { %16832 = vst [vmem:[#allocation120_spill] sm:$0xff] %v11968_v1  ;;  %v12041_v44 = vand.u32 4294901760, %v12021_v0  ;;  %799 = vmatpush.msra.mxu2 %v11849_v63  ;;  %518 = vmatmul.f32.gmra.mxu1 %v16821_v42 }
  0x81   :  { %16833 = vst [vmem:[#allocation121_spill] sm:$0xff] %v11971_v13  ;;  %744 = vmatpush.msra.mxu1 %v11794_v16  ;;  %714 = vmatpush.msra.mxu0 %v11971_v13 }
  0x82   :  { %16834 = vst [vmem:[#allocation122_spill] sm:$0xff] %v11975_v51  ;;  %v646_v51 = vsub.f32 %v11971_v13, %v11993_v39  ;;  %v664_v6 = vsub.f32 %v12021_v0, %v12041_v44  ;;  %803 = vmatpush.msra.mxu2 %v11884_v41  ;;  %v137_v13 = vld [vmem:[#allocation8 + $0x170] sm:$0xff] }
  0x83   :  { %16835 = vst [vmem:[#allocation123_spill] sm:$0xff] %v11978_v23  ;;  %746 = vmatpush.msra.mxu1 %v11836_v14  ;;  %717 = vmatpush.msra.mxu0 %v11996_v54  ;;  %v12124_v29 = vand.u32 4294901760, %v137_v13  ;;  %v131_v41 = vld [vmem:[#allocation8 + $0x130] sm:$0xff] }
  0x84   :  { %16836 = vst [vmem:[#allocation124_spill] sm:$0xff] %v11982_v40  ;;  %v12036_v18 = vand.u32 4294901760, %v646_v51  ;;  %v12053_v51 = vand.u32 4294901760, %v652_v53  ;;  %v12067_v53 = vand.u32 4294901760, %v664_v6  ;;  %v149_v6 = vld [vmem:[#allocation8 + $0x1f0] sm:$0xff]  ;;  %807 = vmatpush.msra.mxu2 %v11898_v33  ;;  %v12127_v33 = vsub.f32 %v143_v17, %v12106_v62 }
  0x85   :  { %16837 = vst [vmem:[#allocation125_spill] sm:$0xff] %v11986_v43  ;;  %748 = vmatpush.msra.mxu1 %v11851_v58  ;;  %v12089_v61 = vand.u32 4294901760, %v149_v6  ;;  %720 = vmatpush.msra.mxu0 %v12007_v46  ;;  %v12159_v12 = vand.u32 4294901760, %v131_v41 }
  0x86   :  { %16838 = vst [vmem:[#allocation126_spill] sm:$0xff] %v11993_v39  ;;  %648 = vmatpush.msrb.mxu3 %v12036_v18  ;;  %811 = vmatpush.msra.mxu2 %v11910_v8  ;;  %v12148_v63 = vand.u32 4294901760, %v12127_v33 }
  0x87   :  { %16839 = vst [vmem:[#allocation127_spill] sm:$0xff] %v11996_v54  ;;  %750 = vmatpush.msra.mxu1 %v11862_v36  ;;  %v12102_v38 = vsub.f32 %v149_v6, %v12089_v61  ;;  %v12115_v6 = vsub.f32 %v146_v21, %v12097_v9  ;;  %723 = vmatpush.msra.mxu0 %v12021_v0 }
  0x88   :  { %16840 = vst [vmem:[#allocation128_spill] sm:$0xff] %v11998_v27  ;;  %654 = vmatpush.msrb.mxu3 %v12053_v51  ;;  %815 = vmatpush.msra.mxu2 %v11924_v5  ;;  %v128_v5 = vld [vmem:[#allocation8 + $0x110] sm:$0xff] }
  0x89   :  { %16841 = vst [vmem:[#allocation129_spill] sm:$0xff] %v12007_v46  ;;  %752 = vmatpush.msra.mxu1 %v11875_v49  ;;  %v12120_v54 = vand.u32 4294901760, %v12102_v38  ;;  %v134_v46 = vld [vmem:[#allocation8 + $0x150] sm:$0xff]  ;;  %895 = vmatpush.msrb.mxu0 %v12089_v61  ;;  %v12134_v21 = vand.u32 4294901760, %v12115_v6 }
  0x8a   :  { %16842 = vst [vmem:[#allocation130_spill] sm:$0xff] %v12011_v32  ;;  %660 = vmatpush.msrb.mxu3 %v12061_v48  ;;  %v12143_v8 = vand.u32 4294901760, %v134_v46  ;;  %819 = vmatpush.msra.mxu2 %v11937_v15  ;;  %v958_v15 = vsub.f32 %v12127_v33, %v12148_v63 }
  0x8b   :  { %16843 = vst [vmem:[#allocation131_spill] sm:$0xff] %v12018_v20  ;;  %754 = vmatpush.msra.mxu1 %v11889_v55  ;;  %v946_v17 = vsub.f32 %v12102_v38, %v12120_v54  ;;  %897 = vmatpush.msrb.mxu0 %v12097_v9  ;;  %v952_v52 = vsub.f32 %v12115_v6, %v12134_v21 }
  0x8c   :  { %16844 = vst [vmem:[#allocation132_spill] sm:$0xff] %v12021_v0  ;;  %666 = vmatpush.msrb.mxu3 %v12067_v53  ;;  %v12137_v0 = vsub.f32 %v140_v26, %v12112_v22  ;;  %v12151_v26 = vsub.f32 %v137_v13, %v12124_v29  ;;  %823 = vmatpush.msra.mxu2 %v11964_v11  ;;  %v12188_v11 = vand.u32 4294901760, %v125_v2 }
  0x8d   :  { %16845 = vst [vmem:[#allocation133_spill] sm:$0xff] %v12025_v3  ;;  %756 = vmatpush.msra.mxu1 %v11912_v59  ;;  %668 = vmatmul.f32.vlgmr.msrb.gmra.mxu3 %v16821_v42  ;;  %v12166_v13 = vand.u32 4294901760, %v946_v17 }
  0x8e   :  { %16846 = vst [vmem:[#allocation134_spill] sm:$0xff] %v12030_v10  ;;  %854 = vmatpush.msra.mxu3 %v11705_v25  ;;  %v12162_v19 = vand.u32 4294901760, %v12137_v0  ;;  %899 = vmatpush.msrb.mxu0 %v12106_v62 }
  0x8f   :  { %16847 = vst [vmem:[#allocation135_spill] sm:$0xff] %v12036_v18  ;;  %758 = vmatpush.msra.mxu1 %v11926_v4  ;;  %827 = vmatpush.msra.mxu2 %v11978_v23  ;;  %v12191_v18 = vsub.f32 %v131_v41, %v12159_v12  ;;  %v12209_v41 = vand.u32 4294901760, %v122_v50 }
  0x90   :  { %16848 = vst [vmem:[#allocation136_spill] sm:$0xff] %v12041_v44  ;;  %856 = vmatpush.msra.mxu3 %v11712_v30  ;;  %901 = vmatpush.msrb.mxu0 %v12112_v22  ;;  %v964_v17 = vsub.f32 %v12137_v0, %v12162_v19 }
  0x91   :  { %16849 = vst [vmem:[#allocation137_spill] sm:$0xff] %v12053_v51  ;;  %760 = vmatpush.msra.mxu1 %v11944_v57  ;;  %v12178_v51 = vand.u32 4294901760, %v12151_v26  ;;  %567 = vmatmul.f32.gmra.mxu2 %v16821_v42 }
  0x92   :  { %16850 = vst [vmem:[#allocation138_spill] sm:$0xff] %v12061_v48  ;;  %858 = vmatpush.msra.mxu3 %v11759_v28  ;;  %v12175_v48 = vand.u32 4294901760, %v128_v5  ;;  %903 = vmatpush.msrb.mxu0 %v12124_v29  ;;  %v12213_v43 = vand.u32 4294901760, %v964_v17 }
  0x93   :  { %16851 = vst [vmem:[#allocation139_spill] sm:$0xff] %v12067_v53  ;;  %762 = vmatpush.msra.mxu1 %v11968_v1  ;;  %v12169_v53 = vsub.f32 %v134_v46, %v12143_v8  ;;  %v12184_v46 = vand.u32 4294901760, %v952_v52  ;;  %v12200_v52 = vand.u32 4294901760, %v958_v15  ;;  %v970_v23 = vsub.f32 %v12151_v26, %v12178_v51  ;;  %831 = vmatpush.msra.mxu2 %v11993_v39  ;;  %v116_v39 = vld [vmem:[#allocation8 + $0x90] sm:$0xff] }
  0x94   :  { %16852 = vst [vmem:[#allocation140_spill] sm:$0xff] %v12089_v61  ;;  %860 = vmatpush.msra.mxu3 %v11775_v31  ;;  %v12205_v32 = vsub.f32 %v128_v5, %v12175_v48  ;;  %905 = vmatpush.msrb.mxu0 %v12143_v8  ;;  %v12216_v15 = vand.u32 4294901760, %v12191_v18 }
  0x95   :  { %16853 = vst [vmem:[#allocation141_spill] sm:$0xff] %v12097_v9  ;;  %764 = vmatpush.msra.mxu1 %v11982_v40  ;;  %v12196_v3 = vand.u32 4294901760, %v12169_v53  ;;  %672 = vmatmul.f32.gmra.mxu3 %v16821_v42  ;;  %v12227_v17 = vand.u32 4294901760, %v970_v23 }
  0x96   :  { %16854 = vst [vmem:[#allocation142_spill] sm:$0xff] %v12102_v38  ;;  %862 = vmatpush.msra.mxu3 %v11794_v16  ;;  %835 = vmatpush.msra.mxu2 %v12018_v20  ;;  %v12237_v20 = vsub.f32 %v122_v50, %v12209_v41  ;;  %v982_v23 = vsub.f32 %v12191_v18, %v12216_v15  ;;  %v110_v50 = vld [vmem:[#allocation8 + $0x50] sm:$0xff] }
  0x97   :  { %16855 = vst [vmem:[#allocation143_spill] sm:$0xff] %v12106_v62  ;;  %766 = vmatpush.msra.mxu1 %v11998_v27  ;;  %v976_v5 = vsub.f32 %v12169_v53, %v12196_v3  ;;  %907 = vmatpush.msrb.mxu0 %v12159_v12 }
  0x98   :  { %16856 = vst [vmem:[#allocation144_spill] sm:$0xff] %v12112_v22  ;;  %864 = vmatpush.msra.mxu3 %v11836_v14  ;;  %839 = vmatpush.msra.mxu2 %v12030_v10 }
  0x99   :  { %16857 = vst [vmem:[#allocation145_spill] sm:$0xff] %v12115_v6  ;;  %948 = vmatpush.msrb.mxu1 %v12166_v13  ;;  %909 = vmatpush.msrb.mxu0 %v12175_v48  ;;  %v12250_v10 = vand.u32 4294901760, %v976_v5  ;;  %v12264_v5 = vand.u32 4294901760, %v12237_v20 }
  0x9a   :  { %16858 = vst [vmem:[#allocation146_spill] sm:$0xff] %v12120_v54  ;;  %866 = vmatpush.msra.mxu3 %v11851_v58  ;;  %843 = vmatpush.msra.mxu2 %v12041_v44  ;;  %v107_v44 = vld [vmem:[#allocation8 + $0x30] sm:$0xff] }
  0x9b   :  { %16859 = vst [vmem:[#allocation147_spill] sm:$0xff] %v12124_v29  ;;  %954 = vmatpush.msrb.mxu1 %v12184_v46  ;;  %911 = vmatpush.msrb.mxu0 %v12188_v11 }
  0x9c   :  { %16860 = vst [vmem:[#allocation148_spill] sm:$0xff] %v12127_v33  ;;  %868 = vmatpush.msra.mxu3 %v11862_v36  ;;  %1050 = vmatpush.msrb.mxu2 %v12102_v38  ;;  %v104_v38 = vld [vmem:[#allocation8 + $0x10] sm:$0xff] }
  0x9d   :  { %16861 = vst [vmem:[#allocation149_spill] sm:$0xff] %v12134_v21  ;;  %960 = vmatpush.msrb.mxu1 %v12200_v52  ;;  %845 = vmatmul.f32.vlgmr.msra.gmra.mxu2 %v16821_v42 }
  0x9e   :  { %16862 = vst [vmem:[#allocation150_spill] sm:$0xff] %v12137_v0  ;;  %870 = vmatpush.msra.mxu3 %v11875_v49  ;;  %913 = vmatpush.msrb.mxu0 %v12209_v41  ;;  %v12272_v49 = vand.u32 4294901760, %v110_v50 }
  0x9f   :  { %16863 = vst [vmem:[#allocation151_spill] sm:$0xff] %v12143_v8  ;;  %966 = vmatpush.msrb.mxu1 %v12213_v43  ;;  %1053 = vmatpush.msrb.mxu2 %v12115_v6 }
  0xa0   :  { %16864 = vst [vmem:[#allocation152_spill] sm:$0xff] %v12148_v63  ;;  %872 = vmatpush.msra.mxu3 %v11889_v55  ;;  %726 = vmatmul.f32.vlgmr.msra.gmra.mxu0 %v16821_v42 }
  0xa1   :  { %16865 = vst [vmem:[#allocation153_spill] sm:$0xff] %v12151_v26  ;;  %972 = vmatpush.msrb.mxu1 %v12227_v17  ;;  %1056 = vmatpush.msrb.mxu2 %v12127_v33 }
  0xa2   :  { %16866 = vst [vmem:[#allocation154_spill] sm:$0xff] %v12159_v12  ;;  %874 = vmatpush.msra.mxu3 %v11912_v59  ;;  %v12232_v59 = vand.u32 4294901760, %v12205_v32  ;;  %770 = vmatmul.f32.vlgmr.msra.gmra.mxu1 %v16821_v42 }
  0xa3   :  { %16867 = vst [vmem:[#allocation155_spill] sm:$0xff] %v12162_v19  ;;  %978 = vmatpush.msrb.mxu1 %v12250_v10  ;;  %1059 = vmatpush.msrb.mxu2 %v12137_v0 }
  0xa4   :  { %16868 = vst [vmem:[#allocation156_spill] sm:$0xff] %v12166_v13  ;;  %876 = vmatpush.msra.mxu3 %v11926_v4  ;;  %v119_v13 = vld [vmem:[#allocation8 + $0xb0] sm:$0xff]  ;;  %v12219_v4 = vsub.f32 %v125_v2, %v12188_v11 }
  0xa5   :  { %16869 = vst [vmem:[#allocation157_spill] sm:$0xff] %v12169_v53  ;;  %v113_v2 = vld [vmem:[#allocation8 + $0x70] sm:$0xff]  ;;  %1062 = vmatpush.msrb.mxu2 %v12151_v26 }
  0xa6   :  { %16870 = vst [vmem:[#allocation158_spill] sm:$0xff] %v12175_v48  ;;  %878 = vmatpush.msra.mxu3 %v11944_v57  ;;  %v12246_v57 = vand.u32 4294901760, %v12219_v4  ;;  %849 = vmatmul.f32.gmra.mxu2 %v16821_v42 }
  0xa7   :  { %16871 = vst [vmem:[#allocation159_spill] sm:$0xff] %v12178_v51  ;;  %1065 = vmatpush.msrb.mxu2 %v12169_v53 }
  0xa8   :  { %16872 = vst [vmem:[#allocation160_spill] sm:$0xff] %v12184_v46  ;;  %v12229_v46 = vand.u32 4294901760, %v119_v13  ;;  %880 = vmatpush.msra.mxu3 %v11968_v1  ;;  %v12256_v1 = vand.u32 4294901760, %v113_v2  ;;  %731 = vmatmul.f32.gmra.mxu0 %v16821_v42 }
  0xa9   :  { %16873 = vst [vmem:[#allocation161_spill] sm:$0xff] %v12188_v11  ;;  %1068 = vmatpush.msrb.mxu2 %v12191_v18 }
  0xaa   :  { %16874 = vst [vmem:[#allocation162_spill] sm:$0xff] %v12191_v18  ;;  %882 = vmatpush.msra.mxu3 %v11982_v40  ;;  %v12259_v55 = vsub.f32 %v119_v13, %v12229_v46  ;;  %v994_v40 = vsub.f32 %v12219_v4, %v12246_v57  ;;  %v12289_v58 = vsub.f32 %v113_v2, %v12256_v1 }
  0xab   :  { %16875 = vst [vmem:[#allocation163_spill] sm:$0xff] %v12196_v3  ;;  %915 = vmatpush.msrb.mxu0 %v12229_v46  ;;  %v12305_v2 = vsub.f32 %v110_v50, %v12272_v49  ;;  %776 = vmatmul.f32.gmra.mxu1 %v16821_v42 }
  0xac   :  { %16876 = vst [vmem:[#allocation164_spill] sm:$0xff] %v12200_v52  ;;  %v12243_v52 = vand.u32 4294901760, %v116_v39  ;;  %884 = vmatpush.msra.mxu3 %v11998_v27  ;;  %v12286_v36 = vand.u32 4294901760, %v12259_v55  ;;  %1071 = vmatpush.msrb.mxu2 %v12205_v32 }
  0xad   :  { %16877 = vst [vmem:[#allocation165_spill] sm:$0xff] %v12205_v32  ;;  %886 = vmatmul.f32.vlgmr.msra.gmra.mxu3 %v16821_v42  ;;  %v12328_v14 = vand.u32 4294901760, %v12305_v2 }
  0xae   :  { %16878 = vst [vmem:[#allocation166_spill] sm:$0xff] %v12209_v41  ;;  %v12275_v13 = vsub.f32 %v116_v39, %v12243_v52  ;;  %1108 = vmatpush.msrb.mxu3 %v12089_v61  ;;  %v1000_v39 = vsub.f32 %v12237_v20, %v12264_v5  ;;  %917 = vmatpush.msrb.mxu0 %v12243_v52 }
  0xaf   :  { %16879 = vst [vmem:[#allocation167_spill] sm:$0xff] %v12213_v43  ;;  %v988_v43 = vsub.f32 %v12205_v32, %v12232_v59  ;;  %1074 = vmatpush.msrb.mxu2 %v12219_v4 }
  0xb0   :  { %16880 = vst [vmem:[#allocation168_spill] sm:$0xff] %v12216_v15  ;;  %v12302_v6 = vand.u32 4294901760, %v12275_v13  ;;  %1110 = vmatpush.msrb.mxu3 %v12097_v9  ;;  %v12321_v50 = vand.u32 4294901760, %v1000_v39  ;;  %919 = vmatpush.msrb.mxu0 %v12256_v1 }
  0xb1   :  { %16881 = vst [vmem:[#allocation169_spill] sm:$0xff] %v12219_v4  ;;  %v12281_v27 = vand.u32 4294901760, %v988_v43  ;;  %v12297_v43 = vand.u32 4294901760, %v994_v40  ;;  %v1006_v40 = vsub.f32 %v12259_v55, %v12286_v36  ;;  %1077 = vmatpush.msrb.mxu2 %v12237_v20 }
  0xb2   :  { %16882 = vst [vmem:[#allocation170_spill] sm:$0xff] %v12227_v17  ;;  %v12268_v17 = vand.u32 4294901760, %v982_v23  ;;  %v12283_v23 = vand.u32 4294901760, %v107_v44  ;;  %1112 = vmatpush.msrb.mxu3 %v12106_v62  ;;  %921 = vmatpush.msrb.mxu0 %v12272_v49 }
  0xb3   :  { %16883 = vst [vmem:[#allocation171_spill] sm:$0xff] %v12229_v46  ;;  %1080 = vmatpush.msrb.mxu2 %v12259_v55 }
  0xb4   :  { %16884 = vst [vmem:[#allocation172_spill] sm:$0xff] %v12232_v59  ;;  %984 = vmatpush.msrb.mxu1 %v12268_v17  ;;  %v12317_v33 = vsub.f32 %v107_v44, %v12283_v23  ;;  %1114 = vmatpush.msrb.mxu3 %v12112_v22  ;;  %v12337_v44 = vand.u32 4294901760, %v1006_v40  ;;  %v1024_v40 = vsub.f32 %v12305_v2, %v12328_v14 }
  0xb5   :  { %16885 = vst [vmem:[#allocation173_spill] sm:$0xff] %v12237_v20  ;;  %890 = vmatmul.f32.gmra.mxu3 %v16821_v42  ;;  %923 = vmatpush.msrb.mxu0 %v12283_v23 }
  0xb6   :  { %16886 = vst [vmem:[#allocation174_spill] sm:$0xff] %v12243_v52  ;;  %990 = vmatpush.msrb.mxu1 %v12281_v27  ;;  %1116 = vmatpush.msrb.mxu3 %v12124_v29  ;;  %v12367_v53 = vand.u32 4294901760, %v1024_v40 }
  0xb7   :  { %16887 = vst [vmem:[#allocation175_spill] sm:$0xff] %v12246_v57  ;;  %1083 = vmatpush.msrb.mxu2 %v12275_v13 }
  0xb8   :  { %16888 = vst [vmem:[#allocation176_spill] sm:$0xff] %v12250_v10  ;;  %v12299_v10 = vand.u32 4294901760, %v104_v38  ;;  %996 = vmatpush.msrb.mxu1 %v12297_v43  ;;  %1118 = vmatpush.msrb.mxu3 %v12143_v8 }
  0xb9   :  { %16889 = vst [vmem:[#allocation177_spill] sm:$0xff] %v12256_v1  ;;  %1086 = vmatpush.msrb.mxu2 %v12289_v58 }
  0xba   :  { %16890 = vst [vmem:[#allocation178_spill] sm:$0xff] %v12259_v55  ;;  %v12331_v16 = vsub.f32 %v104_v38, %v12299_v10  ;;  %1002 = vmatpush.msrb.mxu1 %v12321_v50  ;;  %925 = vmatpush.msrb.mxu0 %v12299_v10 }
  0xbb   :  { %16891 = vst [vmem:[#allocation179_spill] sm:$0xff] %v12264_v5  ;;  %1120 = vmatpush.msrb.mxu3 %v12159_v12  ;;  %1089 = vmatpush.msrb.mxu2 %v12305_v2 }
  0xbc   :  { %16892 = vst [vmem:[#allocation180_spill] sm:$0xff] %v12268_v17  ;;  %v12314_v17 = vand.u32 4294901760, %v12289_v58  ;;  %v12353_v26 = vand.u32 4294901760, %v12331_v16  ;;  %1008 = vmatpush.msrb.mxu1 %v12337_v44  ;;  %1155 = vmatpush.msra.mxu0 %v12120_v54  ;;  %v16983_v54 = vld [vmem:[#allocation122_spill] sm:$0xff] }
  0xbd   :  { %16893 = vst [vmem:[#allocation181_spill] sm:$0xff] %v12272_v49  ;;  %1122 = vmatpush.msrb.mxu3 %v12175_v48  ;;  %1092 = vmatpush.msrb.mxu2 %v12317_v33 }
  0xbe   :  { %16894 = vst [vmem:[#allocation182_spill] sm:$0xff] %v12275_v13  ;;  %v1018_v39 = vsub.f32 %v12289_v58, %v12314_v17  ;;  %1159 = vmatpush.msra.mxu0 %v12134_v21  ;;  %v16976_v21 = vld [vmem:[#allocation108_spill] sm:$0xff] }
  0xbf   :  { %16895 = vst [vmem:[#allocation183_spill] sm:$0xff] %v12281_v27  ;;  %v1012_v27 = vsub.f32 %v12275_v13, %v12302_v6  ;;  %1124 = vmatpush.msrb.mxu3 %v12188_v11  ;;  %931 = vmatmul.f32.vlgmr.msrb.gmra.mxu0 %v16821_v42 }
  0xc0   :  { %16896 = vst [vmem:[#allocation184_spill] sm:$0xff] %v12283_v23  ;;  %1163 = vmatpush.msra.mxu0 %v12148_v63  ;;  %1095 = vmatpush.msrb.mxu2 %v12331_v16  ;;  %v16968_v63 = vld [vmem:[#allocation100_spill] sm:$0xff] }
  0xc1   :  { %16897 = vst [vmem:[#allocation185_spill] sm:$0xff] %v12286_v36  ;;  %v12348_v38 = vand.u32 4294901760, %v1012_v27  ;;  %1126 = vmatpush.msrb.mxu3 %v12209_v41  ;;  %1098 = vmatmul.f32.vlgmr.msrb.gmra.mxu2 %v16821_v42 }
  0xc2   :  { %16898 = vst [vmem:[#allocation186_spill] sm:$0xff] %v12289_v58  ;;  %1167 = vmatpush.msra.mxu0 %v12162_v19  ;;  %v16939_v19 = vld [vmem:[#allocation75_spill] sm:$0xff] }
  0xc3   :  { %16899 = vst [vmem:[#allocation187_spill] sm:$0xff] %v12297_v43  ;;  %v12342_v43 = vand.u32 4294901760, %v12317_v33  ;;  %1014 = vmatpush.msrb.mxu1 %v12348_v38  ;;  %1128 = vmatpush.msrb.mxu3 %v12229_v46 }
  0xc4   :  { %16900 = vst [vmem:[#allocation188_spill] sm:$0xff] %v12299_v10  ;;  %1171 = vmatpush.msra.mxu0 %v12178_v51  ;;  %v16931_v51 = vld [vmem:[#allocation63_spill] sm:$0xff] }
  0xc5   :  { %16901 = vst [vmem:[#allocation189_spill] sm:$0xff] %v12302_v6  ;;  %v1030_v27 = vsub.f32 %v12317_v33, %v12342_v43  ;;  %1130 = vmatpush.msrb.mxu3 %v12243_v52 }
  0xc6   :  { %16902 = vst [vmem:[#allocation190_spill] sm:$0xff] %v12305_v2  ;;  %1175 = vmatpush.msra.mxu0 %v12196_v3  ;;  %v16928_v3 = vld [vmem:[#allocation58_spill] sm:$0xff] }
  0xc7   :  { %16903 = vst [vmem:[#allocation191_spill] sm:$0xff] %v12314_v17  ;;  %1132 = vmatpush.msrb.mxu3 %v12256_v1  ;;  %939 = vmatmul.f32.gmra.mxu0 %v16821_v42 }
  0xc8   :  { %16904 = vst [vmem:[#allocation192_spill] sm:$0xff] %v12317_v33  ;;  %1179 = vmatpush.msra.mxu0 %v12216_v15  ;;  %v16927_v15 = vld [vmem:[#allocation24_spill] sm:$0xff] }
  0xc9   :  { %16905 = vst [vmem:[#allocation193_spill] sm:$0xff] %v12321_v50  ;;  %v12359_v50 = vand.u32 4294901760, %v1018_v39  ;;  %v12375_v39 = vand.u32 4294901760, %v1030_v27  ;;  %1134 = vmatpush.msrb.mxu3 %v12272_v49  ;;  %v16917_v27 = vld [vmem:[#allocation39_spill] sm:$0xff]  ;;  %1103 = vmatmul.f32.gmra.mxu2 %v16821_v42 }
  0xca   :  { %16906 = vst [vmem:[#allocation194_spill] sm:$0xff] %v12328_v14  ;;  %1183 = vmatpush.msra.mxu0 %v12232_v59  ;;  %v16925_v59 = vld [vmem:[#allocation55_spill] sm:$0xff] }
  0xcb   :  { %16907 = vst [vmem:[#allocation195_spill] sm:$0xff] %v12331_v16  ;;  %1020 = vmatpush.msrb.mxu1 %v12359_v50  ;;  %1136 = vmatpush.msrb.mxu3 %v12283_v23 }
  0xcc   :  { %16908 = vst [vmem:[#allocation196_spill] sm:$0xff] %v12337_v44  ;;  %v1036_v44 = vsub.f32 %v12331_v16, %v12353_v26  ;;  %1187 = vmatpush.msra.mxu0 %v12246_v57  ;;  %v16924_v57 = vld [vmem:[#allocation23_spill] sm:$0xff]  ;;  %v16996_v16 = vld [vmem:[#allocation137_spill] sm:$0xff] }
  0xcd   :  { %16909 = vst [vmem:[#allocation197_spill] sm:$0xff] %v12342_v43  ;;  %1026 = vmatpush.msrb.mxu1 %v12367_v53  ;;  %1138 = vmatpush.msrb.mxu3 %v12299_v10 }
  0xce   :  { %16910 = vst [vmem:[#allocation198_spill] sm:$0xff] %v12348_v38  ;;  %v12381_v40 = vand.u32 4294901760, %v1036_v44  ;;  %1191 = vmatpush.msra.mxu0 %v12264_v5  ;;  %1142 = vmatmul.f32.vlgmr.msrb.gmra.mxu3 %v16821_v42  ;;  %v16916_v44 = vld [vmem:[#allocation16_spill] sm:$0xff]  ;;  %v16922_v5 = vld [vmem:[#allocation50_spill] sm:$0xff] }
  0xcf   :  { %16911 = vst [vmem:[#allocation199_spill] sm:$0xff] %v12353_v26  ;;  %1032 = vmatpush.msrb.mxu1 %v12375_v39  ;;  %1421 = vmatpush.msra.mxu3 %v11615_v37  ;;  %v16990_v37 = vld [vmem:[#allocation70_spill] sm:$0xff] }
  0xd0   :  { %16912 = vst [vmem:[#allocation200_spill] sm:$0xff] %v12359_v50  ;;  %1195 = vmatpush.msra.mxu0 %v12286_v36  ;;  %1368 = vmatpush.msra.mxu2 %v16916_v44  ;;  %v16918_v36 = vld [vmem:[#allocation43_spill] sm:$0xff] }
  0xd1   :  { %16913 = vst [vmem:[#allocation201_spill] sm:$0xff] %v12367_v53  ;;  %1038 = vmatpush.msrb.mxu1 %v12381_v40  ;;  %1427 = vmatpush.msra.mxu3 %v16917_v27  ;;  %v16980_v27 = vld [vmem:[#allocation118_spill] sm:$0xff] }
  0xd2   :  { %16914 = vst [vmem:[#allocation202_spill] sm:$0xff] %v12375_v39  ;;  %1040 = vmatmul.f32.vlgmr.msrb.gmra.mxu1 %v16821_v42  ;;  %1199 = vmatpush.msra.mxu0 %v12302_v6  ;;  %v16920_v6 = vld [vmem:[#allocation17_spill] sm:$0xff] }
  0xd3   :  { %16915 = vst [vmem:[#allocation203_spill] sm:$0xff] %v12381_v40  ;;  %1226 = vmatpush.msra.mxu1 %v12089_v61  ;;  %1433 = vmatpush.msra.mxu3 %v16918_v36  ;;  %v16945_v36 = vld [vmem:[#allocation82_spill] sm:$0xff] }
  0xd4   :  { %1203 = vmatpush.msra.mxu0 %v12314_v17  ;;  %v16919_v17 = vld [vmem:[#allocation47_spill] sm:$0xff]  ;;  %1370 = vmatpush.msra.mxu2 %v16920_v6 }
  0xd5   :  { %1228 = vmatpush.msra.mxu1 %v12097_v9  ;;  %1439 = vmatpush.msra.mxu3 %v16919_v17  ;;  %v16938_v17 = vld [vmem:[#allocation25_spill] sm:$0xff] }
  0xd6   :  { %1207 = vmatpush.msra.mxu0 %v12328_v14  ;;  %1148 = vmatmul.f32.gmra.mxu3 %v16821_v42  ;;  %v16921_v14 = vld [vmem:[#allocation22_spill] sm:$0xff] }
  0xd7   :  { %1230 = vmatpush.msra.mxu1 %v12106_v62  ;;  %1445 = vmatpush.msra.mxu3 %v16922_v5  ;;  %v16930_v5 = vld [vmem:[#allocation26_spill] sm:$0xff] }
  0xd8   :  { %1211 = vmatpush.msra.mxu0 %v12342_v43  ;;  %v16923_v43 = vld [vmem:[#allocation18_spill] sm:$0xff] }
  0xd9   :  { %1232 = vmatpush.msra.mxu1 %v12112_v22  ;;  %1372 = vmatpush.msra.mxu2 %v16923_v43 }
  0xda   :  { %1044 = vmatmul.f32.gmra.mxu1 %v16821_v42  ;;  %1215 = vmatpush.msra.mxu0 %v12353_v26  ;;  %v16926_v26 = vld [vmem:[#allocation19_spill] sm:$0xff] }
  0xdb   :  { %1234 = vmatpush.msra.mxu1 %v12124_v29  ;;  %1217 = vmatmul.f32.vlgmr.msra.gmra.mxu0 %v16821_v42 }
  0xdc   :  { %1523 = vmatpush.msrb.mxu0 %v16921_v14  ;;  %1451 = vmatpush.msra.mxu3 %v16925_v59  ;;  %v16929_v14 = vld [vmem:[#allocation20_spill] sm:$0xff]  ;;  %v16935_v59 = vld [vmem:[#allocation21_spill] sm:$0xff] }
  0xdd   :  { %1236 = vmatpush.msra.mxu1 %v12143_v8  ;;  %1374 = vmatpush.msra.mxu2 %v16926_v26 }
  0xde   :  { %1526 = vmatpush.msrb.mxu0 %v16924_v57  ;;  %1457 = vmatpush.msra.mxu3 %v16928_v3  ;;  %v16932_v57 = vld [vmem:[#allocation27_spill] sm:$0xff]  ;;  %v16934_v3 = vld [vmem:[#allocation34_spill] sm:$0xff] }
  0xdf   :  { %1238 = vmatpush.msra.mxu1 %v12159_v12  ;;  %1376 = vmatpush.msra.mxu2 %v16929_v14 }
  0xe0   :  { %1529 = vmatpush.msrb.mxu0 %v16927_v15  ;;  %1463 = vmatpush.msra.mxu3 %v16931_v51  ;;  %v16933_v15 = vld [vmem:[#allocation67_spill] sm:$0xff]  ;;  %v16937_v51 = vld [vmem:[#allocation37_spill] sm:$0xff] }
  0xe1   :  { %1240 = vmatpush.msra.mxu1 %v12175_v48  ;;  %1378 = vmatpush.msra.mxu2 %v16935_v59 }
  0xe2   :  { %1532 = vmatpush.msrb.mxu0 %v16930_v5  ;;  %1469 = vmatpush.msra.mxu3 %v16933_v15  ;;  %v16936_v5 = vld [vmem:[#allocation72_spill] sm:$0xff]  ;;  %v16942_v15 = vld [vmem:[#allocation45_spill] sm:$0xff] }
  0xe3   :  { %1242 = vmatpush.msra.mxu1 %v12188_v11  ;;  %1221 = vmatmul.f32.gmra.mxu0 %v16821_v42 }
  0xe4   :  { %1535 = vmatpush.msrb.mxu0 %v16932_v57  ;;  %1475 = vmatpush.msra.mxu3 %v16936_v5  ;;  %v16940_v57 = vld [vmem:[#allocation41_spill] sm:$0xff] }
  0xe5   :  { %1244 = vmatpush.msra.mxu1 %v12209_v41  ;;  %1380 = vmatpush.msra.mxu2 %v16938_v17  ;;  %v16944_v5 = vld [vmem:[#allocation49_spill] sm:$0xff] }
  0xe6   :  { %1538 = vmatpush.msrb.mxu0 %v16934_v3  ;;  %1481 = vmatpush.msra.mxu3 %v16939_v19  ;;  %v16941_v3 = vld [vmem:[#allocation78_spill] sm:$0xff]  ;;  %v16947_v19 = vld [vmem:[#allocation84_spill] sm:$0xff] }
  0xe7   :  { %1246 = vmatpush.msra.mxu1 %v12229_v46  ;;  %1382 = vmatpush.msra.mxu2 %v11583_v24 }
  0xe8   :  { %1541 = vmatpush.msrb.mxu0 %v16937_v51  ;;  %1487 = vmatpush.msra.mxu3 %v16941_v3  ;;  %v16943_v51 = vld [vmem:[#allocation33_spill] sm:$0xff]  ;;  %v16962_v3 = vld [vmem:[#allocation91_spill] sm:$0xff] }
  0xe9   :  { %1248 = vmatpush.msra.mxu1 %v12243_v52  ;;  %1384 = vmatpush.msra.mxu2 %v16943_v51 }
  0xea   :  { %1544 = vmatpush.msrb.mxu0 %v16940_v57  ;;  %1493 = vmatpush.msra.mxu3 %v16945_v36  ;;  %v16946_v57 = vld [vmem:[#allocation53_spill] sm:$0xff]  ;;  %v16951_v36 = vld [vmem:[#allocation92_spill] sm:$0xff] }
  0xeb   :  { %1250 = vmatpush.msra.mxu1 %v12256_v1  ;;  %1386 = vmatpush.msra.mxu2 %v11608_v34 }
  0xec   :  { %1547 = vmatpush.msrb.mxu0 %v16942_v15  ;;  %1499 = vmatpush.msra.mxu3 %v16947_v19  ;;  %v16949_v15 = vld [vmem:[#allocation88_spill] sm:$0xff]  ;;  %v188_v19 = vpop.f32.mrf.mxu0 }
  0xed   :  { %1252 = vmatpush.msra.mxu1 %v12272_v49  ;;  %1388 = vmatpush.msra.mxu2 %v11636_v45  ;;  %v16997_v49 = vld [vmem:[#allocation138_spill] sm:$0xff] }
  0xee   :  { %1550 = vmatpush.msrb.mxu0 %v16944_v5  ;;  %1505 = vmatpush.msra.mxu3 %v16949_v15  ;;  %v16950_v5 = vld [vmem:[#allocation61_spill] sm:$0xff]  ;;  %v16960_v15 = vld [vmem:[#allocation32_spill] sm:$0xff] }
  0xef   :  { %1254 = vmatpush.msra.mxu1 %v12283_v23  ;;  %1390 = vmatpush.msra.mxu2 %v11641_v47  ;;  %v16994_v23 = vld [vmem:[#allocation135_spill] sm:$0xff] }
  0xf0   :  { %1553 = vmatpush.msrb.mxu0 %v16946_v57  ;;  %1511 = vmatpush.msra.mxu3 %v16951_v36  ;;  %v16952_v57 = vld [vmem:[#allocation62_spill] sm:$0xff]  ;;  %v16959_v36 = vld [vmem:[#allocation87_spill] sm:$0xff] }
  0xf1   :  { %1256 = vmatpush.msra.mxu1 %v12299_v10  ;;  %1392 = vmatpush.msra.mxu2 %v11665_v56  ;;  %v16993_v10 = vld [vmem:[#allocation76_spill] sm:$0xff] }
  0xf2   :  { %1258 = vmatmul.f32.vlgmr.msra.gmra.mxu1 %v16821_v42  ;;  %1699 = vmatpush.msrb.mxu3 %v16916_v44 }
  0xf3   :  { %1581 = vmatpush.msrb.mxu1 %v16916_v44  ;;  %1394 = vmatpush.msra.mxu2 %v11673_v60  ;;  %v16991_v44 = vld [vmem:[#allocation128_spill] sm:$0xff] }
  0xf4   :  { %1701 = vmatpush.msrb.mxu3 %v16920_v6 }
  0xf5   :  { %1583 = vmatpush.msrb.mxu1 %v16920_v6  ;;  %1396 = vmatpush.msra.mxu2 %v11691_v7  ;;  %v16987_v6 = vld [vmem:[#allocation68_spill] sm:$0xff] }
  0xf6   :  { %1703 = vmatpush.msrb.mxu3 %v16923_v43 }
  0xf7   :  { %1585 = vmatpush.msrb.mxu1 %v16923_v43  ;;  %1398 = vmatpush.msra.mxu2 %v11720_v35  ;;  %v16974_v43 = vld [vmem:[#allocation112_spill] sm:$0xff] }
  0xf8   :  { %1705 = vmatpush.msrb.mxu3 %v16926_v26 }
  0xf9   :  { %1587 = vmatpush.msrb.mxu1 %v16926_v26  ;;  %v16966_v26 = vld [vmem:[#allocation40_spill] sm:$0xff] }
  0xfa   :  { %1262 = vmatmul.f32.gmra.mxu1 %v16821_v42  ;;  %v16948_v42 = vld [vmem:[#allocation57_spill] sm:$0xff]  ;;  %1707 = vmatpush.msrb.mxu3 %v16929_v14 }
  0xfb   :  { %1589 = vmatpush.msrb.mxu1 %v16929_v14  ;;  %1556 = vmatpush.msrb.mxu0 %v16948_v42  ;;  %v16953_v42 = vld [vmem:[#allocation69_spill] sm:$0xff] }
  0xfc   :  { %1709 = vmatpush.msrb.mxu3 %v16935_v59  ;;  %v16965_v14 = vld [vmem:[#allocation97_spill] sm:$0xff] }
  0xfd   :  { %1591 = vmatpush.msrb.mxu1 %v16935_v59  ;;  %1559 = vmatpush.msrb.mxu0 %v16950_v5  ;;  %v16954_v5 = vld [vmem:[#allocation73_spill] sm:$0xff]  ;;  %v16963_v59 = vld [vmem:[#allocation35_spill] sm:$0xff] }
  0xfe   :  { %1711 = vmatpush.msrb.mxu3 %v16938_v17 }
  0xff   :  { %1593 = vmatpush.msrb.mxu1 %v16938_v17  ;;  %1562 = vmatpush.msrb.mxu0 %v16952_v57  ;;  %v16957_v57 = vld [vmem:[#allocation30_spill] sm:$0xff]  ;;  %v297_v17 = vpop.f32.mrf.mxu1 }
 0x100   :  { %1713 = vmatpush.msrb.mxu3 %v11583_v24  ;;  %v298_v1 = vadd.f32 %v297_v17, %v188_v19 }
 0x101   :  { %1595 = vmatpush.msrb.mxu1 %v11583_v24  ;;  %1565 = vmatpush.msrb.mxu0 %v16953_v42  ;;  %v16955_v42 = vld [vmem:[#allocation28_spill] sm:$0xff]  ;;  %v16969_v24 = vld [vmem:[#allocation42_spill] sm:$0xff] }
 0x102   :  { %1628 = vmatpush.msrb.mxu2 %v16955_v42  ;;  %v16958_v42 = vld [vmem:[#allocation81_spill] sm:$0xff]  ;;  %1715 = vmatpush.msrb.mxu3 %v16943_v51 }
 0x103   :  { %1597 = vmatpush.msrb.mxu1 %v16943_v51  ;;  %1568 = vmatpush.msrb.mxu0 %v16954_v5  ;;  %v16956_v5 = vld [vmem:[#allocation29_spill] sm:$0xff]  ;;  %v16972_v51 = vld [vmem:[#allocation48_spill] sm:$0xff] }
 0x104   :  { %1632 = vmatpush.msrb.mxu2 %v16956_v5  ;;  %v16961_v5 = vld [vmem:[#allocation90_spill] sm:$0xff]  ;;  %1717 = vmatpush.msrb.mxu3 %v11608_v34 }
 0x105   :  { %1599 = vmatpush.msrb.mxu1 %v11608_v34  ;;  %1740 = vmatpush.msra.mxu0 %v11705_v25  ;;  %v16975_v34 = vld [vmem:[#allocation52_spill] sm:$0xff] }
 0x106   :  { %1636 = vmatpush.msrb.mxu2 %v16957_v57  ;;  %v16964_v57 = vld [vmem:[#allocation94_spill] sm:$0xff]  ;;  %1719 = vmatpush.msrb.mxu3 %v11636_v45 }
 0x107   :  { %1601 = vmatpush.msrb.mxu1 %v11636_v45  ;;  %1742 = vmatpush.msra.mxu0 %v11712_v30  ;;  %v16978_v45 = vld [vmem:[#allocation56_spill] sm:$0xff] }
 0x108   :  { %1640 = vmatpush.msrb.mxu2 %v16960_v15  ;;  %v355_v15 = vpop.f32.mrf.mxu2  ;;  %1721 = vmatpush.msrb.mxu3 %v11641_v47 }
 0x109   :  { %1603 = vmatpush.msrb.mxu1 %v11641_v47  ;;  %1744 = vmatpush.msra.mxu0 %v11759_v28  ;;  %v356_v39 = vadd.f32 %v355_v15, %v298_v1 }
 0x10a   :  { %1644 = vmatpush.msrb.mxu2 %v16963_v59  ;;  %v16971_v59 = vld [vmem:[#allocation104_spill] sm:$0xff]  ;;  %1723 = vmatpush.msrb.mxu3 %v11665_v56 }
 0x10b   :  { %1605 = vmatpush.msrb.mxu1 %v11665_v56  ;;  %1746 = vmatpush.msra.mxu0 %v11775_v31  ;;  %v16984_v56 = vld [vmem:[#allocation65_spill] sm:$0xff] }
 0x10c   :  { %1648 = vmatpush.msrb.mxu2 %v16966_v26  ;;  %v399_v26 = vpop.f32.mrf.mxu3  ;;  %1725 = vmatpush.msrb.mxu3 %v11673_v60 }
 0x10d   :  { %1607 = vmatpush.msrb.mxu1 %v11673_v60  ;;  %1748 = vmatpush.msra.mxu0 %v16958_v42  ;;  %v16986_v60 = vld [vmem:[#allocation125_spill] sm:$0xff]  ;;  %v400_v53 = vadd.f32 %v399_v26, %v356_v39 }
 0x10e   :  { %1652 = vmatpush.msrb.mxu2 %v16969_v24  ;;  %v16977_v24 = vld [vmem:[#allocation116_spill] sm:$0xff]  ;;  %1727 = vmatpush.msrb.mxu3 %v11691_v7  ;;  %v94_v26 = vld [vmem:[#allocation3 + $0xc] sm:$0xff] }
 0x10f   :  { %1609 = vmatpush.msrb.mxu1 %v11691_v7  ;;  %1750 = vmatpush.msra.mxu0 %v16961_v5 }
 0x110   :  { %1656 = vmatpush.msrb.mxu2 %v16972_v51  ;;  %v301_v51 = vpop.f32.mrf.mxu1  ;;  %v360_v47 = vpop.f32.mrf.mxu2  ;;  %1729 = vmatpush.msrb.mxu3 %v11720_v35 }
 0x111   :  { %1611 = vmatpush.msrb.mxu1 %v11720_v35  ;;  %1752 = vmatpush.msra.mxu0 %v16964_v57 }
 0x112   :  { %1660 = vmatpush.msrb.mxu2 %v16975_v34  ;;  %v16982_v34 = vld [vmem:[#allocation115_spill] sm:$0xff] }
 0x113   :  { %1793 = vmatpush.msra.mxu1 %v16959_v36  ;;  %v16967_v36 = vld [vmem:[#allocation96_spill] sm:$0xff] }
 0x114   :  { %1754 = vmatpush.msra.mxu0 %v16967_v36  ;;  %1664 = vmatpush.msrb.mxu2 %v16978_v45  ;;  %v405_v45 = vpop.f32.mrf.mxu3 }
 0x115   :  { %1799 = vmatpush.msra.mxu1 %v16962_v3  ;;  %v16970_v3 = vld [vmem:[#allocation99_spill] sm:$0xff] }
 0x116   :  { %1756 = vmatpush.msra.mxu0 %v16970_v3 }
 0x117   :  { %1805 = vmatpush.msra.mxu1 %v16965_v14  ;;  %v16973_v14 = vld [vmem:[#allocation103_spill] sm:$0xff] }
 0x118   :  { %1758 = vmatpush.msra.mxu0 %v16973_v14  ;;  %v515_v35 = vpop.f32.mrf.mxu1 }
 0x119   :  { %1811 = vmatpush.msra.mxu1 %v16968_v63  ;;  %v196_v63 = vpop.f32.mrf.mxu0 }
 0x11a   :  { %1760 = vmatpush.msra.mxu0 %v16976_v21 }
 0x11b   :  { %1817 = vmatpush.msra.mxu1 %v16971_v59  ;;  %v16979_v59 = vld [vmem:[#allocation111_spill] sm:$0xff] }
 0x11c   :  { %1762 = vmatpush.msra.mxu0 %v16979_v59 }
 0x11d   :  { %1823 = vmatpush.msra.mxu1 %v16974_v43  ;;  %v16981_v43 = vld [vmem:[#allocation60_spill] sm:$0xff] }
 0x11e   :  { %1668 = vmatpush.msrb.mxu2 %v16981_v43  ;;  %1764 = vmatpush.msra.mxu0 %v16982_v34  ;;  %v16989_v43 = vld [vmem:[#allocation130_spill] sm:$0xff] }
 0x11f   :  { %1829 = vmatpush.msra.mxu1 %v16977_v24  ;;  %v16985_v24 = vld [vmem:[#allocation120_spill] sm:$0xff] }
 0x120   :  { %1672 = vmatpush.msrb.mxu2 %v16984_v56  ;;  %1766 = vmatpush.msra.mxu0 %v16985_v24  ;;  %v16992_v56 = vld [vmem:[#allocation133_spill] sm:$0xff]  ;;  %v519_v33 = vpop.f32.mrf.mxu1 }
 0x121   :  { %1835 = vmatpush.msra.mxu1 %v16980_v27  ;;  %v16988_v27 = vld [vmem:[#allocation124_spill] sm:$0xff]  ;;  %v474_v7 = vpop.f32.mrf.mxu0 }
 0x122   :  { %1676 = vmatpush.msrb.mxu2 %v16987_v6  ;;  %1768 = vmatpush.msra.mxu0 %v16988_v27  ;;  %v669_v6 = vpop.f32.mrf.mxu3 }
 0x123   :  { %1841 = vmatpush.msra.mxu1 %v16983_v54  ;;  %v560_v54 = vpop.f32.mrf.mxu2 }
 0x124   :  { %1680 = vmatpush.msrb.mxu2 %v16990_v37  ;;  %1770 = vmatpush.msra.mxu0 %v16991_v44  ;;  %v16998_v37 = vld [vmem:[#allocation139_spill] sm:$0xff]  ;;  %v670_v2 = vadd.f32 %v669_v6, %v560_v54 }
 0x125   :  { %1847 = vmatpush.msra.mxu1 %v16986_v60  ;;  %v16995_v60 = vld [vmem:[#allocation79_spill] sm:$0xff] }
 0x126   :  { %1684 = vmatpush.msrb.mxu2 %v16993_v10 }
 0x127   :  { %1853 = vmatpush.msra.mxu1 %v16989_v43 }
 0x128   :  { %1688 = vmatpush.msrb.mxu2 %v16995_v60  ;;  %v771_v58 = vpop.f32.mrf.mxu1 }
 0x129   :  { %1859 = vmatpush.msra.mxu1 %v16992_v56  ;;  %v478_v43 = vpop.f32.mrf.mxu0 }
 0x12a   :  { %v673_v56 = vpop.f32.mrf.mxu3 }
 0x12b   :  { %1865 = vmatpush.msra.mxu1 %v16994_v23  ;;  %v568_v40 = vpop.f32.mrf.mxu2  ;;  %v302_v23 = vadd.f32 %v301_v51, %v196_v63 }
 0x12c   :  { %v674_v13 = vadd.f32 %v673_v56, %v568_v40 }
 0x12d   :  { %1871 = vmatpush.msra.mxu1 %v16996_v16  ;;  %v475_v16 = vadd.f32 %v474_v7, %v400_v53  ;;  %v361_v50 = vadd.f32 %v360_v47, %v302_v23  ;;  %v99_v53 = vunpack.c.l.bf16 %v94_v26 }
 0x12f   :  { %1877 = vmatpush.msra.mxu1 %v16997_v49  ;;  %v92_v49 = vld [vmem:[#allocation3] sm:$0xff]  ;;  %v516_v19 = vadd.f32 %v515_v35, %v475_v16  ;;  %v406_v54 = vadd.f32 %v405_v45, %v361_v50 }
 0x130   :  { %v96_v11 = vunpack.c.l.bf16 %v92_v49  ;;  %v777_v6 = vpop.f32.mrf.mxu1  ;;  %v97_v1 = vunpack.c.h.bf16 %v92_v49 }
 0x131   :  { %1883 = vmatpush.msra.mxu1 %v16998_v37  ;;  %v727_v10 = vpop.f32.mrf.mxu0  ;;  %v479_v51 = vadd.f32 %v478_v43, %v406_v54 }
 0x132   :  { %v728_v52 = vadd.f32 %v727_v10, %v670_v2  ;;  %v887_v41 = vpop.f32.mrf.mxu3  ;;  %v1266_v63 = vadd.f32 %v516_v19, %v96_v11 }
 0x133   :  { %v846_v60 = vpop.f32.mrf.mxu2 }
 0x134   :  { %v772_v46 = vadd.f32 %v771_v58, %v728_v52  ;;  %v11123_v47 = vmul.f32 -1.442695, %v1266_v63  ;;  %v520_v52 = vadd.f32 %v519_v33, %v479_v51 }
 0x136   :  { %v847_v55 = vadd.f32 %v846_v60, %v772_v46  ;;  %v100_v46 = vunpack.c.h.bf16 %v94_v26  ;;  %11202 = vpow2.f32 %v11123_v47  ;;  %v1269_v16 = vadd.f32 %v520_v52, %v99_v53 }
 0x138   :  { %v888_v15 = vadd.f32 %v887_v41, %v847_v55  ;;  %v11124_v49 = vmul.f32 -1.442695, %v1269_v16 }
 0x139   :  { %v732_v37 = vpop.f32.mrf.mxu0 }
 0x13a   :  { %v733_v38 = vadd.f32 %v732_v37, %v674_v13  ;;  %v1267_v58 = vadd.f32 %v888_v15, %v97_v1  ;;  %v891_v7 = vpop.f32.mrf.mxu3 }
 0x13b   :  { %v850_v17 = vpop.f32.mrf.mxu2 }
 0x13c   :  { %v778_v10 = vadd.f32 %v777_v6, %v733_v38  ;;  %v11125_v60 = vmul.f32 -1.442695, %v1267_v58  ;;  %v11203_v35 = vpop.eup %11202 }
 0x13d   :  { %v12570_v13 = vadd.f32 1.0, %v11203_v35 }
 0x13e   :  { %v851_v56 = vadd.f32 %v850_v17, %v778_v10  ;;  %11204 = vpow2.f32 %v11125_v60 }
 0x13f   :  { %11206 = vpow2.f32 %v11124_v49  ;;  %vm1285_vm0 = vweird.f32 %v12570_v13  ;;  %v1291_v49 = vand.u32 2147483648, %v12570_v13 }
 0x140   :  { %v892_v37 = vadd.f32 %v891_v7, %v851_v56  ;;  %v93_v7 = vld [vmem:[#allocation3 + $0x8] sm:$0xf] }
 0x141   :  { %v932_v41 = vpop.f32.mrf.mxu0 }
 0x142   :  { %v1270_v45 = vadd.f32 %v892_v37, %v100_v46 }
 0x144   :  { %v11126_v55 = vmul.f32 -1.442695, %v1270_v45  ;;  %v11205_v11 = vpop.eup %11204  ;;  %v1099_v19 = vpop.f32.mrf.mxu2  ;;  %v98_v45 = vunpack.c.l.bf16 %v93_v7 }
 0x145   :  { %v12572_v23 = vadd.f32 1.0, %v11205_v11  ;;  %v11207_v33 = vpop.eup %11206 }
 0x146   :  { %11208 = vpow2.f32 %v11126_v55  ;;  %v12576_v38 = vadd.f32 1.0, %v11207_v33 }
 0x147   :  { %11210 = vrcp.f32 %v12570_v13  ;;  %vm1323_vm2 = vweird.f32 %v12572_v23 }
 0x148   :  { %11212 = vrcp.f32 %v12572_v23  ;;  %vm1300_vm7 = vweird.f32 %v12576_v38 }
 0x149   :  { %v940_v50 = vpop.f32.mrf.mxu0  ;;  %11214 = vrcp.f32 %v12576_v38 }
 0x14c   :  { %v11209_v2 = vpop.eup %11208  ;;  %v1104_v37 = vpop.f32.mrf.mxu2 }
 0x14d   :  { %v12578_v39 = vpop.eup %11210  ;;  %v12580_v40 = vadd.f32 1.0, %v11209_v2 }
 0x14e   :  { %v12582_v54 = vpop.eup %11212  ;;  %v1281_v1 = vmul.f32 %v12578_v39, %v12570_v13  ;;  %vm1286_vm1 = vweird.f32 %v12578_v39 }
 0x14f   :  { %v1041_v43 = vpop.f32.mrf.mxu1  ;;  %11216 = vrcp.f32 %v12580_v40  ;;  %v1319_v15 = vmul.f32 %v12582_v54, %v12572_v23  ;;  %v12590_v58 = vpop.eup %11214  ;;  %vm1324_vm3 = vweird.f32 %v12582_v54  ;;  %vm12610_vm4 = vmor %vm1285_vm0, %vm1286_vm1  ;;  %vm1338_vm10 = vweird.f32 %v12580_v40 }
 0x150   :  { %v1042_v6 = vadd.f32 %v1041_v43, %v932_v41  ;;  %v1282_v51 = vsub.f32 1.0, %v1281_v1  ;;  %v1296_v46 = vmul.f32 %v12590_v58, %v12576_v38  ;;  %v1289_v43 = vand.u32 2147483647, %v12570_v13  ;;  %vm12616_vm5 = vmor %vm1323_vm2, %vm1324_vm3 }
 0x151   :  { %v1143_v10 = vpop.f32.mrf.mxu3  ;;  %v1320_v56 = vsub.f32 1.0, %v1319_v15  ;;  %v1329_v1 = vand.u32 2147483648, %v12572_v23  ;;  %vm1301_vm9 = vweird.f32 %v12590_v58 }
 0x152   :  { %v1100_v63 = vadd.f32 %v1099_v19, %v1042_v6  ;;  %v1283_v60 = vmul.f32 %v12578_v39, %v1282_v51  ;;  %v1297_v2 = vsub.f32 1.0, %v1296_v46  ;;  %v1327_v51 = vand.u32 2147483647, %v12572_v23  ;;  %vm12637_vm12 = vmor %vm1300_vm7, %vm1301_vm9 }
 0x153   :  { %v1321_v41 = vmul.f32 %v12582_v54, %v1320_v56  ;;  %vm1290_vm6 = vcmp.eq.f32.partialorder %v1289_v43, 8.507059e+37  ;;  %v1330_v46 = vor.u32 1.1754944e-38, %v1329_v1  ;;  %v1342_v1 = vand.u32 2147483647, %v12580_v40  ;;  %v17013_v43 = vld [vmem:[#allocation101_spill] sm:$0xff] }
 0x154   :  { %v1144_v53 = vadd.f32 %v1143_v10, %v1100_v63  ;;  %v1284_v19 = vadd.f32 %v12578_v39, %v1283_v60  ;;  %vm1328_vm8 = vcmp.eq.f32.partialorder %v1327_v51, 8.507059e+37 }
 0x155   :  { %v12592_v47 = vpop.eup %11216  ;;  %v1322_v63 = vadd.f32 %v12582_v54, %v1321_v41  ;;  %v1304_v41 = vand.u32 2147483647, %v12576_v38  ;;  %vm1343_vm15 = vcmp.eq.f32.partialorder %v1342_v1, 8.507059e+37  ;;  %v17018_v1 = vld [vmem:[#allocation95_spill] sm:$0xff] }
 0x156   :  { %v1334_v35 = vmul.f32 %v12592_v47, %v12580_v40  ;;  %v1288_v13 = vsel %vm12610_vm4, %v12578_v39, %v1284_v19  ;;  %vm1339_vm11 = vweird.f32 %v12592_v47 }
 0x157   :  { %v1045_v17 = vpop.f32.mrf.mxu1  ;;  %vm1340_vm13 = vmor %vm1338_vm10, %vm1339_vm11  ;;  %vm1305_vm14 = vcmp.eq.f32.partialorder %v1304_v41, 8.507059e+37 }
 0x158   :  { %v1218_v26 = vpop.f32.mrf.mxu0  ;;  %v1046_v52 = vadd.f32 %v1045_v17, %v940_v50  ;;  %v1335_v15 = vsub.f32 1.0, %v1334_v35 }
 0x159   :  { %v1219_v16 = vadd.f32 %v1218_v26, %v1144_v53  ;;  %v1149_v50 = vpop.f32.mrf.mxu3  ;;  %v95_v26 = vld [vmem:[#allocation3 + $0x14] sm:$0xf]  ;;  %v1292_v53 = vor.u32 1.1754944e-38, %v1291_v49  ;;  %v1306_v49 = vand.u32 2147483648, %v12576_v38 }
 0x15a   :  { %v1105_v11 = vadd.f32 %v1104_v37, %v1046_v52  ;;  %v1298_v52 = vmul.f32 %v12590_v58, %v1297_v2  ;;  %v101_v23 = vunpack.c.l.bf16 %v95_v26  ;;  %v1326_v37 = vsel %vm12616_vm5, %v12582_v54, %v1322_v63 }
 0x15b   :  { %v1293_v35 = vsel %vm1290_vm6, %v1292_v53, %v1288_v13  ;;  %v1331_v54 = vsel %vm1328_vm8, %v1330_v46, %v1326_v37  ;;  %v1344_v2 = vand.u32 2147483648, %v12580_v40  ;;  %v17006_v46 = vld [vmem:[#allocation77_spill] sm:$0xff] }
 0x15c   :  { %v1150_v56 = vadd.f32 %v1149_v50, %v1105_v11  ;;  %v1350_v50 = vmul.f32 0.0, %v1293_v35  ;;  %v17009_v35 = vld [vmem:[#allocation89_spill] sm:$0xff] }
 0x15d   :  { %v1345_v17 = vor.u32 1.1754944e-38, %v1344_v2  ;;  %v17014_v2 = vld [vmem:[#allocation83_spill] sm:$0xff] }
 0x160   :  { %v1222_v10 = vpop.f32.mrf.mxu0 }
 0x161   :  { %v1223_v60 = vadd.f32 %v1222_v10, %v1150_v56 }
 0x16f   :  { %v1259_v55 = vpop.f32.mrf.mxu1 }
 0x170   :  { %v1260_v33 = vadd.f32 %v1259_v55, %v1219_v16  ;;  %v1299_v55 = vadd.f32 %v12590_v58, %v1298_v52 }
 0x172   :  { %v1268_v6 = vadd.f32 %v1260_v33, %v98_v45  ;;  %v1336_v45 = vmul.f32 %v12592_v47, %v1335_v15  ;;  %v1307_v15 = vor.u32 1.1754944e-38, %v1306_v49  ;;  %v1303_v38 = vsel %vm12637_vm12, %v12590_v58, %v1299_v55  ;;  %v17008_v49 = vld [vmem:[#allocation66_spill] sm:$0xff]  ;;  %v17010_v55 = vld [vmem:[#allocation71_spill] sm:$0xff] }
 0x174   :  { %11218 = vtanh.f32 %v1268_v6  ;;  %v1337_v6 = vadd.f32 %v12592_v47, %v1336_v45  ;;  %v1308_v26 = vsel %vm1305_vm14, %v1307_v15, %v1303_v38  ;;  %v17019_v15 = vld [vmem:[#allocation110_spill] sm:$0xff] }
 0x175   :  { %v1351_v58 = vmul.f32 0.0, %v1308_v26  ;;  %v17020_v38 = vld [vmem:[#allocation98_spill] sm:$0xff]  ;;  %v17023_v26 = vld [vmem:[#allocation119_spill] sm:$0xff] }
 0x176   :  { %v1341_v51 = vsel %vm1340_vm13, %v12592_v47, %v1337_v6  ;;  %v17005_v47 = vld [vmem:[#allocation74_spill] sm:$0xff]  ;;  %v17017_v6 = vld [vmem:[#allocation107_spill] sm:$0xff] }
 0x177   :  { %v1263_v16 = vpop.f32.mrf.mxu1  ;;  %v1346_v7 = vsel %vm1343_vm15, %v1345_v17, %v1341_v51  ;;  %v17021_v17 = vld [vmem:[#allocation113_spill] sm:$0xff]  ;;  %v17022_v51 = vld [vmem:[#allocation102_spill] sm:$0xff] }
 0x178   :  { %v1264_v39 = vadd.f32 %v1263_v16, %v1223_v60  ;;  %v17007_v16 = vld [vmem:[#allocation85_spill] sm:$0xff] }
 0x17a   :  { %v11219_v11 = vpop.eup %11218  ;;  %v1271_v33 = vadd.f32 %v1264_v39, %v101_v23 }
 0x17b   :  { %v1352_v19 = vmul.f32 %v11219_v11, %v1331_v54  ;;  %v17011_v11 = vld [vmem:[#allocation93_spill] sm:$0xff]  ;;  %v17012_v54 = vld [vmem:[#allocation80_spill] sm:$0xff] }
 0x17c   :  { %11220 = vtanh.f32 %v1271_v33 }
 0x17d   :  { %v12644_v10 = vsub.f32 %v1350_v50, %v1352_v19  ;;  %v17015_v50 = vld [vmem:[#allocation105_spill] sm:$0xff]  ;;  %v17016_v19 = vld [vmem:[#allocation86_spill] sm:$0xff] }
 0x17f   :  { %v12650_v63 = vand.u32 4294901760, %v12644_v10 }
 0x181   :  { %1513 = vmatmul.f32.vlgmr.msra.gmra.mxu3 %v12650_v63  ;;  %v12656_v40 = vsub.f32 %v12644_v10, %v12650_v63 }
 0x182   :  { %v11221_v56 = vpop.eup %11220  ;;  %1953 = vmatpush.msra.mxu3 %v11705_v25 }
 0x183   :  { %v1353_v53 = vmul.f32 %v11221_v56, %v1346_v7  ;;  %1571 = vmatmul.f32.vlgmr.msrb.gmra.mxu0 %v12656_v40  ;;  %v12661_v52 = vand.u32 4294901760, %v12656_v40  ;;  %v17024_v56 = vld [vmem:[#allocation106_spill] sm:$0xff]  ;;  %v17025_v7 = vld [vmem:[#allocation123_spill] sm:$0xff] }
 0x184   :  { %1955 = vmatpush.msra.mxu3 %v11712_v30  ;;  %2000 = vmatpush.msrb.mxu0 %v17005_v47 }
 0x185   :  { %v12665_v13 = vsub.f32 %v1351_v58, %v1353_v53  ;;  %1615 = vmatmul.f32.vlgmr.msrb.gmra.mxu1 %v12661_v52  ;;  %v1402_v60 = vsub.f32 %v12656_v40, %v12661_v52  ;;  %v17026_v58 = vld [vmem:[#allocation109_spill] sm:$0xff]  ;;  %v17027_v53 = vld [vmem:[#allocation126_spill] sm:$0xff] }
 0x186   :  { %1957 = vmatpush.msra.mxu3 %v11759_v28  ;;  %2004 = vmatpush.msrb.mxu0 %v17006_v46 }
 0x187   :  { %v12673_v23 = vand.u32 4294901760, %v12665_v13  ;;  %2071 = vmatpush.msrb.mxu1 %v11705_v25  ;;  %v12676_v37 = vand.u32 4294901760, %v1402_v60  ;;  %v17028_v60 = vld [vmem:[#allocation114_spill] sm:$0xff] }
 0x188   :  { %1959 = vmatpush.msra.mxu3 %v11775_v31  ;;  %2008 = vmatpush.msrb.mxu0 %v17007_v16 }
 0x189   :  { %2073 = vmatpush.msrb.mxu1 %v11712_v30  ;;  %1404 = vmatmul.f32.vlgmr.msra.gmra.mxu2 %v12676_v37  ;;  %v12684_v45 = vsub.f32 %v12665_v13, %v12673_v23 }
 0x18a   :  { %1517 = vmatmul.f32.gmra.mxu3 %v12673_v23  ;;  %1895 = vmatpush.msra.mxu2 %v17008_v49 }
 0x18b   :  { %1961 = vmatpush.msra.mxu3 %v16958_v42  ;;  %2012 = vmatpush.msrb.mxu0 %v17009_v35  ;;  %v12691_v39 = vand.u32 4294901760, %v12684_v45 }
 0x18c   :  { %2075 = vmatpush.msrb.mxu1 %v11759_v28  ;;  %1576 = vmatmul.f32.gmra.mxu0 %v12684_v45 }
 0x18d   :  { %1898 = vmatpush.msra.mxu2 %v17010_v55  ;;  %1963 = vmatpush.msra.mxu3 %v16961_v5  ;;  %v1410_v41 = vsub.f32 %v12684_v45, %v12691_v39 }
 0x18e   :  { %2016 = vmatpush.msrb.mxu0 %v17011_v11  ;;  %2077 = vmatpush.msrb.mxu1 %v11775_v31 }
 0x18f   :  { %1621 = vmatmul.f32.gmra.mxu1 %v12691_v39  ;;  %1901 = vmatpush.msra.mxu2 %v17012_v54  ;;  %v12703_v33 = vand.u32 4294901760, %v1410_v41  ;;  %v17029_v41 = vld [vmem:[#allocation131_spill] sm:$0xff] }
 0x190   :  { %1965 = vmatpush.msra.mxu3 %v16964_v57  ;;  %2020 = vmatpush.msrb.mxu0 %v17013_v43 }
 0x191   :  { %2079 = vmatpush.msrb.mxu1 %v16958_v42  ;;  %1904 = vmatpush.msra.mxu2 %v17014_v2 }
 0x192   :  { %1967 = vmatpush.msra.mxu3 %v16967_v36  ;;  %2024 = vmatpush.msrb.mxu0 %v17015_v50 }
 0x193   :  { %2081 = vmatpush.msrb.mxu1 %v16961_v5  ;;  %1412 = vmatmul.f32.gmra.mxu2 %v12703_v33 }
 0x194   :  { %1731 = vmatmul.f32.vlgmr.msrb.gmra.mxu3 %v12650_v63  ;;  %1907 = vmatpush.msra.mxu2 %v17016_v19 }
 0x195   :  { %1969 = vmatpush.msra.mxu3 %v16970_v3  ;;  %2028 = vmatpush.msrb.mxu0 %v17017_v6 }
 0x196   :  { %2083 = vmatpush.msrb.mxu1 %v16964_v57  ;;  %1776 = vmatmul.f32.vlgmr.msra.gmra.mxu0 %v12676_v37 }
 0x197   :  { %1910 = vmatpush.msra.mxu2 %v17018_v1  ;;  %1971 = vmatpush.msra.mxu3 %v16973_v14 }
 0x198   :  { %2032 = vmatpush.msrb.mxu0 %v17019_v15  ;;  %2085 = vmatpush.msrb.mxu1 %v16967_v36 }
 0x199   :  { %1885 = vmatmul.f32.vlgmr.msra.gmra.mxu1 %v12650_v63  ;;  %1913 = vmatpush.msra.mxu2 %v17020_v38 }
 0x19a   :  { %1973 = vmatpush.msra.mxu3 %v16976_v21  ;;  %2036 = vmatpush.msrb.mxu0 %v17021_v17 }
 0x19b   :  { %2087 = vmatpush.msrb.mxu1 %v16970_v3  ;;  %1916 = vmatpush.msra.mxu2 %v17022_v51 }
 0x19c   :  { %1975 = vmatpush.msra.mxu3 %v16979_v59  ;;  %2040 = vmatpush.msrb.mxu0 %v17023_v26  ;;  %v17037_v26 = vld [vmem:[#allocation127_spill] sm:$0xff] }
 0x19d   :  { %2089 = vmatpush.msrb.mxu1 %v16973_v14  ;;  %1690 = vmatmul.f32.vlgmr.msrb.gmra.mxu2 %v12650_v63 }
 0x19e   :  { %1735 = vmatmul.f32.gmra.mxu3 %v12673_v23  ;;  %1919 = vmatpush.msra.mxu2 %v17024_v56  ;;  %v17034_v56 = vld [vmem:[#allocation136_spill] sm:$0xff] }
 0x19f   :  { %1977 = vmatpush.msra.mxu3 %v16982_v34  ;;  %2044 = vmatpush.msrb.mxu0 %v17025_v7  ;;  %v17030_v7 = vld [vmem:[#allocation117_spill] sm:$0xff] }
 0x1a0   :  { %2091 = vmatpush.msrb.mxu1 %v16976_v21  ;;  %1784 = vmatmul.f32.gmra.mxu0 %v12703_v33 }
 0x1a1   :  { %1922 = vmatpush.msra.mxu2 %v17026_v58  ;;  %1979 = vmatpush.msra.mxu3 %v16985_v24  ;;  %v17031_v58 = vld [vmem:[#allocation134_spill] sm:$0xff] }
 0x1a2   :  { %2048 = vmatpush.msrb.mxu0 %v17027_v53  ;;  %2093 = vmatpush.msrb.mxu1 %v16979_v59  ;;  %v17032_v53 = vld [vmem:[#allocation156_spill] sm:$0xff] }
 0x1a3   :  { %1889 = vmatmul.f32.gmra.mxu1 %v12673_v23  ;;  %1925 = vmatpush.msra.mxu2 %v17028_v60  ;;  %v17033_v60 = vld [vmem:[#allocation121_spill] sm:$0xff] }
 0x1a4   :  { %1981 = vmatpush.msra.mxu3 %v16988_v27  ;;  %2052 = vmatpush.msrb.mxu0 %v17029_v41  ;;  %v17035_v41 = vld [vmem:[#allocation160_spill] sm:$0xff] }
 0x1a5   :  { %2095 = vmatpush.msrb.mxu1 %v16982_v34  ;;  %1928 = vmatpush.msra.mxu2 %v17030_v7  ;;  %v17036_v7 = vld [vmem:[#allocation142_spill] sm:$0xff] }
 0x1a6   :  { %1983 = vmatpush.msra.mxu3 %v16991_v44  ;;  %2056 = vmatpush.msrb.mxu0 %v17031_v58  ;;  %v17039_v58 = vld [vmem:[#allocation145_spill] sm:$0xff] }
 0x1a7   :  { %2097 = vmatpush.msrb.mxu1 %v16985_v24  ;;  %1694 = vmatmul.f32.gmra.mxu2 %v12673_v23 }
 0x1a8   :  { %2165 = vmatpush.msrb.mxu3 %v17032_v53  ;;  %1931 = vmatpush.msra.mxu2 %v17033_v60  ;;  %v17038_v53 = vld [vmem:[#allocation164_spill] sm:$0xff]  ;;  %v17040_v60 = vld [vmem:[#allocation129_spill] sm:$0xff] }
 0x1a9   :  { %1987 = vmatmul.f32.vlgmr.msra.gmra.mxu3 %v12661_v52  ;;  %2060 = vmatpush.msrb.mxu0 %v17034_v56  ;;  %v17041_v56 = vld [vmem:[#allocation167_spill] sm:$0xff] }
 0x1aa   :  { %2099 = vmatpush.msrb.mxu1 %v16988_v27  ;;  %2171 = vmatpush.msrb.mxu3 %v17035_v41  ;;  %v17042_v41 = vld [vmem:[#allocation148_spill] sm:$0xff] }
 0x1ab   :  { %2267 = vmatpush.msra.mxu0 %v17036_v7  ;;  %1934 = vmatpush.msra.mxu2 %v17037_v26  ;;  %v17043_v26 = vld [vmem:[#allocation132_spill] sm:$0xff]  ;;  %v17044_v7 = vld [vmem:[#allocation170_spill] sm:$0xff] }
 0x1ac   :  { %2062 = vmatmul.f32.vlgmr.msrb.gmra.mxu0 %v12650_v63  ;;  %2101 = vmatpush.msrb.mxu1 %v16991_v44 }
 0x1ad   :  { %2177 = vmatpush.msrb.mxu3 %v17038_v53  ;;  %2270 = vmatpush.msra.mxu0 %v17039_v58  ;;  %v17065_v58 = vld [vmem:[#allocation177_spill] sm:$0xff] }
 0x1ae   :  { %2325 = vmatpush.msra.mxu1 %v12089_v61  ;;  %1937 = vmatpush.msra.mxu2 %v17040_v60  ;;  %v17062_v60 = vld [vmem:[#allocation174_spill] sm:$0xff]  ;;  %v17068_v53 = vld [vmem:[#allocation181_spill] sm:$0xff] }
 0x1af   :  { %2103 = vmatmul.f32.vlgmr.msrb.gmra.mxu1 %v12650_v63  ;;  %2183 = vmatpush.msrb.mxu3 %v17041_v56  ;;  %v17045_v56 = vld [vmem:[#allocation176_spill] sm:$0xff] }
 0x1b0   :  { %2273 = vmatpush.msra.mxu0 %v17042_v41  ;;  %2327 = vmatpush.msra.mxu1 %v12097_v9  ;;  %v17046_v41 = vld [vmem:[#allocation153_spill] sm:$0xff] }
 0x1b1   :  { %1940 = vmatpush.msra.mxu2 %v17043_v26  ;;  %2189 = vmatpush.msrb.mxu3 %v17044_v7  ;;  %v17047_v7 = vld [vmem:[#allocation180_spill] sm:$0xff]  ;;  %v17049_v26 = vld [vmem:[#allocation183_spill] sm:$0xff] }
 0x1b2   :  { %2276 = vmatpush.msra.mxu0 %v12137_v0  ;;  %2329 = vmatpush.msra.mxu1 %v12106_v62  ;;  %v17048_v0 = vld [vmem:[#allocation157_spill] sm:$0xff] }
 0x1b3   :  { %2112 = vmatpush.msrb.mxu2 %v12089_v61  ;;  %1993 = vmatmul.f32.gmra.mxu3 %v12691_v39 }
 0x1b4   :  { %1943 = vmatmul.f32.vlgmr.msra.gmra.mxu2 %v12656_v40  ;;  %2195 = vmatpush.msrb.mxu3 %v17045_v56  ;;  %v17059_v56 = vld [vmem:[#allocation171_spill] sm:$0xff] }
 0x1b5   :  { %2114 = vmatpush.msrb.mxu2 %v12097_v9  ;;  %2279 = vmatpush.msra.mxu0 %v17046_v41  ;;  %v17050_v41 = vld [vmem:[#allocation187_spill] sm:$0xff] }
 0x1b6   :  { %2331 = vmatpush.msra.mxu1 %v12112_v22  ;;  %2066 = vmatmul.f32.gmra.mxu0 %v12673_v23 }
 0x1b7   :  { %2116 = vmatpush.msrb.mxu2 %v12106_v62  ;;  %2201 = vmatpush.msrb.mxu3 %v17047_v7  ;;  %v17056_v7 = vld [vmem:[#allocation166_spill] sm:$0xff] }
 0x1b8   :  { %2282 = vmatpush.msra.mxu0 %v17048_v0  ;;  %2333 = vmatpush.msra.mxu1 %v12124_v29  ;;  %v17051_v0 = vld [vmem:[#allocation193_spill] sm:$0xff] }
 0x1b9   :  { %2107 = vmatmul.f32.gmra.mxu1 %v12673_v23  ;;  %2118 = vmatpush.msrb.mxu2 %v12112_v22 }
 0x1ba   :  { %2207 = vmatpush.msrb.mxu3 %v17049_v26  ;;  %2285 = vmatpush.msra.mxu0 %v12191_v18  ;;  %v17052_v18 = vld [vmem:[#allocation196_spill] sm:$0xff]  ;;  %v17055_v26 = vld [vmem:[#allocation178_spill] sm:$0xff] }
 0x1bb   :  { %2335 = vmatpush.msra.mxu1 %v12143_v8  ;;  %2120 = vmatpush.msrb.mxu2 %v12124_v29 }
 0x1bc   :  { %2213 = vmatpush.msrb.mxu3 %v17050_v41  ;;  %2288 = vmatpush.msra.mxu0 %v12205_v32  ;;  %v17053_v41 = vld [vmem:[#allocation161_spill] sm:$0xff]  ;;  %v17054_v32 = vld [vmem:[#allocation198_spill] sm:$0xff] }
 0x1bd   :  { %2337 = vmatpush.msra.mxu1 %v12159_v12  ;;  %1948 = vmatmul.f32.gmra.mxu2 %v12684_v45 }
 0x1be   :  { %2122 = vmatpush.msrb.mxu2 %v12143_v8  ;;  %2219 = vmatpush.msrb.mxu3 %v17051_v0  ;;  %v17058_v0 = vld [vmem:[#allocation182_spill] sm:$0xff] }
 0x1bf   :  { %2291 = vmatpush.msra.mxu0 %v12219_v4  ;;  %2339 = vmatpush.msra.mxu1 %v12175_v48  ;;  %v17057_v4 = vld [vmem:[#allocation200_spill] sm:$0xff] }
 0x1c0   :  { %2124 = vmatpush.msrb.mxu2 %v12159_v12  ;;  %2225 = vmatpush.msrb.mxu3 %v17052_v18  ;;  %v17061_v18 = vld [vmem:[#allocation186_spill] sm:$0xff] }
 0x1c1   :  { %2294 = vmatpush.msra.mxu0 %v12237_v20  ;;  %2341 = vmatpush.msra.mxu1 %v17053_v41  ;;  %v17060_v20 = vld [vmem:[#allocation201_spill] sm:$0xff] }
 0x1c2   :  { %2126 = vmatpush.msrb.mxu2 %v12175_v48  ;;  %2231 = vmatpush.msrb.mxu3 %v17054_v32  ;;  %v17064_v32 = vld [vmem:[#allocation190_spill] sm:$0xff] }
 0x1c3   :  { %2297 = vmatpush.msra.mxu0 %v17055_v26  ;;  %2343 = vmatpush.msra.mxu1 %v17056_v7  ;;  %v17063_v26 = vld [vmem:[#allocation202_spill] sm:$0xff] }
 0x1c4   :  { %2128 = vmatpush.msrb.mxu2 %v17053_v41  ;;  %2237 = vmatpush.msrb.mxu3 %v17057_v4  ;;  %v17067_v4 = vld [vmem:[#allocation192_spill] sm:$0xff] }
 0x1c5   :  { %2300 = vmatpush.msra.mxu0 %v17058_v0  ;;  %2345 = vmatpush.msra.mxu1 %v17059_v56  ;;  %v17066_v0 = vld [vmem:[#allocation203_spill] sm:$0xff] }
 0x1c6   :  { %2130 = vmatpush.msrb.mxu2 %v17056_v7  ;;  %2243 = vmatpush.msrb.mxu3 %v17060_v20  ;;  %v17078_v20 = vld [vmem:[#allocation18_spill] sm:$0xff] }
 0x1c7   :  { %2303 = vmatpush.msra.mxu0 %v17061_v18  ;;  %2347 = vmatpush.msra.mxu1 %v17062_v60  ;;  %v17069_v18 = vld [vmem:[#allocation195_spill] sm:$0xff] }
 0x1c8   :  { %2132 = vmatpush.msrb.mxu2 %v17059_v56  ;;  %2249 = vmatpush.msrb.mxu3 %v17063_v26  ;;  %v17070_v26 = vld [vmem:[#allocation184_spill] sm:$0xff] }
 0x1c9   :  { %2306 = vmatpush.msra.mxu0 %v17064_v32  ;;  %2349 = vmatpush.msra.mxu1 %v17065_v58  ;;  %v17073_v32 = vld [vmem:[#allocation38_spill] sm:$0xff] }
 0x1ca   :  { %2134 = vmatpush.msrb.mxu2 %v17062_v60  ;;  %2255 = vmatpush.msrb.mxu3 %v17066_v0  ;;  %v17071_v0 = vld [vmem:[#allocation188_spill] sm:$0xff] }
 0x1cb   :  { %2309 = vmatpush.msra.mxu0 %v17067_v4  ;;  %2351 = vmatpush.msra.mxu1 %v17068_v53  ;;  %v17072_v4 = vld [vmem:[#allocation16_spill] sm:$0xff] }
 0x1cc   :  { %2257 = vmatmul.f32.vlgmr.msrb.gmra.mxu3 %v12650_v63  ;;  %2136 = vmatpush.msrb.mxu2 %v17065_v58 }
 0x1cd   :  { %2443 = vmatpush.msra.mxu3 %v12089_v61  ;;  %2312 = vmatpush.msra.mxu0 %v17069_v18  ;;  %v17074_v18 = vld [vmem:[#allocation17_spill] sm:$0xff] }
 0x1ce   :  { %2353 = vmatpush.msra.mxu1 %v17070_v26  ;;  %2315 = vmatmul.f32.vlgmr.msra.gmra.mxu0 %v12656_v40  ;;  %v17075_v40 = vld [vmem:[#allocation146_spill] sm:$0xff] }
 0x1cf   :  { %2445 = vmatpush.msra.mxu3 %v12097_v9  ;;  %2138 = vmatpush.msrb.mxu2 %v17068_v53 }
 0x1d0   :  { %2355 = vmatpush.msra.mxu1 %v17071_v0  ;;  %2585 = vmatpush.msrb.mxu0 %v17072_v4 }
 0x1d1   :  { %2359 = vmatmul.f32.vlgmr.msra.gmra.mxu1 %v12661_v52  ;;  %2447 = vmatpush.msra.mxu3 %v12106_v62  ;;  %v17076_v52 = vld [vmem:[#allocation39_spill] sm:$0xff] }
 0x1d2   :  { %2140 = vmatpush.msrb.mxu2 %v17070_v26  ;;  %2638 = vmatpush.msrb.mxu1 %v17073_v32  ;;  %v17077_v32 = vld [vmem:[#allocation149_spill] sm:$0xff] }
 0x1d3   :  { %2449 = vmatpush.msra.mxu3 %v12112_v22  ;;  %2587 = vmatpush.msrb.mxu0 %v17074_v18  ;;  %v17079_v22 = vld [vmem:[#allocation152_spill] sm:$0xff] }
 0x1d4   :  { %2142 = vmatpush.msrb.mxu2 %v17071_v0  ;;  %2261 = vmatmul.f32.gmra.mxu3 %v12673_v23 }
 0x1d5   :  { %2148 = vmatmul.f32.vlgmr.msrb.gmra.mxu2 %v12676_v37  ;;  %2451 = vmatpush.msra.mxu3 %v12124_v29  ;;  %v17080_v37 = vld [vmem:[#allocation43_spill] sm:$0xff] }
 0x1d6   :  { %2372 = vmatpush.msra.mxu2 %v17075_v40  ;;  %2320 = vmatmul.f32.gmra.mxu0 %v12684_v45  ;;  %v17081_v40 = vld [vmem:[#allocation19_spill] sm:$0xff] }
 0x1d7   :  { %2453 = vmatpush.msra.mxu3 %v12143_v8  ;;  %2644 = vmatpush.msrb.mxu1 %v17076_v52  ;;  %v17082_v45 = vld [vmem:[#allocation155_spill] sm:$0xff] }
 0x1d8   :  { %2376 = vmatpush.msra.mxu2 %v17077_v32  ;;  %2589 = vmatpush.msrb.mxu0 %v17078_v20  ;;  %v17083_v8 = vld [vmem:[#allocation47_spill] sm:$0xff] }
 0x1d9   :  { %2365 = vmatmul.f32.gmra.mxu1 %v12691_v39  ;;  %2455 = vmatpush.msra.mxu3 %v12159_v12  ;;  %v17084_v32 = vld [vmem:[#allocation159_spill] sm:$0xff]  ;;  %v17085_v39 = vld [vmem:[#allocation50_spill] sm:$0xff] }
 0x1da   :  { %2380 = vmatpush.msra.mxu2 %v17079_v22  ;;  %2650 = vmatpush.msrb.mxu1 %v17080_v37  ;;  %v17086_v22 = vld [vmem:[#allocation20_spill] sm:$0xff]  ;;  %v17087_v37 = vld [vmem:[#allocation163_spill] sm:$0xff] }
 0x1db   :  { %2457 = vmatpush.msra.mxu3 %v12175_v48  ;;  %2591 = vmatpush.msrb.mxu0 %v17081_v40  ;;  %v17088_v52 = vld [vmem:[#allocation55_spill] sm:$0xff] }
 0x1dc   :  { %2384 = vmatpush.msra.mxu2 %v17082_v45  ;;  %2656 = vmatpush.msrb.mxu1 %v17083_v8  ;;  %v17089_v45 = vld [vmem:[#allocation21_spill] sm:$0xff]  ;;  %v17090_v8 = vld [vmem:[#allocation168_spill] sm:$0xff] }
 0x1dd   :  { %2156 = vmatmul.f32.gmra.mxu2 %v12703_v33  ;;  %2459 = vmatpush.msra.mxu3 %v17053_v41  ;;  %v17091_v33 = vld [vmem:[#allocation58_spill] sm:$0xff] }
 0x1de   :  { %2388 = vmatpush.msra.mxu2 %v17084_v32  ;;  %2662 = vmatpush.msrb.mxu1 %v17085_v39  ;;  %v17092_v32 = vld [vmem:[#allocation25_spill] sm:$0xff]  ;;  %v17093_v39 = vld [vmem:[#allocation172_spill] sm:$0xff]  ;;  %v17114_v41 = vld [vmem:[#allocation54_spill] sm:$0xff] }
 0x1df   :  { %2461 = vmatpush.msra.mxu3 %v17056_v7  ;;  %2593 = vmatpush.msrb.mxu0 %v17086_v22  ;;  %v17094_v7 = vld [vmem:[#allocation63_spill] sm:$0xff] }
 0x1e0   :  { %2392 = vmatpush.msra.mxu2 %v17087_v37  ;;  %2668 = vmatpush.msrb.mxu1 %v17088_v52  ;;  %v17095_v37 = vld [vmem:[#allocation31_spill] sm:$0xff] }
 0x1e1   :  { %2463 = vmatpush.msra.mxu3 %v17059_v56  ;;  %2595 = vmatpush.msrb.mxu0 %v17089_v45  ;;  %v17096_v52 = vld [vmem:[#allocation175_spill] sm:$0xff] }
 0x1e2   :  { %2396 = vmatpush.msra.mxu2 %v17090_v8  ;;  %2674 = vmatpush.msrb.mxu1 %v17091_v33  ;;  %v17097_v56 = vld [vmem:[#allocation67_spill] sm:$0xff]  ;;  %v17098_v8 = vld [vmem:[#allocation33_spill] sm:$0xff] }
 0x1e3   :  { %2465 = vmatpush.msra.mxu3 %v17062_v60  ;;  %2597 = vmatpush.msrb.mxu0 %v17092_v32  ;;  %v17099_v33 = vld [vmem:[#allocation179_spill] sm:$0xff]  ;;  %v17100_v60 = vld [vmem:[#allocation72_spill] sm:$0xff] }
 0x1e4   :  { %2400 = vmatpush.msra.mxu2 %v17093_v39  ;;  %2680 = vmatpush.msrb.mxu1 %v17094_v7  ;;  %v17101_v39 = vld [vmem:[#allocation36_spill] sm:$0xff]  ;;  %v17102_v7 = vld [vmem:[#allocation185_spill] sm:$0xff] }
 0x1e5   :  { %2467 = vmatpush.msra.mxu3 %v17065_v58  ;;  %2599 = vmatpush.msrb.mxu0 %v17095_v37  ;;  %v17103_v58 = vld [vmem:[#allocation75_spill] sm:$0xff] }
 0x1e6   :  { %2404 = vmatpush.msra.mxu2 %v17096_v52  ;;  %2686 = vmatpush.msrb.mxu1 %v17097_v56  ;;  %v17104_v52 = vld [vmem:[#allocation44_spill] sm:$0xff]  ;;  %v17105_v56 = vld [vmem:[#allocation189_spill] sm:$0xff] }
 0x1e7   :  { %2469 = vmatpush.msra.mxu3 %v17068_v53  ;;  %2601 = vmatpush.msrb.mxu0 %v17098_v8  ;;  %v17113_v53 = vld [vmem:[#allocation197_spill] sm:$0xff] }
 0x1e8   :  { %2408 = vmatpush.msra.mxu2 %v17099_v33  ;;  %2692 = vmatpush.msrb.mxu1 %v17100_v60  ;;  %v17106_v33 = vld [vmem:[#allocation78_spill] sm:$0xff]  ;;  %v17107_v60 = vld [vmem:[#allocation191_spill] sm:$0xff] }
 0x1e9   :  { %2471 = vmatpush.msra.mxu3 %v17070_v26  ;;  %2603 = vmatpush.msrb.mxu0 %v17101_v39  ;;  %v17108_v26 = vld [vmem:[#allocation46_spill] sm:$0xff] }
 0x1ea   :  { %2412 = vmatpush.msra.mxu2 %v17102_v7  ;;  %2698 = vmatpush.msrb.mxu1 %v17103_v58  ;;  %v17109_v7 = vld [vmem:[#allocation82_spill] sm:$0xff] }
 0x1eb   :  { %2473 = vmatpush.msra.mxu3 %v17071_v0  ;;  %2605 = vmatpush.msrb.mxu0 %v17104_v52  ;;  %v17110_v58 = vld [vmem:[#allocation194_spill] sm:$0xff]  ;;  %v17111_v0 = vld [vmem:[#allocation51_spill] sm:$0xff] }
 0x1ec   :  { %2416 = vmatpush.msra.mxu2 %v17105_v56  ;;  %2475 = vmatmul.f32.vlgmr.msra.gmra.mxu3 %v12650_v63  ;;  %v17112_v56 = vld [vmem:[#allocation84_spill] sm:$0xff] }
 0x1ed   :  { %2798 = vmatpush.msrb.mxu3 %v17072_v4  ;;  %2704 = vmatpush.msrb.mxu1 %v17106_v33  ;;  %v17116_v33 = vld [vmem:[#allocation199_spill] sm:$0xff] }
 0x1ee   :  { %2420 = vmatpush.msra.mxu2 %v17107_v60  ;;  %2607 = vmatpush.msrb.mxu0 %v17108_v26  ;;  %v17115_v60 = vld [vmem:[#allocation88_spill] sm:$0xff] }
 0x1ef   :  { %2800 = vmatpush.msrb.mxu3 %v17074_v18  ;;  %2710 = vmatpush.msrb.mxu1 %v17109_v7  ;;  %v17118_v7 = vld [vmem:[#allocation92_spill] sm:$0xff] }
 0x1f0   :  { %2424 = vmatpush.msra.mxu2 %v17110_v58  ;;  %2609 = vmatpush.msrb.mxu0 %v17111_v0  ;;  %v17117_v58 = vld [vmem:[#allocation22_spill] sm:$0xff] }
 0x1f1   :  { %2802 = vmatpush.msrb.mxu3 %v17078_v20  ;;  %2716 = vmatpush.msrb.mxu1 %v17112_v56  ;;  %v17120_v56 = vld [vmem:[#allocation59_spill] sm:$0xff] }
 0x1f2   :  { %2428 = vmatpush.msra.mxu2 %v17113_v53  ;;  %2611 = vmatpush.msrb.mxu0 %v17114_v41  ;;  %v17119_v53 = vld [vmem:[#allocation23_spill] sm:$0xff] }
 0x1f3   :  { %2804 = vmatpush.msrb.mxu3 %v17081_v40  ;;  %2722 = vmatpush.msrb.mxu1 %v17115_v60  ;;  %v17127_v60 = vld [vmem:[#allocation34_spill] sm:$0xff] }
 0x1f4   :  { %2432 = vmatpush.msra.mxu2 %v17116_v33  ;;  %2479 = vmatmul.f32.gmra.mxu3 %v12673_v23  ;;  %v17121_v33 = vld [vmem:[#allocation24_spill] sm:$0xff] }
 0x1f5   :  { %2434 = vmatmul.f32.vlgmr.msra.gmra.mxu2 %v12650_v63  ;;  %2806 = vmatpush.msrb.mxu3 %v17086_v22  ;;  %v17122_v63 = vld [vmem:[#allocation64_spill] sm:$0xff] }
 0x1f6   :  { %2740 = vmatpush.msrb.mxu2 %v17117_v58  ;;  %2728 = vmatpush.msrb.mxu1 %v17118_v7  ;;  %v17123_v7 = vld [vmem:[#allocation26_spill] sm:$0xff]  ;;  %v17124_v58 = vld [vmem:[#allocation28_spill] sm:$0xff] }
 0x1f7   :  { %2808 = vmatpush.msrb.mxu3 %v17089_v45  ;;  %2613 = vmatpush.msrb.mxu0 %v17120_v56 }
 0x1f8   :  { %2916 = vmatpush.msra.mxu1 %v17072_v4  ;;  %2743 = vmatpush.msrb.mxu2 %v17119_v53  ;;  %v17125_v53 = vld [vmem:[#allocation27_spill] sm:$0xff] }
 0x1f9   :  { %2810 = vmatpush.msrb.mxu3 %v17092_v32  ;;  %2615 = vmatpush.msrb.mxu0 %v17122_v63 }
 0x1fa   :  { %2918 = vmatpush.msra.mxu1 %v17074_v18  ;;  %2746 = vmatpush.msrb.mxu2 %v17121_v33  ;;  %v17126_v33 = vld [vmem:[#allocation29_spill] sm:$0xff] }
 0x1fb   :  { %2812 = vmatpush.msrb.mxu3 %v17095_v37  ;;  %2845 = vmatpush.msra.mxu0 %v17124_v58  ;;  %v17129_v58 = vld [vmem:[#allocation37_spill] sm:$0xff] }
 0x1fc   :  { %2920 = vmatpush.msra.mxu1 %v17078_v20  ;;  %2749 = vmatpush.msrb.mxu2 %v17123_v7  ;;  %v17128_v7 = vld [vmem:[#allocation30_spill] sm:$0xff] }
 0x1fd   :  { %2438 = vmatmul.f32.gmra.mxu2 %v12673_v23  ;;  %2814 = vmatpush.msrb.mxu3 %v17098_v8  ;;  %v17130_v23 = vld [vmem:[#allocation32_spill] sm:$0xff] }
 0x1fe   :  { %2752 = vmatpush.msrb.mxu2 %v17125_v53  ;;  %2922 = vmatpush.msra.mxu1 %v17081_v40  ;;  %v17131_v53 = vld [vmem:[#allocation41_spill] sm:$0xff] }
 0x1ff   :  { %2816 = vmatpush.msrb.mxu3 %v17101_v39  ;;  %2849 = vmatpush.msra.mxu0 %v17126_v33  ;;  %v17133_v33 = vld [vmem:[#allocation45_spill] sm:$0xff] }
 0x200   :  { %2755 = vmatpush.msrb.mxu2 %v17127_v60  ;;  %2924 = vmatpush.msra.mxu1 %v17086_v22  ;;  %v17132_v60 = vld [vmem:[#allocation35_spill] sm:$0xff] }
 0x201   :  { %2818 = vmatpush.msrb.mxu3 %v17104_v52  ;;  %2853 = vmatpush.msra.mxu0 %v17128_v7  ;;  %v17135_v7 = vld [vmem:[#allocation49_spill] sm:$0xff] }
 0x202   :  { %2758 = vmatpush.msrb.mxu2 %v17129_v58  ;;  %2926 = vmatpush.msra.mxu1 %v17089_v45  ;;  %v17134_v58 = vld [vmem:[#allocation40_spill] sm:$0xff] }
 0x203   :  { %2820 = vmatpush.msrb.mxu3 %v17108_v26  ;;  %2857 = vmatpush.msra.mxu0 %v17130_v23  ;;  %v17137_v23 = vld [vmem:[#allocation53_spill] sm:$0xff] }
 0x204   :  { %2761 = vmatpush.msrb.mxu2 %v17131_v53  ;;  %2928 = vmatpush.msra.mxu1 %v17092_v32  ;;  %v17136_v53 = vld [vmem:[#allocation42_spill] sm:$0xff] }
 0x205   :  { %2822 = vmatpush.msrb.mxu3 %v17111_v0  ;;  %2861 = vmatpush.msra.mxu0 %v17132_v60  ;;  %v17139_v60 = vld [vmem:[#allocation57_spill] sm:$0xff] }
 0x206   :  { %2764 = vmatpush.msrb.mxu2 %v17133_v33  ;;  %2930 = vmatpush.msra.mxu1 %v17095_v37  ;;  %v17138_v33 = vld [vmem:[#allocation48_spill] sm:$0xff]  ;;  %v17140_v37 = vld [vmem:[#allocation87_spill] sm:$0xff] }
 0x207   :  { %2824 = vmatpush.msrb.mxu3 %v17114_v41  ;;  %2865 = vmatpush.msra.mxu0 %v17134_v58  ;;  %v17142_v58 = vld [vmem:[#allocation61_spill] sm:$0xff] }
 0x208   :  { %2767 = vmatpush.msrb.mxu2 %v17135_v7  ;;  %2932 = vmatpush.msra.mxu1 %v17098_v8  ;;  %v17141_v7 = vld [vmem:[#allocation52_spill] sm:$0xff]  ;;  %v17143_v8 = vld [vmem:[#allocation91_spill] sm:$0xff] }
 0x209   :  { %2826 = vmatpush.msrb.mxu3 %v17120_v56  ;;  %2869 = vmatpush.msra.mxu0 %v17136_v53  ;;  %v17145_v53 = vld [vmem:[#allocation62_spill] sm:$0xff] }
 0x20a   :  { %2770 = vmatpush.msrb.mxu2 %v17137_v23  ;;  %2934 = vmatpush.msra.mxu1 %v17101_v39  ;;  %v17144_v23 = vld [vmem:[#allocation56_spill] sm:$0xff]  ;;  %v17146_v39 = vld [vmem:[#allocation97_spill] sm:$0xff] }
 0x20b   :  { %2828 = vmatpush.msrb.mxu3 %v17122_v63  ;;  %2873 = vmatpush.msra.mxu0 %v17138_v33  ;;  %v17149_v33 = vld [vmem:[#allocation100_spill] sm:$0xff] }
 0x20c   :  { %2773 = vmatpush.msrb.mxu2 %v17139_v60  ;;  %2936 = vmatpush.msra.mxu1 %v17104_v52  ;;  %v17147_v60 = vld [vmem:[#allocation60_spill] sm:$0xff] }
 0x20d   :  { %3010 = vmatpush.msra.mxu3 %v17140_v37  ;;  %2877 = vmatpush.msra.mxu0 %v17141_v7  ;;  %v17148_v37 = vld [vmem:[#allocation69_spill] sm:$0xff]  ;;  %v17152_v7 = vld [vmem:[#allocation104_spill] sm:$0xff] }
 0x20e   :  { %2776 = vmatpush.msrb.mxu2 %v17142_v58  ;;  %2938 = vmatpush.msra.mxu1 %v17108_v26  ;;  %v17150_v58 = vld [vmem:[#allocation65_spill] sm:$0xff] }
 0x20f   :  { %3016 = vmatpush.msra.mxu3 %v17143_v8  ;;  %2881 = vmatpush.msra.mxu0 %v17144_v23  ;;  %v17151_v8 = vld [vmem:[#allocation73_spill] sm:$0xff] }
 0x210   :  { %2779 = vmatpush.msrb.mxu2 %v17145_v53  ;;  %2940 = vmatpush.msra.mxu1 %v17111_v0  ;;  %v17154_v53 = vld [vmem:[#allocation68_spill] sm:$0xff]  ;;  %v17161_v23 = vld [vmem:[#allocation125_spill] sm:$0xff] }
 0x211   :  { %3022 = vmatpush.msra.mxu3 %v17146_v39  ;;  %2885 = vmatpush.msra.mxu0 %v17147_v60  ;;  %v17153_v39 = vld [vmem:[#allocation112_spill] sm:$0xff]  ;;  %v1405_v60 = vpop.f32.mrf.mxu2 }
 0x212   :  { %2782 = vmatpush.msrb.mxu2 %v17148_v37  ;;  %2942 = vmatpush.msra.mxu1 %v17114_v41  ;;  %v1514_v37 = vpop.f32.mrf.mxu3 }
 0x213   :  { %3028 = vmatpush.msra.mxu3 %v17149_v33  ;;  %2889 = vmatpush.msra.mxu0 %v17150_v58  ;;  %v17155_v33 = vld [vmem:[#allocation116_spill] sm:$0xff]  ;;  %v17156_v58 = vld [vmem:[#allocation70_spill] sm:$0xff]  ;;  %v1515_v45 = vadd.f32 %v1514_v37, %v1405_v60 }
 0x214   :  { %2785 = vmatpush.msrb.mxu2 %v17151_v8  ;;  %2944 = vmatpush.msra.mxu1 %v17120_v56  ;;  %v17158_v8 = vld [vmem:[#allocation76_spill] sm:$0xff]  ;;  %v17166_v56 = vld [vmem:[#allocation138_spill] sm:$0xff] }
 0x215   :  { %3034 = vmatpush.msra.mxu3 %v17152_v7  ;;  %2893 = vmatpush.msra.mxu0 %v17154_v53  ;;  %v17157_v7 = vld [vmem:[#allocation118_spill] sm:$0xff]  ;;  %v17160_v53 = vld [vmem:[#allocation79_spill] sm:$0xff] }
 0x216   :  { %2957 = vmatpush.msra.mxu2 %v11705_v25  ;;  %2946 = vmatpush.msra.mxu1 %v17122_v63 }
 0x217   :  { %3040 = vmatpush.msra.mxu3 %v17153_v39  ;;  %2897 = vmatpush.msra.mxu0 %v17156_v58  ;;  %v17159_v39 = vld [vmem:[#allocation122_spill] sm:$0xff] }
 0x218   :  { %2959 = vmatpush.msra.mxu2 %v11712_v30  ;;  %v17162_v58 = vld [vmem:[#allocation130_spill] sm:$0xff] }
 0x219   :  { %3046 = vmatpush.msra.mxu3 %v17155_v33  ;;  %2901 = vmatpush.msra.mxu0 %v17158_v8  ;;  %v1572_v33 = vpop.f32.mrf.mxu0  ;;  %v1413_v63 = vpop.f32.mrf.mxu2  ;;  %v17163_v8 = vld [vmem:[#allocation133_spill] sm:$0xff] }
 0x21a   :  { %2961 = vmatpush.msra.mxu2 %v11759_v28  ;;  %v1573_v20 = vadd.f32 %v1572_v33, %v1515_v45 }
 0x21b   :  { %3052 = vmatpush.msra.mxu3 %v17157_v7  ;;  %2905 = vmatpush.msra.mxu0 %v17160_v53  ;;  %v1616_v53 = vpop.f32.mrf.mxu1  ;;  %v17165_v7 = vld [vmem:[#allocation137_spill] sm:$0xff] }
 0x21c   :  { %2963 = vmatpush.msra.mxu2 %v11775_v31  ;;  %v1617_v12 = vadd.f32 %v1616_v53, %v1573_v20  ;;  %v1359_v20 = vld [vmem:[#allocation3 + $0x24] sm:$0xff] }
 0x21d   :  { %3058 = vmatpush.msra.mxu3 %v17159_v39  ;;  %v17164_v39 = vld [vmem:[#allocation135_spill] sm:$0xff] }
 0x21e   :  { %2965 = vmatpush.msra.mxu2 %v16958_v42 }
 0x21f   :  { %3064 = vmatpush.msra.mxu3 %v17161_v23  ;;  %v1518_v23 = vpop.f32.mrf.mxu3 }
 0x220   :  { %2967 = vmatpush.msra.mxu2 %v16961_v5  ;;  %v1519_v48 = vadd.f32 %v1518_v23, %v1413_v63 }
 0x221   :  { %3070 = vmatpush.msra.mxu3 %v17162_v58  ;;  %v17167_v58 = vld [vmem:[#allocation139_spill] sm:$0xff]  ;;  %v1577_v41 = vpop.f32.mrf.mxu0 }
 0x222   :  { %2969 = vmatpush.msra.mxu2 %v16964_v57 }
 0x223   :  { %3076 = vmatpush.msra.mxu3 %v17163_v8  ;;  %v1691_v8 = vpop.f32.mrf.mxu2 }
 0x224   :  { %2971 = vmatpush.msra.mxu2 %v16967_v36 }
 0x225   :  { %3082 = vmatpush.msra.mxu3 %v17164_v39  ;;  %v1622_v39 = vpop.f32.mrf.mxu1 }
 0x226   :  { %2973 = vmatpush.msra.mxu2 %v16970_v3 }
 0x227   :  { %3088 = vmatpush.msra.mxu3 %v17165_v7  ;;  %v1732_v0 = vpop.f32.mrf.mxu3 }
 0x228   :  { %2975 = vmatpush.msra.mxu2 %v16973_v14 }
 0x229   :  { %3094 = vmatpush.msra.mxu3 %v17166_v56  ;;  %v1777_v7 = vpop.f32.mrf.mxu0 }
 0x22a   :  { %2977 = vmatpush.msra.mxu2 %v16976_v21 }
 0x22b   :  { %3100 = vmatpush.msra.mxu3 %v17167_v58  ;;  %v1695_v56 = vpop.f32.mrf.mxu2 }
 0x22c   :  { %2979 = vmatpush.msra.mxu2 %v16979_v59 }
 0x22d   :  { %v1886_v26 = vpop.f32.mrf.mxu1 }
 0x22e   :  { %2981 = vmatpush.msra.mxu2 %v16982_v34  ;;  %v1887_v22 = vadd.f32 %v1886_v26, %v1777_v7 }
 0x22f   :  { %v1736_v52 = vpop.f32.mrf.mxu3 }
 0x230   :  { %2983 = vmatpush.msra.mxu2 %v16985_v24  ;;  %v1578_v24 = vadd.f32 %v1577_v41, %v1519_v48 }
 0x231   :  { %v1785_v32 = vpop.f32.mrf.mxu0 }
 0x232   :  { %2985 = vmatpush.msra.mxu2 %v16988_v27  ;;  %v1692_v27 = vadd.f32 %v1691_v8, %v1617_v12  ;;  %v1623_v7 = vadd.f32 %v1622_v39, %v1578_v24  ;;  %v1364_v12 = vunpack.c.l.bf16 %v1359_v20 }
 0x234   :  { %2987 = vmatpush.msra.mxu2 %v16991_v44  ;;  %v1357_v44 = vld [vmem:[#allocation3 + $0x18] sm:$0xff]  ;;  %v1733_v21 = vadd.f32 %v1732_v0, %v1692_v27  ;;  %v1696_v45 = vadd.f32 %v1695_v56, %v1623_v7 }
 0x235   :  { %v1890_v40 = vpop.f32.mrf.mxu1  ;;  %v1361_v17 = vunpack.c.l.bf16 %v1357_v44  ;;  %v1362_v26 = vunpack.c.h.bf16 %v1357_v44 }
 0x236   :  { %v1891_v61 = vadd.f32 %v1890_v40, %v1785_v32  ;;  %v1737_v8 = vadd.f32 %v1736_v52, %v1696_v45 }
 0x237   :  { %v1944_v58 = vpop.f32.mrf.mxu2  ;;  %v1988_v4 = vpop.f32.mrf.mxu3 }
 0x238   :  { %v1945_v18 = vadd.f32 %v1944_v58, %v1887_v22  ;;  %v2483_v58 = vadd.f32 %v1733_v21, %v1361_v17  ;;  %v2486_v0 = vadd.f32 %v1737_v8, %v1364_v12 }
 0x239   :  { %v2063_v62 = vpop.f32.mrf.mxu0 }
 0x23a   :  { %v1989_v29 = vadd.f32 %v1988_v4, %v1945_v18  ;;  %v11127_v32 = vmul.f32 -1.442695, %v2483_v58  ;;  %v11128_v24 = vmul.f32 -1.442695, %v2486_v0 }
 0x23c   :  { %v2064_v34 = vadd.f32 %v2063_v62, %v1989_v29  ;;  %v1365_v29 = vunpack.c.h.bf16 %v1359_v20  ;;  %11222 = vpow2.f32 %v11127_v32 }
 0x23d   :  { %v2104_v51 = vpop.f32.mrf.mxu1 }
 0x23e   :  { %v2105_v37 = vadd.f32 %v2104_v51, %v2064_v34 }
 0x23f   :  { %v1994_v60 = vpop.f32.mrf.mxu3 }
 0x240   :  { %v1949_v9 = vpop.f32.mrf.mxu2  ;;  %v2484_v18 = vadd.f32 %v2105_v37, %v1362_v26 }
 0x241   :  { %v1950_v59 = vadd.f32 %v1949_v9, %v1891_v61  ;;  %v2067_v4 = vpop.f32.mrf.mxu0 }
 0x242   :  { %v11129_v9 = vmul.f32 -1.442695, %v2484_v18  ;;  %v11223_v34 = vpop.eup %11222 }
 0x243   :  { %v1995_v22 = vadd.f32 %v1994_v60, %v1950_v59  ;;  %v13004_v44 = vadd.f32 1.0, %v11223_v34 }
 0x244   :  { %11224 = vpow2.f32 %v11129_v9 }
 0x245   :  { %v2068_v53 = vadd.f32 %v2067_v4, %v1995_v22  ;;  %v2108_v48 = vpop.f32.mrf.mxu1  ;;  %11226 = vpow2.f32 %v11128_v24  ;;  %v1358_v4 = vld [vmem:[#allocation3 + $0x20] sm:$0xf]  ;;  %vm2502_vm1 = vweird.f32 %v13004_v44 }
 0x247   :  { %v2109_v62 = vadd.f32 %v2108_v48, %v2068_v53 }
 0x249   :  { %v2487_v61 = vadd.f32 %v2109_v62, %v1365_v29  ;;  %v1363_v62 = vunpack.c.l.bf16 %v1358_v4 }
 0x24a   :  { %v11225_v21 = vpop.eup %11224 }
 0x24b   :  { %v11130_v59 = vmul.f32 -1.442695, %v2487_v61  ;;  %v13006_v27 = vadd.f32 1.0, %v11225_v21  ;;  %v11227_v56 = vpop.eup %11226  ;;  %v2316_v63 = vpop.f32.mrf.mxu0 }
 0x24c   :  { %v13010_v40 = vadd.f32 1.0, %v11227_v56  ;;  %v2508_v56 = vand.u32 2147483648, %v13004_v44 }
 0x24d   :  { %11228 = vpow2.f32 %v11130_v59  ;;  %vm2540_vm4 = vweird.f32 %v13006_v27 }
 0x24e   :  { %11230 = vrcp.f32 %v13004_v44  ;;  %v2360_v45 = vpop.f32.mrf.mxu1  ;;  %vm2517_vm7 = vweird.f32 %v13010_v40 }
 0x24f   :  { %v2258_v17 = vpop.f32.mrf.mxu3  ;;  %11232 = vrcp.f32 %v13006_v27 }
 0x250   :  { %11234 = vrcp.f32 %v13010_v40 }
 0x253   :  { %v11229_v41 = vpop.eup %11228  ;;  %v2321_v24 = vpop.f32.mrf.mxu0 }
 0x254   :  { %v11231_v52 = vpop.eup %11230  ;;  %v13012_v39 = vadd.f32 1.0, %v11229_v41 }
 0x255   :  { %v13014_v33 = vpop.eup %11232  ;;  %v2498_v60 = vmul.f32 %v11231_v52, %v13004_v44  ;;  %vm2503_vm0 = vweird.f32 %v11231_v52 }
 0x256   :  { %11236 = vrcp.f32 %v13012_v39  ;;  %v2536_v37 = vmul.f32 %v13014_v33, %v13006_v27  ;;  %v13021_v20 = vpop.eup %11234  ;;  %vm2541_vm2 = vweird.f32 %v13014_v33  ;;  %vm13035_vm3 = vmor %vm2502_vm1, %vm2503_vm0  ;;  %vm2555_vm12 = vweird.f32 %v13012_v39 }
 0x257   :  { %v2262_v26 = vpop.f32.mrf.mxu3  ;;  %v2499_v58 = vsub.f32 1.0, %v2498_v60  ;;  %v2513_v48 = vmul.f32 %v13021_v20, %v13010_v40  ;;  %vm13045_vm5 = vmor %vm2540_vm4, %vm2541_vm2  ;;  %vm2518_vm8 = vweird.f32 %v13021_v20 }
 0x258   :  { %v2149_v51 = vpop.f32.mrf.mxu2  ;;  %v2537_v18 = vsub.f32 1.0, %v2536_v37  ;;  %vm2519_vm11 = vmor %vm2517_vm7, %vm2518_vm8 }
 0x259   :  { %v2259_v23 = vadd.f32 %v2258_v17, %v2149_v51  ;;  %v2500_v8 = vmul.f32 %v11231_v52, %v2499_v58  ;;  %v2514_v17 = vsub.f32 1.0, %v2513_v48 }
 0x25a   :  { %v2538_v34 = vmul.f32 %v13014_v33, %v2537_v18 }
 0x25b   :  { %v2317_v22 = vadd.f32 %v2316_v63, %v2259_v23  ;;  %v2501_v51 = vadd.f32 %v11231_v52, %v2500_v8  ;;  %v2366_v63 = vpop.f32.mrf.mxu1  ;;  %v2506_v23 = vand.u32 2147483647, %v13004_v44  ;;  %v2544_v44 = vand.u32 2147483647, %v13006_v27 }
 0x25c   :  { %v13023_v53 = vpop.eup %11236  ;;  %v2539_v60 = vadd.f32 %v13014_v33, %v2538_v34  ;;  %v2523_v34 = vand.u32 2147483648, %v13010_v40 }
 0x25d   :  { %v2361_v12 = vadd.f32 %v2360_v45, %v2317_v22  ;;  %v2551_v61 = vmul.f32 %v13023_v53, %v13012_v39  ;;  %v2546_v22 = vand.u32 2147483648, %v13006_v27  ;;  %v2515_v45 = vmul.f32 %v13021_v20, %v2514_v17 }
 0x25e   :  { %v2505_v4 = vsel %vm13035_vm3, %v11231_v52, %v2501_v51  ;;  %vm2507_vm6 = vcmp.eq.f32.partialorder %v2506_v23, 8.507059e+37  ;;  %vm2545_vm9 = vcmp.eq.f32.partialorder %v2544_v44, 8.507059e+37  ;;  %vm2556_vm10 = vweird.f32 %v13023_v53 }
 0x25f   :  { %v2516_v27 = vadd.f32 %v13021_v20, %v2515_v45  ;;  %vm2557_vm13 = vmor %vm2555_vm12, %vm2556_vm10 }
 0x260   :  { %v2157_v7 = vpop.f32.mrf.mxu2 }
 0x261   :  { %v2263_v32 = vadd.f32 %v2262_v26, %v2157_v7  ;;  %v1360_v26 = vld [vmem:[#allocation3 + $0x2c] sm:$0xf]  ;;  %v2552_v7 = vsub.f32 1.0, %v2551_v61  ;;  %v2520_v23 = vsel %vm2519_vm11, %v13021_v20, %v2516_v27  ;;  %v17178_v27 = vld [vmem:[#allocation115_spill] sm:$0xff] }
 0x262   :  { %v1366_v8 = vunpack.c.l.bf16 %v1360_v26 }
 0x263   :  { %v2322_v59 = vadd.f32 %v2321_v24, %v2263_v32  ;;  %v2509_v32 = vor.u32 1.1754944e-38, %v2508_v56  ;;  %v2553_v52 = vmul.f32 %v13023_v53, %v2552_v7 }
 0x265   :  { %v2367_v58 = vadd.f32 %v2366_v63, %v2322_v59  ;;  %v2554_v56 = vadd.f32 %v13023_v53, %v2553_v52  ;;  %v17174_v52 = vld [vmem:[#allocation102_spill] sm:$0xff] }
 0x267   :  { %v2558_v26 = vsel %vm2557_vm13, %v13023_v53, %v2554_v56  ;;  %v17186_v56 = vld [vmem:[#allocation117_spill] sm:$0xff] }
 0x26f   :  { %v2476_v29 = vpop.f32.mrf.mxu3 }
 0x278   :  { %v2435_v9 = vpop.f32.mrf.mxu2 }
 0x279   :  { %v2436_v0 = vadd.f32 %v2435_v9, %v2361_v12  ;;  %v2480_v9 = vpop.f32.mrf.mxu3 }
 0x27b   :  { %v2477_v21 = vadd.f32 %v2476_v29, %v2436_v0  ;;  %v2543_v29 = vsel %vm13045_vm5, %v13014_v33, %v2539_v60  ;;  %v2547_v0 = vor.u32 1.1754944e-38, %v2546_v22  ;;  %v2521_v33 = vand.u32 2147483647, %v13010_v40 }
 0x27c   :  { %v2559_v60 = vand.u32 2147483647, %v13012_v39  ;;  %v2524_v40 = vor.u32 1.1754944e-38, %v2523_v34  ;;  %v17180_v34 = vld [vmem:[#allocation109_spill] sm:$0xff] }
 0x27d   :  { %v2485_v41 = vadd.f32 %v2477_v21, %v1363_v62  ;;  %v2510_v62 = vsel %vm2507_vm6, %v2509_v32, %v2505_v4  ;;  %v2548_v59 = vsel %vm2545_vm9, %v2547_v0, %v2543_v29  ;;  %vm2522_vm14 = vcmp.eq.f32.partialorder %v2521_v33, 8.507059e+37  ;;  %v17172_v29 = vld [vmem:[#allocation108_spill] sm:$0xff]  ;;  %v17176_v0 = vld [vmem:[#allocation119_spill] sm:$0xff]  ;;  %v17183_v33 = vld [vmem:[#allocation114_spill] sm:$0xff] }
 0x27e   :  { %v2567_v17 = vmul.f32 %v2510_v62, %v12644_v10  ;;  %v2525_v7 = vsel %vm2522_vm14, %v2524_v40, %v2520_v23  ;;  %vm2560_vm15 = vcmp.eq.f32.partialorder %v2559_v60, 8.507059e+37  ;;  %v17175_v62 = vld [vmem:[#allocation111_spill] sm:$0xff]  ;;  %v17188_v23 = vld [vmem:[#allocation134_spill] sm:$0xff]  ;;  %v17189_v60 = vld [vmem:[#allocation156_spill] sm:$0xff] }
 0x27f   :  { %11238 = vtanh.f32 %v2485_v41  ;;  %v2561_v41 = vand.u32 2147483648, %v13012_v39  ;;  %v2568_v39 = vmul.f32 %v2525_v7, %v12665_v13  ;;  %v17190_v40 = vld [vmem:[#allocation121_spill] sm:$0xff]  ;;  %v17192_v7 = vld [vmem:[#allocation160_spill] sm:$0xff] }
 0x280   :  { %v2439_v18 = vpop.f32.mrf.mxu2 }
 0x281   :  { %v2440_v48 = vadd.f32 %v2439_v18, %v2367_v58  ;;  %v2562_v37 = vor.u32 1.1754944e-38, %v2561_v41  ;;  %v17187_v41 = vld [vmem:[#allocation128_spill] sm:$0xff] }
 0x283   :  { %v2481_v61 = vadd.f32 %v2480_v9, %v2440_v48  ;;  %v2563_v58 = vsel %vm2560_vm15, %v2562_v37, %v2558_v26  ;;  %v17173_v9 = vld [vmem:[#allocation113_spill] sm:$0xff]  ;;  %v17191_v26 = vld [vmem:[#allocation136_spill] sm:$0xff]  ;;  %v17193_v37 = vld [vmem:[#allocation142_spill] sm:$0xff] }
 0x285   :  { %v11239_v24 = vpop.eup %11238  ;;  %v2488_v21 = vadd.f32 %v2481_v61, %v1366_v8  ;;  %v17177_v61 = vld [vmem:[#allocation106_spill] sm:$0xff] }
 0x286   :  { %v2569_v51 = vmul.f32 %v11239_v24, %v2548_v59  ;;  %v17179_v24 = vld [vmem:[#allocation123_spill] sm:$0xff]  ;;  %v17181_v59 = vld [vmem:[#allocation120_spill] sm:$0xff] }
 0x287   :  { %11240 = vtanh.f32 %v2488_v21  ;;  %v17182_v21 = vld [vmem:[#allocation126_spill] sm:$0xff] }
 0x288   :  { %v13062_v63 = vsub.f32 %v2567_v17, %v2569_v51  ;;  %v17184_v17 = vld [vmem:[#allocation124_spill] sm:$0xff]  ;;  %v17185_v51 = vld [vmem:[#allocation131_spill] sm:$0xff] }
 0x28a   :  { %v13068_v10 = vand.u32 4294901760, %v13062_v63 }
 0x28c   :  { %2730 = vmatmul.f32.vlgmr.msrb.gmra.mxu1 %v13068_v10  ;;  %v13074_v20 = vsub.f32 %v13062_v63, %v13068_v10 }
 0x28d   :  { %v11241_v22 = vpop.eup %11240  ;;  %3170 = vmatpush.msrb.mxu1 %v11705_v25 }
 0x28e   :  { %v2570_v45 = vmul.f32 %v11241_v22, %v2563_v58  ;;  %2788 = vmatmul.f32.vlgmr.msrb.gmra.mxu2 %v13074_v20  ;;  %v13080_v53 = vand.u32 4294901760, %v13074_v20  ;;  %v17194_v22 = vld [vmem:[#allocation127_spill] sm:$0xff]  ;;  %v17195_v58 = vld [vmem:[#allocation164_spill] sm:$0xff] }
 0x28f   :  { %3172 = vmatpush.msrb.mxu1 %v11712_v30  ;;  %3217 = vmatpush.msrb.mxu2 %v17005_v47 }
 0x290   :  { %v13084_v4 = vsub.f32 %v2568_v39, %v2570_v45  ;;  %2832 = vmatmul.f32.vlgmr.msrb.gmra.mxu3 %v13080_v53  ;;  %v2619_v44 = vsub.f32 %v13074_v20, %v13080_v53  ;;  %v17196_v39 = vld [vmem:[#allocation145_spill] sm:$0xff]  ;;  %v17197_v45 = vld [vmem:[#allocation140_spill] sm:$0xff] }
 0x291   :  { %3174 = vmatpush.msrb.mxu1 %v11759_v28  ;;  %3221 = vmatpush.msrb.mxu2 %v17006_v46 }
 0x292   :  { %v13092_v13 = vand.u32 4294901760, %v13084_v4  ;;  %3288 = vmatpush.msrb.mxu3 %v11705_v25  ;;  %v13095_v18 = vand.u32 4294901760, %v2619_v44  ;;  %v17198_v44 = vld [vmem:[#allocation129_spill] sm:$0xff] }
 0x293   :  { %3176 = vmatpush.msrb.mxu1 %v11775_v31  ;;  %3225 = vmatpush.msrb.mxu2 %v17007_v16 }
 0x294   :  { %3290 = vmatpush.msrb.mxu3 %v11712_v30  ;;  %2621 = vmatmul.f32.vlgmr.msrb.gmra.mxu0 %v13095_v18  ;;  %v13103_v32 = vsub.f32 %v13084_v4, %v13092_v13 }
 0x295   :  { %2734 = vmatmul.f32.gmra.mxu1 %v13092_v13  ;;  %3112 = vmatpush.msrb.mxu0 %v17008_v49 }
 0x296   :  { %3178 = vmatpush.msrb.mxu1 %v16958_v42  ;;  %3229 = vmatpush.msrb.mxu2 %v17009_v35  ;;  %v13110_v12 = vand.u32 4294901760, %v13103_v32 }
 0x297   :  { %3292 = vmatpush.msrb.mxu3 %v11759_v28  ;;  %2793 = vmatmul.f32.gmra.mxu2 %v13103_v32 }
 0x298   :  { %3115 = vmatpush.msrb.mxu0 %v17010_v55  ;;  %3180 = vmatpush.msrb.mxu1 %v16961_v5  ;;  %v2627_v8 = vsub.f32 %v13103_v32, %v13110_v12 }
 0x299   :  { %3233 = vmatpush.msrb.mxu2 %v17011_v11  ;;  %3294 = vmatpush.msrb.mxu3 %v11775_v31 }
 0x29a   :  { %2838 = vmatmul.f32.gmra.mxu3 %v13110_v12  ;;  %3118 = vmatpush.msrb.mxu0 %v17012_v54  ;;  %v13122_v48 = vand.u32 4294901760, %v2627_v8  ;;  %v17199_v8 = vld [vmem:[#allocation167_spill] sm:$0xff] }
 0x29b   :  { %3182 = vmatpush.msrb.mxu1 %v16964_v57  ;;  %3237 = vmatpush.msrb.mxu2 %v17013_v43 }
 0x29c   :  { %3296 = vmatpush.msrb.mxu3 %v16958_v42  ;;  %3121 = vmatpush.msrb.mxu0 %v17014_v2 }
 0x29d   :  { %3184 = vmatpush.msrb.mxu1 %v16967_v36  ;;  %3241 = vmatpush.msrb.mxu2 %v17015_v50 }
 0x29e   :  { %3298 = vmatpush.msrb.mxu3 %v16961_v5  ;;  %2629 = vmatmul.f32.gmra.mxu0 %v13122_v48 }
 0x29f   :  { %2948 = vmatmul.f32.vlgmr.msra.gmra.mxu1 %v13068_v10  ;;  %3124 = vmatpush.msrb.mxu0 %v17016_v19 }
 0x2a0   :  { %3186 = vmatpush.msrb.mxu1 %v16970_v3  ;;  %3245 = vmatpush.msrb.mxu2 %v17017_v6 }
 0x2a1   :  { %3300 = vmatpush.msrb.mxu3 %v16964_v57  ;;  %2993 = vmatmul.f32.vlgmr.msra.gmra.mxu2 %v13095_v18 }
 0x2a2   :  { %3127 = vmatpush.msrb.mxu0 %v17018_v1  ;;  %3188 = vmatpush.msrb.mxu1 %v16973_v14 }
 0x2a3   :  { %3249 = vmatpush.msrb.mxu2 %v17019_v15  ;;  %3302 = vmatpush.msrb.mxu3 %v16967_v36 }
 0x2a4   :  { %3102 = vmatmul.f32.vlgmr.msra.gmra.mxu3 %v13068_v10  ;;  %3130 = vmatpush.msrb.mxu0 %v17020_v38 }
 0x2a5   :  { %3190 = vmatpush.msrb.mxu1 %v17172_v29  ;;  %3253 = vmatpush.msrb.mxu2 %v17173_v9 }
 0x2a6   :  { %3304 = vmatpush.msrb.mxu3 %v16970_v3  ;;  %3133 = vmatpush.msrb.mxu0 %v17174_v52 }
 0x2a7   :  { %3192 = vmatpush.msrb.mxu1 %v17175_v62  ;;  %3257 = vmatpush.msrb.mxu2 %v17176_v0  ;;  %v17238_v0 = vld [vmem:[#allocation181_spill] sm:$0xff] }
 0x2a8   :  { %3306 = vmatpush.msrb.mxu3 %v16973_v14  ;;  %2907 = vmatmul.f32.vlgmr.msra.gmra.mxu0 %v13068_v10 }
 0x2a9   :  { %2952 = vmatmul.f32.gmra.mxu1 %v13092_v13  ;;  %3136 = vmatpush.msrb.mxu0 %v17177_v61  ;;  %v17235_v61 = vld [vmem:[#allocation177_spill] sm:$0xff] }
 0x2aa   :  { %3194 = vmatpush.msrb.mxu1 %v17178_v27  ;;  %3261 = vmatpush.msrb.mxu2 %v17179_v24  ;;  %v17232_v24 = vld [vmem:[#allocation174_spill] sm:$0xff] }
 0x2ab   :  { %3308 = vmatpush.msrb.mxu3 %v17172_v29  ;;  %3001 = vmatmul.f32.gmra.mxu2 %v13122_v48 }
 0x2ac   :  { %3139 = vmatpush.msrb.mxu0 %v17180_v34  ;;  %3196 = vmatpush.msrb.mxu1 %v17181_v59  ;;  %v17229_v34 = vld [vmem:[#allocation171_spill] sm:$0xff] }
 0x2ad   :  { %3265 = vmatpush.msrb.mxu2 %v17182_v21  ;;  %3310 = vmatpush.msrb.mxu3 %v17175_v62  ;;  %v17226_v21 = vld [vmem:[#allocation166_spill] sm:$0xff] }
 0x2ae   :  { %3106 = vmatmul.f32.gmra.mxu3 %v13092_v13  ;;  %3142 = vmatpush.msrb.mxu0 %v17183_v33  ;;  %v17225_v33 = vld [vmem:[#allocation178_spill] sm:$0xff] }
 0x2af   :  { %3198 = vmatpush.msrb.mxu1 %v17184_v17  ;;  %3269 = vmatpush.msrb.mxu2 %v17185_v51  ;;  %v17222_v51 = vld [vmem:[#allocation173_spill] sm:$0xff] }
 0x2b0   :  { %3312 = vmatpush.msrb.mxu3 %v17178_v27  ;;  %3145 = vmatpush.msrb.mxu0 %v17186_v56  ;;  %v17219_v56 = vld [vmem:[#allocation169_spill] sm:$0xff] }
 0x2b1   :  { %3200 = vmatpush.msrb.mxu1 %v17187_v41  ;;  %3273 = vmatpush.msrb.mxu2 %v17188_v23  ;;  %v17216_v23 = vld [vmem:[#allocation165_spill] sm:$0xff] }
 0x2b2   :  { %3314 = vmatpush.msrb.mxu3 %v17181_v59  ;;  %2911 = vmatmul.f32.gmra.mxu0 %v13092_v13 }
 0x2b3   :  { %3382 = vmatpush.msra.mxu1 %v17189_v60  ;;  %3148 = vmatpush.msrb.mxu0 %v17190_v40  ;;  %v17212_v40 = vld [vmem:[#allocation183_spill] sm:$0xff] }
 0x2b4   :  { %3204 = vmatmul.f32.vlgmr.msrb.gmra.mxu1 %v13080_v53  ;;  %3277 = vmatpush.msrb.mxu2 %v17191_v26  ;;  %v17203_v26 = vld [vmem:[#allocation170_spill] sm:$0xff]  ;;  %v17215_v60 = vld [vmem:[#allocation187_spill] sm:$0xff] }
 0x2b5   :  { %3316 = vmatpush.msrb.mxu3 %v17184_v17  ;;  %3388 = vmatpush.msra.mxu1 %v17192_v7  ;;  %v17200_v7 = vld [vmem:[#allocation148_spill] sm:$0xff] }
 0x2b6   :  { %3484 = vmatpush.msra.mxu2 %v17193_v37  ;;  %3151 = vmatpush.msrb.mxu0 %v17194_v22  ;;  %v17201_v37 = vld [vmem:[#allocation141_spill] sm:$0xff]  ;;  %v17202_v22 = vld [vmem:[#allocation132_spill] sm:$0xff] }
 0x2b7   :  { %3279 = vmatmul.f32.vlgmr.msrb.gmra.mxu2 %v13068_v10  ;;  %3318 = vmatpush.msrb.mxu3 %v17187_v41 }
 0x2b8   :  { %3394 = vmatpush.msra.mxu1 %v17195_v58  ;;  %3487 = vmatpush.msra.mxu2 %v17196_v39  ;;  %v17204_v58 = vld [vmem:[#allocation150_spill] sm:$0xff]  ;;  %v17205_v39 = vld [vmem:[#allocation143_spill] sm:$0xff] }
 0x2b9   :  { %3542 = vmatpush.msra.mxu3 %v17197_v45  ;;  %3154 = vmatpush.msrb.mxu0 %v17198_v44  ;;  %v17208_v44 = vld [vmem:[#allocation144_spill] sm:$0xff] }
 0x2ba   :  { %3320 = vmatmul.f32.vlgmr.msrb.gmra.mxu3 %v13068_v10  ;;  %3400 = vmatpush.msra.mxu1 %v17199_v8  ;;  %v17206_v8 = vld [vmem:[#allocation176_spill] sm:$0xff] }
 0x2bb   :  { %3490 = vmatpush.msra.mxu2 %v17200_v7  ;;  %3544 = vmatpush.msra.mxu3 %v17201_v37  ;;  %v17207_v7 = vld [vmem:[#allocation153_spill] sm:$0xff] }
 0x2bc   :  { %3157 = vmatpush.msrb.mxu0 %v17202_v22  ;;  %3406 = vmatpush.msra.mxu1 %v17203_v26  ;;  %v17209_v26 = vld [vmem:[#allocation180_spill] sm:$0xff]  ;;  %v17211_v22 = vld [vmem:[#allocation147_spill] sm:$0xff] }
 0x2bd   :  { %3493 = vmatpush.msra.mxu2 %v17204_v58  ;;  %3546 = vmatpush.msra.mxu3 %v17205_v39  ;;  %v17210_v58 = vld [vmem:[#allocation157_spill] sm:$0xff] }
 0x2be   :  { %3329 = vmatpush.msra.mxu0 %v17197_v45  ;;  %3210 = vmatmul.f32.gmra.mxu1 %v13110_v12 }
 0x2bf   :  { %3160 = vmatmul.f32.vlgmr.msrb.gmra.mxu0 %v13074_v20  ;;  %3412 = vmatpush.msra.mxu1 %v17206_v8  ;;  %v17213_v8 = vld [vmem:[#allocation162_spill] sm:$0xff] }
 0x2c0   :  { %3331 = vmatpush.msra.mxu0 %v17201_v37  ;;  %3496 = vmatpush.msra.mxu2 %v17207_v7  ;;  %v17214_v7 = vld [vmem:[#allocation151_spill] sm:$0xff] }
 0x2c1   :  { %3548 = vmatpush.msra.mxu3 %v17208_v44  ;;  %3283 = vmatmul.f32.gmra.mxu2 %v13092_v13 }
 0x2c2   :  { %3333 = vmatpush.msra.mxu0 %v17205_v39  ;;  %3418 = vmatpush.msra.mxu1 %v17209_v26  ;;  %v17217_v26 = vld [vmem:[#allocation154_spill] sm:$0xff] }
 0x2c3   :  { %3499 = vmatpush.msra.mxu2 %v17210_v58  ;;  %3550 = vmatpush.msra.mxu3 %v17211_v22  ;;  %v17218_v58 = vld [vmem:[#allocation193_spill] sm:$0xff] }
 0x2c4   :  { %3324 = vmatmul.f32.gmra.mxu3 %v13092_v13  ;;  %3335 = vmatpush.msra.mxu0 %v17208_v44 }
 0x2c5   :  { %3424 = vmatpush.msra.mxu1 %v17212_v40  ;;  %3502 = vmatpush.msra.mxu2 %v17213_v8  ;;  %v17220_v40 = vld [vmem:[#allocation158_spill] sm:$0xff]  ;;  %v17221_v8 = vld [vmem:[#allocation196_spill] sm:$0xff] }
 0x2c6   :  { %3552 = vmatpush.msra.mxu3 %v17214_v7  ;;  %3337 = vmatpush.msra.mxu0 %v17211_v22 }
 0x2c7   :  { %3430 = vmatpush.msra.mxu1 %v17215_v60  ;;  %3505 = vmatpush.msra.mxu2 %v17216_v23  ;;  %v17223_v60 = vld [vmem:[#allocation161_spill] sm:$0xff]  ;;  %v17224_v23 = vld [vmem:[#allocation198_spill] sm:$0xff] }
 0x2c8   :  { %3554 = vmatpush.msra.mxu3 %v17217_v26  ;;  %3165 = vmatmul.f32.gmra.mxu0 %v13103_v32 }
 0x2c9   :  { %3339 = vmatpush.msra.mxu0 %v17214_v7  ;;  %3436 = vmatpush.msra.mxu1 %v17218_v58  ;;  %v17228_v58 = vld [vmem:[#allocation182_spill] sm:$0xff] }
 0x2ca   :  { %3508 = vmatpush.msra.mxu2 %v17219_v56  ;;  %3556 = vmatpush.msra.mxu3 %v17220_v40  ;;  %v17227_v56 = vld [vmem:[#allocation200_spill] sm:$0xff] }
 0x2cb   :  { %3341 = vmatpush.msra.mxu0 %v17217_v26  ;;  %3442 = vmatpush.msra.mxu1 %v17221_v8  ;;  %v17231_v8 = vld [vmem:[#allocation186_spill] sm:$0xff] }
 0x2cc   :  { %3511 = vmatpush.msra.mxu2 %v17222_v51  ;;  %3558 = vmatpush.msra.mxu3 %v17223_v60  ;;  %v17230_v51 = vld [vmem:[#allocation201_spill] sm:$0xff] }
 0x2cd   :  { %3343 = vmatpush.msra.mxu0 %v17220_v40  ;;  %3448 = vmatpush.msra.mxu1 %v17224_v23  ;;  %v17234_v23 = vld [vmem:[#allocation190_spill] sm:$0xff] }
 0x2ce   :  { %3514 = vmatpush.msra.mxu2 %v17225_v33  ;;  %3560 = vmatpush.msra.mxu3 %v17226_v21  ;;  %v17233_v33 = vld [vmem:[#allocation202_spill] sm:$0xff] }
 0x2cf   :  { %3345 = vmatpush.msra.mxu0 %v17223_v60  ;;  %3454 = vmatpush.msra.mxu1 %v17227_v56  ;;  %v17237_v56 = vld [vmem:[#allocation192_spill] sm:$0xff] }
 0x2d0   :  { %3517 = vmatpush.msra.mxu2 %v17228_v58  ;;  %3562 = vmatpush.msra.mxu3 %v17229_v34  ;;  %v17236_v58 = vld [vmem:[#allocation203_spill] sm:$0xff] }
 0x2d1   :  { %3347 = vmatpush.msra.mxu0 %v17226_v21  ;;  %3460 = vmatpush.msra.mxu1 %v17230_v51  ;;  %v17248_v51 = vld [vmem:[#allocation18_spill] sm:$0xff] }
 0x2d2   :  { %3520 = vmatpush.msra.mxu2 %v17231_v8  ;;  %3564 = vmatpush.msra.mxu3 %v17232_v24  ;;  %v17239_v8 = vld [vmem:[#allocation195_spill] sm:$0xff] }
 0x2d3   :  { %3349 = vmatpush.msra.mxu0 %v17229_v34  ;;  %3466 = vmatpush.msra.mxu1 %v17233_v33  ;;  %v17240_v33 = vld [vmem:[#allocation184_spill] sm:$0xff] }
 0x2d4   :  { %3523 = vmatpush.msra.mxu2 %v17234_v23  ;;  %3566 = vmatpush.msra.mxu3 %v17235_v61  ;;  %v17243_v23 = vld [vmem:[#allocation38_spill] sm:$0xff] }
 0x2d5   :  { %3351 = vmatpush.msra.mxu0 %v17232_v24  ;;  %3472 = vmatpush.msra.mxu1 %v17236_v58  ;;  %v17241_v58 = vld [vmem:[#allocation188_spill] sm:$0xff] }
 0x2d6   :  { %3526 = vmatpush.msra.mxu2 %v17237_v56  ;;  %3568 = vmatpush.msra.mxu3 %v17238_v0  ;;  %v17242_v56 = vld [vmem:[#allocation16_spill] sm:$0xff] }
 0x2d7   :  { %3474 = vmatmul.f32.vlgmr.msra.gmra.mxu1 %v13068_v10  ;;  %3353 = vmatpush.msra.mxu0 %v17235_v61 }
 0x2d8   :  { %3660 = vmatpush.msrb.mxu1 %v17197_v45  ;;  %3529 = vmatpush.msra.mxu2 %v17239_v8  ;;  %v17244_v8 = vld [vmem:[#allocation17_spill] sm:$0xff] }
 0x2d9   :  { %3570 = vmatpush.msra.mxu3 %v17240_v33  ;;  %3532 = vmatmul.f32.vlgmr.msra.gmra.mxu2 %v13074_v20  ;;  %v17245_v20 = vld [vmem:[#allocation146_spill] sm:$0xff] }
 0x2da   :  { %3662 = vmatpush.msrb.mxu1 %v17201_v37  ;;  %3355 = vmatpush.msra.mxu0 %v17238_v0 }
 0x2db   :  { %3572 = vmatpush.msra.mxu3 %v17241_v58  ;;  %3802 = vmatpush.msrb.mxu2 %v17242_v56 }
 0x2dc   :  { %3576 = vmatmul.f32.vlgmr.msra.gmra.mxu3 %v13080_v53  ;;  %3664 = vmatpush.msrb.mxu1 %v17205_v39  ;;  %v17246_v53 = vld [vmem:[#allocation39_spill] sm:$0xff] }
 0x2dd   :  { %3357 = vmatpush.msra.mxu0 %v17240_v33  ;;  %3855 = vmatpush.msrb.mxu3 %v17243_v23  ;;  %v17247_v23 = vld [vmem:[#allocation149_spill] sm:$0xff] }
 0x2de   :  { %3666 = vmatpush.msrb.mxu1 %v17208_v44  ;;  %3804 = vmatpush.msrb.mxu2 %v17244_v8  ;;  %v17249_v44 = vld [vmem:[#allocation152_spill] sm:$0xff] }
 0x2df   :  { %3359 = vmatpush.msra.mxu0 %v17241_v58  ;;  %3478 = vmatmul.f32.gmra.mxu1 %v13092_v13 }
 0x2e0   :  { %3365 = vmatmul.f32.vlgmr.msra.gmra.mxu0 %v13095_v18  ;;  %3668 = vmatpush.msrb.mxu1 %v17211_v22  ;;  %v17250_v18 = vld [vmem:[#allocation43_spill] sm:$0xff] }
 0x2e1   :  { %3589 = vmatpush.msrb.mxu0 %v17245_v20  ;;  %3537 = vmatmul.f32.gmra.mxu2 %v13103_v32  ;;  %v17251_v20 = vld [vmem:[#allocation19_spill] sm:$0xff] }
 0x2e2   :  { %3670 = vmatpush.msrb.mxu1 %v17214_v7  ;;  %3861 = vmatpush.msrb.mxu3 %v17246_v53  ;;  %v17252_v32 = vld [vmem:[#allocation155_spill] sm:$0xff] }
 0x2e3   :  { %3593 = vmatpush.msrb.mxu0 %v17247_v23  ;;  %3806 = vmatpush.msrb.mxu2 %v17248_v51  ;;  %v17253_v7 = vld [vmem:[#allocation47_spill] sm:$0xff] }
 0x2e4   :  { %3582 = vmatmul.f32.gmra.mxu3 %v13110_v12  ;;  %3672 = vmatpush.msrb.mxu1 %v17217_v26  ;;  %v17254_v23 = vld [vmem:[#allocation159_spill] sm:$0xff]  ;;  %v17255_v12 = vld [vmem:[#allocation50_spill] sm:$0xff] }
 0x2e5   :  { %3597 = vmatpush.msrb.mxu0 %v17249_v44  ;;  %3867 = vmatpush.msrb.mxu3 %v17250_v18  ;;  %v17256_v44 = vld [vmem:[#allocation20_spill] sm:$0xff]  ;;  %v17257_v18 = vld [vmem:[#allocation163_spill] sm:$0xff] }
 0x2e6   :  { %3674 = vmatpush.msrb.mxu1 %v17220_v40  ;;  %3808 = vmatpush.msrb.mxu2 %v17251_v20  ;;  %v17258_v53 = vld [vmem:[#allocation55_spill] sm:$0xff] }
 0x2e7   :  { %3601 = vmatpush.msrb.mxu0 %v17252_v32  ;;  %3873 = vmatpush.msrb.mxu3 %v17253_v7  ;;  %v17259_v32 = vld [vmem:[#allocation21_spill] sm:$0xff]  ;;  %v17260_v7 = vld [vmem:[#allocation168_spill] sm:$0xff] }
 0x2e8   :  { %3373 = vmatmul.f32.gmra.mxu0 %v13122_v48  ;;  %3676 = vmatpush.msrb.mxu1 %v17223_v60  ;;  %v17261_v48 = vld [vmem:[#allocation58_spill] sm:$0xff] }
 0x2e9   :  { %3605 = vmatpush.msrb.mxu0 %v17254_v23  ;;  %3879 = vmatpush.msrb.mxu3 %v17255_v12  ;;  %v17262_v23 = vld [vmem:[#allocation25_spill] sm:$0xff]  ;;  %v17263_v12 = vld [vmem:[#allocation172_spill] sm:$0xff]  ;;  %v17284_v60 = vld [vmem:[#allocation54_spill] sm:$0xff] }
 0x2ea   :  { %3678 = vmatpush.msrb.mxu1 %v17226_v21  ;;  %3810 = vmatpush.msrb.mxu2 %v17256_v44  ;;  %v17264_v21 = vld [vmem:[#allocation63_spill] sm:$0xff] }
 0x2eb   :  { %3609 = vmatpush.msrb.mxu0 %v17257_v18  ;;  %3885 = vmatpush.msrb.mxu3 %v17258_v53  ;;  %v17265_v18 = vld [vmem:[#allocation31_spill] sm:$0xff] }
 0x2ec   :  { %3680 = vmatpush.msrb.mxu1 %v17229_v34  ;;  %3812 = vmatpush.msrb.mxu2 %v17259_v32  ;;  %v17266_v53 = vld [vmem:[#allocation175_spill] sm:$0xff] }
 0x2ed   :  { %3613 = vmatpush.msrb.mxu0 %v17260_v7  ;;  %3891 = vmatpush.msrb.mxu3 %v17261_v48  ;;  %v17267_v34 = vld [vmem:[#allocation67_spill] sm:$0xff]  ;;  %v17268_v7 = vld [vmem:[#allocation33_spill] sm:$0xff] }
 0x2ee   :  { %3682 = vmatpush.msrb.mxu1 %v17232_v24  ;;  %3814 = vmatpush.msrb.mxu2 %v17262_v23  ;;  %v17269_v48 = vld [vmem:[#allocation179_spill] sm:$0xff]  ;;  %v17270_v24 = vld [vmem:[#allocation72_spill] sm:$0xff] }
 0x2ef   :  { %3617 = vmatpush.msrb.mxu0 %v17263_v12  ;;  %3897 = vmatpush.msrb.mxu3 %v17264_v21  ;;  %v17271_v12 = vld [vmem:[#allocation36_spill] sm:$0xff]  ;;  %v17272_v21 = vld [vmem:[#allocation185_spill] sm:$0xff] }
 0x2f0   :  { %3684 = vmatpush.msrb.mxu1 %v17235_v61  ;;  %3816 = vmatpush.msrb.mxu2 %v17265_v18  ;;  %v17273_v61 = vld [vmem:[#allocation75_spill] sm:$0xff] }
 0x2f1   :  { %3621 = vmatpush.msrb.mxu0 %v17266_v53  ;;  %3903 = vmatpush.msrb.mxu3 %v17267_v34  ;;  %v17274_v53 = vld [vmem:[#allocation44_spill] sm:$0xff]  ;;  %v17275_v34 = vld [vmem:[#allocation189_spill] sm:$0xff] }
 0x2f2   :  { %3686 = vmatpush.msrb.mxu1 %v17238_v0  ;;  %3818 = vmatpush.msrb.mxu2 %v17268_v7  ;;  %v17283_v0 = vld [vmem:[#allocation197_spill] sm:$0xff] }
 0x2f3   :  { %3625 = vmatpush.msrb.mxu0 %v17269_v48  ;;  %3909 = vmatpush.msrb.mxu3 %v17270_v24  ;;  %v17276_v48 = vld [vmem:[#allocation78_spill] sm:$0xff]  ;;  %v17277_v24 = vld [vmem:[#allocation191_spill] sm:$0xff] }
 0x2f4   :  { %3688 = vmatpush.msrb.mxu1 %v17240_v33  ;;  %3820 = vmatpush.msrb.mxu2 %v17271_v12  ;;  %v17278_v33 = vld [vmem:[#allocation46_spill] sm:$0xff] }
 0x2f5   :  { %3629 = vmatpush.msrb.mxu0 %v17272_v21  ;;  %3915 = vmatpush.msrb.mxu3 %v17273_v61  ;;  %v17279_v21 = vld [vmem:[#allocation82_spill] sm:$0xff] }
 0x2f6   :  { %3690 = vmatpush.msrb.mxu1 %v17241_v58  ;;  %3822 = vmatpush.msrb.mxu2 %v17274_v53  ;;  %v17280_v61 = vld [vmem:[#allocation194_spill] sm:$0xff]  ;;  %v17281_v58 = vld [vmem:[#allocation51_spill] sm:$0xff] }
 0x2f7   :  { %3633 = vmatpush.msrb.mxu0 %v17275_v34  ;;  %3692 = vmatmul.f32.vlgmr.msrb.gmra.mxu1 %v13068_v10  ;;  %v17282_v34 = vld [vmem:[#allocation84_spill] sm:$0xff] }
 0x2f8   :  { %4015 = vmatpush.msra.mxu1 %v17242_v56  ;;  %3921 = vmatpush.msrb.mxu3 %v17276_v48  ;;  %v17286_v48 = vld [vmem:[#allocation199_spill] sm:$0xff] }
 0x2f9   :  { %3637 = vmatpush.msrb.mxu0 %v17277_v24  ;;  %3824 = vmatpush.msrb.mxu2 %v17278_v33  ;;  %v17285_v24 = vld [vmem:[#allocation88_spill] sm:$0xff] }
 0x2fa   :  { %4017 = vmatpush.msra.mxu1 %v17244_v8  ;;  %3927 = vmatpush.msrb.mxu3 %v17279_v21  ;;  %v17288_v21 = vld [vmem:[#allocation92_spill] sm:$0xff] }
 0x2fb   :  { %3641 = vmatpush.msrb.mxu0 %v17280_v61  ;;  %3826 = vmatpush.msrb.mxu2 %v17281_v58  ;;  %v17287_v61 = vld [vmem:[#allocation22_spill] sm:$0xff] }
 0x2fc   :  { %4019 = vmatpush.msra.mxu1 %v17248_v51  ;;  %3933 = vmatpush.msrb.mxu3 %v17282_v34  ;;  %v17290_v34 = vld [vmem:[#allocation59_spill] sm:$0xff] }
 0x2fd   :  { %3645 = vmatpush.msrb.mxu0 %v17283_v0  ;;  %3828 = vmatpush.msrb.mxu2 %v17284_v60  ;;  %v17289_v0 = vld [vmem:[#allocation23_spill] sm:$0xff] }
 0x2fe   :  { %4021 = vmatpush.msra.mxu1 %v17251_v20  ;;  %3939 = vmatpush.msrb.mxu3 %v17285_v24  ;;  %v17297_v24 = vld [vmem:[#allocation34_spill] sm:$0xff] }
 0x2ff   :  { %3649 = vmatpush.msrb.mxu0 %v17286_v48  ;;  %3696 = vmatmul.f32.gmra.mxu1 %v13092_v13  ;;  %v17291_v48 = vld [vmem:[#allocation24_spill] sm:$0xff] }
 0x300   :  { %3651 = vmatmul.f32.vlgmr.msrb.gmra.mxu0 %v13068_v10  ;;  %4023 = vmatpush.msra.mxu1 %v17256_v44  ;;  %v17292_v10 = vld [vmem:[#allocation64_spill] sm:$0xff] }
 0x301   :  { %3957 = vmatpush.msra.mxu0 %v17287_v61  ;;  %3945 = vmatpush.msrb.mxu3 %v17288_v21  ;;  %v17293_v21 = vld [vmem:[#allocation26_spill] sm:$0xff]  ;;  %v17294_v61 = vld [vmem:[#allocation28_spill] sm:$0xff] }
 0x302   :  { %4025 = vmatpush.msra.mxu1 %v17259_v32  ;;  %3830 = vmatpush.msrb.mxu2 %v17290_v34 }
 0x303   :  { %4133 = vmatpush.msra.mxu3 %v17242_v56  ;;  %3960 = vmatpush.msra.mxu0 %v17289_v0  ;;  %v17295_v0 = vld [vmem:[#allocation27_spill] sm:$0xff] }
 0x304   :  { %4027 = vmatpush.msra.mxu1 %v17262_v23  ;;  %3832 = vmatpush.msrb.mxu2 %v17292_v10 }
 0x305   :  { %4135 = vmatpush.msra.mxu3 %v17244_v8  ;;  %3963 = vmatpush.msra.mxu0 %v17291_v48  ;;  %v17296_v48 = vld [vmem:[#allocation29_spill] sm:$0xff] }
 0x306   :  { %4029 = vmatpush.msra.mxu1 %v17265_v18  ;;  %4062 = vmatpush.msra.mxu2 %v17294_v61  ;;  %v17299_v61 = vld [vmem:[#allocation37_spill] sm:$0xff] }
 0x307   :  { %4137 = vmatpush.msra.mxu3 %v17248_v51  ;;  %3966 = vmatpush.msra.mxu0 %v17293_v21  ;;  %v17298_v21 = vld [vmem:[#allocation30_spill] sm:$0xff] }
 0x308   :  { %3655 = vmatmul.f32.gmra.mxu0 %v13092_v13  ;;  %4031 = vmatpush.msra.mxu1 %v17268_v7  ;;  %v17300_v13 = vld [vmem:[#allocation32_spill] sm:$0xff] }
 0x309   :  { %3969 = vmatpush.msra.mxu0 %v17295_v0  ;;  %4139 = vmatpush.msra.mxu3 %v17251_v20  ;;  %v17301_v0 = vld [vmem:[#allocation41_spill] sm:$0xff] }
 0x30a   :  { %4033 = vmatpush.msra.mxu1 %v17271_v12  ;;  %4066 = vmatpush.msra.mxu2 %v17296_v48  ;;  %v17303_v48 = vld [vmem:[#allocation45_spill] sm:$0xff] }
 0x30b   :  { %3972 = vmatpush.msra.mxu0 %v17297_v24  ;;  %4141 = vmatpush.msra.mxu3 %v17256_v44  ;;  %v17302_v24 = vld [vmem:[#allocation35_spill] sm:$0xff] }
 0x30c   :  { %4035 = vmatpush.msra.mxu1 %v17274_v53  ;;  %4070 = vmatpush.msra.mxu2 %v17298_v21  ;;  %v17305_v21 = vld [vmem:[#allocation49_spill] sm:$0xff] }
 0x30d   :  { %3975 = vmatpush.msra.mxu0 %v17299_v61  ;;  %4143 = vmatpush.msra.mxu3 %v17259_v32  ;;  %v17304_v61 = vld [vmem:[#allocation40_spill] sm:$0xff] }
 0x30e   :  { %4037 = vmatpush.msra.mxu1 %v17278_v33  ;;  %4074 = vmatpush.msra.mxu2 %v17300_v13  ;;  %v17307_v13 = vld [vmem:[#allocation53_spill] sm:$0xff] }
 0x30f   :  { %3978 = vmatpush.msra.mxu0 %v17301_v0  ;;  %4145 = vmatpush.msra.mxu3 %v17262_v23  ;;  %v17306_v0 = vld [vmem:[#allocation42_spill] sm:$0xff] }
 0x310   :  { %4039 = vmatpush.msra.mxu1 %v17281_v58  ;;  %4078 = vmatpush.msra.mxu2 %v17302_v24  ;;  %v17309_v24 = vld [vmem:[#allocation57_spill] sm:$0xff] }
 0x311   :  { %3981 = vmatpush.msra.mxu0 %v17303_v48  ;;  %4147 = vmatpush.msra.mxu3 %v17265_v18  ;;  %v17308_v48 = vld [vmem:[#allocation48_spill] sm:$0xff]  ;;  %v17310_v18 = vld [vmem:[#allocation87_spill] sm:$0xff] }
 0x312   :  { %4041 = vmatpush.msra.mxu1 %v17284_v60  ;;  %4082 = vmatpush.msra.mxu2 %v17304_v61  ;;  %v17312_v61 = vld [vmem:[#allocation61_spill] sm:$0xff] }
 0x313   :  { %3984 = vmatpush.msra.mxu0 %v17305_v21  ;;  %4149 = vmatpush.msra.mxu3 %v17268_v7  ;;  %v17311_v21 = vld [vmem:[#allocation52_spill] sm:$0xff]  ;;  %v17313_v7 = vld [vmem:[#allocation91_spill] sm:$0xff] }
 0x314   :  { %4043 = vmatpush.msra.mxu1 %v17290_v34  ;;  %4086 = vmatpush.msra.mxu2 %v17306_v0  ;;  %v17315_v0 = vld [vmem:[#allocation62_spill] sm:$0xff] }
 0x315   :  { %3987 = vmatpush.msra.mxu0 %v17307_v13  ;;  %4151 = vmatpush.msra.mxu3 %v17271_v12  ;;  %v17314_v13 = vld [vmem:[#allocation56_spill] sm:$0xff]  ;;  %v17316_v12 = vld [vmem:[#allocation97_spill] sm:$0xff] }
 0x316   :  { %4045 = vmatpush.msra.mxu1 %v17292_v10  ;;  %4090 = vmatpush.msra.mxu2 %v17308_v48  ;;  %v2622_v48 = vpop.f32.mrf.mxu0 }
 0x317   :  { %3990 = vmatpush.msra.mxu0 %v17309_v24  ;;  %4153 = vmatpush.msra.mxu3 %v17274_v53  ;;  %v17318_v24 = vld [vmem:[#allocation69_spill] sm:$0xff] }
 0x318   :  { %4227 = vmatpush.msrb.mxu1 %v17310_v18  ;;  %4094 = vmatpush.msra.mxu2 %v17311_v21  ;;  %v17317_v18 = vld [vmem:[#allocation60_spill] sm:$0xff] }
 0x319   :  { %3993 = vmatpush.msra.mxu0 %v17312_v61  ;;  %4155 = vmatpush.msra.mxu3 %v17278_v33  ;;  %v17319_v21 = vld [vmem:[#allocation100_spill] sm:$0xff]  ;;  %v17321_v61 = vld [vmem:[#allocation73_spill] sm:$0xff]  ;;  %v17337_v33 = vld [vmem:[#allocation139_spill] sm:$0xff] }
 0x31a   :  { %4233 = vmatpush.msrb.mxu1 %v17313_v7  ;;  %4098 = vmatpush.msra.mxu2 %v17314_v13  ;;  %v17320_v7 = vld [vmem:[#allocation65_spill] sm:$0xff]  ;;  %v17322_v13 = vld [vmem:[#allocation104_spill] sm:$0xff] }
 0x31b   :  { %3996 = vmatpush.msra.mxu0 %v17315_v0  ;;  %4157 = vmatpush.msra.mxu3 %v17281_v58  ;;  %v17324_v0 = vld [vmem:[#allocation68_spill] sm:$0xff]  ;;  %v17335_v58 = vld [vmem:[#allocation137_spill] sm:$0xff] }
 0x31c   :  { %4239 = vmatpush.msrb.mxu1 %v17316_v12  ;;  %4102 = vmatpush.msra.mxu2 %v17317_v18  ;;  %v17323_v12 = vld [vmem:[#allocation112_spill] sm:$0xff]  ;;  %v2731_v18 = vpop.f32.mrf.mxu1 }
 0x31d   :  { %3999 = vmatpush.msra.mxu0 %v17318_v24  ;;  %4159 = vmatpush.msra.mxu3 %v17284_v60  ;;  %v2789_v24 = vpop.f32.mrf.mxu2  ;;  %v17334_v60 = vld [vmem:[#allocation135_spill] sm:$0xff]  ;;  %v2732_v44 = vadd.f32 %v2731_v18, %v2622_v48 }
 0x31e   :  { %4245 = vmatpush.msrb.mxu1 %v17319_v21  ;;  %4106 = vmatpush.msra.mxu2 %v17320_v7  ;;  %v17325_v21 = vld [vmem:[#allocation116_spill] sm:$0xff]  ;;  %v17326_v7 = vld [vmem:[#allocation70_spill] sm:$0xff] }
 0x31f   :  { %4002 = vmatpush.msra.mxu0 %v17321_v61  ;;  %4161 = vmatpush.msra.mxu3 %v17290_v34  ;;  %v17328_v61 = vld [vmem:[#allocation76_spill] sm:$0xff]  ;;  %v2630_v34 = vpop.f32.mrf.mxu0  ;;  %v2790_v51 = vadd.f32 %v2789_v24, %v2732_v44 }
 0x320   :  { %4251 = vmatpush.msrb.mxu1 %v17322_v13  ;;  %4110 = vmatpush.msra.mxu2 %v17324_v0  ;;  %v17327_v13 = vld [vmem:[#allocation118_spill] sm:$0xff] }
 0x321   :  { %4174 = vmatpush.msrb.mxu0 %v11705_v25  ;;  %4163 = vmatpush.msra.mxu3 %v17292_v10  ;;  %v17329_v0 = vld [vmem:[#allocation122_spill] sm:$0xff]  ;;  %v17331_v10 = vld [vmem:[#allocation125_spill] sm:$0xff] }
 0x322   :  { %4257 = vmatpush.msrb.mxu1 %v17323_v12  ;;  %4114 = vmatpush.msra.mxu2 %v17326_v7  ;;  %v17330_v12 = vld [vmem:[#allocation79_spill] sm:$0xff]  ;;  %v17332_v7 = vld [vmem:[#allocation130_spill] sm:$0xff] }
 0x323   :  { %4176 = vmatpush.msrb.mxu0 %v11712_v30 }
 0x324   :  { %4263 = vmatpush.msrb.mxu1 %v17325_v21  ;;  %4118 = vmatpush.msra.mxu2 %v17328_v61  ;;  %v2833_v21 = vpop.f32.mrf.mxu3  ;;  %v17333_v61 = vld [vmem:[#allocation133_spill] sm:$0xff] }
 0x325   :  { %4178 = vmatpush.msrb.mxu0 %v11759_v28  ;;  %v2834_v40 = vadd.f32 %v2833_v21, %v2790_v51 }
 0x326   :  { %4269 = vmatpush.msrb.mxu1 %v17327_v13  ;;  %4122 = vmatpush.msra.mxu2 %v17330_v12  ;;  %v2735_v13 = vpop.f32.mrf.mxu1 }
 0x327   :  { %4180 = vmatpush.msrb.mxu0 %v11775_v31  ;;  %v2908_v12 = vpop.f32.mrf.mxu0  ;;  %v2736_v26 = vadd.f32 %v2735_v13, %v2630_v34  ;;  %v2576_v34 = vld [vmem:[#allocation3 + $0x3c] sm:$0xff] }
 0x328   :  { %4275 = vmatpush.msrb.mxu1 %v17329_v0  ;;  %v2794_v0 = vpop.f32.mrf.mxu2  ;;  %v2909_v45 = vadd.f32 %v2908_v12, %v2834_v40 }
 0x329   :  { %4182 = vmatpush.msrb.mxu0 %v16958_v42 }
 0x32a   :  { %4281 = vmatpush.msrb.mxu1 %v17331_v10  ;;  %v17336_v10 = vld [vmem:[#allocation138_spill] sm:$0xff] }
 0x32b   :  { %4184 = vmatpush.msrb.mxu0 %v16961_v5 }
 0x32c   :  { %4287 = vmatpush.msrb.mxu1 %v17332_v7  ;;  %v2839_v7 = vpop.f32.mrf.mxu3 }
 0x32d   :  { %4186 = vmatpush.msrb.mxu0 %v16964_v57 }
 0x32e   :  { %4293 = vmatpush.msrb.mxu1 %v17333_v61  ;;  %v2949_v61 = vpop.f32.mrf.mxu1 }
 0x32f   :  { %4188 = vmatpush.msrb.mxu0 %v16967_v36  ;;  %v2912_v53 = vpop.f32.mrf.mxu0 }
 0x330   :  { %4299 = vmatpush.msrb.mxu1 %v17334_v60  ;;  %v2994_v60 = vpop.f32.mrf.mxu2 }
 0x331   :  { %4190 = vmatpush.msrb.mxu0 %v16970_v3 }
 0x332   :  { %4305 = vmatpush.msrb.mxu1 %v17335_v58 }
 0x333   :  { %4192 = vmatpush.msrb.mxu0 %v16973_v14 }
 0x334   :  { %4311 = vmatpush.msrb.mxu1 %v17336_v10  ;;  %v3103_v58 = vpop.f32.mrf.mxu3 }
 0x335   :  { %4194 = vmatpush.msrb.mxu0 %v17172_v29  ;;  %v3104_v20 = vadd.f32 %v3103_v58, %v2994_v60  ;;  %v2950_v29 = vadd.f32 %v2949_v61, %v2909_v45 }
 0x336   :  { %4317 = vmatpush.msrb.mxu1 %v17337_v33  ;;  %v2953_v10 = vpop.f32.mrf.mxu1 }
 0x337   :  { %4196 = vmatpush.msrb.mxu0 %v17175_v62 }
 0x338   :  { %v3002_v23 = vpop.f32.mrf.mxu2 }
 0x339   :  { %4198 = vmatpush.msrb.mxu0 %v17178_v27  ;;  %v2795_v27 = vadd.f32 %v2794_v0, %v2736_v26 }
 0x33b   :  { %4200 = vmatpush.msrb.mxu0 %v17181_v59  ;;  %v2840_v60 = vadd.f32 %v2839_v7, %v2795_v27 }
 0x33c   :  { %v3161_v32 = vpop.f32.mrf.mxu0  ;;  %v3107_v33 = vpop.f32.mrf.mxu3 }
 0x33d   :  { %4202 = vmatpush.msrb.mxu0 %v17184_v17  ;;  %v3162_v8 = vadd.f32 %v3161_v32, %v3104_v20  ;;  %v3108_v59 = vadd.f32 %v3107_v33, %v3002_v23  ;;  %v2574_v17 = vld [vmem:[#allocation3 + $0x30] sm:$0xff]  ;;  %v2913_v21 = vadd.f32 %v2912_v53, %v2840_v60  ;;  %v2581_v33 = vunpack.c.l.bf16 %v2576_v34 }
 0x33e   :  { %v3205_v56 = vpop.f32.mrf.mxu1  ;;  %v2578_v9 = vunpack.c.l.bf16 %v2574_v17  ;;  %v2579_v58 = vunpack.c.h.bf16 %v2574_v17 }
 0x33f   :  { %4204 = vmatpush.msrb.mxu0 %v17187_v41  ;;  %v3206_v22 = vadd.f32 %v3205_v56, %v3162_v8  ;;  %v2954_v23 = vadd.f32 %v2953_v10, %v2913_v21 }
 0x340   :  { %v3280_v39 = vpop.f32.mrf.mxu2  ;;  %v3700_v20 = vadd.f32 %v2950_v29, %v2578_v9 }
 0x341   :  { %v3281_v62 = vadd.f32 %v3280_v39, %v3206_v22  ;;  %v3703_v61 = vadd.f32 %v2954_v23, %v2581_v33 }
 0x342   :  { %v11131_v40 = vmul.f32 -1.442695, %v3700_v20 }
 0x343   :  { %v11132_v17 = vmul.f32 -1.442695, %v3703_v61 }
 0x344   :  { %v3321_v52 = vpop.f32.mrf.mxu3  ;;  %11242 = vpow2.f32 %v11131_v40 }
 0x345   :  { %v3166_v37 = vpop.f32.mrf.mxu0  ;;  %v3322_v24 = vadd.f32 %v3321_v52, %v3281_v62 }
 0x346   :  { %v3167_v41 = vadd.f32 %v3166_v37, %v3108_v59  ;;  %v3211_v18 = vpop.f32.mrf.mxu1  ;;  %v2582_v59 = vunpack.c.h.bf16 %v2576_v34 }
 0x347   :  { %v3701_v56 = vadd.f32 %v3322_v24, %v2579_v58 }
 0x348   :  { %v3212_v44 = vadd.f32 %v3211_v18, %v3167_v41  ;;  %v3284_v51 = vpop.f32.mrf.mxu2 }
 0x349   :  { %v11133_v26 = vmul.f32 -1.442695, %v3701_v56  ;;  %v2575_v56 = vld [vmem:[#allocation3 + $0x38] sm:$0xf] }
 0x34a   :  { %v3285_v8 = vadd.f32 %v3284_v51, %v3212_v44  ;;  %v11243_v52 = vpop.eup %11242 }
 0x34b   :  { %11244 = vpow2.f32 %v11133_v26  ;;  %v13423_v9 = vadd.f32 1.0, %v11243_v52 }
 0x34c   :  { %v3325_v0 = vpop.f32.mrf.mxu3  ;;  %11246 = vpow2.f32 %v11132_v17 }
 0x34d   :  { %v3326_v37 = vadd.f32 %v3325_v0, %v3285_v8  ;;  %vm3719_vm1 = vweird.f32 %v13423_v9 }
 0x34f   :  { %v3704_v27 = vadd.f32 %v3326_v37, %v2582_v59  ;;  %v2580_v37 = vunpack.c.l.bf16 %v2575_v56 }
 0x351   :  { %v11134_v62 = vmul.f32 -1.442695, %v3704_v27  ;;  %v11245_v29 = vpop.eup %11244 }
 0x352   :  { %v13425_v41 = vadd.f32 1.0, %v11245_v29  ;;  %v11247_v39 = vpop.eup %11246 }
 0x353   :  { %11248 = vpow2.f32 %v11134_v62  ;;  %v13429_v53 = vadd.f32 1.0, %v11247_v39  ;;  %v3725_v39 = vand.u32 2147483648, %v13423_v9 }
 0x354   :  { %v3475_v7 = vpop.f32.mrf.mxu1  ;;  %11250 = vrcp.f32 %v13423_v9  ;;  %vm3757_vm4 = vweird.f32 %v13425_v41 }
 0x355   :  { %11252 = vrcp.f32 %v13425_v41  ;;  %vm3734_vm7 = vweird.f32 %v13429_v53 }
 0x356   :  { %11254 = vrcp.f32 %v13429_v53 }
 0x359   :  { %v11249_v45 = vpop.eup %11248 }
 0x35a   :  { %v11251_v32 = vpop.eup %11250  ;;  %v13431_v12 = vadd.f32 1.0, %v11249_v45 }
 0x35b   :  { %v13433_v48 = vpop.eup %11252  ;;  %v3715_v18 = vmul.f32 %v11251_v32, %v13423_v9  ;;  %vm3720_vm0 = vweird.f32 %v11251_v32 }
 0x35c   :  { %v3479_v13 = vpop.f32.mrf.mxu1  ;;  %v3533_v60 = vpop.f32.mrf.mxu2  ;;  %11256 = vrcp.f32 %v13431_v12  ;;  %v3753_v24 = vmul.f32 %v13433_v48, %v13425_v41  ;;  %vm3758_vm2 = vweird.f32 %v13433_v48  ;;  %vm13454_vm3 = vmor %vm3719_vm1, %vm3720_vm0  ;;  %vm3772_vm12 = vweird.f32 %v13431_v12 }
 0x35d   :  { %v3366_v22 = vpop.f32.mrf.mxu0  ;;  %v3716_v20 = vsub.f32 1.0, %v3715_v18  ;;  %v13440_v34 = vpop.eup %11254  ;;  %v3723_v18 = vand.u32 2147483647, %v13423_v9  ;;  %vm13464_vm5 = vmor %vm3757_vm4, %vm3758_vm2 }
 0x35e   :  { %v3476_v10 = vadd.f32 %v3475_v7, %v3366_v22  ;;  %v3754_v51 = vsub.f32 1.0, %v3753_v24  ;;  %v3730_v0 = vmul.f32 %v13440_v34, %v13429_v53  ;;  %vm3735_vm8 = vweird.f32 %v13440_v34 }
 0x35f   :  { %v3577_v21 = vpop.f32.mrf.mxu3  ;;  %v3717_v23 = vmul.f32 %v11251_v32, %v3716_v20  ;;  %vm3724_vm6 = vcmp.eq.f32.partialorder %v3723_v18, 8.507059e+37  ;;  %vm3736_vm11 = vmor %vm3734_vm7, %vm3735_vm8  ;;  %v3776_v18 = vand.u32 2147483647, %v13431_v12 }
 0x360   :  { %v3534_v44 = vadd.f32 %v3533_v60, %v3476_v10  ;;  %v3755_v27 = vmul.f32 %v13433_v48, %v3754_v51  ;;  %v3731_v7 = vsub.f32 1.0, %v3730_v0  ;;  %v3761_v51 = vand.u32 2147483647, %v13425_v41 }
 0x361   :  { %v3718_v22 = vadd.f32 %v11251_v32, %v3717_v23  ;;  %vm3777_vm15 = vcmp.eq.f32.partialorder %v3776_v18, 8.507059e+37  ;;  %v17359_v18 = vld [vmem:[#allocation156_spill] sm:$0xff] }
 0x362   :  { %v13442_v8 = vpop.eup %11256  ;;  %v3578_v40 = vadd.f32 %v3577_v21, %v3534_v44  ;;  %v3756_v60 = vadd.f32 %v13433_v48, %v3755_v27  ;;  %v3763_v44 = vand.u32 2147483648, %v13425_v41  ;;  %v3732_v21 = vmul.f32 %v13440_v34, %v3731_v7 }
 0x363   :  { %v3768_v17 = vmul.f32 %v13442_v8, %v13431_v12  ;;  %v3722_v9 = vsel %vm13454_vm3, %v11251_v32, %v3718_v22  ;;  %vm3762_vm9 = vcmp.eq.f32.partialorder %v3761_v51, 8.507059e+37  ;;  %v3738_v7 = vand.u32 2147483647, %v13429_v53 }
 0x364   :  { %v3538_v52 = vpop.f32.mrf.mxu2  ;;  %v3764_v32 = vor.u32 1.1754944e-38, %v3763_v44  ;;  %v3733_v41 = vadd.f32 %v13440_v34, %v3732_v21  ;;  %vm3773_vm10 = vweird.f32 %v13442_v8 }
 0x365   :  { %v3374_v58 = vpop.f32.mrf.mxu0  ;;  %v3769_v10 = vsub.f32 1.0, %v3768_v17  ;;  %vm3774_vm13 = vmor %vm3772_vm12, %vm3773_vm10  ;;  %vm3739_vm14 = vcmp.eq.f32.partialorder %v3738_v7, 8.507059e+37  ;;  %v17353_v7 = vld [vmem:[#allocation114_spill] sm:$0xff] }
 0x366   :  { %v3480_v33 = vadd.f32 %v3479_v13, %v3374_v58  ;;  %v2577_v58 = vld [vmem:[#allocation3 + $0x44] sm:$0xf] }
 0x367   :  { %v3583_v13 = vpop.f32.mrf.mxu3  ;;  %v2583_v23 = vunpack.c.l.bf16 %v2577_v58 }
 0x368   :  { %v3539_v62 = vadd.f32 %v3538_v52, %v3480_v33  ;;  %v3740_v52 = vand.u32 2147483648, %v13429_v53 }
 0x36a   :  { %v3584_v20 = vadd.f32 %v3583_v13, %v3539_v62  ;;  %v3737_v13 = vsel %vm3736_vm11, %v13440_v34, %v3733_v41  ;;  %v3741_v53 = vor.u32 1.1754944e-38, %v3740_v52  ;;  %v17348_v41 = vld [vmem:[#allocation115_spill] sm:$0xff]  ;;  %v17350_v52 = vld [vmem:[#allocation109_spill] sm:$0xff] }
 0x36c   :  { %v3742_v58 = vsel %vm3739_vm14, %v3741_v53, %v3737_v13  ;;  %v17358_v13 = vld [vmem:[#allocation134_spill] sm:$0xff]  ;;  %v17360_v53 = vld [vmem:[#allocation121_spill] sm:$0xff] }
 0x374   :  { %v3693_v26 = vpop.f32.mrf.mxu1 }
 0x37d   :  { %v3652_v59 = vpop.f32.mrf.mxu0 }
 0x37e   :  { %v3653_v61 = vadd.f32 %v3652_v59, %v3578_v40  ;;  %v3726_v40 = vor.u32 1.1754944e-38, %v3725_v39  ;;  %v3760_v59 = vsel %vm13464_vm5, %v13433_v48, %v3756_v60 }
 0x37f   :  { %v3765_v62 = vsel %vm3762_vm9, %v3764_v32, %v3760_v59  ;;  %v17343_v59 = vld [vmem:[#allocation113_spill] sm:$0xff]  ;;  %v17346_v32 = vld [vmem:[#allocation119_spill] sm:$0xff] }
 0x380   :  { %v3694_v29 = vadd.f32 %v3693_v26, %v3653_v61  ;;  %v3770_v26 = vmul.f32 %v13442_v8, %v3769_v10  ;;  %v3727_v61 = vsel %vm3724_vm6, %v3726_v40, %v3722_v9 }
 0x381   :  { %v3784_v48 = vmul.f32 %v3727_v61, %v13062_v63  ;;  %v17345_v61 = vld [vmem:[#allocation111_spill] sm:$0xff] }
 0x382   :  { %v3702_v45 = vadd.f32 %v3694_v29, %v2580_v37  ;;  %v3697_v37 = vpop.f32.mrf.mxu1  ;;  %v3771_v39 = vadd.f32 %v13442_v8, %v3770_v26  ;;  %v17342_v26 = vld [vmem:[#allocation108_spill] sm:$0xff] }
 0x384   :  { %11258 = vtanh.f32 %v3702_v45  ;;  %v3778_v45 = vand.u32 2147483648, %v13431_v12  ;;  %v3775_v60 = vsel %vm3774_vm13, %v13442_v8, %v3771_v39  ;;  %v3785_v12 = vmul.f32 %v3742_v58, %v13084_v4  ;;  %v17356_v39 = vld [vmem:[#allocation117_spill] sm:$0xff]  ;;  %v17362_v58 = vld [vmem:[#allocation160_spill] sm:$0xff] }
 0x385   :  { %v3656_v56 = vpop.f32.mrf.mxu0 }
 0x386   :  { %v3657_v0 = vadd.f32 %v3656_v56, %v3584_v20  ;;  %v3779_v24 = vor.u32 1.1754944e-38, %v3778_v45  ;;  %v17357_v45 = vld [vmem:[#allocation128_spill] sm:$0xff] }
 0x388   :  { %v3698_v27 = vadd.f32 %v3697_v37, %v3657_v0  ;;  %v3780_v20 = vsel %vm3777_vm15, %v3779_v24, %v3775_v60  ;;  %v17344_v37 = vld [vmem:[#allocation102_spill] sm:$0xff]  ;;  %v17361_v60 = vld [vmem:[#allocation136_spill] sm:$0xff] }
 0x389   :  { %v17363_v24 = vld [vmem:[#allocation142_spill] sm:$0xff] }
 0x38a   :  { %v11259_v17 = vpop.eup %11258  ;;  %v3705_v29 = vadd.f32 %v3698_v27, %v2583_v23  ;;  %v17347_v27 = vld [vmem:[#allocation106_spill] sm:$0xff] }
 0x38b   :  { %v3786_v22 = vmul.f32 %v11259_v17, %v3765_v62  ;;  %v17349_v17 = vld [vmem:[#allocation123_spill] sm:$0xff]  ;;  %v17351_v62 = vld [vmem:[#allocation120_spill] sm:$0xff] }
 0x38c   :  { %11260 = vtanh.f32 %v3705_v29  ;;  %v17352_v29 = vld [vmem:[#allocation126_spill] sm:$0xff] }
 0x38d   :  { %v13482_v10 = vsub.f32 %v3784_v48, %v3786_v22  ;;  %v17354_v48 = vld [vmem:[#allocation124_spill] sm:$0xff]  ;;  %v17355_v22 = vld [vmem:[#allocation131_spill] sm:$0xff] }
 0x38f   :  { %v13487_v63 = vand.u32 4294901760, %v13482_v10 }
 0x391   :  { %3947 = vmatmul.f32.vlgmr.msrb.gmra.mxu3 %v13487_v63  ;;  %v13493_v44 = vsub.f32 %v13482_v10, %v13487_v63 }
 0x392   :  { %v11261_v34 = vpop.eup %11260  ;;  %4387 = vmatpush.msrb.mxu3 %v11705_v25 }
 0x393   :  { %v3787_v21 = vmul.f32 %v11261_v34, %v3780_v20  ;;  %4005 = vmatmul.f32.vlgmr.msra.gmra.mxu0 %v13493_v44  ;;  %v13499_v8 = vand.u32 4294901760, %v13493_v44  ;;  %v17364_v34 = vld [vmem:[#allocation127_spill] sm:$0xff]  ;;  %v17365_v20 = vld [vmem:[#allocation164_spill] sm:$0xff] }
 0x394   :  { %4389 = vmatpush.msrb.mxu3 %v11712_v30  ;;  %4434 = vmatpush.msra.mxu0 %v17005_v47 }
 0x395   :  { %v13503_v9 = vsub.f32 %v3785_v12, %v3787_v21  ;;  %4049 = vmatmul.f32.vlgmr.msra.gmra.mxu1 %v13499_v8  ;;  %v3836_v51 = vsub.f32 %v13493_v44, %v13499_v8  ;;  %v17366_v12 = vld [vmem:[#allocation145_spill] sm:$0xff]  ;;  %v17367_v21 = vld [vmem:[#allocation140_spill] sm:$0xff] }
 0x396   :  { %4391 = vmatpush.msrb.mxu3 %v11759_v28  ;;  %4438 = vmatpush.msra.mxu0 %v17006_v46 }
 0x397   :  { %v13511_v4 = vand.u32 4294901760, %v13503_v9  ;;  %4505 = vmatpush.msra.mxu1 %v11705_v25  ;;  %v13514_v56 = vand.u32 4294901760, %v3836_v51  ;;  %v17368_v51 = vld [vmem:[#allocation129_spill] sm:$0xff] }
 0x398   :  { %4393 = vmatpush.msrb.mxu3 %v11775_v31  ;;  %4442 = vmatpush.msra.mxu0 %v17007_v16 }
 0x399   :  { %4507 = vmatpush.msra.mxu1 %v11712_v30  ;;  %3838 = vmatmul.f32.vlgmr.msrb.gmra.mxu2 %v13514_v56  ;;  %v13522_v40 = vsub.f32 %v13503_v9, %v13511_v4 }
 0x39a   :  { %3951 = vmatmul.f32.gmra.mxu3 %v13511_v4  ;;  %4329 = vmatpush.msrb.mxu2 %v17008_v49 }
 0x39b   :  { %4395 = vmatpush.msrb.mxu3 %v16958_v42  ;;  %4446 = vmatpush.msra.mxu0 %v17009_v35  ;;  %v13529_v33 = vand.u32 4294901760, %v13522_v40 }
 0x39c   :  { %4509 = vmatpush.msra.mxu1 %v11759_v28  ;;  %4010 = vmatmul.f32.gmra.mxu0 %v13522_v40 }
 0x39d   :  { %4332 = vmatpush.msrb.mxu2 %v17010_v55  ;;  %4397 = vmatpush.msrb.mxu3 %v16961_v5  ;;  %v3844_v23 = vsub.f32 %v13522_v40, %v13529_v33 }
 0x39e   :  { %4450 = vmatpush.msra.mxu0 %v17011_v11  ;;  %4511 = vmatpush.msra.mxu1 %v11775_v31 }
 0x39f   :  { %4055 = vmatmul.f32.gmra.mxu1 %v13529_v33  ;;  %4335 = vmatpush.msrb.mxu2 %v17012_v54  ;;  %v13541_v0 = vand.u32 4294901760, %v3844_v23  ;;  %v17369_v23 = vld [vmem:[#allocation167_spill] sm:$0xff] }
 0x3a0   :  { %4399 = vmatpush.msrb.mxu3 %v16964_v57  ;;  %4454 = vmatpush.msra.mxu0 %v17013_v43 }
 0x3a1   :  { %4513 = vmatpush.msra.mxu1 %v16958_v42  ;;  %4338 = vmatpush.msrb.mxu2 %v17014_v2 }
 0x3a2   :  { %4401 = vmatpush.msrb.mxu3 %v16967_v36  ;;  %4458 = vmatpush.msra.mxu0 %v17015_v50 }
 0x3a3   :  { %4515 = vmatpush.msra.mxu1 %v16961_v5  ;;  %3846 = vmatmul.f32.gmra.mxu2 %v13541_v0 }
 0x3a4   :  { %4165 = vmatmul.f32.vlgmr.msra.gmra.mxu3 %v13487_v63  ;;  %4341 = vmatpush.msrb.mxu2 %v17016_v19 }
 0x3a5   :  { %4403 = vmatpush.msrb.mxu3 %v16970_v3  ;;  %4462 = vmatpush.msra.mxu0 %v17017_v6 }
 0x3a6   :  { %4517 = vmatpush.msra.mxu1 %v16964_v57  ;;  %4210 = vmatmul.f32.vlgmr.msrb.gmra.mxu0 %v13514_v56 }
 0x3a7   :  { %4344 = vmatpush.msrb.mxu2 %v17018_v1  ;;  %4405 = vmatpush.msrb.mxu3 %v16973_v14 }
 0x3a8   :  { %4466 = vmatpush.msra.mxu0 %v17019_v15  ;;  %4519 = vmatpush.msra.mxu1 %v16967_v36 }
 0x3a9   :  { %4319 = vmatmul.f32.vlgmr.msrb.gmra.mxu1 %v13487_v63  ;;  %4347 = vmatpush.msrb.mxu2 %v17020_v38 }
 0x3aa   :  { %4407 = vmatpush.msrb.mxu3 %v17342_v26  ;;  %4470 = vmatpush.msra.mxu0 %v17343_v59 }
 0x3ab   :  { %4521 = vmatpush.msra.mxu1 %v16970_v3  ;;  %4350 = vmatpush.msrb.mxu2 %v17344_v37 }
 0x3ac   :  { %4409 = vmatpush.msrb.mxu3 %v17345_v61  ;;  %4474 = vmatpush.msra.mxu0 %v17346_v32  ;;  %v17408_v32 = vld [vmem:[#allocation181_spill] sm:$0xff] }
 0x3ad   :  { %4523 = vmatpush.msra.mxu1 %v16973_v14  ;;  %4124 = vmatmul.f32.vlgmr.msra.gmra.mxu2 %v13487_v63 }
 0x3ae   :  { %4169 = vmatmul.f32.gmra.mxu3 %v13511_v4  ;;  %4353 = vmatpush.msrb.mxu2 %v17347_v27  ;;  %v17405_v27 = vld [vmem:[#allocation177_spill] sm:$0xff] }
 0x3af   :  { %4411 = vmatpush.msrb.mxu3 %v17348_v41  ;;  %4478 = vmatpush.msra.mxu0 %v17349_v17  ;;  %v17402_v17 = vld [vmem:[#allocation174_spill] sm:$0xff] }
 0x3b0   :  { %4525 = vmatpush.msra.mxu1 %v17342_v26  ;;  %4218 = vmatmul.f32.gmra.mxu0 %v13541_v0 }
 0x3b1   :  { %4356 = vmatpush.msrb.mxu2 %v17350_v52  ;;  %4413 = vmatpush.msrb.mxu3 %v17351_v62  ;;  %v17399_v52 = vld [vmem:[#allocation171_spill] sm:$0xff] }
 0x3b2   :  { %4482 = vmatpush.msra.mxu0 %v17352_v29  ;;  %4527 = vmatpush.msra.mxu1 %v17345_v61  ;;  %v17396_v29 = vld [vmem:[#allocation166_spill] sm:$0xff] }
 0x3b3   :  { %4323 = vmatmul.f32.gmra.mxu1 %v13511_v4  ;;  %4359 = vmatpush.msrb.mxu2 %v17353_v7  ;;  %v17395_v7 = vld [vmem:[#allocation178_spill] sm:$0xff] }
 0x3b4   :  { %4415 = vmatpush.msrb.mxu3 %v17354_v48  ;;  %4486 = vmatpush.msra.mxu0 %v17355_v22  ;;  %v17392_v22 = vld [vmem:[#allocation173_spill] sm:$0xff] }
 0x3b5   :  { %4529 = vmatpush.msra.mxu1 %v17348_v41  ;;  %4362 = vmatpush.msrb.mxu2 %v17356_v39  ;;  %v17389_v39 = vld [vmem:[#allocation169_spill] sm:$0xff] }
 0x3b6   :  { %4417 = vmatpush.msrb.mxu3 %v17357_v45  ;;  %4490 = vmatpush.msra.mxu0 %v17358_v13  ;;  %v17386_v13 = vld [vmem:[#allocation165_spill] sm:$0xff] }
 0x3b7   :  { %4531 = vmatpush.msra.mxu1 %v17351_v62  ;;  %4128 = vmatmul.f32.gmra.mxu2 %v13511_v4 }
 0x3b8   :  { %4599 = vmatpush.msra.mxu3 %v17359_v18  ;;  %4365 = vmatpush.msrb.mxu2 %v17360_v53  ;;  %v17382_v53 = vld [vmem:[#allocation183_spill] sm:$0xff] }
 0x3b9   :  { %4421 = vmatmul.f32.vlgmr.msrb.gmra.mxu3 %v13499_v8  ;;  %4494 = vmatpush.msra.mxu0 %v17361_v60  ;;  %v17373_v60 = vld [vmem:[#allocation170_spill] sm:$0xff]  ;;  %v17385_v18 = vld [vmem:[#allocation187_spill] sm:$0xff] }
 0x3ba   :  { %4533 = vmatpush.msra.mxu1 %v17354_v48  ;;  %4605 = vmatpush.msra.mxu3 %v17362_v58  ;;  %v17370_v58 = vld [vmem:[#allocation148_spill] sm:$0xff] }
 0x3bb   :  { %4701 = vmatpush.msrb.mxu0 %v17363_v24  ;;  %4368 = vmatpush.msrb.mxu2 %v17364_v34  ;;  %v17371_v24 = vld [vmem:[#allocation141_spill] sm:$0xff]  ;;  %v17372_v34 = vld [vmem:[#allocation132_spill] sm:$0xff] }
 0x3bc   :  { %4496 = vmatmul.f32.vlgmr.msra.gmra.mxu0 %v13487_v63  ;;  %4535 = vmatpush.msra.mxu1 %v17357_v45 }
 0x3bd   :  { %4611 = vmatpush.msra.mxu3 %v17365_v20  ;;  %4704 = vmatpush.msrb.mxu0 %v17366_v12  ;;  %v17374_v20 = vld [vmem:[#allocation150_spill] sm:$0xff]  ;;  %v17375_v12 = vld [vmem:[#allocation143_spill] sm:$0xff] }
 0x3be   :  { %4759 = vmatpush.msrb.mxu1 %v17367_v21  ;;  %4371 = vmatpush.msrb.mxu2 %v17368_v51  ;;  %v17378_v51 = vld [vmem:[#allocation144_spill] sm:$0xff] }
 0x3bf   :  { %4537 = vmatmul.f32.vlgmr.msra.gmra.mxu1 %v13487_v63  ;;  %4617 = vmatpush.msra.mxu3 %v17369_v23  ;;  %v17376_v23 = vld [vmem:[#allocation176_spill] sm:$0xff] }
 0x3c0   :  { %4707 = vmatpush.msrb.mxu0 %v17370_v58  ;;  %4761 = vmatpush.msrb.mxu1 %v17371_v24  ;;  %v17377_v58 = vld [vmem:[#allocation153_spill] sm:$0xff] }
 0x3c1   :  { %4374 = vmatpush.msrb.mxu2 %v17372_v34  ;;  %4623 = vmatpush.msra.mxu3 %v17373_v60  ;;  %v17379_v60 = vld [vmem:[#allocation180_spill] sm:$0xff]  ;;  %v17381_v34 = vld [vmem:[#allocation147_spill] sm:$0xff] }
 0x3c2   :  { %4710 = vmatpush.msrb.mxu0 %v17374_v20  ;;  %4763 = vmatpush.msrb.mxu1 %v17375_v12  ;;  %v17380_v20 = vld [vmem:[#allocation157_spill] sm:$0xff] }
 0x3c3   :  { %4546 = vmatpush.msra.mxu2 %v17367_v21  ;;  %4427 = vmatmul.f32.gmra.mxu3 %v13529_v33 }
 0x3c4   :  { %4377 = vmatmul.f32.vlgmr.msrb.gmra.mxu2 %v13493_v44  ;;  %4629 = vmatpush.msra.mxu3 %v17376_v23  ;;  %v17383_v23 = vld [vmem:[#allocation162_spill] sm:$0xff] }
 0x3c5   :  { %4548 = vmatpush.msra.mxu2 %v17371_v24  ;;  %4713 = vmatpush.msrb.mxu0 %v17377_v58  ;;  %v17384_v58 = vld [vmem:[#allocation151_spill] sm:$0xff] }
 0x3c6   :  { %4765 = vmatpush.msrb.mxu1 %v17378_v51  ;;  %4500 = vmatmul.f32.gmra.mxu0 %v13511_v4 }
 0x3c7   :  { %4550 = vmatpush.msra.mxu2 %v17375_v12  ;;  %4635 = vmatpush.msra.mxu3 %v17379_v60  ;;  %v17387_v60 = vld [vmem:[#allocation154_spill] sm:$0xff] }
 0x3c8   :  { %4716 = vmatpush.msrb.mxu0 %v17380_v20  ;;  %4767 = vmatpush.msrb.mxu1 %v17381_v34  ;;  %v17388_v20 = vld [vmem:[#allocation193_spill] sm:$0xff] }
 0x3c9   :  { %4541 = vmatmul.f32.gmra.mxu1 %v13511_v4  ;;  %4552 = vmatpush.msra.mxu2 %v17378_v51 }
 0x3ca   :  { %4641 = vmatpush.msra.mxu3 %v17382_v53  ;;  %4719 = vmatpush.msrb.mxu0 %v17383_v23  ;;  %v17390_v53 = vld [vmem:[#allocation158_spill] sm:$0xff]  ;;  %v17391_v23 = vld [vmem:[#allocation196_spill] sm:$0xff] }
 0x3cb   :  { %4769 = vmatpush.msrb.mxu1 %v17384_v58  ;;  %4554 = vmatpush.msra.mxu2 %v17381_v34 }
 0x3cc   :  { %4647 = vmatpush.msra.mxu3 %v17385_v18  ;;  %4722 = vmatpush.msrb.mxu0 %v17386_v13  ;;  %v17393_v18 = vld [vmem:[#allocation161_spill] sm:$0xff]  ;;  %v17394_v13 = vld [vmem:[#allocation198_spill] sm:$0xff] }
 0x3cd   :  { %4771 = vmatpush.msrb.mxu1 %v17387_v60  ;;  %4382 = vmatmul.f32.gmra.mxu2 %v13522_v40 }
 0x3ce   :  { %4556 = vmatpush.msra.mxu2 %v17384_v58  ;;  %4653 = vmatpush.msra.mxu3 %v17388_v20  ;;  %v17398_v20 = vld [vmem:[#allocation182_spill] sm:$0xff] }
 0x3cf   :  { %4725 = vmatpush.msrb.mxu0 %v17389_v39  ;;  %4773 = vmatpush.msrb.mxu1 %v17390_v53  ;;  %v17397_v39 = vld [vmem:[#allocation200_spill] sm:$0xff] }
 0x3d0   :  { %4558 = vmatpush.msra.mxu2 %v17387_v60  ;;  %4659 = vmatpush.msra.mxu3 %v17391_v23  ;;  %v17401_v23 = vld [vmem:[#allocation186_spill] sm:$0xff] }
 0x3d1   :  { %4728 = vmatpush.msrb.mxu0 %v17392_v22  ;;  %4775 = vmatpush.msrb.mxu1 %v17393_v18  ;;  %v17400_v22 = vld [vmem:[#allocation201_spill] sm:$0xff] }
 0x3d2   :  { %4560 = vmatpush.msra.mxu2 %v17390_v53  ;;  %4665 = vmatpush.msra.mxu3 %v17394_v13  ;;  %v17404_v13 = vld [vmem:[#allocation190_spill] sm:$0xff] }
 0x3d3   :  { %4731 = vmatpush.msrb.mxu0 %v17395_v7  ;;  %4777 = vmatpush.msrb.mxu1 %v17396_v29  ;;  %v17403_v7 = vld [vmem:[#allocation202_spill] sm:$0xff] }
 0x3d4   :  { %4562 = vmatpush.msra.mxu2 %v17393_v18  ;;  %4671 = vmatpush.msra.mxu3 %v17397_v39  ;;  %v17407_v39 = vld [vmem:[#allocation192_spill] sm:$0xff] }
 0x3d5   :  { %4734 = vmatpush.msrb.mxu0 %v17398_v20  ;;  %4779 = vmatpush.msrb.mxu1 %v17399_v52  ;;  %v17406_v20 = vld [vmem:[#allocation203_spill] sm:$0xff] }
 0x3d6   :  { %4564 = vmatpush.msra.mxu2 %v17396_v29  ;;  %4677 = vmatpush.msra.mxu3 %v17400_v22  ;;  %v17418_v22 = vld [vmem:[#allocation18_spill] sm:$0xff] }
 0x3d7   :  { %4737 = vmatpush.msrb.mxu0 %v17401_v23  ;;  %4781 = vmatpush.msrb.mxu1 %v17402_v17  ;;  %v17409_v23 = vld [vmem:[#allocation195_spill] sm:$0xff] }
 0x3d8   :  { %4566 = vmatpush.msra.mxu2 %v17399_v52  ;;  %4683 = vmatpush.msra.mxu3 %v17403_v7  ;;  %v17410_v7 = vld [vmem:[#allocation184_spill] sm:$0xff] }
 0x3d9   :  { %4740 = vmatpush.msrb.mxu0 %v17404_v13  ;;  %4783 = vmatpush.msrb.mxu1 %v17405_v27  ;;  %v17413_v13 = vld [vmem:[#allocation38_spill] sm:$0xff] }
 0x3da   :  { %4568 = vmatpush.msra.mxu2 %v17402_v17  ;;  %4689 = vmatpush.msra.mxu3 %v17406_v20  ;;  %v17411_v20 = vld [vmem:[#allocation188_spill] sm:$0xff] }
 0x3db   :  { %4743 = vmatpush.msrb.mxu0 %v17407_v39  ;;  %4785 = vmatpush.msrb.mxu1 %v17408_v32  ;;  %v17412_v39 = vld [vmem:[#allocation16_spill] sm:$0xff] }
 0x3dc   :  { %4691 = vmatmul.f32.vlgmr.msra.gmra.mxu3 %v13487_v63  ;;  %4570 = vmatpush.msra.mxu2 %v17405_v27 }
 0x3dd   :  { %4877 = vmatpush.msrb.mxu3 %v17367_v21  ;;  %4746 = vmatpush.msrb.mxu0 %v17409_v23  ;;  %v17414_v23 = vld [vmem:[#allocation17_spill] sm:$0xff] }
 0x3de   :  { %4787 = vmatpush.msrb.mxu1 %v17410_v7  ;;  %4749 = vmatmul.f32.vlgmr.msrb.gmra.mxu0 %v13493_v44  ;;  %v17415_v44 = vld [vmem:[#allocation146_spill] sm:$0xff] }
 0x3df   :  { %4879 = vmatpush.msrb.mxu3 %v17371_v24  ;;  %4572 = vmatpush.msra.mxu2 %v17408_v32 }
 0x3e0   :  { %4789 = vmatpush.msrb.mxu1 %v17411_v20  ;;  %5019 = vmatpush.msra.mxu0 %v17412_v39 }
 0x3e1   :  { %4793 = vmatmul.f32.vlgmr.msrb.gmra.mxu1 %v13499_v8  ;;  %4881 = vmatpush.msrb.mxu3 %v17375_v12  ;;  %v17416_v8 = vld [vmem:[#allocation39_spill] sm:$0xff] }
 0x3e2   :  { %4574 = vmatpush.msra.mxu2 %v17410_v7  ;;  %5072 = vmatpush.msra.mxu1 %v17413_v13  ;;  %v17417_v13 = vld [vmem:[#allocation149_spill] sm:$0xff] }
 0x3e3   :  { %4883 = vmatpush.msrb.mxu3 %v17378_v51  ;;  %5021 = vmatpush.msra.mxu0 %v17414_v23  ;;  %v17419_v51 = vld [vmem:[#allocation152_spill] sm:$0xff] }
 0x3e4   :  { %4576 = vmatpush.msra.mxu2 %v17411_v20  ;;  %4695 = vmatmul.f32.gmra.mxu3 %v13511_v4 }
 0x3e5   :  { %4582 = vmatmul.f32.vlgmr.msra.gmra.mxu2 %v13514_v56  ;;  %4885 = vmatpush.msrb.mxu3 %v17381_v34  ;;  %v17420_v56 = vld [vmem:[#allocation43_spill] sm:$0xff] }
 0x3e6   :  { %4806 = vmatpush.msrb.mxu2 %v17415_v44  ;;  %4754 = vmatmul.f32.gmra.mxu0 %v13522_v40  ;;  %v17421_v44 = vld [vmem:[#allocation19_spill] sm:$0xff] }
 0x3e7   :  { %4887 = vmatpush.msrb.mxu3 %v17384_v58  ;;  %5078 = vmatpush.msra.mxu1 %v17416_v8  ;;  %v17422_v40 = vld [vmem:[#allocation155_spill] sm:$0xff] }
 0x3e8   :  { %4810 = vmatpush.msrb.mxu2 %v17417_v13  ;;  %5023 = vmatpush.msra.mxu0 %v17418_v22  ;;  %v17423_v58 = vld [vmem:[#allocation47_spill] sm:$0xff] }
 0x3e9   :  { %4799 = vmatmul.f32.gmra.mxu1 %v13529_v33  ;;  %4889 = vmatpush.msrb.mxu3 %v17387_v60  ;;  %v17424_v13 = vld [vmem:[#allocation159_spill] sm:$0xff]  ;;  %v17425_v33 = vld [vmem:[#allocation50_spill] sm:$0xff] }
 0x3ea   :  { %4814 = vmatpush.msrb.mxu2 %v17419_v51  ;;  %5084 = vmatpush.msra.mxu1 %v17420_v56  ;;  %v17426_v51 = vld [vmem:[#allocation20_spill] sm:$0xff]  ;;  %v17427_v56 = vld [vmem:[#allocation163_spill] sm:$0xff] }
 0x3eb   :  { %4891 = vmatpush.msrb.mxu3 %v17390_v53  ;;  %5025 = vmatpush.msra.mxu0 %v17421_v44  ;;  %v17428_v8 = vld [vmem:[#allocation55_spill] sm:$0xff] }
 0x3ec   :  { %4818 = vmatpush.msrb.mxu2 %v17422_v40  ;;  %5090 = vmatpush.msra.mxu1 %v17423_v58  ;;  %v17429_v40 = vld [vmem:[#allocation21_spill] sm:$0xff]  ;;  %v17430_v58 = vld [vmem:[#allocation168_spill] sm:$0xff] }
 0x3ed   :  { %4590 = vmatmul.f32.gmra.mxu2 %v13541_v0  ;;  %4893 = vmatpush.msrb.mxu3 %v17393_v18  ;;  %v17431_v0 = vld [vmem:[#allocation58_spill] sm:$0xff] }
 0x3ee   :  { %4822 = vmatpush.msrb.mxu2 %v17424_v13  ;;  %5096 = vmatpush.msra.mxu1 %v17425_v33  ;;  %v17432_v13 = vld [vmem:[#allocation25_spill] sm:$0xff]  ;;  %v17433_v33 = vld [vmem:[#allocation172_spill] sm:$0xff]  ;;  %v17454_v18 = vld [vmem:[#allocation54_spill] sm:$0xff] }
 0x3ef   :  { %4895 = vmatpush.msrb.mxu3 %v17396_v29  ;;  %5027 = vmatpush.msra.mxu0 %v17426_v51  ;;  %v17434_v29 = vld [vmem:[#allocation63_spill] sm:$0xff] }
 0x3f0   :  { %4826 = vmatpush.msrb.mxu2 %v17427_v56  ;;  %5102 = vmatpush.msra.mxu1 %v17428_v8  ;;  %v17435_v56 = vld [vmem:[#allocation31_spill] sm:$0xff] }
 0x3f1   :  { %4897 = vmatpush.msrb.mxu3 %v17399_v52  ;;  %5029 = vmatpush.msra.mxu0 %v17429_v40  ;;  %v17436_v8 = vld [vmem:[#allocation175_spill] sm:$0xff] }
 0x3f2   :  { %4830 = vmatpush.msrb.mxu2 %v17430_v58  ;;  %5108 = vmatpush.msra.mxu1 %v17431_v0  ;;  %v17437_v52 = vld [vmem:[#allocation67_spill] sm:$0xff]  ;;  %v17438_v58 = vld [vmem:[#allocation33_spill] sm:$0xff] }
 0x3f3   :  { %4899 = vmatpush.msrb.mxu3 %v17402_v17  ;;  %5031 = vmatpush.msra.mxu0 %v17432_v13  ;;  %v17439_v0 = vld [vmem:[#allocation179_spill] sm:$0xff]  ;;  %v17440_v17 = vld [vmem:[#allocation72_spill] sm:$0xff] }
 0x3f4   :  { %4834 = vmatpush.msrb.mxu2 %v17433_v33  ;;  %5114 = vmatpush.msra.mxu1 %v17434_v29  ;;  %v17441_v33 = vld [vmem:[#allocation36_spill] sm:$0xff]  ;;  %v17442_v29 = vld [vmem:[#allocation185_spill] sm:$0xff] }
 0x3f5   :  { %4901 = vmatpush.msrb.mxu3 %v17405_v27  ;;  %5033 = vmatpush.msra.mxu0 %v17435_v56  ;;  %v17443_v27 = vld [vmem:[#allocation75_spill] sm:$0xff] }
 0x3f6   :  { %4838 = vmatpush.msrb.mxu2 %v17436_v8  ;;  %5120 = vmatpush.msra.mxu1 %v17437_v52  ;;  %v17444_v8 = vld [vmem:[#allocation44_spill] sm:$0xff]  ;;  %v17445_v52 = vld [vmem:[#allocation189_spill] sm:$0xff] }
 0x3f7   :  { %4903 = vmatpush.msrb.mxu3 %v17408_v32  ;;  %5035 = vmatpush.msra.mxu0 %v17438_v58  ;;  %v17453_v32 = vld [vmem:[#allocation197_spill] sm:$0xff] }
 0x3f8   :  { %4842 = vmatpush.msrb.mxu2 %v17439_v0  ;;  %5126 = vmatpush.msra.mxu1 %v17440_v17  ;;  %v17446_v0 = vld [vmem:[#allocation78_spill] sm:$0xff]  ;;  %v17447_v17 = vld [vmem:[#allocation191_spill] sm:$0xff] }
 0x3f9   :  { %4905 = vmatpush.msrb.mxu3 %v17410_v7  ;;  %5037 = vmatpush.msra.mxu0 %v17441_v33  ;;  %v17448_v7 = vld [vmem:[#allocation46_spill] sm:$0xff] }
 0x3fa   :  { %4846 = vmatpush.msrb.mxu2 %v17442_v29  ;;  %5132 = vmatpush.msra.mxu1 %v17443_v27  ;;  %v17449_v29 = vld [vmem:[#allocation82_spill] sm:$0xff] }
 0x3fb   :  { %4907 = vmatpush.msrb.mxu3 %v17411_v20  ;;  %5039 = vmatpush.msra.mxu0 %v17444_v8  ;;  %v17450_v27 = vld [vmem:[#allocation194_spill] sm:$0xff]  ;;  %v17451_v20 = vld [vmem:[#allocation51_spill] sm:$0xff] }
 0x3fc   :  { %4850 = vmatpush.msrb.mxu2 %v17445_v52  ;;  %4909 = vmatmul.f32.vlgmr.msrb.gmra.mxu3 %v13487_v63  ;;  %v17452_v52 = vld [vmem:[#allocation84_spill] sm:$0xff] }
 0x3fd   :  { %5232 = vmatpush.msra.mxu3 %v17412_v39  ;;  %5138 = vmatpush.msra.mxu1 %v17446_v0  ;;  %v17456_v0 = vld [vmem:[#allocation199_spill] sm:$0xff] }
 0x3fe   :  { %4854 = vmatpush.msrb.mxu2 %v17447_v17  ;;  %5041 = vmatpush.msra.mxu0 %v17448_v7  ;;  %v17455_v17 = vld [vmem:[#allocation88_spill] sm:$0xff] }
 0x3ff   :  { %5234 = vmatpush.msra.mxu3 %v17414_v23  ;;  %5144 = vmatpush.msra.mxu1 %v17449_v29  ;;  %v17458_v29 = vld [vmem:[#allocation92_spill] sm:$0xff] }
 0x400   :  { %4858 = vmatpush.msrb.mxu2 %v17450_v27  ;;  %5043 = vmatpush.msra.mxu0 %v17451_v20  ;;  %v17457_v27 = vld [vmem:[#allocation22_spill] sm:$0xff] }
 0x401   :  { %5236 = vmatpush.msra.mxu3 %v17418_v22  ;;  %5150 = vmatpush.msra.mxu1 %v17452_v52  ;;  %v17460_v52 = vld [vmem:[#allocation59_spill] sm:$0xff] }
 0x402   :  { %4862 = vmatpush.msrb.mxu2 %v17453_v32  ;;  %5045 = vmatpush.msra.mxu0 %v17454_v18  ;;  %v17459_v32 = vld [vmem:[#allocation23_spill] sm:$0xff] }
 0x403   :  { %5238 = vmatpush.msra.mxu3 %v17421_v44  ;;  %5156 = vmatpush.msra.mxu1 %v17455_v17  ;;  %v17467_v17 = vld [vmem:[#allocation34_spill] sm:$0xff] }
 0x404   :  { %4866 = vmatpush.msrb.mxu2 %v17456_v0  ;;  %4913 = vmatmul.f32.gmra.mxu3 %v13511_v4  ;;  %v17461_v0 = vld [vmem:[#allocation24_spill] sm:$0xff] }
 0x405   :  { %4868 = vmatmul.f32.vlgmr.msrb.gmra.mxu2 %v13487_v63  ;;  %5240 = vmatpush.msra.mxu3 %v17426_v51  ;;  %v17462_v63 = vld [vmem:[#allocation64_spill] sm:$0xff] }
 0x406   :  { %5174 = vmatpush.msra.mxu2 %v17457_v27  ;;  %5162 = vmatpush.msra.mxu1 %v17458_v29  ;;  %v17463_v29 = vld [vmem:[#allocation26_spill] sm:$0xff]  ;;  %v17464_v27 = vld [vmem:[#allocation28_spill] sm:$0xff] }
 0x407   :  { %5242 = vmatpush.msra.mxu3 %v17429_v40  ;;  %5047 = vmatpush.msra.mxu0 %v17460_v52 }
 0x408   :  { %5350 = vmatpush.msrb.mxu1 %v17412_v39  ;;  %5177 = vmatpush.msra.mxu2 %v17459_v32  ;;  %v17465_v32 = vld [vmem:[#allocation27_spill] sm:$0xff] }
 0x409   :  { %5244 = vmatpush.msra.mxu3 %v17432_v13  ;;  %5049 = vmatpush.msra.mxu0 %v17462_v63 }
 0x40a   :  { %5352 = vmatpush.msrb.mxu1 %v17414_v23  ;;  %5180 = vmatpush.msra.mxu2 %v17461_v0  ;;  %v17466_v0 = vld [vmem:[#allocation29_spill] sm:$0xff] }
 0x40b   :  { %5246 = vmatpush.msra.mxu3 %v17435_v56  ;;  %5279 = vmatpush.msrb.mxu0 %v17464_v27  ;;  %v17469_v27 = vld [vmem:[#allocation37_spill] sm:$0xff] }
 0x40c   :  { %5354 = vmatpush.msrb.mxu1 %v17418_v22  ;;  %5183 = vmatpush.msra.mxu2 %v17463_v29  ;;  %v17468_v29 = vld [vmem:[#allocation30_spill] sm:$0xff] }
 0x40d   :  { %4872 = vmatmul.f32.gmra.mxu2 %v13511_v4  ;;  %5248 = vmatpush.msra.mxu3 %v17438_v58  ;;  %v17470_v4 = vld [vmem:[#allocation32_spill] sm:$0xff] }
 0x40e   :  { %5186 = vmatpush.msra.mxu2 %v17465_v32  ;;  %5356 = vmatpush.msrb.mxu1 %v17421_v44  ;;  %v17471_v32 = vld [vmem:[#allocation41_spill] sm:$0xff] }
 0x40f   :  { %5250 = vmatpush.msra.mxu3 %v17441_v33  ;;  %5283 = vmatpush.msrb.mxu0 %v17466_v0  ;;  %v17473_v0 = vld [vmem:[#allocation45_spill] sm:$0xff] }
 0x410   :  { %5189 = vmatpush.msra.mxu2 %v17467_v17  ;;  %5358 = vmatpush.msrb.mxu1 %v17426_v51  ;;  %v17472_v17 = vld [vmem:[#allocation35_spill] sm:$0xff] }
 0x411   :  { %5252 = vmatpush.msra.mxu3 %v17444_v8  ;;  %5287 = vmatpush.msrb.mxu0 %v17468_v29  ;;  %v17475_v29 = vld [vmem:[#allocation49_spill] sm:$0xff] }
 0x412   :  { %5192 = vmatpush.msra.mxu2 %v17469_v27  ;;  %5360 = vmatpush.msrb.mxu1 %v17429_v40  ;;  %v17474_v27 = vld [vmem:[#allocation40_spill] sm:$0xff] }
 0x413   :  { %5254 = vmatpush.msra.mxu3 %v17448_v7  ;;  %5291 = vmatpush.msrb.mxu0 %v17470_v4  ;;  %v17477_v4 = vld [vmem:[#allocation53_spill] sm:$0xff] }
 0x414   :  { %5195 = vmatpush.msra.mxu2 %v17471_v32  ;;  %5362 = vmatpush.msrb.mxu1 %v17432_v13  ;;  %v17476_v32 = vld [vmem:[#allocation42_spill] sm:$0xff] }
 0x415   :  { %5256 = vmatpush.msra.mxu3 %v17451_v20  ;;  %5295 = vmatpush.msrb.mxu0 %v17472_v17  ;;  %v17479_v17 = vld [vmem:[#allocation57_spill] sm:$0xff] }
 0x416   :  { %5198 = vmatpush.msra.mxu2 %v17473_v0  ;;  %5364 = vmatpush.msrb.mxu1 %v17435_v56  ;;  %v17478_v0 = vld [vmem:[#allocation48_spill] sm:$0xff]  ;;  %v17480_v56 = vld [vmem:[#allocation87_spill] sm:$0xff] }
 0x417   :  { %5258 = vmatpush.msra.mxu3 %v17454_v18  ;;  %5299 = vmatpush.msrb.mxu0 %v17474_v27  ;;  %v17482_v27 = vld [vmem:[#allocation61_spill] sm:$0xff] }
 0x418   :  { %5201 = vmatpush.msra.mxu2 %v17475_v29  ;;  %5366 = vmatpush.msrb.mxu1 %v17438_v58  ;;  %v17481_v29 = vld [vmem:[#allocation52_spill] sm:$0xff]  ;;  %v17483_v58 = vld [vmem:[#allocation91_spill] sm:$0xff] }
 0x419   :  { %5260 = vmatpush.msra.mxu3 %v17460_v52  ;;  %5303 = vmatpush.msrb.mxu0 %v17476_v32  ;;  %v17485_v32 = vld [vmem:[#allocation62_spill] sm:$0xff] }
 0x41a   :  { %5204 = vmatpush.msra.mxu2 %v17477_v4  ;;  %5368 = vmatpush.msrb.mxu1 %v17441_v33  ;;  %v17484_v4 = vld [vmem:[#allocation56_spill] sm:$0xff]  ;;  %v17486_v33 = vld [vmem:[#allocation97_spill] sm:$0xff] }
 0x41b   :  { %5262 = vmatpush.msra.mxu3 %v17462_v63  ;;  %5307 = vmatpush.msrb.mxu0 %v17478_v0  ;;  %v17489_v0 = vld [vmem:[#allocation100_spill] sm:$0xff] }
 0x41c   :  { %5207 = vmatpush.msra.mxu2 %v17479_v17  ;;  %5370 = vmatpush.msrb.mxu1 %v17444_v8  ;;  %v17487_v17 = vld [vmem:[#allocation60_spill] sm:$0xff] }
 0x41d   :  { %5444 = vmatpush.msrb.mxu3 %v17480_v56  ;;  %5311 = vmatpush.msrb.mxu0 %v17481_v29  ;;  %v17488_v56 = vld [vmem:[#allocation69_spill] sm:$0xff]  ;;  %v17492_v29 = vld [vmem:[#allocation104_spill] sm:$0xff] }
 0x41e   :  { %5210 = vmatpush.msra.mxu2 %v17482_v27  ;;  %5372 = vmatpush.msrb.mxu1 %v17448_v7  ;;  %v17490_v27 = vld [vmem:[#allocation65_spill] sm:$0xff] }
 0x41f   :  { %5450 = vmatpush.msrb.mxu3 %v17483_v58  ;;  %5315 = vmatpush.msrb.mxu0 %v17484_v4  ;;  %v17491_v58 = vld [vmem:[#allocation73_spill] sm:$0xff] }
 0x420   :  { %5213 = vmatpush.msra.mxu2 %v17485_v32  ;;  %5374 = vmatpush.msrb.mxu1 %v17451_v20  ;;  %v17494_v32 = vld [vmem:[#allocation68_spill] sm:$0xff]  ;;  %v17501_v4 = vld [vmem:[#allocation125_spill] sm:$0xff] }
 0x421   :  { %5456 = vmatpush.msrb.mxu3 %v17486_v33  ;;  %5319 = vmatpush.msrb.mxu0 %v17487_v17  ;;  %v17493_v33 = vld [vmem:[#allocation112_spill] sm:$0xff]  ;;  %v3839_v17 = vpop.f32.mrf.mxu2 }
 0x422   :  { %5216 = vmatpush.msra.mxu2 %v17488_v56  ;;  %5376 = vmatpush.msrb.mxu1 %v17454_v18  ;;  %v3948_v56 = vpop.f32.mrf.mxu3 }
 0x423   :  { %5462 = vmatpush.msrb.mxu3 %v17489_v0  ;;  %5323 = vmatpush.msrb.mxu0 %v17490_v27  ;;  %v17495_v0 = vld [vmem:[#allocation116_spill] sm:$0xff]  ;;  %v17496_v27 = vld [vmem:[#allocation70_spill] sm:$0xff]  ;;  %v3949_v40 = vadd.f32 %v3948_v56, %v3839_v17 }
 0x424   :  { %5219 = vmatpush.msra.mxu2 %v17491_v58  ;;  %5378 = vmatpush.msrb.mxu1 %v17460_v52  ;;  %v17498_v58 = vld [vmem:[#allocation76_spill] sm:$0xff]  ;;  %v17506_v52 = vld [vmem:[#allocation138_spill] sm:$0xff] }
 0x425   :  { %5468 = vmatpush.msrb.mxu3 %v17492_v29  ;;  %5327 = vmatpush.msrb.mxu0 %v17494_v32  ;;  %v17497_v29 = vld [vmem:[#allocation118_spill] sm:$0xff]  ;;  %v17500_v32 = vld [vmem:[#allocation79_spill] sm:$0xff] }
 0x426   :  { %5391 = vmatpush.msrb.mxu2 %v11705_v25  ;;  %5380 = vmatpush.msrb.mxu1 %v17462_v63 }
 0x427   :  { %5474 = vmatpush.msrb.mxu3 %v17493_v33  ;;  %5331 = vmatpush.msrb.mxu0 %v17496_v27  ;;  %v17499_v33 = vld [vmem:[#allocation122_spill] sm:$0xff] }
 0x428   :  { %5393 = vmatpush.msrb.mxu2 %v11712_v30  ;;  %v17502_v27 = vld [vmem:[#allocation130_spill] sm:$0xff] }
 0x429   :  { %5480 = vmatpush.msrb.mxu3 %v17495_v0  ;;  %5335 = vmatpush.msrb.mxu0 %v17498_v58  ;;  %v4006_v0 = vpop.f32.mrf.mxu0  ;;  %v3847_v63 = vpop.f32.mrf.mxu2  ;;  %v17503_v58 = vld [vmem:[#allocation133_spill] sm:$0xff] }
 0x42a   :  { %5395 = vmatpush.msrb.mxu2 %v11759_v28  ;;  %v4007_v22 = vadd.f32 %v4006_v0, %v3949_v40 }
 0x42b   :  { %5486 = vmatpush.msrb.mxu3 %v17497_v29  ;;  %5339 = vmatpush.msrb.mxu0 %v17500_v32  ;;  %v4050_v32 = vpop.f32.mrf.mxu1  ;;  %v17505_v29 = vld [vmem:[#allocation137_spill] sm:$0xff] }
 0x42c   :  { %5397 = vmatpush.msrb.mxu2 %v11775_v31  ;;  %v4051_v60 = vadd.f32 %v4050_v32, %v4007_v22  ;;  %v3793_v32 = vld [vmem:[#allocation3 + $0x54] sm:$0xff] }
 0x42d   :  { %5492 = vmatpush.msrb.mxu3 %v17499_v33  ;;  %v17504_v33 = vld [vmem:[#allocation135_spill] sm:$0xff] }
 0x42e   :  { %5399 = vmatpush.msrb.mxu2 %v16958_v42 }
 0x42f   :  { %5498 = vmatpush.msrb.mxu3 %v17501_v4  ;;  %v3952_v4 = vpop.f32.mrf.mxu3 }
 0x430   :  { %5401 = vmatpush.msrb.mxu2 %v16961_v5  ;;  %v3953_v53 = vadd.f32 %v3952_v4, %v3847_v63 }
 0x431   :  { %5504 = vmatpush.msrb.mxu3 %v17502_v27  ;;  %v17507_v27 = vld [vmem:[#allocation139_spill] sm:$0xff]  ;;  %v4011_v18 = vpop.f32.mrf.mxu0 }
 0x432   :  { %5403 = vmatpush.msrb.mxu2 %v16964_v57 }
 0x433   :  { %5510 = vmatpush.msrb.mxu3 %v17503_v58  ;;  %v4125_v58 = vpop.f32.mrf.mxu2 }
 0x434   :  { %5405 = vmatpush.msrb.mxu2 %v16967_v36 }
 0x435   :  { %5516 = vmatpush.msrb.mxu3 %v17504_v33  ;;  %v4056_v33 = vpop.f32.mrf.mxu1 }
 0x436   :  { %5407 = vmatpush.msrb.mxu2 %v16970_v3 }
 0x437   :  { %5522 = vmatpush.msrb.mxu3 %v17505_v29  ;;  %v4166_v20 = vpop.f32.mrf.mxu3 }
 0x438   :  { %5409 = vmatpush.msrb.mxu2 %v16973_v14 }
 0x439   :  { %5528 = vmatpush.msrb.mxu3 %v17506_v52  ;;  %v4211_v29 = vpop.f32.mrf.mxu0 }
 0x43a   :  { %5411 = vmatpush.msrb.mxu2 %v17342_v26 }
 0x43b   :  { %5534 = vmatpush.msrb.mxu3 %v17507_v27  ;;  %v4129_v52 = vpop.f32.mrf.mxu2 }
 0x43c   :  { %5413 = vmatpush.msrb.mxu2 %v17345_v61 }
 0x43d   :  { %v4320_v7 = vpop.f32.mrf.mxu1 }
 0x43e   :  { %5415 = vmatpush.msrb.mxu2 %v17348_v41  ;;  %v4321_v51 = vadd.f32 %v4320_v7, %v4211_v29 }
 0x43f   :  { %v4170_v8 = vpop.f32.mrf.mxu3 }
 0x440   :  { %5417 = vmatpush.msrb.mxu2 %v17351_v62  ;;  %v4012_v62 = vadd.f32 %v4011_v18, %v3953_v53  ;;  %v3799_v53 = vunpack.c.h.bf16 %v3793_v32 }
 0x441   :  { %v4219_v13 = vpop.f32.mrf.mxu0 }
 0x442   :  { %5419 = vmatpush.msrb.mxu2 %v17354_v48  ;;  %v4126_v48 = vadd.f32 %v4125_v58, %v4051_v60  ;;  %v4057_v7 = vadd.f32 %v4056_v33, %v4012_v62  ;;  %v3798_v60 = vunpack.c.l.bf16 %v3793_v32 }
 0x444   :  { %5421 = vmatpush.msrb.mxu2 %v17357_v45  ;;  %v3791_v45 = vld [vmem:[#allocation3 + $0x48] sm:$0xff]  ;;  %v4167_v26 = vadd.f32 %v4166_v20, %v4126_v48  ;;  %v4130_v40 = vadd.f32 %v4129_v52, %v4057_v7 }
 0x445   :  { %v4324_v44 = vpop.f32.mrf.mxu1  ;;  %v3795_v59 = vunpack.c.l.bf16 %v3791_v45  ;;  %v3796_v29 = vunpack.c.h.bf16 %v3791_v45 }
 0x446   :  { %v4325_v21 = vadd.f32 %v4324_v44, %v4219_v13  ;;  %v4171_v58 = vadd.f32 %v4170_v8, %v4130_v40 }
 0x447   :  { %v4378_v27 = vpop.f32.mrf.mxu2  ;;  %v4422_v39 = vpop.f32.mrf.mxu3 }
 0x448   :  { %v4379_v23 = vadd.f32 %v4378_v27, %v4321_v51  ;;  %v4917_v51 = vadd.f32 %v4167_v26, %v3795_v59  ;;  %v4920_v48 = vadd.f32 %v4171_v58, %v3798_v60 }
 0x449   :  { %v4497_v12 = vpop.f32.mrf.mxu0 }
 0x44a   :  { %v4423_v34 = vadd.f32 %v4422_v39, %v4379_v23  ;;  %v11135_v13 = vmul.f32 -1.442695, %v4917_v51  ;;  %v11136_v62 = vmul.f32 -1.442695, %v4920_v48 }
 0x44c   :  { %v4498_v41 = vadd.f32 %v4497_v12, %v4423_v34  ;;  %11262 = vpow2.f32 %v11135_v13 }
 0x44d   :  { %v4538_v37 = vpop.f32.mrf.mxu1 }
 0x44e   :  { %v4539_v56 = vadd.f32 %v4538_v37, %v4498_v41 }
 0x44f   :  { %v4428_v17 = vpop.f32.mrf.mxu3 }
 0x450   :  { %v4383_v24 = vpop.f32.mrf.mxu2  ;;  %v4918_v39 = vadd.f32 %v4539_v56, %v3796_v29 }
 0x451   :  { %v4384_v61 = vadd.f32 %v4383_v24, %v4325_v21  ;;  %v4501_v22 = vpop.f32.mrf.mxu0 }
 0x452   :  { %v11137_v24 = vmul.f32 -1.442695, %v4918_v39  ;;  %v11263_v37 = vpop.eup %11262 }
 0x453   :  { %v4429_v27 = vadd.f32 %v4428_v17, %v4384_v61  ;;  %v13842_v59 = vadd.f32 1.0, %v11263_v37 }
 0x454   :  { %11264 = vpow2.f32 %v11137_v24 }
 0x455   :  { %v4502_v23 = vadd.f32 %v4501_v22, %v4429_v27  ;;  %v4542_v18 = vpop.f32.mrf.mxu1  ;;  %11266 = vpow2.f32 %v11136_v62  ;;  %v3792_v22 = vld [vmem:[#allocation3 + $0x50] sm:$0xf]  ;;  %vm4936_vm1 = vweird.f32 %v13842_v59 }
 0x457   :  { %v4543_v34 = vadd.f32 %v4542_v18, %v4502_v23 }
 0x459   :  { %v4921_v45 = vadd.f32 %v4543_v34, %v3799_v53  ;;  %v3797_v34 = vunpack.c.l.bf16 %v3792_v22 }
 0x45a   :  { %v11265_v26 = vpop.eup %11264 }
 0x45b   :  { %v11138_v61 = vmul.f32 -1.442695, %v4921_v45  ;;  %v13844_v41 = vadd.f32 1.0, %v11265_v26  ;;  %v11267_v12 = vpop.eup %11266  ;;  %v4750_v63 = vpop.f32.mrf.mxu0 }
 0x45c   :  { %v13848_v44 = vadd.f32 1.0, %v11267_v12  ;;  %v4942_v12 = vand.u32 2147483648, %v13842_v59 }
 0x45d   :  { %11268 = vpow2.f32 %v11138_v61  ;;  %vm4974_vm4 = vweird.f32 %v13844_v41 }
 0x45e   :  { %11270 = vrcp.f32 %v13842_v59  ;;  %v4794_v40 = vpop.f32.mrf.mxu1  ;;  %vm4951_vm7 = vweird.f32 %v13848_v44 }
 0x45f   :  { %v4692_v52 = vpop.f32.mrf.mxu3  ;;  %11272 = vrcp.f32 %v13844_v41 }
 0x460   :  { %11274 = vrcp.f32 %v13848_v44 }
 0x463   :  { %v11269_v21 = vpop.eup %11268  ;;  %v4755_v62 = vpop.f32.mrf.mxu0 }
 0x464   :  { %v11271_v8 = vpop.eup %11270  ;;  %v13850_v33 = vadd.f32 1.0, %v11269_v21 }
 0x465   :  { %v13852_v0 = vpop.eup %11272  ;;  %v4932_v17 = vmul.f32 %v11271_v8, %v13842_v59  ;;  %vm4937_vm0 = vweird.f32 %v11271_v8 }
 0x466   :  { %11276 = vrcp.f32 %v13850_v33  ;;  %v4970_v56 = vmul.f32 %v13852_v0, %v13844_v41  ;;  %v13859_v32 = vpop.eup %11274  ;;  %vm4975_vm2 = vweird.f32 %v13852_v0  ;;  %vm13873_vm3 = vmor %vm4936_vm1, %vm4937_vm0  ;;  %vm4989_vm12 = vweird.f32 %v13850_v33 }
 0x467   :  { %v4696_v29 = vpop.f32.mrf.mxu3  ;;  %v4933_v51 = vsub.f32 1.0, %v4932_v17  ;;  %v4947_v18 = vmul.f32 %v13859_v32, %v13848_v44  ;;  %vm13883_vm5 = vmor %vm4974_vm4, %vm4975_vm2  ;;  %vm4952_vm8 = vweird.f32 %v13859_v32 }
 0x468   :  { %v4583_v20 = vpop.f32.mrf.mxu2  ;;  %v4971_v39 = vsub.f32 1.0, %v4970_v56  ;;  %vm4953_vm11 = vmor %vm4951_vm7, %vm4952_vm8 }
 0x469   :  { %v4693_v4 = vadd.f32 %v4692_v52, %v4583_v20  ;;  %v4934_v58 = vmul.f32 %v11271_v8, %v4933_v51  ;;  %v4948_v52 = vsub.f32 1.0, %v4947_v18 }
 0x46a   :  { %v4972_v37 = vmul.f32 %v13852_v0, %v4971_v39 }
 0x46b   :  { %v4751_v27 = vadd.f32 %v4750_v63, %v4693_v4  ;;  %v4935_v20 = vadd.f32 %v11271_v8, %v4934_v58  ;;  %v4800_v63 = vpop.f32.mrf.mxu1  ;;  %v4940_v4 = vand.u32 2147483647, %v13842_v59  ;;  %v4978_v59 = vand.u32 2147483647, %v13844_v41 }
 0x46c   :  { %v13861_v23 = vpop.eup %11276  ;;  %v4973_v17 = vadd.f32 %v13852_v0, %v4972_v37  ;;  %v4957_v37 = vand.u32 2147483648, %v13848_v44 }
 0x46d   :  { %v4795_v60 = vadd.f32 %v4794_v40, %v4751_v27  ;;  %v4985_v45 = vmul.f32 %v13861_v23, %v13850_v33  ;;  %v4980_v27 = vand.u32 2147483648, %v13844_v41  ;;  %v4949_v40 = vmul.f32 %v13859_v32, %v4948_v52 }
 0x46e   :  { %v4939_v22 = vsel %vm13873_vm3, %v11271_v8, %v4935_v20  ;;  %vm4941_vm6 = vcmp.eq.f32.partialorder %v4940_v4, 8.507059e+37  ;;  %vm4979_vm9 = vcmp.eq.f32.partialorder %v4978_v59, 8.507059e+37  ;;  %vm4990_vm10 = vweird.f32 %v13861_v23 }
 0x46f   :  { %v4950_v41 = vadd.f32 %v13859_v32, %v4949_v40  ;;  %vm4991_vm13 = vmor %vm4989_vm12, %vm4990_vm10 }
 0x470   :  { %v4591_v7 = vpop.f32.mrf.mxu2 }
 0x471   :  { %v4697_v13 = vadd.f32 %v4696_v29, %v4591_v7  ;;  %v3794_v29 = vld [vmem:[#allocation3 + $0x5c] sm:$0xf]  ;;  %v4986_v7 = vsub.f32 1.0, %v4985_v45  ;;  %v4954_v4 = vsel %vm4953_vm11, %v13859_v32, %v4950_v41 }
 0x472   :  { %v3800_v58 = vunpack.c.l.bf16 %v3794_v29  ;;  %v17518_v41 = vld [vmem:[#allocation115_spill] sm:$0xff] }
 0x473   :  { %v4756_v61 = vadd.f32 %v4755_v62, %v4697_v13  ;;  %v4943_v13 = vor.u32 1.1754944e-38, %v4942_v12  ;;  %v4987_v8 = vmul.f32 %v13861_v23, %v4986_v7 }
 0x475   :  { %v4801_v51 = vadd.f32 %v4800_v63, %v4756_v61  ;;  %v4988_v12 = vadd.f32 %v13861_v23, %v4987_v8  ;;  %v17514_v8 = vld [vmem:[#allocation102_spill] sm:$0xff] }
 0x477   :  { %v4992_v29 = vsel %vm4991_vm13, %v13861_v23, %v4988_v12  ;;  %v17526_v12 = vld [vmem:[#allocation117_spill] sm:$0xff] }
 0x47f   :  { %v4910_v53 = vpop.f32.mrf.mxu3 }
 0x488   :  { %v4869_v24 = vpop.f32.mrf.mxu2 }
 0x489   :  { %v4870_v48 = vadd.f32 %v4869_v24, %v4795_v60  ;;  %v4914_v24 = vpop.f32.mrf.mxu3 }
 0x48b   :  { %v4911_v26 = vadd.f32 %v4910_v53, %v4870_v48  ;;  %v4977_v53 = vsel %vm13883_vm5, %v13852_v0, %v4973_v17  ;;  %v4981_v48 = vor.u32 1.1754944e-38, %v4980_v27  ;;  %v4955_v0 = vand.u32 2147483647, %v13848_v44 }
 0x48c   :  { %v4993_v17 = vand.u32 2147483647, %v13850_v33  ;;  %v4958_v44 = vor.u32 1.1754944e-38, %v4957_v37  ;;  %v17520_v37 = vld [vmem:[#allocation109_spill] sm:$0xff] }
 0x48d   :  { %v4919_v21 = vadd.f32 %v4911_v26, %v3797_v34  ;;  %v4944_v34 = vsel %vm4941_vm6, %v4943_v13, %v4939_v22  ;;  %v4982_v61 = vsel %vm4979_vm9, %v4981_v48, %v4977_v53  ;;  %vm4956_vm14 = vcmp.eq.f32.partialorder %v4955_v0, 8.507059e+37  ;;  %v17512_v53 = vld [vmem:[#allocation108_spill] sm:$0xff]  ;;  %v17516_v48 = vld [vmem:[#allocation119_spill] sm:$0xff]  ;;  %v17523_v0 = vld [vmem:[#allocation114_spill] sm:$0xff] }
 0x48e   :  { %v5001_v52 = vmul.f32 %v4944_v34, %v13482_v10  ;;  %v4959_v7 = vsel %vm4956_vm14, %v4958_v44, %v4954_v4  ;;  %vm4994_vm15 = vcmp.eq.f32.partialorder %v4993_v17, 8.507059e+37  ;;  %v17515_v34 = vld [vmem:[#allocation111_spill] sm:$0xff]  ;;  %v17528_v4 = vld [vmem:[#allocation134_spill] sm:$0xff]  ;;  %v17529_v17 = vld [vmem:[#allocation156_spill] sm:$0xff] }
 0x48f   :  { %11278 = vtanh.f32 %v4919_v21  ;;  %v4995_v21 = vand.u32 2147483648, %v13850_v33  ;;  %v5002_v33 = vmul.f32 %v4959_v7, %v13503_v9  ;;  %v17530_v44 = vld [vmem:[#allocation121_spill] sm:$0xff]  ;;  %v17532_v7 = vld [vmem:[#allocation160_spill] sm:$0xff] }
 0x490   :  { %v4873_v39 = vpop.f32.mrf.mxu2 }
 0x491   :  { %v4874_v18 = vadd.f32 %v4873_v39, %v4801_v51  ;;  %v4996_v56 = vor.u32 1.1754944e-38, %v4995_v21  ;;  %v17527_v21 = vld [vmem:[#allocation128_spill] sm:$0xff] }
 0x493   :  { %v4915_v45 = vadd.f32 %v4914_v24, %v4874_v18  ;;  %v4997_v51 = vsel %vm4994_vm15, %v4996_v56, %v4992_v29  ;;  %v17513_v24 = vld [vmem:[#allocation113_spill] sm:$0xff]  ;;  %v17531_v29 = vld [vmem:[#allocation136_spill] sm:$0xff]  ;;  %v17533_v56 = vld [vmem:[#allocation142_spill] sm:$0xff] }
 0x495   :  { %v11279_v62 = vpop.eup %11278  ;;  %v4922_v26 = vadd.f32 %v4915_v45, %v3800_v58  ;;  %v17517_v45 = vld [vmem:[#allocation106_spill] sm:$0xff] }
 0x496   :  { %v5003_v20 = vmul.f32 %v11279_v62, %v4982_v61  ;;  %v17519_v62 = vld [vmem:[#allocation123_spill] sm:$0xff]  ;;  %v17521_v61 = vld [vmem:[#allocation120_spill] sm:$0xff] }
 0x497   :  { %11280 = vtanh.f32 %v4922_v26  ;;  %v17522_v26 = vld [vmem:[#allocation126_spill] sm:$0xff] }
 0x498   :  { %v13900_v63 = vsub.f32 %v5001_v52, %v5003_v20  ;;  %v17524_v52 = vld [vmem:[#allocation124_spill] sm:$0xff]  ;;  %v17525_v20 = vld [vmem:[#allocation131_spill] sm:$0xff] }
 0x49a   :  { %v13906_v10 = vand.u32 4294901760, %v13900_v63 }
 0x49c   :  { %5164 = vmatmul.f32.vlgmr.msra.gmra.mxu1 %v13906_v10  ;;  %v13912_v32 = vsub.f32 %v13900_v63, %v13906_v10 }
 0x49d   :  { %v11281_v27 = vpop.eup %11280  ;;  %5604 = vmatpush.msra.mxu1 %v11705_v25 }
 0x49e   :  { %v5004_v40 = vmul.f32 %v11281_v27, %v4997_v51  ;;  %5222 = vmatmul.f32.vlgmr.msra.gmra.mxu2 %v13912_v32  ;;  %v13918_v23 = vand.u32 4294901760, %v13912_v32  ;;  %v17534_v27 = vld [vmem:[#allocation127_spill] sm:$0xff]  ;;  %v17535_v51 = vld [vmem:[#allocation164_spill] sm:$0xff] }
 0x49f   :  { %5606 = vmatpush.msra.mxu1 %v11712_v30  ;;  %5651 = vmatpush.msra.mxu2 %v17005_v47 }
 0x4a0   :  { %v13922_v22 = vsub.f32 %v5002_v33, %v5004_v40  ;;  %5266 = vmatmul.f32.vlgmr.msra.gmra.mxu3 %v13918_v23  ;;  %v5053_v59 = vsub.f32 %v13912_v32, %v13918_v23  ;;  %v17536_v33 = vld [vmem:[#allocation145_spill] sm:$0xff]  ;;  %v17537_v40 = vld [vmem:[#allocation140_spill] sm:$0xff] }
 0x4a1   :  { %5608 = vmatpush.msra.mxu1 %v11759_v28  ;;  %5655 = vmatpush.msra.mxu2 %v17006_v46 }
 0x4a2   :  { %v13930_v9 = vand.u32 4294901760, %v13922_v22  ;;  %5722 = vmatpush.msra.mxu3 %v11705_v25  ;;  %v13933_v39 = vand.u32 4294901760, %v5053_v59  ;;  %v17538_v59 = vld [vmem:[#allocation129_spill] sm:$0xff] }
 0x4a3   :  { %5610 = vmatpush.msra.mxu1 %v11775_v31  ;;  %5659 = vmatpush.msra.mxu2 %v17007_v16 }
 0x4a4   :  { %5724 = vmatpush.msra.mxu3 %v11712_v30  ;;  %5055 = vmatmul.f32.vlgmr.msra.gmra.mxu0 %v13933_v39  ;;  %v13941_v13 = vsub.f32 %v13922_v22, %v13930_v9 }
 0x4a5   :  { %5168 = vmatmul.f32.gmra.mxu1 %v13930_v9  ;;  %5546 = vmatpush.msra.mxu0 %v17008_v49 }
 0x4a6   :  { %5612 = vmatpush.msra.mxu1 %v16958_v42  ;;  %5663 = vmatpush.msra.mxu2 %v17009_v35  ;;  %v13948_v60 = vand.u32 4294901760, %v13941_v13 }
 0x4a7   :  { %5726 = vmatpush.msra.mxu3 %v11759_v28  ;;  %5227 = vmatmul.f32.gmra.mxu2 %v13941_v13 }
 0x4a8   :  { %5549 = vmatpush.msra.mxu0 %v17010_v55  ;;  %5614 = vmatpush.msra.mxu1 %v16961_v5  ;;  %v5061_v58 = vsub.f32 %v13941_v13, %v13948_v60 }
 0x4a9   :  { %5667 = vmatpush.msra.mxu2 %v17011_v11  ;;  %5728 = vmatpush.msra.mxu3 %v11775_v31 }
 0x4aa   :  { %5272 = vmatmul.f32.gmra.mxu3 %v13948_v60  ;;  %5552 = vmatpush.msra.mxu0 %v17012_v54  ;;  %v13960_v18 = vand.u32 4294901760, %v5061_v58  ;;  %v17539_v58 = vld [vmem:[#allocation167_spill] sm:$0xff] }
 0x4ab   :  { %5616 = vmatpush.msra.mxu1 %v16964_v57  ;;  %5671 = vmatpush.msra.mxu2 %v17013_v43 }
 0x4ac   :  { %5730 = vmatpush.msra.mxu3 %v16958_v42  ;;  %5555 = vmatpush.msra.mxu0 %v17014_v2 }
 0x4ad   :  { %5618 = vmatpush.msra.mxu1 %v16967_v36  ;;  %5675 = vmatpush.msra.mxu2 %v17015_v50 }
 0x4ae   :  { %5732 = vmatpush.msra.mxu3 %v16961_v5  ;;  %5063 = vmatmul.f32.gmra.mxu0 %v13960_v18 }
 0x4af   :  { %5382 = vmatmul.f32.vlgmr.msrb.gmra.mxu1 %v13906_v10  ;;  %5558 = vmatpush.msra.mxu0 %v17016_v19 }
 0x4b0   :  { %5620 = vmatpush.msra.mxu1 %v16970_v3  ;;  %5679 = vmatpush.msra.mxu2 %v17017_v6 }
 0x4b1   :  { %5734 = vmatpush.msra.mxu3 %v16964_v57  ;;  %5427 = vmatmul.f32.vlgmr.msrb.gmra.mxu2 %v13933_v39 }
 0x4b2   :  { %5561 = vmatpush.msra.mxu0 %v17018_v1  ;;  %5622 = vmatpush.msra.mxu1 %v16973_v14 }
 0x4b3   :  { %5683 = vmatpush.msra.mxu2 %v17019_v15  ;;  %5736 = vmatpush.msra.mxu3 %v16967_v36 }
 0x4b4   :  { %5536 = vmatmul.f32.vlgmr.msrb.gmra.mxu3 %v13906_v10  ;;  %5564 = vmatpush.msra.mxu0 %v17020_v38 }
 0x4b5   :  { %5624 = vmatpush.msra.mxu1 %v17512_v53  ;;  %5687 = vmatpush.msra.mxu2 %v17513_v24 }
 0x4b6   :  { %5738 = vmatpush.msra.mxu3 %v16970_v3  ;;  %5567 = vmatpush.msra.mxu0 %v17514_v8 }
 0x4b7   :  { %5626 = vmatpush.msra.mxu1 %v17515_v34  ;;  %5691 = vmatpush.msra.mxu2 %v17516_v48  ;;  %v17578_v48 = vld [vmem:[#allocation181_spill] sm:$0xff] }
 0x4b8   :  { %5740 = vmatpush.msra.mxu3 %v16973_v14  ;;  %5341 = vmatmul.f32.vlgmr.msrb.gmra.mxu0 %v13906_v10 }
 0x4b9   :  { %5386 = vmatmul.f32.gmra.mxu1 %v13930_v9  ;;  %5570 = vmatpush.msra.mxu0 %v17517_v45  ;;  %v17575_v45 = vld [vmem:[#allocation177_spill] sm:$0xff] }
 0x4ba   :  { %5628 = vmatpush.msra.mxu1 %v17518_v41  ;;  %5695 = vmatpush.msra.mxu2 %v17519_v62  ;;  %v17572_v62 = vld [vmem:[#allocation174_spill] sm:$0xff] }
 0x4bb   :  { %5742 = vmatpush.msra.mxu3 %v17512_v53  ;;  %5435 = vmatmul.f32.gmra.mxu2 %v13960_v18 }
 0x4bc   :  { %5573 = vmatpush.msra.mxu0 %v17520_v37  ;;  %5630 = vmatpush.msra.mxu1 %v17521_v61  ;;  %v17569_v37 = vld [vmem:[#allocation171_spill] sm:$0xff] }
 0x4bd   :  { %5699 = vmatpush.msra.mxu2 %v17522_v26  ;;  %5744 = vmatpush.msra.mxu3 %v17515_v34  ;;  %v17566_v26 = vld [vmem:[#allocation166_spill] sm:$0xff] }
 0x4be   :  { %5540 = vmatmul.f32.gmra.mxu3 %v13930_v9  ;;  %5576 = vmatpush.msra.mxu0 %v17523_v0  ;;  %v17565_v0 = vld [vmem:[#allocation178_spill] sm:$0xff] }
 0x4bf   :  { %5632 = vmatpush.msra.mxu1 %v17524_v52  ;;  %5703 = vmatpush.msra.mxu2 %v17525_v20  ;;  %v17562_v20 = vld [vmem:[#allocation173_spill] sm:$0xff] }
 0x4c0   :  { %5746 = vmatpush.msra.mxu3 %v17518_v41  ;;  %5579 = vmatpush.msra.mxu0 %v17526_v12  ;;  %v17559_v12 = vld [vmem:[#allocation169_spill] sm:$0xff] }
 0x4c1   :  { %5634 = vmatpush.msra.mxu1 %v17527_v21  ;;  %5707 = vmatpush.msra.mxu2 %v17528_v4  ;;  %v17556_v4 = vld [vmem:[#allocation165_spill] sm:$0xff] }
 0x4c2   :  { %5748 = vmatpush.msra.mxu3 %v17521_v61  ;;  %5345 = vmatmul.f32.gmra.mxu0 %v13930_v9 }
 0x4c3   :  { %5816 = vmatpush.msrb.mxu1 %v17529_v17  ;;  %5582 = vmatpush.msra.mxu0 %v17530_v44  ;;  %v17552_v44 = vld [vmem:[#allocation183_spill] sm:$0xff] }
 0x4c4   :  { %5638 = vmatmul.f32.vlgmr.msra.gmra.mxu1 %v13918_v23  ;;  %5711 = vmatpush.msra.mxu2 %v17531_v29  ;;  %v17543_v29 = vld [vmem:[#allocation170_spill] sm:$0xff]  ;;  %v17555_v17 = vld [vmem:[#allocation187_spill] sm:$0xff] }
 0x4c5   :  { %5750 = vmatpush.msra.mxu3 %v17524_v52  ;;  %5822 = vmatpush.msrb.mxu1 %v17532_v7  ;;  %v17540_v7 = vld [vmem:[#allocation148_spill] sm:$0xff] }
 0x4c6   :  { %5918 = vmatpush.msrb.mxu2 %v17533_v56  ;;  %5585 = vmatpush.msra.mxu0 %v17534_v27  ;;  %v17541_v56 = vld [vmem:[#allocation141_spill] sm:$0xff]  ;;  %v17542_v27 = vld [vmem:[#allocation132_spill] sm:$0xff] }
 0x4c7   :  { %5713 = vmatmul.f32.vlgmr.msra.gmra.mxu2 %v13906_v10  ;;  %5752 = vmatpush.msra.mxu3 %v17527_v21 }
 0x4c8   :  { %5828 = vmatpush.msrb.mxu1 %v17535_v51  ;;  %5921 = vmatpush.msrb.mxu2 %v17536_v33  ;;  %v17544_v51 = vld [vmem:[#allocation150_spill] sm:$0xff]  ;;  %v17545_v33 = vld [vmem:[#allocation143_spill] sm:$0xff] }
 0x4c9   :  { %5976 = vmatpush.msrb.mxu3 %v17537_v40  ;;  %5588 = vmatpush.msra.mxu0 %v17538_v59  ;;  %v17548_v59 = vld [vmem:[#allocation144_spill] sm:$0xff] }
 0x4ca   :  { %5754 = vmatmul.f32.vlgmr.msra.gmra.mxu3 %v13906_v10  ;;  %5834 = vmatpush.msrb.mxu1 %v17539_v58  ;;  %v17546_v58 = vld [vmem:[#allocation176_spill] sm:$0xff] }
 0x4cb   :  { %5924 = vmatpush.msrb.mxu2 %v17540_v7  ;;  %5978 = vmatpush.msrb.mxu3 %v17541_v56  ;;  %v17547_v7 = vld [vmem:[#allocation153_spill] sm:$0xff] }
 0x4cc   :  { %5591 = vmatpush.msra.mxu0 %v17542_v27  ;;  %5840 = vmatpush.msrb.mxu1 %v17543_v29  ;;  %v17549_v29 = vld [vmem:[#allocation180_spill] sm:$0xff]  ;;  %v17551_v27 = vld [vmem:[#allocation147_spill] sm:$0xff] }
 0x4cd   :  { %5927 = vmatpush.msrb.mxu2 %v17544_v51  ;;  %5980 = vmatpush.msrb.mxu3 %v17545_v33  ;;  %v17550_v51 = vld [vmem:[#allocation157_spill] sm:$0xff] }
 0x4ce   :  { %5763 = vmatpush.msrb.mxu0 %v17537_v40  ;;  %5644 = vmatmul.f32.gmra.mxu1 %v13948_v60 }
 0x4cf   :  { %5594 = vmatmul.f32.vlgmr.msra.gmra.mxu0 %v13912_v32  ;;  %5846 = vmatpush.msrb.mxu1 %v17546_v58  ;;  %v17553_v58 = vld [vmem:[#allocation162_spill] sm:$0xff] }
 0x4d0   :  { %5765 = vmatpush.msrb.mxu0 %v17541_v56  ;;  %5930 = vmatpush.msrb.mxu2 %v17547_v7  ;;  %v17554_v7 = vld [vmem:[#allocation151_spill] sm:$0xff] }
 0x4d1   :  { %5982 = vmatpush.msrb.mxu3 %v17548_v59  ;;  %5717 = vmatmul.f32.gmra.mxu2 %v13930_v9 }
 0x4d2   :  { %5767 = vmatpush.msrb.mxu0 %v17545_v33  ;;  %5852 = vmatpush.msrb.mxu1 %v17549_v29  ;;  %v17557_v29 = vld [vmem:[#allocation154_spill] sm:$0xff] }
 0x4d3   :  { %5933 = vmatpush.msrb.mxu2 %v17550_v51  ;;  %5984 = vmatpush.msrb.mxu3 %v17551_v27  ;;  %v17558_v51 = vld [vmem:[#allocation193_spill] sm:$0xff] }
 0x4d4   :  { %5758 = vmatmul.f32.gmra.mxu3 %v13930_v9  ;;  %5769 = vmatpush.msrb.mxu0 %v17548_v59 }
 0x4d5   :  { %5858 = vmatpush.msrb.mxu1 %v17552_v44  ;;  %5936 = vmatpush.msrb.mxu2 %v17553_v58  ;;  %v17560_v44 = vld [vmem:[#allocation158_spill] sm:$0xff]  ;;  %v17561_v58 = vld [vmem:[#allocation196_spill] sm:$0xff] }
 0x4d6   :  { %5986 = vmatpush.msrb.mxu3 %v17554_v7  ;;  %5771 = vmatpush.msrb.mxu0 %v17551_v27 }
 0x4d7   :  { %5864 = vmatpush.msrb.mxu1 %v17555_v17  ;;  %5939 = vmatpush.msrb.mxu2 %v17556_v4  ;;  %v17563_v17 = vld [vmem:[#allocation161_spill] sm:$0xff]  ;;  %v17564_v4 = vld [vmem:[#allocation198_spill] sm:$0xff] }
 0x4d8   :  { %5988 = vmatpush.msrb.mxu3 %v17557_v29  ;;  %5599 = vmatmul.f32.gmra.mxu0 %v13941_v13 }
 0x4d9   :  { %5773 = vmatpush.msrb.mxu0 %v17554_v7  ;;  %5870 = vmatpush.msrb.mxu1 %v17558_v51  ;;  %v17568_v51 = vld [vmem:[#allocation182_spill] sm:$0xff] }
 0x4da   :  { %5942 = vmatpush.msrb.mxu2 %v17559_v12  ;;  %5990 = vmatpush.msrb.mxu3 %v17560_v44  ;;  %v17567_v12 = vld [vmem:[#allocation200_spill] sm:$0xff] }
 0x4db   :  { %5775 = vmatpush.msrb.mxu0 %v17557_v29  ;;  %5876 = vmatpush.msrb.mxu1 %v17561_v58  ;;  %v17571_v58 = vld [vmem:[#allocation186_spill] sm:$0xff] }
 0x4dc   :  { %5945 = vmatpush.msrb.mxu2 %v17562_v20  ;;  %5992 = vmatpush.msrb.mxu3 %v17563_v17  ;;  %v17570_v20 = vld [vmem:[#allocation201_spill] sm:$0xff] }
 0x4dd   :  { %5777 = vmatpush.msrb.mxu0 %v17560_v44  ;;  %5882 = vmatpush.msrb.mxu1 %v17564_v4  ;;  %v17574_v4 = vld [vmem:[#allocation190_spill] sm:$0xff] }
 0x4de   :  { %5948 = vmatpush.msrb.mxu2 %v17565_v0  ;;  %5994 = vmatpush.msrb.mxu3 %v17566_v26  ;;  %v17573_v0 = vld [vmem:[#allocation202_spill] sm:$0xff] }
 0x4df   :  { %5779 = vmatpush.msrb.mxu0 %v17563_v17  ;;  %5888 = vmatpush.msrb.mxu1 %v17567_v12  ;;  %v17577_v12 = vld [vmem:[#allocation192_spill] sm:$0xff] }
 0x4e0   :  { %5951 = vmatpush.msrb.mxu2 %v17568_v51  ;;  %5996 = vmatpush.msrb.mxu3 %v17569_v37  ;;  %v17576_v51 = vld [vmem:[#allocation203_spill] sm:$0xff] }
 0x4e1   :  { %5781 = vmatpush.msrb.mxu0 %v17566_v26  ;;  %5894 = vmatpush.msrb.mxu1 %v17570_v20  ;;  %v17588_v20 = vld [vmem:[#allocation18_spill] sm:$0xff] }
 0x4e2   :  { %5954 = vmatpush.msrb.mxu2 %v17571_v58  ;;  %5998 = vmatpush.msrb.mxu3 %v17572_v62  ;;  %v17579_v58 = vld [vmem:[#allocation195_spill] sm:$0xff] }
 0x4e3   :  { %5783 = vmatpush.msrb.mxu0 %v17569_v37  ;;  %5900 = vmatpush.msrb.mxu1 %v17573_v0  ;;  %v17580_v0 = vld [vmem:[#allocation184_spill] sm:$0xff] }
 0x4e4   :  { %5957 = vmatpush.msrb.mxu2 %v17574_v4  ;;  %6000 = vmatpush.msrb.mxu3 %v17575_v45  ;;  %v17583_v4 = vld [vmem:[#allocation38_spill] sm:$0xff] }
 0x4e5   :  { %5785 = vmatpush.msrb.mxu0 %v17572_v62  ;;  %5906 = vmatpush.msrb.mxu1 %v17576_v51  ;;  %v17581_v51 = vld [vmem:[#allocation188_spill] sm:$0xff] }
 0x4e6   :  { %5960 = vmatpush.msrb.mxu2 %v17577_v12  ;;  %6002 = vmatpush.msrb.mxu3 %v17578_v48  ;;  %v17582_v12 = vld [vmem:[#allocation16_spill] sm:$0xff] }
 0x4e7   :  { %5908 = vmatmul.f32.vlgmr.msrb.gmra.mxu1 %v13906_v10  ;;  %5787 = vmatpush.msrb.mxu0 %v17575_v45 }
 0x4e8   :  { %6094 = vmatpush.msra.mxu1 %v17537_v40  ;;  %5963 = vmatpush.msrb.mxu2 %v17579_v58  ;;  %v17584_v58 = vld [vmem:[#allocation17_spill] sm:$0xff] }
 0x4e9   :  { %6004 = vmatpush.msrb.mxu3 %v17580_v0  ;;  %5966 = vmatmul.f32.vlgmr.msrb.gmra.mxu2 %v13912_v32  ;;  %v17585_v32 = vld [vmem:[#allocation146_spill] sm:$0xff] }
 0x4ea   :  { %6096 = vmatpush.msra.mxu1 %v17541_v56  ;;  %5789 = vmatpush.msrb.mxu0 %v17578_v48 }
 0x4eb   :  { %6006 = vmatpush.msrb.mxu3 %v17581_v51  ;;  %6236 = vmatpush.msra.mxu2 %v17582_v12 }
 0x4ec   :  { %6010 = vmatmul.f32.vlgmr.msrb.gmra.mxu3 %v13918_v23  ;;  %6098 = vmatpush.msra.mxu1 %v17545_v33  ;;  %v17586_v23 = vld [vmem:[#allocation39_spill] sm:$0xff] }
 0x4ed   :  { %5791 = vmatpush.msrb.mxu0 %v17580_v0  ;;  %6289 = vmatpush.msra.mxu3 %v17583_v4  ;;  %v17587_v4 = vld [vmem:[#allocation149_spill] sm:$0xff] }
 0x4ee   :  { %6100 = vmatpush.msra.mxu1 %v17548_v59  ;;  %6238 = vmatpush.msra.mxu2 %v17584_v58  ;;  %v17589_v59 = vld [vmem:[#allocation152_spill] sm:$0xff] }
 0x4ef   :  { %5793 = vmatpush.msrb.mxu0 %v17581_v51  ;;  %5912 = vmatmul.f32.gmra.mxu1 %v13930_v9 }
 0x4f0   :  { %5799 = vmatmul.f32.vlgmr.msrb.gmra.mxu0 %v13933_v39  ;;  %6102 = vmatpush.msra.mxu1 %v17551_v27  ;;  %v17590_v39 = vld [vmem:[#allocation43_spill] sm:$0xff] }
 0x4f1   :  { %6023 = vmatpush.msra.mxu0 %v17585_v32  ;;  %5971 = vmatmul.f32.gmra.mxu2 %v13941_v13  ;;  %v17591_v32 = vld [vmem:[#allocation19_spill] sm:$0xff] }
 0x4f2   :  { %6104 = vmatpush.msra.mxu1 %v17554_v7  ;;  %6295 = vmatpush.msra.mxu3 %v17586_v23  ;;  %v17592_v13 = vld [vmem:[#allocation155_spill] sm:$0xff] }
 0x4f3   :  { %6027 = vmatpush.msra.mxu0 %v17587_v4  ;;  %6240 = vmatpush.msra.mxu2 %v17588_v20  ;;  %v17593_v7 = vld [vmem:[#allocation47_spill] sm:$0xff] }
 0x4f4   :  { %6016 = vmatmul.f32.gmra.mxu3 %v13948_v60  ;;  %6106 = vmatpush.msra.mxu1 %v17557_v29  ;;  %v17594_v4 = vld [vmem:[#allocation159_spill] sm:$0xff]  ;;  %v17595_v60 = vld [vmem:[#allocation50_spill] sm:$0xff] }
 0x4f5   :  { %6031 = vmatpush.msra.mxu0 %v17589_v59  ;;  %6301 = vmatpush.msra.mxu3 %v17590_v39  ;;  %v17596_v59 = vld [vmem:[#allocation20_spill] sm:$0xff]  ;;  %v17597_v39 = vld [vmem:[#allocation163_spill] sm:$0xff] }
 0x4f6   :  { %6108 = vmatpush.msra.mxu1 %v17560_v44  ;;  %6242 = vmatpush.msra.mxu2 %v17591_v32  ;;  %v17598_v23 = vld [vmem:[#allocation55_spill] sm:$0xff] }
 0x4f7   :  { %6035 = vmatpush.msra.mxu0 %v17592_v13  ;;  %6307 = vmatpush.msra.mxu3 %v17593_v7  ;;  %v17599_v13 = vld [vmem:[#allocation21_spill] sm:$0xff]  ;;  %v17600_v7 = vld [vmem:[#allocation168_spill] sm:$0xff] }
 0x4f8   :  { %5807 = vmatmul.f32.gmra.mxu0 %v13960_v18  ;;  %6110 = vmatpush.msra.mxu1 %v17563_v17  ;;  %v17601_v18 = vld [vmem:[#allocation58_spill] sm:$0xff] }
 0x4f9   :  { %6039 = vmatpush.msra.mxu0 %v17594_v4  ;;  %6313 = vmatpush.msra.mxu3 %v17595_v60  ;;  %v17602_v4 = vld [vmem:[#allocation25_spill] sm:$0xff]  ;;  %v17603_v60 = vld [vmem:[#allocation172_spill] sm:$0xff]  ;;  %v17624_v17 = vld [vmem:[#allocation54_spill] sm:$0xff] }
 0x4fa   :  { %6112 = vmatpush.msra.mxu1 %v17566_v26  ;;  %6244 = vmatpush.msra.mxu2 %v17596_v59  ;;  %v17604_v26 = vld [vmem:[#allocation63_spill] sm:$0xff] }
 0x4fb   :  { %6043 = vmatpush.msra.mxu0 %v17597_v39  ;;  %6319 = vmatpush.msra.mxu3 %v17598_v23  ;;  %v17605_v39 = vld [vmem:[#allocation31_spill] sm:$0xff] }
 0x4fc   :  { %6114 = vmatpush.msra.mxu1 %v17569_v37  ;;  %6246 = vmatpush.msra.mxu2 %v17599_v13  ;;  %v17606_v23 = vld [vmem:[#allocation175_spill] sm:$0xff] }
 0x4fd   :  { %6047 = vmatpush.msra.mxu0 %v17600_v7  ;;  %6325 = vmatpush.msra.mxu3 %v17601_v18  ;;  %v17607_v37 = vld [vmem:[#allocation67_spill] sm:$0xff]  ;;  %v17608_v7 = vld [vmem:[#allocation33_spill] sm:$0xff] }
 0x4fe   :  { %6116 = vmatpush.msra.mxu1 %v17572_v62  ;;  %6248 = vmatpush.msra.mxu2 %v17602_v4  ;;  %v17609_v18 = vld [vmem:[#allocation179_spill] sm:$0xff]  ;;  %v17610_v62 = vld [vmem:[#allocation72_spill] sm:$0xff] }
 0x4ff   :  { %6051 = vmatpush.msra.mxu0 %v17603_v60  ;;  %6331 = vmatpush.msra.mxu3 %v17604_v26  ;;  %v17611_v60 = vld [vmem:[#allocation36_spill] sm:$0xff]  ;;  %v17612_v26 = vld [vmem:[#allocation185_spill] sm:$0xff] }
 0x500   :  { %6118 = vmatpush.msra.mxu1 %v17575_v45  ;;  %6250 = vmatpush.msra.mxu2 %v17605_v39  ;;  %v17613_v45 = vld [vmem:[#allocation75_spill] sm:$0xff] }
 0x501   :  { %6055 = vmatpush.msra.mxu0 %v17606_v23  ;;  %6337 = vmatpush.msra.mxu3 %v17607_v37  ;;  %v17614_v23 = vld [vmem:[#allocation44_spill] sm:$0xff]  ;;  %v17615_v37 = vld [vmem:[#allocation189_spill] sm:$0xff] }
 0x502   :  { %6120 = vmatpush.msra.mxu1 %v17578_v48  ;;  %6252 = vmatpush.msra.mxu2 %v17608_v7  ;;  %v17623_v48 = vld [vmem:[#allocation197_spill] sm:$0xff] }
 0x503   :  { %6059 = vmatpush.msra.mxu0 %v17609_v18  ;;  %6343 = vmatpush.msra.mxu3 %v17610_v62  ;;  %v17616_v18 = vld [vmem:[#allocation78_spill] sm:$0xff]  ;;  %v17617_v62 = vld [vmem:[#allocation191_spill] sm:$0xff] }
 0x504   :  { %6122 = vmatpush.msra.mxu1 %v17580_v0  ;;  %6254 = vmatpush.msra.mxu2 %v17611_v60  ;;  %v17618_v0 = vld [vmem:[#allocation46_spill] sm:$0xff] }
 0x505   :  { %6063 = vmatpush.msra.mxu0 %v17612_v26  ;;  %6349 = vmatpush.msra.mxu3 %v17613_v45  ;;  %v17619_v26 = vld [vmem:[#allocation82_spill] sm:$0xff] }
 0x506   :  { %6124 = vmatpush.msra.mxu1 %v17581_v51  ;;  %6256 = vmatpush.msra.mxu2 %v17614_v23  ;;  %v17620_v45 = vld [vmem:[#allocation194_spill] sm:$0xff]  ;;  %v17621_v51 = vld [vmem:[#allocation51_spill] sm:$0xff] }
 0x507   :  { %6067 = vmatpush.msra.mxu0 %v17615_v37  ;;  %6126 = vmatmul.f32.vlgmr.msra.gmra.mxu1 %v13906_v10  ;;  %v17622_v37 = vld [vmem:[#allocation84_spill] sm:$0xff] }
 0x508   :  { %6449 = vmatpush.msrb.mxu1 %v17582_v12  ;;  %6355 = vmatpush.msra.mxu3 %v17616_v18  ;;  %v17626_v18 = vld [vmem:[#allocation199_spill] sm:$0xff] }
 0x509   :  { %6071 = vmatpush.msra.mxu0 %v17617_v62  ;;  %6258 = vmatpush.msra.mxu2 %v17618_v0  ;;  %v17625_v62 = vld [vmem:[#allocation88_spill] sm:$0xff] }
 0x50a   :  { %6451 = vmatpush.msrb.mxu1 %v17584_v58  ;;  %6361 = vmatpush.msra.mxu3 %v17619_v26  ;;  %v17628_v26 = vld [vmem:[#allocation92_spill] sm:$0xff] }
 0x50b   :  { %6075 = vmatpush.msra.mxu0 %v17620_v45  ;;  %6260 = vmatpush.msra.mxu2 %v17621_v51  ;;  %v17627_v45 = vld [vmem:[#allocation22_spill] sm:$0xff] }
 0x50c   :  { %6453 = vmatpush.msrb.mxu1 %v17588_v20  ;;  %6367 = vmatpush.msra.mxu3 %v17622_v37  ;;  %v17630_v37 = vld [vmem:[#allocation59_spill] sm:$0xff] }
 0x50d   :  { %6079 = vmatpush.msra.mxu0 %v17623_v48  ;;  %6262 = vmatpush.msra.mxu2 %v17624_v17  ;;  %v17629_v48 = vld [vmem:[#allocation23_spill] sm:$0xff] }
 0x50e   :  { %6455 = vmatpush.msrb.mxu1 %v17591_v32  ;;  %6373 = vmatpush.msra.mxu3 %v17625_v62  ;;  %v17637_v62 = vld [vmem:[#allocation34_spill] sm:$0xff] }
 0x50f   :  { %6083 = vmatpush.msra.mxu0 %v17626_v18  ;;  %6130 = vmatmul.f32.gmra.mxu1 %v13930_v9  ;;  %v17631_v18 = vld [vmem:[#allocation24_spill] sm:$0xff] }
 0x510   :  { %6085 = vmatmul.f32.vlgmr.msra.gmra.mxu0 %v13906_v10  ;;  %6457 = vmatpush.msrb.mxu1 %v17596_v59  ;;  %v17632_v10 = vld [vmem:[#allocation64_spill] sm:$0xff] }
 0x511   :  { %6391 = vmatpush.msrb.mxu0 %v17627_v45  ;;  %6379 = vmatpush.msra.mxu3 %v17628_v26  ;;  %v17633_v26 = vld [vmem:[#allocation26_spill] sm:$0xff]  ;;  %v17634_v45 = vld [vmem:[#allocation28_spill] sm:$0xff] }
 0x512   :  { %6459 = vmatpush.msrb.mxu1 %v17599_v13  ;;  %6264 = vmatpush.msra.mxu2 %v17630_v37 }
 0x513   :  { %6567 = vmatpush.msrb.mxu3 %v17582_v12  ;;  %6394 = vmatpush.msrb.mxu0 %v17629_v48  ;;  %v17635_v48 = vld [vmem:[#allocation27_spill] sm:$0xff] }
 0x514   :  { %6461 = vmatpush.msrb.mxu1 %v17602_v4  ;;  %6266 = vmatpush.msra.mxu2 %v17632_v10 }
 0x515   :  { %6569 = vmatpush.msrb.mxu3 %v17584_v58  ;;  %6397 = vmatpush.msrb.mxu0 %v17631_v18  ;;  %v17636_v18 = vld [vmem:[#allocation29_spill] sm:$0xff] }
 0x516   :  { %6463 = vmatpush.msrb.mxu1 %v17605_v39  ;;  %6496 = vmatpush.msrb.mxu2 %v17634_v45  ;;  %v17639_v45 = vld [vmem:[#allocation37_spill] sm:$0xff] }
 0x517   :  { %6571 = vmatpush.msrb.mxu3 %v17588_v20  ;;  %6400 = vmatpush.msrb.mxu0 %v17633_v26  ;;  %v17638_v26 = vld [vmem:[#allocation30_spill] sm:$0xff] }
 0x518   :  { %6089 = vmatmul.f32.gmra.mxu0 %v13930_v9  ;;  %6465 = vmatpush.msrb.mxu1 %v17608_v7  ;;  %v17640_v9 = vld [vmem:[#allocation32_spill] sm:$0xff] }
 0x519   :  { %6403 = vmatpush.msrb.mxu0 %v17635_v48  ;;  %6573 = vmatpush.msrb.mxu3 %v17591_v32  ;;  %v17641_v48 = vld [vmem:[#allocation41_spill] sm:$0xff] }
 0x51a   :  { %6467 = vmatpush.msrb.mxu1 %v17611_v60  ;;  %6500 = vmatpush.msrb.mxu2 %v17636_v18  ;;  %v17643_v18 = vld [vmem:[#allocation45_spill] sm:$0xff] }
 0x51b   :  { %6406 = vmatpush.msrb.mxu0 %v17637_v62  ;;  %6575 = vmatpush.msrb.mxu3 %v17596_v59  ;;  %v17642_v62 = vld [vmem:[#allocation35_spill] sm:$0xff] }
 0x51c   :  { %6469 = vmatpush.msrb.mxu1 %v17614_v23  ;;  %6504 = vmatpush.msrb.mxu2 %v17638_v26  ;;  %v17645_v26 = vld [vmem:[#allocation49_spill] sm:$0xff] }
 0x51d   :  { %6409 = vmatpush.msrb.mxu0 %v17639_v45  ;;  %6577 = vmatpush.msrb.mxu3 %v17599_v13  ;;  %v17644_v45 = vld [vmem:[#allocation40_spill] sm:$0xff] }
 0x51e   :  { %6471 = vmatpush.msrb.mxu1 %v17618_v0  ;;  %6508 = vmatpush.msrb.mxu2 %v17640_v9  ;;  %v17647_v9 = vld [vmem:[#allocation53_spill] sm:$0xff] }
 0x51f   :  { %6412 = vmatpush.msrb.mxu0 %v17641_v48  ;;  %6579 = vmatpush.msrb.mxu3 %v17602_v4  ;;  %v17646_v48 = vld [vmem:[#allocation42_spill] sm:$0xff] }
 0x520   :  { %6473 = vmatpush.msrb.mxu1 %v17621_v51  ;;  %6512 = vmatpush.msrb.mxu2 %v17642_v62  ;;  %v17649_v62 = vld [vmem:[#allocation57_spill] sm:$0xff] }
 0x521   :  { %6415 = vmatpush.msrb.mxu0 %v17643_v18  ;;  %6581 = vmatpush.msrb.mxu3 %v17605_v39  ;;  %v17648_v18 = vld [vmem:[#allocation48_spill] sm:$0xff]  ;;  %v17650_v39 = vld [vmem:[#allocation87_spill] sm:$0xff] }
 0x522   :  { %6475 = vmatpush.msrb.mxu1 %v17624_v17  ;;  %6516 = vmatpush.msrb.mxu2 %v17644_v45  ;;  %v17652_v45 = vld [vmem:[#allocation61_spill] sm:$0xff] }
 0x523   :  { %6418 = vmatpush.msrb.mxu0 %v17645_v26  ;;  %6583 = vmatpush.msrb.mxu3 %v17608_v7  ;;  %v17651_v26 = vld [vmem:[#allocation52_spill] sm:$0xff]  ;;  %v17653_v7 = vld [vmem:[#allocation91_spill] sm:$0xff] }
 0x524   :  { %6477 = vmatpush.msrb.mxu1 %v17630_v37  ;;  %6520 = vmatpush.msrb.mxu2 %v17646_v48  ;;  %v17655_v48 = vld [vmem:[#allocation62_spill] sm:$0xff] }
 0x525   :  { %6421 = vmatpush.msrb.mxu0 %v17647_v9  ;;  %6585 = vmatpush.msrb.mxu3 %v17611_v60  ;;  %v17654_v9 = vld [vmem:[#allocation56_spill] sm:$0xff]  ;;  %v17656_v60 = vld [vmem:[#allocation97_spill] sm:$0xff] }
 0x526   :  { %6479 = vmatpush.msrb.mxu1 %v17632_v10  ;;  %6524 = vmatpush.msrb.mxu2 %v17648_v18  ;;  %v5056_v18 = vpop.f32.mrf.mxu0 }
 0x527   :  { %6424 = vmatpush.msrb.mxu0 %v17649_v62  ;;  %6587 = vmatpush.msrb.mxu3 %v17614_v23  ;;  %v17658_v62 = vld [vmem:[#allocation69_spill] sm:$0xff] }
 0x528   :  { %6661 = vmatpush.msra.mxu1 %v17650_v39  ;;  %6528 = vmatpush.msrb.mxu2 %v17651_v26  ;;  %v17657_v39 = vld [vmem:[#allocation60_spill] sm:$0xff] }
 0x529   :  { %6427 = vmatpush.msrb.mxu0 %v17652_v45  ;;  %6589 = vmatpush.msrb.mxu3 %v17618_v0  ;;  %v17659_v26 = vld [vmem:[#allocation100_spill] sm:$0xff]  ;;  %v17661_v45 = vld [vmem:[#allocation73_spill] sm:$0xff]  ;;  %v17677_v0 = vld [vmem:[#allocation139_spill] sm:$0xff] }
 0x52a   :  { %6667 = vmatpush.msra.mxu1 %v17653_v7  ;;  %6532 = vmatpush.msrb.mxu2 %v17654_v9  ;;  %v17660_v7 = vld [vmem:[#allocation65_spill] sm:$0xff]  ;;  %v17662_v9 = vld [vmem:[#allocation104_spill] sm:$0xff] }
 0x52b   :  { %6430 = vmatpush.msrb.mxu0 %v17655_v48  ;;  %6591 = vmatpush.msrb.mxu3 %v17621_v51  ;;  %v17664_v48 = vld [vmem:[#allocation68_spill] sm:$0xff]  ;;  %v17675_v51 = vld [vmem:[#allocation137_spill] sm:$0xff] }
 0x52c   :  { %6673 = vmatpush.msra.mxu1 %v17656_v60  ;;  %6536 = vmatpush.msrb.mxu2 %v17657_v39  ;;  %v17663_v60 = vld [vmem:[#allocation112_spill] sm:$0xff]  ;;  %v5165_v39 = vpop.f32.mrf.mxu1 }
 0x52d   :  { %6433 = vmatpush.msrb.mxu0 %v17658_v62  ;;  %6593 = vmatpush.msrb.mxu3 %v17624_v17  ;;  %v5223_v62 = vpop.f32.mrf.mxu2  ;;  %v17674_v17 = vld [vmem:[#allocation135_spill] sm:$0xff]  ;;  %v5166_v59 = vadd.f32 %v5165_v39, %v5056_v18 }
 0x52e   :  { %6679 = vmatpush.msra.mxu1 %v17659_v26  ;;  %6540 = vmatpush.msrb.mxu2 %v17660_v7  ;;  %v17665_v26 = vld [vmem:[#allocation116_spill] sm:$0xff]  ;;  %v17666_v7 = vld [vmem:[#allocation70_spill] sm:$0xff] }
 0x52f   :  { %6436 = vmatpush.msrb.mxu0 %v17661_v45  ;;  %6595 = vmatpush.msrb.mxu3 %v17630_v37  ;;  %v17668_v45 = vld [vmem:[#allocation76_spill] sm:$0xff]  ;;  %v5064_v37 = vpop.f32.mrf.mxu0  ;;  %v5224_v20 = vadd.f32 %v5223_v62, %v5166_v59 }
 0x530   :  { %6685 = vmatpush.msra.mxu1 %v17662_v9  ;;  %6544 = vmatpush.msrb.mxu2 %v17664_v48  ;;  %v17667_v9 = vld [vmem:[#allocation118_spill] sm:$0xff] }
 0x531   :  { %6608 = vmatpush.msra.mxu0 %v11705_v25  ;;  %6597 = vmatpush.msrb.mxu3 %v17632_v10  ;;  %v17669_v48 = vld [vmem:[#allocation122_spill] sm:$0xff]  ;;  %v17671_v10 = vld [vmem:[#allocation125_spill] sm:$0xff] }
 0x532   :  { %6691 = vmatpush.msra.mxu1 %v17663_v60  ;;  %6548 = vmatpush.msrb.mxu2 %v17666_v7  ;;  %v17670_v60 = vld [vmem:[#allocation79_spill] sm:$0xff]  ;;  %v17672_v7 = vld [vmem:[#allocation130_spill] sm:$0xff] }
 0x533   :  { %6610 = vmatpush.msra.mxu0 %v11712_v30 }
 0x534   :  { %6697 = vmatpush.msra.mxu1 %v17665_v26  ;;  %6552 = vmatpush.msrb.mxu2 %v17668_v45  ;;  %v5267_v26 = vpop.f32.mrf.mxu3  ;;  %v17673_v45 = vld [vmem:[#allocation133_spill] sm:$0xff] }
 0x535   :  { %6612 = vmatpush.msra.mxu0 %v11759_v28  ;;  %v5268_v44 = vadd.f32 %v5267_v26, %v5224_v20 }
 0x536   :  { %6703 = vmatpush.msra.mxu1 %v17667_v9  ;;  %6556 = vmatpush.msrb.mxu2 %v17670_v60  ;;  %v5169_v9 = vpop.f32.mrf.mxu1 }
 0x537   :  { %6614 = vmatpush.msra.mxu0 %v11775_v31  ;;  %v5342_v60 = vpop.f32.mrf.mxu0  ;;  %v5170_v29 = vadd.f32 %v5169_v9, %v5064_v37  ;;  %v5010_v37 = vld [vmem:[#allocation3 + $0x6c] sm:$0xff] }
 0x538   :  { %6709 = vmatpush.msra.mxu1 %v17669_v48  ;;  %v5228_v48 = vpop.f32.mrf.mxu2  ;;  %v5343_v40 = vadd.f32 %v5342_v60, %v5268_v44 }
 0x539   :  { %6616 = vmatpush.msra.mxu0 %v16958_v42 }
 0x53a   :  { %6715 = vmatpush.msra.mxu1 %v17671_v10  ;;  %v17676_v10 = vld [vmem:[#allocation138_spill] sm:$0xff] }
 0x53b   :  { %6618 = vmatpush.msra.mxu0 %v16961_v5 }
 0x53c   :  { %6721 = vmatpush.msra.mxu1 %v17672_v7  ;;  %v5273_v7 = vpop.f32.mrf.mxu3 }
 0x53d   :  { %6620 = vmatpush.msra.mxu0 %v16964_v57 }
 0x53e   :  { %6727 = vmatpush.msra.mxu1 %v17673_v45  ;;  %v5383_v45 = vpop.f32.mrf.mxu1 }
 0x53f   :  { %6622 = vmatpush.msra.mxu0 %v16967_v36  ;;  %v5346_v23 = vpop.f32.mrf.mxu0 }
 0x540   :  { %6733 = vmatpush.msra.mxu1 %v17674_v17  ;;  %v5428_v17 = vpop.f32.mrf.mxu2 }
 0x541   :  { %6624 = vmatpush.msra.mxu0 %v16970_v3 }
 0x542   :  { %6739 = vmatpush.msra.mxu1 %v17675_v51 }
 0x543   :  { %6626 = vmatpush.msra.mxu0 %v16973_v14 }
 0x544   :  { %6745 = vmatpush.msra.mxu1 %v17676_v10  ;;  %v5537_v51 = vpop.f32.mrf.mxu3 }
 0x545   :  { %6628 = vmatpush.msra.mxu0 %v17512_v53  ;;  %v5538_v32 = vadd.f32 %v5537_v51, %v5428_v17  ;;  %v5384_v53 = vadd.f32 %v5383_v45, %v5343_v40 }
 0x546   :  { %6751 = vmatpush.msra.mxu1 %v17677_v0  ;;  %v5387_v10 = vpop.f32.mrf.mxu1 }
 0x547   :  { %6630 = vmatpush.msra.mxu0 %v17515_v34 }
 0x548   :  { %v5436_v4 = vpop.f32.mrf.mxu2 }
 0x549   :  { %6632 = vmatpush.msra.mxu0 %v17518_v41  ;;  %v5229_v41 = vadd.f32 %v5228_v48, %v5170_v29 }
 0x54b   :  { %6634 = vmatpush.msra.mxu0 %v17521_v61  ;;  %v5274_v17 = vadd.f32 %v5273_v7, %v5229_v41 }
 0x54c   :  { %v5595_v13 = vpop.f32.mrf.mxu0  ;;  %v5541_v0 = vpop.f32.mrf.mxu3 }
 0x54d   :  { %6636 = vmatpush.msra.mxu0 %v17524_v52  ;;  %v5596_v58 = vadd.f32 %v5595_v13, %v5538_v32  ;;  %v5542_v61 = vadd.f32 %v5541_v0, %v5436_v4  ;;  %v5008_v52 = vld [vmem:[#allocation3 + $0x60] sm:$0xff]  ;;  %v5347_v26 = vadd.f32 %v5346_v23, %v5274_v17  ;;  %v5015_v0 = vunpack.c.l.bf16 %v5010_v37 }
 0x54e   :  { %v5639_v12 = vpop.f32.mrf.mxu1  ;;  %v5012_v24 = vunpack.c.l.bf16 %v5008_v52  ;;  %v5013_v51 = vunpack.c.h.bf16 %v5008_v52 }
 0x54f   :  { %6638 = vmatpush.msra.mxu0 %v17527_v21  ;;  %v5640_v27 = vadd.f32 %v5639_v12, %v5596_v58  ;;  %v5388_v4 = vadd.f32 %v5387_v10, %v5347_v26 }
 0x550   :  { %v5714_v33 = vpop.f32.mrf.mxu2  ;;  %v6134_v32 = vadd.f32 %v5384_v53, %v5012_v24 }
 0x551   :  { %v5715_v34 = vadd.f32 %v5714_v33, %v5640_v27  ;;  %v6137_v45 = vadd.f32 %v5388_v4, %v5015_v0 }
 0x552   :  { %v11139_v44 = vmul.f32 -1.442695, %v6134_v32 }
 0x553   :  { %v11140_v52 = vmul.f32 -1.442695, %v6137_v45 }
 0x554   :  { %v5755_v8 = vpop.f32.mrf.mxu3  ;;  %11282 = vpow2.f32 %v11139_v44 }
 0x555   :  { %v5600_v56 = vpop.f32.mrf.mxu0  ;;  %v5756_v62 = vadd.f32 %v5755_v8, %v5715_v34 }
 0x556   :  { %v5601_v21 = vadd.f32 %v5600_v56, %v5542_v61  ;;  %v5645_v39 = vpop.f32.mrf.mxu1  ;;  %v5016_v61 = vunpack.c.h.bf16 %v5010_v37 }
 0x557   :  { %v6135_v12 = vadd.f32 %v5756_v62, %v5013_v51 }
 0x558   :  { %v5646_v59 = vadd.f32 %v5645_v39, %v5601_v21  ;;  %v5718_v20 = vpop.f32.mrf.mxu2 }
 0x559   :  { %v11141_v29 = vmul.f32 -1.442695, %v6135_v12  ;;  %v5009_v12 = vld [vmem:[#allocation3 + $0x68] sm:$0xf] }
 0x55a   :  { %v5719_v58 = vadd.f32 %v5718_v20, %v5646_v59  ;;  %v11283_v8 = vpop.eup %11282 }
 0x55b   :  { %11284 = vpow2.f32 %v11141_v29  ;;  %v14261_v24 = vadd.f32 1.0, %v11283_v8 }
 0x55c   :  { %v5759_v48 = vpop.f32.mrf.mxu3  ;;  %11286 = vpow2.f32 %v11140_v52 }
 0x55d   :  { %v5760_v56 = vadd.f32 %v5759_v48, %v5719_v58  ;;  %vm6153_vm1 = vweird.f32 %v14261_v24 }
 0x55f   :  { %v6138_v41 = vadd.f32 %v5760_v56, %v5016_v61  ;;  %v5014_v56 = vunpack.c.l.bf16 %v5009_v12 }
 0x561   :  { %v11142_v34 = vmul.f32 -1.442695, %v6138_v41  ;;  %v11285_v53 = vpop.eup %11284 }
 0x562   :  { %v14263_v21 = vadd.f32 1.0, %v11285_v53  ;;  %v11287_v33 = vpop.eup %11286 }
 0x563   :  { %11288 = vpow2.f32 %v11142_v34  ;;  %v14267_v23 = vadd.f32 1.0, %v11287_v33  ;;  %v6159_v33 = vand.u32 2147483648, %v14261_v24 }
 0x564   :  { %v5909_v7 = vpop.f32.mrf.mxu1  ;;  %11290 = vrcp.f32 %v14261_v24  ;;  %vm6191_vm4 = vweird.f32 %v14263_v21 }
 0x565   :  { %11292 = vrcp.f32 %v14263_v21  ;;  %vm6168_vm7 = vweird.f32 %v14267_v23 }
 0x566   :  { %11294 = vrcp.f32 %v14267_v23 }
 0x569   :  { %v11289_v40 = vpop.eup %11288 }
 0x56a   :  { %v11291_v13 = vpop.eup %11290  ;;  %v14269_v60 = vadd.f32 1.0, %v11289_v40 }
 0x56b   :  { %v14271_v18 = vpop.eup %11292  ;;  %v6149_v39 = vmul.f32 %v11291_v13, %v14261_v24  ;;  %vm6154_vm0 = vweird.f32 %v11291_v13 }
 0x56c   :  { %v5913_v9 = vpop.f32.mrf.mxu1  ;;  %v5967_v17 = vpop.f32.mrf.mxu2  ;;  %11296 = vrcp.f32 %v14269_v60  ;;  %v6187_v62 = vmul.f32 %v14271_v18, %v14263_v21  ;;  %vm6192_vm2 = vweird.f32 %v14271_v18  ;;  %vm14292_vm3 = vmor %vm6153_vm1, %vm6154_vm0  ;;  %vm6206_vm12 = vweird.f32 %v14269_v60 }
 0x56d   :  { %v5800_v27 = vpop.f32.mrf.mxu0  ;;  %v6150_v32 = vsub.f32 1.0, %v6149_v39  ;;  %v14278_v37 = vpop.eup %11294  ;;  %v6157_v39 = vand.u32 2147483647, %v14261_v24  ;;  %vm14302_vm5 = vmor %vm6191_vm4, %vm6192_vm2 }
 0x56e   :  { %v5910_v10 = vadd.f32 %v5909_v7, %v5800_v27  ;;  %v6188_v20 = vsub.f32 1.0, %v6187_v62  ;;  %v6164_v48 = vmul.f32 %v14278_v37, %v14267_v23  ;;  %vm6169_vm8 = vweird.f32 %v14278_v37 }
 0x56f   :  { %v6011_v26 = vpop.f32.mrf.mxu3  ;;  %v6151_v4 = vmul.f32 %v11291_v13, %v6150_v32  ;;  %vm6158_vm6 = vcmp.eq.f32.partialorder %v6157_v39, 8.507059e+37  ;;  %vm6170_vm11 = vmor %vm6168_vm7, %vm6169_vm8  ;;  %v6210_v39 = vand.u32 2147483647, %v14269_v60 }
 0x570   :  { %v5968_v59 = vadd.f32 %v5967_v17, %v5910_v10  ;;  %v6189_v41 = vmul.f32 %v14271_v18, %v6188_v20  ;;  %v6165_v7 = vsub.f32 1.0, %v6164_v48  ;;  %v6195_v20 = vand.u32 2147483647, %v14263_v21 }
 0x571   :  { %v6152_v27 = vadd.f32 %v11291_v13, %v6151_v4  ;;  %vm6211_vm15 = vcmp.eq.f32.partialorder %v6210_v39, 8.507059e+37  ;;  %v17699_v39 = vld [vmem:[#allocation156_spill] sm:$0xff] }
 0x572   :  { %v14280_v58 = vpop.eup %11296  ;;  %v6012_v44 = vadd.f32 %v6011_v26, %v5968_v59  ;;  %v6190_v17 = vadd.f32 %v14271_v18, %v6189_v41  ;;  %v6197_v59 = vand.u32 2147483648, %v14263_v21  ;;  %v6166_v26 = vmul.f32 %v14278_v37, %v6165_v7 }
 0x573   :  { %v6202_v52 = vmul.f32 %v14280_v58, %v14269_v60  ;;  %v6156_v24 = vsel %vm14292_vm3, %v11291_v13, %v6152_v27  ;;  %vm6196_vm9 = vcmp.eq.f32.partialorder %v6195_v20, 8.507059e+37  ;;  %v6172_v7 = vand.u32 2147483647, %v14267_v23 }
 0x574   :  { %v5972_v8 = vpop.f32.mrf.mxu2  ;;  %v6198_v13 = vor.u32 1.1754944e-38, %v6197_v59  ;;  %v6167_v21 = vadd.f32 %v14278_v37, %v6166_v26  ;;  %vm6207_vm10 = vweird.f32 %v14280_v58 }
 0x575   :  { %v5808_v51 = vpop.f32.mrf.mxu0  ;;  %v6203_v10 = vsub.f32 1.0, %v6202_v52  ;;  %vm6208_vm13 = vmor %vm6206_vm12, %vm6207_vm10  ;;  %vm6173_vm14 = vcmp.eq.f32.partialorder %v6172_v7, 8.507059e+37  ;;  %v17693_v7 = vld [vmem:[#allocation114_spill] sm:$0xff] }
 0x576   :  { %v5914_v0 = vadd.f32 %v5913_v9, %v5808_v51  ;;  %v5011_v51 = vld [vmem:[#allocation3 + $0x74] sm:$0xf] }
 0x577   :  { %v6017_v9 = vpop.f32.mrf.mxu3  ;;  %v5017_v4 = vunpack.c.l.bf16 %v5011_v51 }
 0x578   :  { %v5973_v34 = vadd.f32 %v5972_v8, %v5914_v0  ;;  %v6174_v8 = vand.u32 2147483648, %v14267_v23 }
 0x57a   :  { %v6018_v32 = vadd.f32 %v6017_v9, %v5973_v34  ;;  %v6171_v9 = vsel %vm6170_vm11, %v14278_v37, %v6167_v21  ;;  %v6175_v23 = vor.u32 1.1754944e-38, %v6174_v8  ;;  %v17688_v21 = vld [vmem:[#allocation115_spill] sm:$0xff]  ;;  %v17690_v8 = vld [vmem:[#allocation109_spill] sm:$0xff] }
 0x57c   :  { %v6176_v51 = vsel %vm6173_vm14, %v6175_v23, %v6171_v9  ;;  %v17698_v9 = vld [vmem:[#allocation134_spill] sm:$0xff]  ;;  %v17700_v23 = vld [vmem:[#allocation121_spill] sm:$0xff] }
 0x584   :  { %v6127_v29 = vpop.f32.mrf.mxu1 }
 0x58d   :  { %v6086_v61 = vpop.f32.mrf.mxu0 }
 0x58e   :  { %v6087_v45 = vadd.f32 %v6086_v61, %v6012_v44  ;;  %v6160_v44 = vor.u32 1.1754944e-38, %v6159_v33  ;;  %v6194_v61 = vsel %vm14302_vm5, %v14271_v18, %v6190_v17 }
 0x58f   :  { %v6199_v34 = vsel %vm6196_vm9, %v6198_v13, %v6194_v61  ;;  %v17683_v61 = vld [vmem:[#allocation113_spill] sm:$0xff]  ;;  %v17686_v13 = vld [vmem:[#allocation119_spill] sm:$0xff] }
 0x590   :  { %v6128_v53 = vadd.f32 %v6127_v29, %v6087_v45  ;;  %v6204_v29 = vmul.f32 %v14280_v58, %v6203_v10  ;;  %v6161_v45 = vsel %vm6158_vm6, %v6160_v44, %v6156_v24 }
 0x591   :  { %v6218_v18 = vmul.f32 %v6161_v45, %v13900_v63  ;;  %v17685_v45 = vld [vmem:[#allocation111_spill] sm:$0xff] }
 0x592   :  { %v6136_v40 = vadd.f32 %v6128_v53, %v5014_v56  ;;  %v6131_v56 = vpop.f32.mrf.mxu1  ;;  %v6205_v33 = vadd.f32 %v14280_v58, %v6204_v29  ;;  %v17682_v29 = vld [vmem:[#allocation108_spill] sm:$0xff] }
 0x594   :  { %11298 = vtanh.f32 %v6136_v40  ;;  %v6212_v40 = vand.u32 2147483648, %v14269_v60  ;;  %v6209_v17 = vsel %vm6208_vm13, %v14280_v58, %v6205_v33  ;;  %v6219_v60 = vmul.f32 %v6176_v51, %v13922_v22  ;;  %v17696_v33 = vld [vmem:[#allocation117_spill] sm:$0xff]  ;;  %v17702_v51 = vld [vmem:[#allocation160_spill] sm:$0xff] }
 0x595   :  { %v6090_v12 = vpop.f32.mrf.mxu0 }
 0x596   :  { %v6091_v48 = vadd.f32 %v6090_v12, %v6018_v32  ;;  %v6213_v62 = vor.u32 1.1754944e-38, %v6212_v40  ;;  %v17697_v40 = vld [vmem:[#allocation128_spill] sm:$0xff] }
 0x598   :  { %v6132_v41 = vadd.f32 %v6131_v56, %v6091_v48  ;;  %v6214_v32 = vsel %vm6211_vm15, %v6213_v62, %v6209_v17  ;;  %v17684_v56 = vld [vmem:[#allocation102_spill] sm:$0xff]  ;;  %v17701_v17 = vld [vmem:[#allocation136_spill] sm:$0xff] }
 0x599   :  { %v17703_v62 = vld [vmem:[#allocation142_spill] sm:$0xff] }
 0x59a   :  { %v11299_v52 = vpop.eup %11298  ;;  %v6139_v53 = vadd.f32 %v6132_v41, %v5017_v4  ;;  %v17687_v41 = vld [vmem:[#allocation106_spill] sm:$0xff] }
 0x59b   :  { %v6220_v27 = vmul.f32 %v11299_v52, %v6199_v34  ;;  %v17689_v52 = vld [vmem:[#allocation123_spill] sm:$0xff]  ;;  %v17691_v34 = vld [vmem:[#allocation120_spill] sm:$0xff] }
 0x59c   :  { %11300 = vtanh.f32 %v6139_v53  ;;  %v17692_v53 = vld [vmem:[#allocation126_spill] sm:$0xff] }
 0x59d   :  { %v14320_v10 = vsub.f32 %v6218_v18, %v6220_v27  ;;  %v17694_v18 = vld [vmem:[#allocation124_spill] sm:$0xff]  ;;  %v17695_v27 = vld [vmem:[#allocation131_spill] sm:$0xff] }
 0x59f   :  { %v14325_v63 = vand.u32 4294901760, %v14320_v10 }
 0x5a1   :  { %6381 = vmatmul.f32.vlgmr.msra.gmra.mxu3 %v14325_v63  ;;  %v14331_v59 = vsub.f32 %v14320_v10, %v14325_v63 }
 0x5a2   :  { %v11301_v37 = vpop.eup %11300  ;;  %6821 = vmatpush.msra.mxu3 %v11705_v25 }
 0x5a3   :  { %v6221_v26 = vmul.f32 %v11301_v37, %v6214_v32  ;;  %6439 = vmatmul.f32.vlgmr.msrb.gmra.mxu0 %v14331_v59  ;;  %v14337_v58 = vand.u32 4294901760, %v14331_v59  ;;  %v17704_v37 = vld [vmem:[#allocation127_spill] sm:$0xff]  ;;  %v17705_v32 = vld [vmem:[#allocation164_spill] sm:$0xff] }
 0x5a4   :  { %6823 = vmatpush.msra.mxu3 %v11712_v30  ;;  %6868 = vmatpush.msrb.mxu0 %v17005_v47 }
 0x5a5   :  { %v14341_v24 = vsub.f32 %v6219_v60, %v6221_v26  ;;  %6483 = vmatmul.f32.vlgmr.msrb.gmra.mxu1 %v14337_v58  ;;  %v6270_v20 = vsub.f32 %v14331_v59, %v14337_v58  ;;  %v17706_v60 = vld [vmem:[#allocation145_spill] sm:$0xff]  ;;  %v17707_v26 = vld [vmem:[#allocation140_spill] sm:$0xff] }
 0x5a6   :  { %6825 = vmatpush.msra.mxu3 %v11759_v28  ;;  %6872 = vmatpush.msrb.mxu0 %v17006_v46 }
 0x5a7   :  { %v14349_v22 = vand.u32 4294901760, %v14341_v24  ;;  %6939 = vmatpush.msrb.mxu1 %v11705_v25  ;;  %v14352_v12 = vand.u32 4294901760, %v6270_v20  ;;  %v17708_v20 = vld [vmem:[#allocation129_spill] sm:$0xff] }
 0x5a8   :  { %6827 = vmatpush.msra.mxu3 %v11775_v31  ;;  %6876 = vmatpush.msrb.mxu0 %v17007_v16 }
 0x5a9   :  { %6941 = vmatpush.msrb.mxu1 %v11712_v30  ;;  %6272 = vmatmul.f32.vlgmr.msra.gmra.mxu2 %v14352_v12  ;;  %v14360_v44 = vsub.f32 %v14341_v24, %v14349_v22 }
 0x5aa   :  { %6385 = vmatmul.f32.gmra.mxu3 %v14349_v22  ;;  %6763 = vmatpush.msra.mxu2 %v17008_v49 }
 0x5ab   :  { %6829 = vmatpush.msra.mxu3 %v16958_v42  ;;  %6880 = vmatpush.msrb.mxu0 %v17009_v35  ;;  %v14367_v0 = vand.u32 4294901760, %v14360_v44 }
 0x5ac   :  { %6943 = vmatpush.msrb.mxu1 %v11759_v28  ;;  %6444 = vmatmul.f32.gmra.mxu0 %v14360_v44 }
 0x5ad   :  { %6766 = vmatpush.msra.mxu2 %v17010_v55  ;;  %6831 = vmatpush.msra.mxu3 %v16961_v5  ;;  %v6278_v4 = vsub.f32 %v14360_v44, %v14367_v0 }
 0x5ae   :  { %6884 = vmatpush.msrb.mxu0 %v17011_v11  ;;  %6945 = vmatpush.msrb.mxu1 %v11775_v31 }
 0x5af   :  { %6489 = vmatmul.f32.gmra.mxu1 %v14367_v0  ;;  %6769 = vmatpush.msra.mxu2 %v17012_v54  ;;  %v14379_v48 = vand.u32 4294901760, %v6278_v4  ;;  %v17709_v4 = vld [vmem:[#allocation167_spill] sm:$0xff] }
 0x5b0   :  { %6833 = vmatpush.msra.mxu3 %v16964_v57  ;;  %6888 = vmatpush.msrb.mxu0 %v17013_v43 }
 0x5b1   :  { %6947 = vmatpush.msrb.mxu1 %v16958_v42  ;;  %6772 = vmatpush.msra.mxu2 %v17014_v2 }
 0x5b2   :  { %6835 = vmatpush.msra.mxu3 %v16967_v36  ;;  %6892 = vmatpush.msrb.mxu0 %v17015_v50 }
 0x5b3   :  { %6949 = vmatpush.msrb.mxu1 %v16961_v5  ;;  %6280 = vmatmul.f32.gmra.mxu2 %v14379_v48 }
 0x5b4   :  { %6599 = vmatmul.f32.vlgmr.msrb.gmra.mxu3 %v14325_v63  ;;  %6775 = vmatpush.msra.mxu2 %v17016_v19 }
 0x5b5   :  { %6837 = vmatpush.msra.mxu3 %v16970_v3  ;;  %6896 = vmatpush.msrb.mxu0 %v17017_v6 }
 0x5b6   :  { %6951 = vmatpush.msrb.mxu1 %v16964_v57  ;;  %6644 = vmatmul.f32.vlgmr.msra.gmra.mxu0 %v14352_v12 }
 0x5b7   :  { %6778 = vmatpush.msra.mxu2 %v17018_v1  ;;  %6839 = vmatpush.msra.mxu3 %v16973_v14 }
 0x5b8   :  { %6900 = vmatpush.msrb.mxu0 %v17019_v15  ;;  %6953 = vmatpush.msrb.mxu1 %v16967_v36 }
 0x5b9   :  { %6753 = vmatmul.f32.vlgmr.msra.gmra.mxu1 %v14325_v63  ;;  %6781 = vmatpush.msra.mxu2 %v17020_v38 }
 0x5ba   :  { %6841 = vmatpush.msra.mxu3 %v17682_v29  ;;  %6904 = vmatpush.msrb.mxu0 %v17683_v61 }
 0x5bb   :  { %6955 = vmatpush.msrb.mxu1 %v16970_v3  ;;  %6784 = vmatpush.msra.mxu2 %v17684_v56 }
 0x5bc   :  { %6843 = vmatpush.msra.mxu3 %v17685_v45  ;;  %6908 = vmatpush.msrb.mxu0 %v17686_v13  ;;  %v17748_v13 = vld [vmem:[#allocation181_spill] sm:$0xff] }
 0x5bd   :  { %6957 = vmatpush.msrb.mxu1 %v16973_v14  ;;  %6558 = vmatmul.f32.vlgmr.msrb.gmra.mxu2 %v14325_v63 }
 0x5be   :  { %6603 = vmatmul.f32.gmra.mxu3 %v14349_v22  ;;  %6787 = vmatpush.msra.mxu2 %v17687_v41  ;;  %v17745_v41 = vld [vmem:[#allocation177_spill] sm:$0xff] }
 0x5bf   :  { %6845 = vmatpush.msra.mxu3 %v17688_v21  ;;  %6912 = vmatpush.msrb.mxu0 %v17689_v52  ;;  %v17742_v52 = vld [vmem:[#allocation174_spill] sm:$0xff] }
 0x5c0   :  { %6959 = vmatpush.msrb.mxu1 %v17682_v29  ;;  %6652 = vmatmul.f32.gmra.mxu0 %v14379_v48 }
 0x5c1   :  { %6790 = vmatpush.msra.mxu2 %v17690_v8  ;;  %6847 = vmatpush.msra.mxu3 %v17691_v34  ;;  %v17739_v8 = vld [vmem:[#allocation171_spill] sm:$0xff] }
 0x5c2   :  { %6916 = vmatpush.msrb.mxu0 %v17692_v53  ;;  %6961 = vmatpush.msrb.mxu1 %v17685_v45  ;;  %v17736_v53 = vld [vmem:[#allocation166_spill] sm:$0xff] }
 0x5c3   :  { %6757 = vmatmul.f32.gmra.mxu1 %v14349_v22  ;;  %6793 = vmatpush.msra.mxu2 %v17693_v7  ;;  %v17735_v7 = vld [vmem:[#allocation178_spill] sm:$0xff] }
 0x5c4   :  { %6849 = vmatpush.msra.mxu3 %v17694_v18  ;;  %6920 = vmatpush.msrb.mxu0 %v17695_v27  ;;  %v17732_v27 = vld [vmem:[#allocation173_spill] sm:$0xff] }
 0x5c5   :  { %6963 = vmatpush.msrb.mxu1 %v17688_v21  ;;  %6796 = vmatpush.msra.mxu2 %v17696_v33  ;;  %v17729_v33 = vld [vmem:[#allocation169_spill] sm:$0xff] }
 0x5c6   :  { %6851 = vmatpush.msra.mxu3 %v17697_v40  ;;  %6924 = vmatpush.msrb.mxu0 %v17698_v9  ;;  %v17726_v9 = vld [vmem:[#allocation165_spill] sm:$0xff] }
 0x5c7   :  { %6965 = vmatpush.msrb.mxu1 %v17691_v34  ;;  %6562 = vmatmul.f32.gmra.mxu2 %v14349_v22 }
 0x5c8   :  { %7033 = vmatpush.msrb.mxu3 %v17699_v39  ;;  %6799 = vmatpush.msra.mxu2 %v17700_v23  ;;  %v17722_v23 = vld [vmem:[#allocation183_spill] sm:$0xff] }
 0x5c9   :  { %6855 = vmatmul.f32.vlgmr.msra.gmra.mxu3 %v14337_v58  ;;  %6928 = vmatpush.msrb.mxu0 %v17701_v17  ;;  %v17713_v17 = vld [vmem:[#allocation170_spill] sm:$0xff]  ;;  %v17725_v39 = vld [vmem:[#allocation187_spill] sm:$0xff] }
 0x5ca   :  { %6967 = vmatpush.msrb.mxu1 %v17694_v18  ;;  %7039 = vmatpush.msrb.mxu3 %v17702_v51  ;;  %v17710_v51 = vld [vmem:[#allocation148_spill] sm:$0xff] }
 0x5cb   :  { %7135 = vmatpush.msra.mxu0 %v17703_v62  ;;  %6802 = vmatpush.msra.mxu2 %v17704_v37  ;;  %v17711_v62 = vld [vmem:[#allocation141_spill] sm:$0xff]  ;;  %v17712_v37 = vld [vmem:[#allocation132_spill] sm:$0xff] }
 0x5cc   :  { %6930 = vmatmul.f32.vlgmr.msrb.gmra.mxu0 %v14325_v63  ;;  %6969 = vmatpush.msrb.mxu1 %v17697_v40 }
 0x5cd   :  { %7045 = vmatpush.msrb.mxu3 %v17705_v32  ;;  %7138 = vmatpush.msra.mxu0 %v17706_v60  ;;  %v17714_v32 = vld [vmem:[#allocation150_spill] sm:$0xff]  ;;  %v17715_v60 = vld [vmem:[#allocation143_spill] sm:$0xff] }
 0x5ce   :  { %7193 = vmatpush.msra.mxu1 %v17707_v26  ;;  %6805 = vmatpush.msra.mxu2 %v17708_v20  ;;  %v17718_v20 = vld [vmem:[#allocation144_spill] sm:$0xff] }
 0x5cf   :  { %6971 = vmatmul.f32.vlgmr.msrb.gmra.mxu1 %v14325_v63  ;;  %7051 = vmatpush.msrb.mxu3 %v17709_v4  ;;  %v17716_v4 = vld [vmem:[#allocation176_spill] sm:$0xff] }
 0x5d0   :  { %7141 = vmatpush.msra.mxu0 %v17710_v51  ;;  %7195 = vmatpush.msra.mxu1 %v17711_v62  ;;  %v17717_v51 = vld [vmem:[#allocation153_spill] sm:$0xff] }
 0x5d1   :  { %6808 = vmatpush.msra.mxu2 %v17712_v37  ;;  %7057 = vmatpush.msrb.mxu3 %v17713_v17  ;;  %v17719_v17 = vld [vmem:[#allocation180_spill] sm:$0xff]  ;;  %v17721_v37 = vld [vmem:[#allocation147_spill] sm:$0xff] }
 0x5d2   :  { %7144 = vmatpush.msra.mxu0 %v17714_v32  ;;  %7197 = vmatpush.msra.mxu1 %v17715_v60  ;;  %v17720_v32 = vld [vmem:[#allocation157_spill] sm:$0xff] }
 0x5d3   :  { %6980 = vmatpush.msrb.mxu2 %v17707_v26  ;;  %6861 = vmatmul.f32.gmra.mxu3 %v14367_v0 }
 0x5d4   :  { %6811 = vmatmul.f32.vlgmr.msra.gmra.mxu2 %v14331_v59  ;;  %7063 = vmatpush.msrb.mxu3 %v17716_v4  ;;  %v17723_v4 = vld [vmem:[#allocation162_spill] sm:$0xff] }
 0x5d5   :  { %6982 = vmatpush.msrb.mxu2 %v17711_v62  ;;  %7147 = vmatpush.msra.mxu0 %v17717_v51  ;;  %v17724_v51 = vld [vmem:[#allocation151_spill] sm:$0xff] }
 0x5d6   :  { %7199 = vmatpush.msra.mxu1 %v17718_v20  ;;  %6934 = vmatmul.f32.gmra.mxu0 %v14349_v22 }
 0x5d7   :  { %6984 = vmatpush.msrb.mxu2 %v17715_v60  ;;  %7069 = vmatpush.msrb.mxu3 %v17719_v17  ;;  %v17727_v17 = vld [vmem:[#allocation154_spill] sm:$0xff] }
 0x5d8   :  { %7150 = vmatpush.msra.mxu0 %v17720_v32  ;;  %7201 = vmatpush.msra.mxu1 %v17721_v37  ;;  %v17728_v32 = vld [vmem:[#allocation193_spill] sm:$0xff] }
 0x5d9   :  { %6975 = vmatmul.f32.gmra.mxu1 %v14349_v22  ;;  %6986 = vmatpush.msrb.mxu2 %v17718_v20 }
 0x5da   :  { %7075 = vmatpush.msrb.mxu3 %v17722_v23  ;;  %7153 = vmatpush.msra.mxu0 %v17723_v4  ;;  %v17730_v23 = vld [vmem:[#allocation158_spill] sm:$0xff]  ;;  %v17731_v4 = vld [vmem:[#allocation196_spill] sm:$0xff] }
 0x5db   :  { %7203 = vmatpush.msra.mxu1 %v17724_v51  ;;  %6988 = vmatpush.msrb.mxu2 %v17721_v37 }
 0x5dc   :  { %7081 = vmatpush.msrb.mxu3 %v17725_v39  ;;  %7156 = vmatpush.msra.mxu0 %v17726_v9  ;;  %v17733_v39 = vld [vmem:[#allocation161_spill] sm:$0xff]  ;;  %v17734_v9 = vld [vmem:[#allocation198_spill] sm:$0xff] }
 0x5dd   :  { %7205 = vmatpush.msra.mxu1 %v17727_v17  ;;  %6816 = vmatmul.f32.gmra.mxu2 %v14360_v44 }
 0x5de   :  { %6990 = vmatpush.msrb.mxu2 %v17724_v51  ;;  %7087 = vmatpush.msrb.mxu3 %v17728_v32  ;;  %v17738_v32 = vld [vmem:[#allocation182_spill] sm:$0xff] }
 0x5df   :  { %7159 = vmatpush.msra.mxu0 %v17729_v33  ;;  %7207 = vmatpush.msra.mxu1 %v17730_v23  ;;  %v17737_v33 = vld [vmem:[#allocation200_spill] sm:$0xff] }
 0x5e0   :  { %6992 = vmatpush.msrb.mxu2 %v17727_v17  ;;  %7093 = vmatpush.msrb.mxu3 %v17731_v4  ;;  %v17741_v4 = vld [vmem:[#allocation186_spill] sm:$0xff] }
 0x5e1   :  { %7162 = vmatpush.msra.mxu0 %v17732_v27  ;;  %7209 = vmatpush.msra.mxu1 %v17733_v39  ;;  %v17740_v27 = vld [vmem:[#allocation201_spill] sm:$0xff] }
 0x5e2   :  { %6994 = vmatpush.msrb.mxu2 %v17730_v23  ;;  %7099 = vmatpush.msrb.mxu3 %v17734_v9  ;;  %v17744_v9 = vld [vmem:[#allocation190_spill] sm:$0xff] }
 0x5e3   :  { %7165 = vmatpush.msra.mxu0 %v17735_v7  ;;  %7211 = vmatpush.msra.mxu1 %v17736_v53  ;;  %v17743_v7 = vld [vmem:[#allocation202_spill] sm:$0xff] }
 0x5e4   :  { %6996 = vmatpush.msrb.mxu2 %v17733_v39  ;;  %7105 = vmatpush.msrb.mxu3 %v17737_v33  ;;  %v17747_v33 = vld [vmem:[#allocation192_spill] sm:$0xff] }
 0x5e5   :  { %7168 = vmatpush.msra.mxu0 %v17738_v32  ;;  %7213 = vmatpush.msra.mxu1 %v17739_v8  ;;  %v17746_v32 = vld [vmem:[#allocation203_spill] sm:$0xff] }
 0x5e6   :  { %6998 = vmatpush.msrb.mxu2 %v17736_v53  ;;  %7111 = vmatpush.msrb.mxu3 %v17740_v27  ;;  %v17758_v27 = vld [vmem:[#allocation18_spill] sm:$0xff] }
 0x5e7   :  { %7171 = vmatpush.msra.mxu0 %v17741_v4  ;;  %7215 = vmatpush.msra.mxu1 %v17742_v52  ;;  %v17749_v4 = vld [vmem:[#allocation195_spill] sm:$0xff] }
 0x5e8   :  { %7000 = vmatpush.msrb.mxu2 %v17739_v8  ;;  %7117 = vmatpush.msrb.mxu3 %v17743_v7  ;;  %v17750_v7 = vld [vmem:[#allocation184_spill] sm:$0xff] }
 0x5e9   :  { %7174 = vmatpush.msra.mxu0 %v17744_v9  ;;  %7217 = vmatpush.msra.mxu1 %v17745_v41  ;;  %v17753_v9 = vld [vmem:[#allocation38_spill] sm:$0xff] }
 0x5ea   :  { %7002 = vmatpush.msrb.mxu2 %v17742_v52  ;;  %7123 = vmatpush.msrb.mxu3 %v17746_v32  ;;  %v17751_v32 = vld [vmem:[#allocation188_spill] sm:$0xff] }
 0x5eb   :  { %7177 = vmatpush.msra.mxu0 %v17747_v33  ;;  %7219 = vmatpush.msra.mxu1 %v17748_v13  ;;  %v17752_v33 = vld [vmem:[#allocation16_spill] sm:$0xff] }
 0x5ec   :  { %7125 = vmatmul.f32.vlgmr.msrb.gmra.mxu3 %v14325_v63  ;;  %7004 = vmatpush.msrb.mxu2 %v17745_v41 }
 0x5ed   :  { %7311 = vmatpush.msra.mxu3 %v17707_v26  ;;  %7180 = vmatpush.msra.mxu0 %v17749_v4  ;;  %v17754_v4 = vld [vmem:[#allocation17_spill] sm:$0xff] }
 0x5ee   :  { %7221 = vmatpush.msra.mxu1 %v17750_v7  ;;  %7183 = vmatmul.f32.vlgmr.msra.gmra.mxu0 %v14331_v59  ;;  %v17755_v59 = vld [vmem:[#allocation146_spill] sm:$0xff] }
 0x5ef   :  { %7313 = vmatpush.msra.mxu3 %v17711_v62  ;;  %7006 = vmatpush.msrb.mxu2 %v17748_v13 }
 0x5f0   :  { %7223 = vmatpush.msra.mxu1 %v17751_v32  ;;  %7453 = vmatpush.msrb.mxu0 %v17752_v33 }
 0x5f1   :  { %7227 = vmatmul.f32.vlgmr.msra.gmra.mxu1 %v14337_v58  ;;  %7315 = vmatpush.msra.mxu3 %v17715_v60  ;;  %v17756_v58 = vld [vmem:[#allocation39_spill] sm:$0xff] }
 0x5f2   :  { %7008 = vmatpush.msrb.mxu2 %v17750_v7  ;;  %7506 = vmatpush.msrb.mxu1 %v17753_v9  ;;  %v17757_v9 = vld [vmem:[#allocation149_spill] sm:$0xff] }
 0x5f3   :  { %7317 = vmatpush.msra.mxu3 %v17718_v20  ;;  %7455 = vmatpush.msrb.mxu0 %v17754_v4  ;;  %v17759_v20 = vld [vmem:[#allocation152_spill] sm:$0xff] }
 0x5f4   :  { %7010 = vmatpush.msrb.mxu2 %v17751_v32  ;;  %7129 = vmatmul.f32.gmra.mxu3 %v14349_v22 }
 0x5f5   :  { %7016 = vmatmul.f32.vlgmr.msrb.gmra.mxu2 %v14352_v12  ;;  %7319 = vmatpush.msra.mxu3 %v17721_v37  ;;  %v17760_v12 = vld [vmem:[#allocation43_spill] sm:$0xff] }
 0x5f6   :  { %7240 = vmatpush.msra.mxu2 %v17755_v59  ;;  %7188 = vmatmul.f32.gmra.mxu0 %v14360_v44  ;;  %v17761_v59 = vld [vmem:[#allocation19_spill] sm:$0xff] }
 0x5f7   :  { %7321 = vmatpush.msra.mxu3 %v17724_v51  ;;  %7512 = vmatpush.msrb.mxu1 %v17756_v58  ;;  %v17762_v44 = vld [vmem:[#allocation155_spill] sm:$0xff] }
 0x5f8   :  { %7244 = vmatpush.msra.mxu2 %v17757_v9  ;;  %7457 = vmatpush.msrb.mxu0 %v17758_v27  ;;  %v17763_v51 = vld [vmem:[#allocation47_spill] sm:$0xff] }
 0x5f9   :  { %7233 = vmatmul.f32.gmra.mxu1 %v14367_v0  ;;  %7323 = vmatpush.msra.mxu3 %v17727_v17  ;;  %v17764_v9 = vld [vmem:[#allocation159_spill] sm:$0xff]  ;;  %v17765_v0 = vld [vmem:[#allocation50_spill] sm:$0xff] }
 0x5fa   :  { %7248 = vmatpush.msra.mxu2 %v17759_v20  ;;  %7518 = vmatpush.msrb.mxu1 %v17760_v12  ;;  %v17766_v20 = vld [vmem:[#allocation20_spill] sm:$0xff]  ;;  %v17767_v12 = vld [vmem:[#allocation163_spill] sm:$0xff] }
 0x5fb   :  { %7325 = vmatpush.msra.mxu3 %v17730_v23  ;;  %7459 = vmatpush.msrb.mxu0 %v17761_v59  ;;  %v17768_v58 = vld [vmem:[#allocation55_spill] sm:$0xff] }
 0x5fc   :  { %7252 = vmatpush.msra.mxu2 %v17762_v44  ;;  %7524 = vmatpush.msrb.mxu1 %v17763_v51  ;;  %v17769_v44 = vld [vmem:[#allocation21_spill] sm:$0xff]  ;;  %v17770_v51 = vld [vmem:[#allocation168_spill] sm:$0xff] }
 0x5fd   :  { %7024 = vmatmul.f32.gmra.mxu2 %v14379_v48  ;;  %7327 = vmatpush.msra.mxu3 %v17733_v39  ;;  %v17771_v48 = vld [vmem:[#allocation58_spill] sm:$0xff] }
 0x5fe   :  { %7256 = vmatpush.msra.mxu2 %v17764_v9  ;;  %7530 = vmatpush.msrb.mxu1 %v17765_v0  ;;  %v17772_v9 = vld [vmem:[#allocation25_spill] sm:$0xff]  ;;  %v17773_v0 = vld [vmem:[#allocation172_spill] sm:$0xff]  ;;  %v17794_v39 = vld [vmem:[#allocation54_spill] sm:$0xff] }
 0x5ff   :  { %7329 = vmatpush.msra.mxu3 %v17736_v53  ;;  %7461 = vmatpush.msrb.mxu0 %v17766_v20  ;;  %v17774_v53 = vld [vmem:[#allocation63_spill] sm:$0xff] }
 0x600   :  { %7260 = vmatpush.msra.mxu2 %v17767_v12  ;;  %7536 = vmatpush.msrb.mxu1 %v17768_v58  ;;  %v17775_v12 = vld [vmem:[#allocation31_spill] sm:$0xff] }
 0x601   :  { %7331 = vmatpush.msra.mxu3 %v17739_v8  ;;  %7463 = vmatpush.msrb.mxu0 %v17769_v44  ;;  %v17776_v58 = vld [vmem:[#allocation175_spill] sm:$0xff] }
 0x602   :  { %7264 = vmatpush.msra.mxu2 %v17770_v51  ;;  %7542 = vmatpush.msrb.mxu1 %v17771_v48  ;;  %v17777_v8 = vld [vmem:[#allocation67_spill] sm:$0xff]  ;;  %v17778_v51 = vld [vmem:[#allocation33_spill] sm:$0xff] }
 0x603   :  { %7333 = vmatpush.msra.mxu3 %v17742_v52  ;;  %7465 = vmatpush.msrb.mxu0 %v17772_v9  ;;  %v17779_v48 = vld [vmem:[#allocation179_spill] sm:$0xff]  ;;  %v17780_v52 = vld [vmem:[#allocation72_spill] sm:$0xff] }
 0x604   :  { %7268 = vmatpush.msra.mxu2 %v17773_v0  ;;  %7548 = vmatpush.msrb.mxu1 %v17774_v53  ;;  %v17781_v0 = vld [vmem:[#allocation36_spill] sm:$0xff]  ;;  %v17782_v53 = vld [vmem:[#allocation185_spill] sm:$0xff] }
 0x605   :  { %7335 = vmatpush.msra.mxu3 %v17745_v41  ;;  %7467 = vmatpush.msrb.mxu0 %v17775_v12  ;;  %v17783_v41 = vld [vmem:[#allocation75_spill] sm:$0xff] }
 0x606   :  { %7272 = vmatpush.msra.mxu2 %v17776_v58  ;;  %7554 = vmatpush.msrb.mxu1 %v17777_v8  ;;  %v17784_v58 = vld [vmem:[#allocation44_spill] sm:$0xff]  ;;  %v17785_v8 = vld [vmem:[#allocation189_spill] sm:$0xff] }
 0x607   :  { %7337 = vmatpush.msra.mxu3 %v17748_v13  ;;  %7469 = vmatpush.msrb.mxu0 %v17778_v51  ;;  %v17793_v13 = vld [vmem:[#allocation197_spill] sm:$0xff] }
 0x608   :  { %7276 = vmatpush.msra.mxu2 %v17779_v48  ;;  %7560 = vmatpush.msrb.mxu1 %v17780_v52  ;;  %v17786_v48 = vld [vmem:[#allocation78_spill] sm:$0xff]  ;;  %v17787_v52 = vld [vmem:[#allocation191_spill] sm:$0xff] }
 0x609   :  { %7339 = vmatpush.msra.mxu3 %v17750_v7  ;;  %7471 = vmatpush.msrb.mxu0 %v17781_v0  ;;  %v17788_v7 = vld [vmem:[#allocation46_spill] sm:$0xff] }
 0x60a   :  { %7280 = vmatpush.msra.mxu2 %v17782_v53  ;;  %7566 = vmatpush.msrb.mxu1 %v17783_v41  ;;  %v17789_v53 = vld [vmem:[#allocation82_spill] sm:$0xff] }
 0x60b   :  { %7341 = vmatpush.msra.mxu3 %v17751_v32  ;;  %7473 = vmatpush.msrb.mxu0 %v17784_v58  ;;  %v17790_v41 = vld [vmem:[#allocation194_spill] sm:$0xff]  ;;  %v17791_v32 = vld [vmem:[#allocation51_spill] sm:$0xff] }
 0x60c   :  { %7284 = vmatpush.msra.mxu2 %v17785_v8  ;;  %7343 = vmatmul.f32.vlgmr.msra.gmra.mxu3 %v14325_v63  ;;  %v17792_v8 = vld [vmem:[#allocation84_spill] sm:$0xff] }
 0x60d   :  { %7666 = vmatpush.msrb.mxu3 %v17752_v33  ;;  %7572 = vmatpush.msrb.mxu1 %v17786_v48  ;;  %v17796_v48 = vld [vmem:[#allocation199_spill] sm:$0xff] }
 0x60e   :  { %7288 = vmatpush.msra.mxu2 %v17787_v52  ;;  %7475 = vmatpush.msrb.mxu0 %v17788_v7  ;;  %v17795_v52 = vld [vmem:[#allocation88_spill] sm:$0xff] }
 0x60f   :  { %7668 = vmatpush.msrb.mxu3 %v17754_v4  ;;  %7578 = vmatpush.msrb.mxu1 %v17789_v53  ;;  %v17798_v53 = vld [vmem:[#allocation92_spill] sm:$0xff] }
 0x610   :  { %7292 = vmatpush.msra.mxu2 %v17790_v41  ;;  %7477 = vmatpush.msrb.mxu0 %v17791_v32  ;;  %v17797_v41 = vld [vmem:[#allocation22_spill] sm:$0xff] }
 0x611   :  { %7670 = vmatpush.msrb.mxu3 %v17758_v27  ;;  %7584 = vmatpush.msrb.mxu1 %v17792_v8  ;;  %v17800_v8 = vld [vmem:[#allocation59_spill] sm:$0xff] }
 0x612   :  { %7296 = vmatpush.msra.mxu2 %v17793_v13  ;;  %7479 = vmatpush.msrb.mxu0 %v17794_v39  ;;  %v17799_v13 = vld [vmem:[#allocation23_spill] sm:$0xff] }
 0x613   :  { %7672 = vmatpush.msrb.mxu3 %v17761_v59  ;;  %7590 = vmatpush.msrb.mxu1 %v17795_v52  ;;  %v17807_v52 = vld [vmem:[#allocation34_spill] sm:$0xff] }
 0x614   :  { %7300 = vmatpush.msra.mxu2 %v17796_v48  ;;  %7347 = vmatmul.f32.gmra.mxu3 %v14349_v22  ;;  %v17801_v48 = vld [vmem:[#allocation24_spill] sm:$0xff] }
 0x615   :  { %7302 = vmatmul.f32.vlgmr.msra.gmra.mxu2 %v14325_v63  ;;  %7674 = vmatpush.msrb.mxu3 %v17766_v20  ;;  %v17802_v63 = vld [vmem:[#allocation64_spill] sm:$0xff] }
 0x616   :  { %7608 = vmatpush.msrb.mxu2 %v17797_v41  ;;  %7596 = vmatpush.msrb.mxu1 %v17798_v53  ;;  %v17803_v53 = vld [vmem:[#allocation26_spill] sm:$0xff]  ;;  %v17804_v41 = vld [vmem:[#allocation28_spill] sm:$0xff] }
 0x617   :  { %7676 = vmatpush.msrb.mxu3 %v17769_v44  ;;  %7481 = vmatpush.msrb.mxu0 %v17800_v8 }
 0x618   :  { %7784 = vmatpush.msra.mxu1 %v17752_v33  ;;  %7611 = vmatpush.msrb.mxu2 %v17799_v13  ;;  %v17805_v13 = vld [vmem:[#allocation27_spill] sm:$0xff] }
 0x619   :  { %7678 = vmatpush.msrb.mxu3 %v17772_v9  ;;  %7483 = vmatpush.msrb.mxu0 %v17802_v63 }
 0x61a   :  { %7786 = vmatpush.msra.mxu1 %v17754_v4  ;;  %7614 = vmatpush.msrb.mxu2 %v17801_v48  ;;  %v17806_v48 = vld [vmem:[#allocation29_spill] sm:$0xff] }
 0x61b   :  { %7680 = vmatpush.msrb.mxu3 %v17775_v12  ;;  %7713 = vmatpush.msra.mxu0 %v17804_v41  ;;  %v17809_v41 = vld [vmem:[#allocation37_spill] sm:$0xff] }
 0x61c   :  { %7788 = vmatpush.msra.mxu1 %v17758_v27  ;;  %7617 = vmatpush.msrb.mxu2 %v17803_v53  ;;  %v17808_v53 = vld [vmem:[#allocation30_spill] sm:$0xff] }
 0x61d   :  { %7306 = vmatmul.f32.gmra.mxu2 %v14349_v22  ;;  %7682 = vmatpush.msrb.mxu3 %v17778_v51  ;;  %v17810_v22 = vld [vmem:[#allocation32_spill] sm:$0xff] }
 0x61e   :  { %7620 = vmatpush.msrb.mxu2 %v17805_v13  ;;  %7790 = vmatpush.msra.mxu1 %v17761_v59  ;;  %v17811_v13 = vld [vmem:[#allocation41_spill] sm:$0xff] }
 0x61f   :  { %7684 = vmatpush.msrb.mxu3 %v17781_v0  ;;  %7717 = vmatpush.msra.mxu0 %v17806_v48  ;;  %v17813_v48 = vld [vmem:[#allocation45_spill] sm:$0xff] }
 0x620   :  { %7623 = vmatpush.msrb.mxu2 %v17807_v52  ;;  %7792 = vmatpush.msra.mxu1 %v17766_v20  ;;  %v17812_v52 = vld [vmem:[#allocation35_spill] sm:$0xff] }
 0x621   :  { %7686 = vmatpush.msrb.mxu3 %v17784_v58  ;;  %7721 = vmatpush.msra.mxu0 %v17808_v53  ;;  %v17815_v53 = vld [vmem:[#allocation49_spill] sm:$0xff] }
 0x622   :  { %7626 = vmatpush.msrb.mxu2 %v17809_v41  ;;  %7794 = vmatpush.msra.mxu1 %v17769_v44  ;;  %v17814_v41 = vld [vmem:[#allocation40_spill] sm:$0xff] }
 0x623   :  { %7688 = vmatpush.msrb.mxu3 %v17788_v7  ;;  %7725 = vmatpush.msra.mxu0 %v17810_v22  ;;  %v17817_v22 = vld [vmem:[#allocation53_spill] sm:$0xff] }
 0x624   :  { %7629 = vmatpush.msrb.mxu2 %v17811_v13  ;;  %7796 = vmatpush.msra.mxu1 %v17772_v9  ;;  %v17816_v13 = vld [vmem:[#allocation42_spill] sm:$0xff] }
 0x625   :  { %7690 = vmatpush.msrb.mxu3 %v17791_v32  ;;  %7729 = vmatpush.msra.mxu0 %v17812_v52  ;;  %v17819_v52 = vld [vmem:[#allocation57_spill] sm:$0xff] }
 0x626   :  { %7632 = vmatpush.msrb.mxu2 %v17813_v48  ;;  %7798 = vmatpush.msra.mxu1 %v17775_v12  ;;  %v17818_v48 = vld [vmem:[#allocation48_spill] sm:$0xff]  ;;  %v17820_v12 = vld [vmem:[#allocation87_spill] sm:$0xff] }
 0x627   :  { %7692 = vmatpush.msrb.mxu3 %v17794_v39  ;;  %7733 = vmatpush.msra.mxu0 %v17814_v41  ;;  %v17822_v41 = vld [vmem:[#allocation61_spill] sm:$0xff] }
 0x628   :  { %7635 = vmatpush.msrb.mxu2 %v17815_v53  ;;  %7800 = vmatpush.msra.mxu1 %v17778_v51  ;;  %v17821_v53 = vld [vmem:[#allocation52_spill] sm:$0xff]  ;;  %v17823_v51 = vld [vmem:[#allocation91_spill] sm:$0xff] }
 0x629   :  { %7694 = vmatpush.msrb.mxu3 %v17800_v8  ;;  %7737 = vmatpush.msra.mxu0 %v17816_v13  ;;  %v17825_v13 = vld [vmem:[#allocation62_spill] sm:$0xff] }
 0x62a   :  { %7638 = vmatpush.msrb.mxu2 %v17817_v22  ;;  %7802 = vmatpush.msra.mxu1 %v17781_v0  ;;  %v17824_v22 = vld [vmem:[#allocation56_spill] sm:$0xff]  ;;  %v17826_v0 = vld [vmem:[#allocation97_spill] sm:$0xff] }
 0x62b   :  { %7696 = vmatpush.msrb.mxu3 %v17802_v63  ;;  %7741 = vmatpush.msra.mxu0 %v17818_v48  ;;  %v17829_v48 = vld [vmem:[#allocation100_spill] sm:$0xff] }
 0x62c   :  { %7641 = vmatpush.msrb.mxu2 %v17819_v52  ;;  %7804 = vmatpush.msra.mxu1 %v17784_v58  ;;  %v17827_v52 = vld [vmem:[#allocation60_spill] sm:$0xff] }
 0x62d   :  { %7878 = vmatpush.msra.mxu3 %v17820_v12  ;;  %7745 = vmatpush.msra.mxu0 %v17821_v53  ;;  %v17828_v12 = vld [vmem:[#allocation69_spill] sm:$0xff]  ;;  %v17832_v53 = vld [vmem:[#allocation104_spill] sm:$0xff] }
 0x62e   :  { %7644 = vmatpush.msrb.mxu2 %v17822_v41  ;;  %7806 = vmatpush.msra.mxu1 %v17788_v7  ;;  %v17830_v41 = vld [vmem:[#allocation65_spill] sm:$0xff] }
 0x62f   :  { %7884 = vmatpush.msra.mxu3 %v17823_v51  ;;  %7749 = vmatpush.msra.mxu0 %v17824_v22  ;;  %v17831_v51 = vld [vmem:[#allocation73_spill] sm:$0xff] }
 0x630   :  { %7647 = vmatpush.msrb.mxu2 %v17825_v13  ;;  %7808 = vmatpush.msra.mxu1 %v17791_v32  ;;  %v17834_v13 = vld [vmem:[#allocation68_spill] sm:$0xff]  ;;  %v17841_v22 = vld [vmem:[#allocation125_spill] sm:$0xff] }
 0x631   :  { %7890 = vmatpush.msra.mxu3 %v17826_v0  ;;  %7753 = vmatpush.msra.mxu0 %v17827_v52  ;;  %v17833_v0 = vld [vmem:[#allocation112_spill] sm:$0xff]  ;;  %v6273_v52 = vpop.f32.mrf.mxu2 }
 0x632   :  { %7650 = vmatpush.msrb.mxu2 %v17828_v12  ;;  %7810 = vmatpush.msra.mxu1 %v17794_v39  ;;  %v6382_v12 = vpop.f32.mrf.mxu3 }
 0x633   :  { %7896 = vmatpush.msra.mxu3 %v17829_v48  ;;  %7757 = vmatpush.msra.mxu0 %v17830_v41  ;;  %v17835_v48 = vld [vmem:[#allocation116_spill] sm:$0xff]  ;;  %v17836_v41 = vld [vmem:[#allocation70_spill] sm:$0xff]  ;;  %v6383_v44 = vadd.f32 %v6382_v12, %v6273_v52 }
 0x634   :  { %7653 = vmatpush.msrb.mxu2 %v17831_v51  ;;  %7812 = vmatpush.msra.mxu1 %v17800_v8  ;;  %v17838_v51 = vld [vmem:[#allocation76_spill] sm:$0xff]  ;;  %v17846_v8 = vld [vmem:[#allocation138_spill] sm:$0xff] }
 0x635   :  { %7902 = vmatpush.msra.mxu3 %v17832_v53  ;;  %7761 = vmatpush.msra.mxu0 %v17834_v13  ;;  %v17837_v53 = vld [vmem:[#allocation118_spill] sm:$0xff]  ;;  %v17840_v13 = vld [vmem:[#allocation79_spill] sm:$0xff] }
 0x636   :  { %7825 = vmatpush.msra.mxu2 %v11705_v25  ;;  %7814 = vmatpush.msra.mxu1 %v17802_v63 }
 0x637   :  { %7908 = vmatpush.msra.mxu3 %v17833_v0  ;;  %7765 = vmatpush.msra.mxu0 %v17836_v41  ;;  %v17839_v0 = vld [vmem:[#allocation122_spill] sm:$0xff] }
 0x638   :  { %7827 = vmatpush.msra.mxu2 %v11712_v30  ;;  %v17842_v41 = vld [vmem:[#allocation130_spill] sm:$0xff] }
 0x639   :  { %7914 = vmatpush.msra.mxu3 %v17835_v48  ;;  %7769 = vmatpush.msra.mxu0 %v17838_v51  ;;  %v6440_v48 = vpop.f32.mrf.mxu0  ;;  %v6281_v63 = vpop.f32.mrf.mxu2  ;;  %v17843_v51 = vld [vmem:[#allocation133_spill] sm:$0xff] }
 0x63a   :  { %7829 = vmatpush.msra.mxu2 %v11759_v28  ;;  %v6441_v27 = vadd.f32 %v6440_v48, %v6383_v44 }
 0x63b   :  { %7920 = vmatpush.msra.mxu3 %v17837_v53  ;;  %7773 = vmatpush.msra.mxu0 %v17840_v13  ;;  %v6484_v13 = vpop.f32.mrf.mxu1  ;;  %v17845_v53 = vld [vmem:[#allocation137_spill] sm:$0xff] }
 0x63c   :  { %7831 = vmatpush.msra.mxu2 %v11775_v31  ;;  %v6485_v17 = vadd.f32 %v6484_v13, %v6441_v27  ;;  %v6227_v13 = vld [vmem:[#allocation3 + $0x84] sm:$0xff] }
 0x63d   :  { %7926 = vmatpush.msra.mxu3 %v17839_v0  ;;  %v17844_v0 = vld [vmem:[#allocation135_spill] sm:$0xff] }
 0x63e   :  { %7833 = vmatpush.msra.mxu2 %v16958_v42 }
 0x63f   :  { %7932 = vmatpush.msra.mxu3 %v17841_v22  ;;  %v6386_v22 = vpop.f32.mrf.mxu3 }
 0x640   :  { %7835 = vmatpush.msra.mxu2 %v16961_v5  ;;  %v6387_v23 = vadd.f32 %v6386_v22, %v6281_v63 }
 0x641   :  { %7938 = vmatpush.msra.mxu3 %v17842_v41  ;;  %v17847_v41 = vld [vmem:[#allocation139_spill] sm:$0xff]  ;;  %v6445_v39 = vpop.f32.mrf.mxu0 }
 0x642   :  { %7837 = vmatpush.msra.mxu2 %v16964_v57 }
 0x643   :  { %7944 = vmatpush.msra.mxu3 %v17843_v51  ;;  %v6559_v51 = vpop.f32.mrf.mxu2 }
 0x644   :  { %7839 = vmatpush.msra.mxu2 %v16967_v36 }
 0x645   :  { %7950 = vmatpush.msra.mxu3 %v17844_v0  ;;  %v6490_v0 = vpop.f32.mrf.mxu1 }
 0x646   :  { %7841 = vmatpush.msra.mxu2 %v16970_v3 }
 0x647   :  { %7956 = vmatpush.msra.mxu3 %v17845_v53  ;;  %v6600_v32 = vpop.f32.mrf.mxu3 }
 0x648   :  { %7843 = vmatpush.msra.mxu2 %v16973_v14 }
 0x649   :  { %7962 = vmatpush.msra.mxu3 %v17846_v8  ;;  %v6645_v53 = vpop.f32.mrf.mxu0 }
 0x64a   :  { %7845 = vmatpush.msra.mxu2 %v17682_v29 }
 0x64b   :  { %7968 = vmatpush.msra.mxu3 %v17847_v41  ;;  %v6563_v8 = vpop.f32.mrf.mxu2 }
 0x64c   :  { %7847 = vmatpush.msra.mxu2 %v17685_v45 }
 0x64d   :  { %v6754_v7 = vpop.f32.mrf.mxu1 }
 0x64e   :  { %7849 = vmatpush.msra.mxu2 %v17688_v21  ;;  %v6755_v20 = vadd.f32 %v6754_v7, %v6645_v53 }
 0x64f   :  { %v6604_v58 = vpop.f32.mrf.mxu3 }
 0x650   :  { %7851 = vmatpush.msra.mxu2 %v17691_v34  ;;  %v6446_v34 = vadd.f32 %v6445_v39, %v6387_v23  ;;  %v6233_v23 = vunpack.c.h.bf16 %v6227_v13 }
 0x651   :  { %v6653_v9 = vpop.f32.mrf.mxu0 }
 0x652   :  { %7853 = vmatpush.msra.mxu2 %v17694_v18  ;;  %v6560_v18 = vadd.f32 %v6559_v51, %v6485_v17  ;;  %v6491_v7 = vadd.f32 %v6490_v0, %v6446_v34  ;;  %v6232_v17 = vunpack.c.l.bf16 %v6227_v13 }
 0x654   :  { %7855 = vmatpush.msra.mxu2 %v17697_v40  ;;  %v6225_v40 = vld [vmem:[#allocation3 + $0x78] sm:$0xff]  ;;  %v6601_v29 = vadd.f32 %v6600_v32, %v6560_v18  ;;  %v6564_v44 = vadd.f32 %v6563_v8, %v6491_v7 }
 0x655   :  { %v6758_v59 = vpop.f32.mrf.mxu1  ;;  %v6229_v61 = vunpack.c.l.bf16 %v6225_v40  ;;  %v6230_v53 = vunpack.c.h.bf16 %v6225_v40 }
 0x656   :  { %v6759_v26 = vadd.f32 %v6758_v59, %v6653_v9  ;;  %v6605_v51 = vadd.f32 %v6604_v58, %v6564_v44 }
 0x657   :  { %v6812_v41 = vpop.f32.mrf.mxu2  ;;  %v6856_v33 = vpop.f32.mrf.mxu3 }
 0x658   :  { %v6813_v4 = vadd.f32 %v6812_v41, %v6755_v20  ;;  %v7351_v20 = vadd.f32 %v6601_v29, %v6229_v61  ;;  %v7354_v18 = vadd.f32 %v6605_v51, %v6232_v17 }
 0x659   :  { %v6931_v60 = vpop.f32.mrf.mxu0 }
 0x65a   :  { %v6857_v37 = vadd.f32 %v6856_v33, %v6813_v4  ;;  %v11143_v9 = vmul.f32 -1.442695, %v7351_v20  ;;  %v11144_v34 = vmul.f32 -1.442695, %v7354_v18 }
 0x65c   :  { %v6932_v21 = vadd.f32 %v6931_v60, %v6857_v37  ;;  %11302 = vpow2.f32 %v11143_v9 }
 0x65d   :  { %v6972_v56 = vpop.f32.mrf.mxu1 }
 0x65e   :  { %v6973_v12 = vadd.f32 %v6972_v56, %v6932_v21 }
 0x65f   :  { %v6862_v52 = vpop.f32.mrf.mxu3 }
 0x660   :  { %v6817_v62 = vpop.f32.mrf.mxu2  ;;  %v7352_v33 = vadd.f32 %v6973_v12, %v6230_v53 }
 0x661   :  { %v6818_v45 = vadd.f32 %v6817_v62, %v6759_v26  ;;  %v6935_v27 = vpop.f32.mrf.mxu0 }
 0x662   :  { %v11145_v62 = vmul.f32 -1.442695, %v7352_v33  ;;  %v11303_v56 = vpop.eup %11302 }
 0x663   :  { %v6863_v41 = vadd.f32 %v6862_v52, %v6818_v45  ;;  %v14680_v61 = vadd.f32 1.0, %v11303_v56 }
 0x664   :  { %11304 = vpow2.f32 %v11145_v62 }
 0x665   :  { %v6936_v4 = vadd.f32 %v6935_v27, %v6863_v41  ;;  %v6976_v39 = vpop.f32.mrf.mxu1  ;;  %11306 = vpow2.f32 %v11144_v34  ;;  %v6226_v27 = vld [vmem:[#allocation3 + $0x80] sm:$0xf]  ;;  %vm7370_vm1 = vweird.f32 %v14680_v61 }
 0x667   :  { %v6977_v37 = vadd.f32 %v6976_v39, %v6936_v4 }
 0x669   :  { %v7355_v40 = vadd.f32 %v6977_v37, %v6233_v23  ;;  %v6231_v37 = vunpack.c.l.bf16 %v6226_v27 }
 0x66a   :  { %v11305_v29 = vpop.eup %11304 }
 0x66b   :  { %v11146_v45 = vmul.f32 -1.442695, %v7355_v40  ;;  %v14682_v21 = vadd.f32 1.0, %v11305_v29  ;;  %v11307_v60 = vpop.eup %11306  ;;  %v7184_v63 = vpop.f32.mrf.mxu0 }
 0x66c   :  { %v14686_v59 = vadd.f32 1.0, %v11307_v60  ;;  %v7376_v60 = vand.u32 2147483648, %v14680_v61 }
 0x66d   :  { %11308 = vpow2.f32 %v11146_v45  ;;  %vm7408_vm4 = vweird.f32 %v14682_v21 }
 0x66e   :  { %11310 = vrcp.f32 %v14680_v61  ;;  %v7228_v44 = vpop.f32.mrf.mxu1  ;;  %vm7385_vm7 = vweird.f32 %v14686_v59 }
 0x66f   :  { %v7126_v8 = vpop.f32.mrf.mxu3  ;;  %11312 = vrcp.f32 %v14682_v21 }
 0x670   :  { %11314 = vrcp.f32 %v14686_v59 }
 0x673   :  { %v11309_v26 = vpop.eup %11308  ;;  %v7189_v34 = vpop.f32.mrf.mxu0 }
 0x674   :  { %v11311_v58 = vpop.eup %11310  ;;  %v14688_v0 = vadd.f32 1.0, %v11309_v26 }
 0x675   :  { %v14690_v48 = vpop.eup %11312  ;;  %v7366_v52 = vmul.f32 %v11311_v58, %v14680_v61  ;;  %vm7371_vm0 = vweird.f32 %v11311_v58 }
 0x676   :  { %11316 = vrcp.f32 %v14688_v0  ;;  %v7404_v12 = vmul.f32 %v14690_v48, %v14682_v21  ;;  %v14697_v13 = vpop.eup %11314  ;;  %vm7409_vm2 = vweird.f32 %v14690_v48  ;;  %vm14711_vm3 = vmor %vm7370_vm1, %vm7371_vm0  ;;  %vm7423_vm12 = vweird.f32 %v14688_v0 }
 0x677   :  { %v7130_v53 = vpop.f32.mrf.mxu3  ;;  %v7367_v20 = vsub.f32 1.0, %v7366_v52  ;;  %v7381_v39 = vmul.f32 %v14697_v13, %v14686_v59  ;;  %vm14721_vm5 = vmor %vm7408_vm4, %vm7409_vm2  ;;  %vm7386_vm8 = vweird.f32 %v14697_v13 }
 0x678   :  { %v7017_v32 = vpop.f32.mrf.mxu2  ;;  %v7405_v33 = vsub.f32 1.0, %v7404_v12  ;;  %vm7387_vm11 = vmor %vm7385_vm7, %vm7386_vm8 }
 0x679   :  { %v7127_v22 = vadd.f32 %v7126_v8, %v7017_v32  ;;  %v7368_v51 = vmul.f32 %v11311_v58, %v7367_v20  ;;  %v7382_v8 = vsub.f32 1.0, %v7381_v39 }
 0x67a   :  { %v7406_v56 = vmul.f32 %v14690_v48, %v7405_v33 }
 0x67b   :  { %v7185_v41 = vadd.f32 %v7184_v63, %v7127_v22  ;;  %v7369_v32 = vadd.f32 %v11311_v58, %v7368_v51  ;;  %v7234_v63 = vpop.f32.mrf.mxu1  ;;  %v7374_v22 = vand.u32 2147483647, %v14680_v61  ;;  %v7412_v61 = vand.u32 2147483647, %v14682_v21 }
 0x67c   :  { %v14699_v4 = vpop.eup %11316  ;;  %v7407_v52 = vadd.f32 %v14690_v48, %v7406_v56  ;;  %v7391_v56 = vand.u32 2147483648, %v14686_v59 }
 0x67d   :  { %v7229_v17 = vadd.f32 %v7228_v44, %v7185_v41  ;;  %v7419_v40 = vmul.f32 %v14699_v4, %v14688_v0  ;;  %v7414_v41 = vand.u32 2147483648, %v14682_v21  ;;  %v7383_v44 = vmul.f32 %v14697_v13, %v7382_v8 }
 0x67e   :  { %v7373_v27 = vsel %vm14711_vm3, %v11311_v58, %v7369_v32  ;;  %vm7375_vm6 = vcmp.eq.f32.partialorder %v7374_v22, 8.507059e+37  ;;  %vm7413_vm9 = vcmp.eq.f32.partialorder %v7412_v61, 8.507059e+37  ;;  %vm7424_vm10 = vweird.f32 %v14699_v4 }
 0x67f   :  { %v7384_v21 = vadd.f32 %v14697_v13, %v7383_v44  ;;  %vm7425_vm13 = vmor %vm7423_vm12, %vm7424_vm10 }
 0x680   :  { %v7025_v7 = vpop.f32.mrf.mxu2 }
 0x681   :  { %v7131_v9 = vadd.f32 %v7130_v53, %v7025_v7  ;;  %v6228_v53 = vld [vmem:[#allocation3 + $0x8c] sm:$0xf]  ;;  %v7420_v7 = vsub.f32 1.0, %v7419_v40  ;;  %v7388_v22 = vsel %vm7387_vm11, %v14697_v13, %v7384_v21  ;;  %v17858_v21 = vld [vmem:[#allocation115_spill] sm:$0xff] }
 0x682   :  { %v6234_v51 = vunpack.c.l.bf16 %v6228_v53 }
 0x683   :  { %v7190_v45 = vadd.f32 %v7189_v34, %v7131_v9  ;;  %v7377_v9 = vor.u32 1.1754944e-38, %v7376_v60  ;;  %v7421_v58 = vmul.f32 %v14699_v4, %v7420_v7 }
 0x685   :  { %v7235_v20 = vadd.f32 %v7234_v63, %v7190_v45  ;;  %v7422_v60 = vadd.f32 %v14699_v4, %v7421_v58  ;;  %v17854_v58 = vld [vmem:[#allocation102_spill] sm:$0xff] }
 0x687   :  { %v7426_v53 = vsel %vm7425_vm13, %v14699_v4, %v7422_v60  ;;  %v17866_v60 = vld [vmem:[#allocation117_spill] sm:$0xff] }
 0x68f   :  { %v7344_v23 = vpop.f32.mrf.mxu3 }
 0x698   :  { %v7303_v62 = vpop.f32.mrf.mxu2 }
 0x699   :  { %v7304_v18 = vadd.f32 %v7303_v62, %v7229_v17  ;;  %v7348_v62 = vpop.f32.mrf.mxu3 }
 0x69b   :  { %v7345_v29 = vadd.f32 %v7344_v23, %v7304_v18  ;;  %v7411_v23 = vsel %vm14721_vm5, %v14690_v48, %v7407_v52  ;;  %v7415_v18 = vor.u32 1.1754944e-38, %v7414_v41  ;;  %v7389_v48 = vand.u32 2147483647, %v14686_v59 }
 0x69c   :  { %v7427_v52 = vand.u32 2147483647, %v14688_v0  ;;  %v7392_v59 = vor.u32 1.1754944e-38, %v7391_v56  ;;  %v17860_v56 = vld [vmem:[#allocation109_spill] sm:$0xff] }
 0x69d   :  { %v7353_v26 = vadd.f32 %v7345_v29, %v6231_v37  ;;  %v7378_v37 = vsel %vm7375_vm6, %v7377_v9, %v7373_v27  ;;  %v7416_v45 = vsel %vm7413_vm9, %v7415_v18, %v7411_v23  ;;  %vm7390_vm14 = vcmp.eq.f32.partialorder %v7389_v48, 8.507059e+37  ;;  %v17852_v23 = vld [vmem:[#allocation108_spill] sm:$0xff]  ;;  %v17856_v18 = vld [vmem:[#allocation119_spill] sm:$0xff]  ;;  %v17863_v48 = vld [vmem:[#allocation114_spill] sm:$0xff] }
 0x69e   :  { %v7435_v8 = vmul.f32 %v7378_v37, %v14320_v10  ;;  %v7393_v7 = vsel %vm7390_vm14, %v7392_v59, %v7388_v22  ;;  %vm7428_vm15 = vcmp.eq.f32.partialorder %v7427_v52, 8.507059e+37  ;;  %v17855_v37 = vld [vmem:[#allocation111_spill] sm:$0xff]  ;;  %v17868_v22 = vld [vmem:[#allocation134_spill] sm:$0xff]  ;;  %v17869_v52 = vld [vmem:[#allocation156_spill] sm:$0xff] }
 0x69f   :  { %11318 = vtanh.f32 %v7353_v26  ;;  %v7429_v26 = vand.u32 2147483648, %v14688_v0  ;;  %v7436_v0 = vmul.f32 %v7393_v7, %v14341_v24  ;;  %v17870_v59 = vld [vmem:[#allocation121_spill] sm:$0xff]  ;;  %v17872_v7 = vld [vmem:[#allocation160_spill] sm:$0xff] }
 0x6a0   :  { %v7307_v33 = vpop.f32.mrf.mxu2 }
 0x6a1   :  { %v7308_v39 = vadd.f32 %v7307_v33, %v7235_v20  ;;  %v7430_v12 = vor.u32 1.1754944e-38, %v7429_v26  ;;  %v17867_v26 = vld [vmem:[#allocation128_spill] sm:$0xff] }
 0x6a3   :  { %v7349_v40 = vadd.f32 %v7348_v62, %v7308_v39  ;;  %v7431_v20 = vsel %vm7428_vm15, %v7430_v12, %v7426_v53  ;;  %v17853_v62 = vld [vmem:[#allocation113_spill] sm:$0xff]  ;;  %v17871_v53 = vld [vmem:[#allocation136_spill] sm:$0xff]  ;;  %v17873_v12 = vld [vmem:[#allocation142_spill] sm:$0xff] }
 0x6a5   :  { %v11319_v34 = vpop.eup %11318  ;;  %v7356_v29 = vadd.f32 %v7349_v40, %v6234_v51  ;;  %v17857_v40 = vld [vmem:[#allocation106_spill] sm:$0xff] }
 0x6a6   :  { %v7437_v32 = vmul.f32 %v11319_v34, %v7416_v45  ;;  %v17859_v34 = vld [vmem:[#allocation123_spill] sm:$0xff]  ;;  %v17861_v45 = vld [vmem:[#allocation120_spill] sm:$0xff] }
 0x6a7   :  { %11320 = vtanh.f32 %v7356_v29  ;;  %v17862_v29 = vld [vmem:[#allocation126_spill] sm:$0xff] }
 0x6a8   :  { %v14738_v63 = vsub.f32 %v7435_v8, %v7437_v32  ;;  %v17864_v8 = vld [vmem:[#allocation124_spill] sm:$0xff]  ;;  %v17865_v32 = vld [vmem:[#allocation131_spill] sm:$0xff] }
 0x6aa   :  { %v14744_v10 = vand.u32 4294901760, %v14738_v63 }
 0x6ac   :  { %7598 = vmatmul.f32.vlgmr.msrb.gmra.mxu1 %v14744_v10  ;;  %v14750_v13 = vsub.f32 %v14738_v63, %v14744_v10 }
 0x6ad   :  { %v11321_v41 = vpop.eup %11320  ;;  %8038 = vmatpush.msrb.mxu1 %v11705_v25 }
 0x6ae   :  { %v7438_v44 = vmul.f32 %v11321_v41, %v7431_v20  ;;  %7656 = vmatmul.f32.vlgmr.msrb.gmra.mxu2 %v14750_v13  ;;  %v14756_v4 = vand.u32 4294901760, %v14750_v13  ;;  %v17874_v41 = vld [vmem:[#allocation127_spill] sm:$0xff]  ;;  %v17875_v20 = vld [vmem:[#allocation164_spill] sm:$0xff] }
 0x6af   :  { %8040 = vmatpush.msrb.mxu1 %v11712_v30  ;;  %8085 = vmatpush.msrb.mxu2 %v17005_v47 }
 0x6b0   :  { %v14760_v27 = vsub.f32 %v7436_v0, %v7438_v44  ;;  %7700 = vmatmul.f32.vlgmr.msrb.gmra.mxu3 %v14756_v4  ;;  %v7487_v61 = vsub.f32 %v14750_v13, %v14756_v4  ;;  %v17876_v0 = vld [vmem:[#allocation145_spill] sm:$0xff]  ;;  %v17877_v44 = vld [vmem:[#allocation140_spill] sm:$0xff] }
 0x6b1   :  { %8042 = vmatpush.msrb.mxu1 %v11759_v28  ;;  %8089 = vmatpush.msrb.mxu2 %v17006_v46 }
 0x6b2   :  { %v14768_v24 = vand.u32 4294901760, %v14760_v27  ;;  %8156 = vmatpush.msrb.mxu3 %v11705_v25  ;;  %v14771_v33 = vand.u32 4294901760, %v7487_v61  ;;  %v17878_v61 = vld [vmem:[#allocation129_spill] sm:$0xff] }
 0x6b3   :  { %8044 = vmatpush.msrb.mxu1 %v11775_v31  ;;  %8093 = vmatpush.msrb.mxu2 %v17007_v16 }
 0x6b4   :  { %8158 = vmatpush.msrb.mxu3 %v11712_v30  ;;  %7489 = vmatmul.f32.vlgmr.msrb.gmra.mxu0 %v14771_v33  ;;  %v14779_v9 = vsub.f32 %v14760_v27, %v14768_v24 }
 0x6b5   :  { %7602 = vmatmul.f32.gmra.mxu1 %v14768_v24  ;;  %7980 = vmatpush.msrb.mxu0 %v17008_v49 }
 0x6b6   :  { %8046 = vmatpush.msrb.mxu1 %v16958_v42  ;;  %8097 = vmatpush.msrb.mxu2 %v17009_v35  ;;  %v14786_v17 = vand.u32 4294901760, %v14779_v9 }
 0x6b7   :  { %8160 = vmatpush.msrb.mxu3 %v11759_v28  ;;  %7661 = vmatmul.f32.gmra.mxu2 %v14779_v9 }
 0x6b8   :  { %7983 = vmatpush.msrb.mxu0 %v17010_v55  ;;  %8048 = vmatpush.msrb.mxu1 %v16961_v5  ;;  %v7495_v51 = vsub.f32 %v14779_v9, %v14786_v17 }
 0x6b9   :  { %8101 = vmatpush.msrb.mxu2 %v17011_v11  ;;  %8162 = vmatpush.msrb.mxu3 %v11775_v31 }
 0x6ba   :  { %7706 = vmatmul.f32.gmra.mxu3 %v14786_v17  ;;  %7986 = vmatpush.msrb.mxu0 %v17012_v54  ;;  %v14798_v39 = vand.u32 4294901760, %v7495_v51  ;;  %v17879_v51 = vld [vmem:[#allocation167_spill] sm:$0xff] }
 0x6bb   :  { %8050 = vmatpush.msrb.mxu1 %v16964_v57  ;;  %8105 = vmatpush.msrb.mxu2 %v17013_v43 }
 0x6bc   :  { %8164 = vmatpush.msrb.mxu3 %v16958_v42  ;;  %7989 = vmatpush.msrb.mxu0 %v17014_v2 }
 0x6bd   :  { %8052 = vmatpush.msrb.mxu1 %v16967_v36  ;;  %8109 = vmatpush.msrb.mxu2 %v17015_v50 }
 0x6be   :  { %8166 = vmatpush.msrb.mxu3 %v16961_v5  ;;  %7497 = vmatmul.f32.gmra.mxu0 %v14798_v39 }
 0x6bf   :  { %7816 = vmatmul.f32.vlgmr.msra.gmra.mxu1 %v14744_v10  ;;  %7992 = vmatpush.msrb.mxu0 %v17016_v19 }
 0x6c0   :  { %8054 = vmatpush.msrb.mxu1 %v16970_v3  ;;  %8113 = vmatpush.msrb.mxu2 %v17017_v6 }
 0x6c1   :  { %8168 = vmatpush.msrb.mxu3 %v16964_v57  ;;  %7861 = vmatmul.f32.vlgmr.msra.gmra.mxu2 %v14771_v33 }
 0x6c2   :  { %7995 = vmatpush.msrb.mxu0 %v17018_v1  ;;  %8056 = vmatpush.msrb.mxu1 %v16973_v14 }
 0x6c3   :  { %8117 = vmatpush.msrb.mxu2 %v17019_v15  ;;  %8170 = vmatpush.msrb.mxu3 %v16967_v36 }
 0x6c4   :  { %7970 = vmatmul.f32.vlgmr.msra.gmra.mxu3 %v14744_v10  ;;  %7998 = vmatpush.msrb.mxu0 %v17020_v38 }
 0x6c5   :  { %8058 = vmatpush.msrb.mxu1 %v17852_v23  ;;  %8121 = vmatpush.msrb.mxu2 %v17853_v62 }
 0x6c6   :  { %8172 = vmatpush.msrb.mxu3 %v16970_v3  ;;  %8001 = vmatpush.msrb.mxu0 %v17854_v58 }
 0x6c7   :  { %8060 = vmatpush.msrb.mxu1 %v17855_v37  ;;  %8125 = vmatpush.msrb.mxu2 %v17856_v18  ;;  %v17918_v18 = vld [vmem:[#allocation181_spill] sm:$0xff] }
 0x6c8   :  { %8174 = vmatpush.msrb.mxu3 %v16973_v14  ;;  %7775 = vmatmul.f32.vlgmr.msra.gmra.mxu0 %v14744_v10 }
 0x6c9   :  { %7820 = vmatmul.f32.gmra.mxu1 %v14768_v24  ;;  %8004 = vmatpush.msrb.mxu0 %v17857_v40  ;;  %v17915_v40 = vld [vmem:[#allocation177_spill] sm:$0xff] }
 0x6ca   :  { %8062 = vmatpush.msrb.mxu1 %v17858_v21  ;;  %8129 = vmatpush.msrb.mxu2 %v17859_v34  ;;  %v17912_v34 = vld [vmem:[#allocation174_spill] sm:$0xff] }
 0x6cb   :  { %8176 = vmatpush.msrb.mxu3 %v17852_v23  ;;  %7869 = vmatmul.f32.gmra.mxu2 %v14798_v39 }
 0x6cc   :  { %8007 = vmatpush.msrb.mxu0 %v17860_v56  ;;  %8064 = vmatpush.msrb.mxu1 %v17861_v45  ;;  %v17909_v56 = vld [vmem:[#allocation171_spill] sm:$0xff] }
 0x6cd   :  { %8133 = vmatpush.msrb.mxu2 %v17862_v29  ;;  %8178 = vmatpush.msrb.mxu3 %v17855_v37  ;;  %v17906_v29 = vld [vmem:[#allocation166_spill] sm:$0xff] }
 0x6ce   :  { %7974 = vmatmul.f32.gmra.mxu3 %v14768_v24  ;;  %8010 = vmatpush.msrb.mxu0 %v17863_v48  ;;  %v17905_v48 = vld [vmem:[#allocation178_spill] sm:$0xff] }
 0x6cf   :  { %8066 = vmatpush.msrb.mxu1 %v17864_v8  ;;  %8137 = vmatpush.msrb.mxu2 %v17865_v32  ;;  %v17902_v32 = vld [vmem:[#allocation173_spill] sm:$0xff] }
 0x6d0   :  { %8180 = vmatpush.msrb.mxu3 %v17858_v21  ;;  %8013 = vmatpush.msrb.mxu0 %v17866_v60  ;;  %v17899_v60 = vld [vmem:[#allocation169_spill] sm:$0xff] }
 0x6d1   :  { %8068 = vmatpush.msrb.mxu1 %v17867_v26  ;;  %8141 = vmatpush.msrb.mxu2 %v17868_v22  ;;  %v17896_v22 = vld [vmem:[#allocation165_spill] sm:$0xff] }
 0x6d2   :  { %8182 = vmatpush.msrb.mxu3 %v17861_v45  ;;  %7779 = vmatmul.f32.gmra.mxu0 %v14768_v24 }
 0x6d3   :  { %8250 = vmatpush.msra.mxu1 %v17869_v52  ;;  %8016 = vmatpush.msrb.mxu0 %v17870_v59  ;;  %v17892_v59 = vld [vmem:[#allocation183_spill] sm:$0xff] }
 0x6d4   :  { %8072 = vmatmul.f32.vlgmr.msrb.gmra.mxu1 %v14756_v4  ;;  %8145 = vmatpush.msrb.mxu2 %v17871_v53  ;;  %v17883_v53 = vld [vmem:[#allocation170_spill] sm:$0xff]  ;;  %v17895_v52 = vld [vmem:[#allocation187_spill] sm:$0xff] }
 0x6d5   :  { %8184 = vmatpush.msrb.mxu3 %v17864_v8  ;;  %8256 = vmatpush.msra.mxu1 %v17872_v7  ;;  %v17880_v7 = vld [vmem:[#allocation148_spill] sm:$0xff] }
 0x6d6   :  { %8352 = vmatpush.msra.mxu2 %v17873_v12  ;;  %8019 = vmatpush.msrb.mxu0 %v17874_v41  ;;  %v17881_v12 = vld [vmem:[#allocation141_spill] sm:$0xff]  ;;  %v17882_v41 = vld [vmem:[#allocation132_spill] sm:$0xff] }
 0x6d7   :  { %8147 = vmatmul.f32.vlgmr.msrb.gmra.mxu2 %v14744_v10  ;;  %8186 = vmatpush.msrb.mxu3 %v17867_v26 }
 0x6d8   :  { %8262 = vmatpush.msra.mxu1 %v17875_v20  ;;  %8355 = vmatpush.msra.mxu2 %v17876_v0  ;;  %v17884_v20 = vld [vmem:[#allocation150_spill] sm:$0xff]  ;;  %v17885_v0 = vld [vmem:[#allocation143_spill] sm:$0xff] }
 0x6d9   :  { %8410 = vmatpush.msra.mxu3 %v17877_v44  ;;  %8022 = vmatpush.msrb.mxu0 %v17878_v61  ;;  %v17888_v61 = vld [vmem:[#allocation144_spill] sm:$0xff] }
 0x6da   :  { %8188 = vmatmul.f32.vlgmr.msrb.gmra.mxu3 %v14744_v10  ;;  %8268 = vmatpush.msra.mxu1 %v17879_v51  ;;  %v17886_v51 = vld [vmem:[#allocation176_spill] sm:$0xff] }
 0x6db   :  { %8358 = vmatpush.msra.mxu2 %v17880_v7  ;;  %8412 = vmatpush.msra.mxu3 %v17881_v12  ;;  %v17887_v7 = vld [vmem:[#allocation153_spill] sm:$0xff] }
 0x6dc   :  { %8025 = vmatpush.msrb.mxu0 %v17882_v41  ;;  %8274 = vmatpush.msra.mxu1 %v17883_v53  ;;  %v17889_v53 = vld [vmem:[#allocation180_spill] sm:$0xff]  ;;  %v17891_v41 = vld [vmem:[#allocation147_spill] sm:$0xff] }
 0x6dd   :  { %8361 = vmatpush.msra.mxu2 %v17884_v20  ;;  %8414 = vmatpush.msra.mxu3 %v17885_v0  ;;  %v17890_v20 = vld [vmem:[#allocation157_spill] sm:$0xff] }
 0x6de   :  { %8197 = vmatpush.msra.mxu0 %v17877_v44  ;;  %8078 = vmatmul.f32.gmra.mxu1 %v14786_v17 }
 0x6df   :  { %8028 = vmatmul.f32.vlgmr.msrb.gmra.mxu0 %v14750_v13  ;;  %8280 = vmatpush.msra.mxu1 %v17886_v51  ;;  %v17893_v51 = vld [vmem:[#allocation162_spill] sm:$0xff] }
 0x6e0   :  { %8199 = vmatpush.msra.mxu0 %v17881_v12  ;;  %8364 = vmatpush.msra.mxu2 %v17887_v7  ;;  %v17894_v7 = vld [vmem:[#allocation151_spill] sm:$0xff] }
 0x6e1   :  { %8416 = vmatpush.msra.mxu3 %v17888_v61  ;;  %8151 = vmatmul.f32.gmra.mxu2 %v14768_v24 }
 0x6e2   :  { %8201 = vmatpush.msra.mxu0 %v17885_v0  ;;  %8286 = vmatpush.msra.mxu1 %v17889_v53  ;;  %v17897_v53 = vld [vmem:[#allocation154_spill] sm:$0xff] }
 0x6e3   :  { %8367 = vmatpush.msra.mxu2 %v17890_v20  ;;  %8418 = vmatpush.msra.mxu3 %v17891_v41  ;;  %v17898_v20 = vld [vmem:[#allocation193_spill] sm:$0xff] }
 0x6e4   :  { %8192 = vmatmul.f32.gmra.mxu3 %v14768_v24  ;;  %8203 = vmatpush.msra.mxu0 %v17888_v61 }
 0x6e5   :  { %8292 = vmatpush.msra.mxu1 %v17892_v59  ;;  %8370 = vmatpush.msra.mxu2 %v17893_v51  ;;  %v17900_v59 = vld [vmem:[#allocation158_spill] sm:$0xff]  ;;  %v17901_v51 = vld [vmem:[#allocation196_spill] sm:$0xff] }
 0x6e6   :  { %8420 = vmatpush.msra.mxu3 %v17894_v7  ;;  %8205 = vmatpush.msra.mxu0 %v17891_v41 }
 0x6e7   :  { %8298 = vmatpush.msra.mxu1 %v17895_v52  ;;  %8373 = vmatpush.msra.mxu2 %v17896_v22  ;;  %v17903_v52 = vld [vmem:[#allocation161_spill] sm:$0xff]  ;;  %v17904_v22 = vld [vmem:[#allocation198_spill] sm:$0xff] }
 0x6e8   :  { %8422 = vmatpush.msra.mxu3 %v17897_v53  ;;  %8033 = vmatmul.f32.gmra.mxu0 %v14779_v9 }
 0x6e9   :  { %8207 = vmatpush.msra.mxu0 %v17894_v7  ;;  %8304 = vmatpush.msra.mxu1 %v17898_v20  ;;  %v17908_v20 = vld [vmem:[#allocation182_spill] sm:$0xff] }
 0x6ea   :  { %8376 = vmatpush.msra.mxu2 %v17899_v60  ;;  %8424 = vmatpush.msra.mxu3 %v17900_v59  ;;  %v17907_v60 = vld [vmem:[#allocation200_spill] sm:$0xff] }
 0x6eb   :  { %8209 = vmatpush.msra.mxu0 %v17897_v53  ;;  %8310 = vmatpush.msra.mxu1 %v17901_v51  ;;  %v17911_v51 = vld [vmem:[#allocation186_spill] sm:$0xff] }
 0x6ec   :  { %8379 = vmatpush.msra.mxu2 %v17902_v32  ;;  %8426 = vmatpush.msra.mxu3 %v17903_v52  ;;  %v17910_v32 = vld [vmem:[#allocation201_spill] sm:$0xff] }
 0x6ed   :  { %8211 = vmatpush.msra.mxu0 %v17900_v59  ;;  %8316 = vmatpush.msra.mxu1 %v17904_v22  ;;  %v17914_v22 = vld [vmem:[#allocation190_spill] sm:$0xff] }
 0x6ee   :  { %8382 = vmatpush.msra.mxu2 %v17905_v48  ;;  %8428 = vmatpush.msra.mxu3 %v17906_v29  ;;  %v17913_v48 = vld [vmem:[#allocation202_spill] sm:$0xff] }
 0x6ef   :  { %8213 = vmatpush.msra.mxu0 %v17903_v52  ;;  %8322 = vmatpush.msra.mxu1 %v17907_v60  ;;  %v17917_v60 = vld [vmem:[#allocation192_spill] sm:$0xff] }
 0x6f0   :  { %8385 = vmatpush.msra.mxu2 %v17908_v20  ;;  %8430 = vmatpush.msra.mxu3 %v17909_v56  ;;  %v17916_v20 = vld [vmem:[#allocation203_spill] sm:$0xff] }
 0x6f1   :  { %8215 = vmatpush.msra.mxu0 %v17906_v29  ;;  %8328 = vmatpush.msra.mxu1 %v17910_v32  ;;  %v17928_v32 = vld [vmem:[#allocation18_spill] sm:$0xff] }
 0x6f2   :  { %8388 = vmatpush.msra.mxu2 %v17911_v51  ;;  %8432 = vmatpush.msra.mxu3 %v17912_v34  ;;  %v17919_v51 = vld [vmem:[#allocation195_spill] sm:$0xff] }
 0x6f3   :  { %8217 = vmatpush.msra.mxu0 %v17909_v56  ;;  %8334 = vmatpush.msra.mxu1 %v17913_v48  ;;  %v17920_v48 = vld [vmem:[#allocation184_spill] sm:$0xff] }
 0x6f4   :  { %8391 = vmatpush.msra.mxu2 %v17914_v22  ;;  %8434 = vmatpush.msra.mxu3 %v17915_v40  ;;  %v17923_v22 = vld [vmem:[#allocation38_spill] sm:$0xff] }
 0x6f5   :  { %8219 = vmatpush.msra.mxu0 %v17912_v34  ;;  %8340 = vmatpush.msra.mxu1 %v17916_v20  ;;  %v17921_v20 = vld [vmem:[#allocation188_spill] sm:$0xff] }
 0x6f6   :  { %8394 = vmatpush.msra.mxu2 %v17917_v60  ;;  %8436 = vmatpush.msra.mxu3 %v17918_v18  ;;  %v17922_v60 = vld [vmem:[#allocation16_spill] sm:$0xff] }
 0x6f7   :  { %8342 = vmatmul.f32.vlgmr.msra.gmra.mxu1 %v14744_v10  ;;  %8221 = vmatpush.msra.mxu0 %v17915_v40 }
 0x6f8   :  { %8528 = vmatpush.msrb.mxu1 %v17877_v44  ;;  %8397 = vmatpush.msra.mxu2 %v17919_v51  ;;  %v17924_v51 = vld [vmem:[#allocation17_spill] sm:$0xff] }
 0x6f9   :  { %8438 = vmatpush.msra.mxu3 %v17920_v48  ;;  %8400 = vmatmul.f32.vlgmr.msra.gmra.mxu2 %v14750_v13  ;;  %v17925_v13 = vld [vmem:[#allocation146_spill] sm:$0xff] }
 0x6fa   :  { %8530 = vmatpush.msrb.mxu1 %v17881_v12  ;;  %8223 = vmatpush.msra.mxu0 %v17918_v18 }
 0x6fb   :  { %8440 = vmatpush.msra.mxu3 %v17921_v20  ;;  %8670 = vmatpush.msrb.mxu2 %v17922_v60 }
 0x6fc   :  { %8444 = vmatmul.f32.vlgmr.msra.gmra.mxu3 %v14756_v4  ;;  %8532 = vmatpush.msrb.mxu1 %v17885_v0  ;;  %v17926_v4 = vld [vmem:[#allocation39_spill] sm:$0xff] }
 0x6fd   :  { %8225 = vmatpush.msra.mxu0 %v17920_v48  ;;  %8723 = vmatpush.msrb.mxu3 %v17923_v22  ;;  %v17927_v22 = vld [vmem:[#allocation149_spill] sm:$0xff] }
 0x6fe   :  { %8534 = vmatpush.msrb.mxu1 %v17888_v61  ;;  %8672 = vmatpush.msrb.mxu2 %v17924_v51  ;;  %v17929_v61 = vld [vmem:[#allocation152_spill] sm:$0xff] }
 0x6ff   :  { %8227 = vmatpush.msra.mxu0 %v17921_v20  ;;  %8346 = vmatmul.f32.gmra.mxu1 %v14768_v24 }
 0x700   :  { %8233 = vmatmul.f32.vlgmr.msra.gmra.mxu0 %v14771_v33  ;;  %8536 = vmatpush.msrb.mxu1 %v17891_v41  ;;  %v17930_v33 = vld [vmem:[#allocation43_spill] sm:$0xff] }
 0x701   :  { %8457 = vmatpush.msrb.mxu0 %v17925_v13  ;;  %8405 = vmatmul.f32.gmra.mxu2 %v14779_v9  ;;  %v17931_v13 = vld [vmem:[#allocation19_spill] sm:$0xff] }
 0x702   :  { %8538 = vmatpush.msrb.mxu1 %v17894_v7  ;;  %8729 = vmatpush.msrb.mxu3 %v17926_v4  ;;  %v17932_v9 = vld [vmem:[#allocation155_spill] sm:$0xff] }
 0x703   :  { %8461 = vmatpush.msrb.mxu0 %v17927_v22  ;;  %8674 = vmatpush.msrb.mxu2 %v17928_v32  ;;  %v17933_v7 = vld [vmem:[#allocation47_spill] sm:$0xff] }
 0x704   :  { %8450 = vmatmul.f32.gmra.mxu3 %v14786_v17  ;;  %8540 = vmatpush.msrb.mxu1 %v17897_v53  ;;  %v17934_v4 = vld [vmem:[#allocation159_spill] sm:$0xff]  ;;  %v17935_v17 = vld [vmem:[#allocation50_spill] sm:$0xff] }
 0x705   :  { %8465 = vmatpush.msrb.mxu0 %v17929_v61  ;;  %8735 = vmatpush.msrb.mxu3 %v17930_v33  ;;  %v17936_v61 = vld [vmem:[#allocation20_spill] sm:$0xff]  ;;  %v17937_v33 = vld [vmem:[#allocation163_spill] sm:$0xff] }
 0x706   :  { %8542 = vmatpush.msrb.mxu1 %v17900_v59  ;;  %8676 = vmatpush.msrb.mxu2 %v17931_v13  ;;  %v17938_v22 = vld [vmem:[#allocation55_spill] sm:$0xff] }
 0x707   :  { %8469 = vmatpush.msrb.mxu0 %v17932_v9  ;;  %8741 = vmatpush.msrb.mxu3 %v17933_v7  ;;  %v17939_v9 = vld [vmem:[#allocation21_spill] sm:$0xff]  ;;  %v17940_v7 = vld [vmem:[#allocation168_spill] sm:$0xff] }
 0x708   :  { %8241 = vmatmul.f32.gmra.mxu0 %v14798_v39  ;;  %8544 = vmatpush.msrb.mxu1 %v17903_v52  ;;  %v17941_v39 = vld [vmem:[#allocation58_spill] sm:$0xff] }
 0x709   :  { %8473 = vmatpush.msrb.mxu0 %v17934_v4  ;;  %8747 = vmatpush.msrb.mxu3 %v17935_v17  ;;  %v17942_v4 = vld [vmem:[#allocation25_spill] sm:$0xff]  ;;  %v17943_v17 = vld [vmem:[#allocation172_spill] sm:$0xff]  ;;  %v17964_v52 = vld [vmem:[#allocation54_spill] sm:$0xff] }
 0x70a   :  { %8546 = vmatpush.msrb.mxu1 %v17906_v29  ;;  %8678 = vmatpush.msrb.mxu2 %v17936_v61  ;;  %v17944_v29 = vld [vmem:[#allocation63_spill] sm:$0xff] }
 0x70b   :  { %8477 = vmatpush.msrb.mxu0 %v17937_v33  ;;  %8753 = vmatpush.msrb.mxu3 %v17938_v22  ;;  %v17945_v33 = vld [vmem:[#allocation31_spill] sm:$0xff] }
 0x70c   :  { %8548 = vmatpush.msrb.mxu1 %v17909_v56  ;;  %8680 = vmatpush.msrb.mxu2 %v17939_v9  ;;  %v17946_v22 = vld [vmem:[#allocation175_spill] sm:$0xff] }
 0x70d   :  { %8481 = vmatpush.msrb.mxu0 %v17940_v7  ;;  %8759 = vmatpush.msrb.mxu3 %v17941_v39  ;;  %v17947_v56 = vld [vmem:[#allocation67_spill] sm:$0xff]  ;;  %v17948_v7 = vld [vmem:[#allocation33_spill] sm:$0xff] }
 0x70e   :  { %8550 = vmatpush.msrb.mxu1 %v17912_v34  ;;  %8682 = vmatpush.msrb.mxu2 %v17942_v4  ;;  %v17949_v39 = vld [vmem:[#allocation179_spill] sm:$0xff]  ;;  %v17950_v34 = vld [vmem:[#allocation72_spill] sm:$0xff] }
 0x70f   :  { %8485 = vmatpush.msrb.mxu0 %v17943_v17  ;;  %8765 = vmatpush.msrb.mxu3 %v17944_v29  ;;  %v17951_v17 = vld [vmem:[#allocation36_spill] sm:$0xff]  ;;  %v17952_v29 = vld [vmem:[#allocation185_spill] sm:$0xff] }
 0x710   :  { %8552 = vmatpush.msrb.mxu1 %v17915_v40  ;;  %8684 = vmatpush.msrb.mxu2 %v17945_v33  ;;  %v17953_v40 = vld [vmem:[#allocation75_spill] sm:$0xff] }
 0x711   :  { %8489 = vmatpush.msrb.mxu0 %v17946_v22  ;;  %8771 = vmatpush.msrb.mxu3 %v17947_v56  ;;  %v17954_v22 = vld [vmem:[#allocation44_spill] sm:$0xff]  ;;  %v17955_v56 = vld [vmem:[#allocation189_spill] sm:$0xff] }
 0x712   :  { %8554 = vmatpush.msrb.mxu1 %v17918_v18  ;;  %8686 = vmatpush.msrb.mxu2 %v17948_v7  ;;  %v17963_v18 = vld [vmem:[#allocation197_spill] sm:$0xff] }
 0x713   :  { %8493 = vmatpush.msrb.mxu0 %v17949_v39  ;;  %8777 = vmatpush.msrb.mxu3 %v17950_v34  ;;  %v17956_v39 = vld [vmem:[#allocation78_spill] sm:$0xff]  ;;  %v17957_v34 = vld [vmem:[#allocation191_spill] sm:$0xff] }
 0x714   :  { %8556 = vmatpush.msrb.mxu1 %v17920_v48  ;;  %8688 = vmatpush.msrb.mxu2 %v17951_v17  ;;  %v17958_v48 = vld [vmem:[#allocation46_spill] sm:$0xff] }
 0x715   :  { %8497 = vmatpush.msrb.mxu0 %v17952_v29  ;;  %8783 = vmatpush.msrb.mxu3 %v17953_v40  ;;  %v17959_v29 = vld [vmem:[#allocation82_spill] sm:$0xff] }
 0x716   :  { %8558 = vmatpush.msrb.mxu1 %v17921_v20  ;;  %8690 = vmatpush.msrb.mxu2 %v17954_v22  ;;  %v17960_v40 = vld [vmem:[#allocation194_spill] sm:$0xff]  ;;  %v17961_v20 = vld [vmem:[#allocation51_spill] sm:$0xff] }
 0x717   :  { %8501 = vmatpush.msrb.mxu0 %v17955_v56  ;;  %8560 = vmatmul.f32.vlgmr.msrb.gmra.mxu1 %v14744_v10  ;;  %v17962_v56 = vld [vmem:[#allocation84_spill] sm:$0xff] }
 0x718   :  { %8883 = vmatpush.msra.mxu1 %v17922_v60  ;;  %8789 = vmatpush.msrb.mxu3 %v17956_v39  ;;  %v17965_v39 = vld [vmem:[#allocation88_spill] sm:$0xff] }
 0x719   :  { %8505 = vmatpush.msrb.mxu0 %v17957_v34  ;;  %8692 = vmatpush.msrb.mxu2 %v17958_v48  ;;  %v17966_v34 = vld [vmem:[#allocation199_spill] sm:$0xff] }
 0x71a   :  { %8885 = vmatpush.msra.mxu1 %v17924_v51  ;;  %8795 = vmatpush.msrb.mxu3 %v17959_v29  ;;  %v17967_v29 = vld [vmem:[#allocation22_spill] sm:$0xff] }
 0x71b   :  { %8509 = vmatpush.msrb.mxu0 %v17960_v40  ;;  %8694 = vmatpush.msrb.mxu2 %v17961_v20  ;;  %v17968_v40 = vld [vmem:[#allocation92_spill] sm:$0xff] }
 0x71c   :  { %8887 = vmatpush.msra.mxu1 %v17928_v32  ;;  %8801 = vmatpush.msrb.mxu3 %v17962_v56  ;;  %v17969_v56 = vld [vmem:[#allocation23_spill] sm:$0xff] }
 0x71d   :  { %8513 = vmatpush.msrb.mxu0 %v17963_v18  ;;  %8696 = vmatpush.msrb.mxu2 %v17964_v52  ;;  %v17970_v18 = vld [vmem:[#allocation59_spill] sm:$0xff] }
 0x71e   :  { %8889 = vmatpush.msra.mxu1 %v17931_v13  ;;  %8807 = vmatpush.msrb.mxu3 %v17965_v39  ;;  %v17971_v39 = vld [vmem:[#allocation24_spill] sm:$0xff] }
 0x71f   :  { %8517 = vmatpush.msrb.mxu0 %v17966_v34  ;;  %8564 = vmatmul.f32.gmra.mxu1 %v14768_v24 }
 0x720   :  { %8519 = vmatmul.f32.vlgmr.msrb.gmra.mxu0 %v14744_v10  ;;  %8891 = vmatpush.msra.mxu1 %v17936_v61  ;;  %v17972_v10 = vld [vmem:[#allocation64_spill] sm:$0xff] }
 0x721   :  { %8825 = vmatpush.msra.mxu0 %v17967_v29  ;;  %8813 = vmatpush.msrb.mxu3 %v17968_v40  ;;  %v17973_v40 = vld [vmem:[#allocation26_spill] sm:$0xff]  ;;  %v17974_v29 = vld [vmem:[#allocation28_spill] sm:$0xff] }
 0x722   :  { %8893 = vmatpush.msra.mxu1 %v17939_v9  ;;  %8698 = vmatpush.msrb.mxu2 %v17970_v18 }
 0x723   :  { %9001 = vmatpush.msra.mxu3 %v17922_v60  ;;  %8828 = vmatpush.msra.mxu0 %v17969_v56  ;;  %v17975_v60 = vld [vmem:[#allocation27_spill] sm:$0xff]  ;;  %v17977_v56 = vld [vmem:[#allocation34_spill] sm:$0xff] }
 0x724   :  { %8895 = vmatpush.msra.mxu1 %v17942_v4  ;;  %8700 = vmatpush.msrb.mxu2 %v17972_v10 }
 0x725   :  { %9003 = vmatpush.msra.mxu3 %v17924_v51  ;;  %8831 = vmatpush.msra.mxu0 %v17971_v39  ;;  %v17976_v51 = vld [vmem:[#allocation29_spill] sm:$0xff] }
 0x726   :  { %8897 = vmatpush.msra.mxu1 %v17945_v33  ;;  %8930 = vmatpush.msra.mxu2 %v17974_v29  ;;  %v17979_v39 = vld [vmem:[#allocation37_spill] sm:$0xff]  ;;  %v17984_v29 = vld [vmem:[#allocation40_spill] sm:$0xff] }
 0x727   :  { %9005 = vmatpush.msra.mxu3 %v17928_v32  ;;  %8834 = vmatpush.msra.mxu0 %v17973_v40  ;;  %v17978_v32 = vld [vmem:[#allocation30_spill] sm:$0xff]  ;;  %v17982_v40 = vld [vmem:[#allocation35_spill] sm:$0xff] }
 0x728   :  { %8523 = vmatmul.f32.gmra.mxu0 %v14768_v24  ;;  %8899 = vmatpush.msra.mxu1 %v17948_v7  ;;  %v17980_v24 = vld [vmem:[#allocation32_spill] sm:$0xff] }
 0x729   :  { %8837 = vmatpush.msra.mxu0 %v17975_v60  ;;  %9007 = vmatpush.msra.mxu3 %v17931_v13  ;;  %v17981_v13 = vld [vmem:[#allocation41_spill] sm:$0xff]  ;;  %v17986_v60 = vld [vmem:[#allocation42_spill] sm:$0xff] }
 0x72a   :  { %8901 = vmatpush.msra.mxu1 %v17951_v17  ;;  %8934 = vmatpush.msra.mxu2 %v17976_v51  ;;  %v17988_v51 = vld [vmem:[#allocation48_spill] sm:$0xff] }
 0x72b   :  { %8840 = vmatpush.msra.mxu0 %v17977_v56  ;;  %9009 = vmatpush.msra.mxu3 %v17936_v61  ;;  %v17983_v61 = vld [vmem:[#allocation45_spill] sm:$0xff]  ;;  %v17990_v56 = vld [vmem:[#allocation87_spill] sm:$0xff] }
 0x72c   :  { %8903 = vmatpush.msra.mxu1 %v17954_v22  ;;  %8938 = vmatpush.msra.mxu2 %v17978_v32  ;;  %v17991_v32 = vld [vmem:[#allocation52_spill] sm:$0xff] }
 0x72d   :  { %8843 = vmatpush.msra.mxu0 %v17979_v39  ;;  %9011 = vmatpush.msra.mxu3 %v17939_v9  ;;  %v17985_v9 = vld [vmem:[#allocation49_spill] sm:$0xff]  ;;  %v17993_v39 = vld [vmem:[#allocation91_spill] sm:$0xff] }
 0x72e   :  { %8905 = vmatpush.msra.mxu1 %v17958_v48  ;;  %8942 = vmatpush.msra.mxu2 %v17980_v24  ;;  %v17994_v24 = vld [vmem:[#allocation56_spill] sm:$0xff] }
 0x72f   :  { %8846 = vmatpush.msra.mxu0 %v17981_v13  ;;  %9013 = vmatpush.msra.mxu3 %v17942_v4  ;;  %v17987_v4 = vld [vmem:[#allocation53_spill] sm:$0xff] }
 0x730   :  { %8907 = vmatpush.msra.mxu1 %v17961_v20  ;;  %8946 = vmatpush.msra.mxu2 %v17982_v40  ;;  %v17996_v13 = vld [vmem:[#allocation97_spill] sm:$0xff] }
 0x731   :  { %8849 = vmatpush.msra.mxu0 %v17983_v61  ;;  %9015 = vmatpush.msra.mxu3 %v17945_v33  ;;  %v17989_v33 = vld [vmem:[#allocation57_spill] sm:$0xff]  ;;  %v7490_v40 = vpop.f32.mrf.mxu0  ;;  %v17997_v61 = vld [vmem:[#allocation60_spill] sm:$0xff] }
 0x732   :  { %8909 = vmatpush.msra.mxu1 %v17964_v52  ;;  %8950 = vmatpush.msra.mxu2 %v17984_v29  ;;  %v17999_v29 = vld [vmem:[#allocation100_spill] sm:$0xff] }
 0x733   :  { %8852 = vmatpush.msra.mxu0 %v17985_v9  ;;  %9017 = vmatpush.msra.mxu3 %v17948_v7  ;;  %v17992_v7 = vld [vmem:[#allocation61_spill] sm:$0xff] }
 0x734   :  { %8911 = vmatpush.msra.mxu1 %v17970_v18  ;;  %8954 = vmatpush.msra.mxu2 %v17986_v60  ;;  %v18000_v9 = vld [vmem:[#allocation65_spill] sm:$0xff]  ;;  %v18002_v60 = vld [vmem:[#allocation104_spill] sm:$0xff] }
 0x735   :  { %8855 = vmatpush.msra.mxu0 %v17987_v4  ;;  %9019 = vmatpush.msra.mxu3 %v17951_v17  ;;  %v17995_v17 = vld [vmem:[#allocation62_spill] sm:$0xff]  ;;  %v18003_v4 = vld [vmem:[#allocation112_spill] sm:$0xff] }
 0x736   :  { %8913 = vmatpush.msra.mxu1 %v17972_v10  ;;  %8958 = vmatpush.msra.mxu2 %v17988_v51  ;;  %v7599_v51 = vpop.f32.mrf.mxu1 }
 0x737   :  { %8858 = vmatpush.msra.mxu0 %v17989_v33  ;;  %9021 = vmatpush.msra.mxu3 %v17954_v22  ;;  %v17998_v22 = vld [vmem:[#allocation69_spill] sm:$0xff]  ;;  %v18006_v33 = vld [vmem:[#allocation70_spill] sm:$0xff] }
 0x738   :  { %9095 = vmatpush.msrb.mxu1 %v17990_v56  ;;  %8962 = vmatpush.msra.mxu2 %v17991_v32  ;;  %v18007_v56 = vld [vmem:[#allocation118_spill] sm:$0xff]  ;;  %v18008_v32 = vld [vmem:[#allocation76_spill] sm:$0xff] }
 0x739   :  { %8861 = vmatpush.msra.mxu0 %v17992_v7  ;;  %9023 = vmatpush.msra.mxu3 %v17958_v48  ;;  %v18001_v48 = vld [vmem:[#allocation73_spill] sm:$0xff] }
 0x73a   :  { %9101 = vmatpush.msrb.mxu1 %v17993_v39  ;;  %8966 = vmatpush.msra.mxu2 %v17994_v24  ;;  %v18009_v39 = vld [vmem:[#allocation122_spill] sm:$0xff]  ;;  %v18010_v24 = vld [vmem:[#allocation79_spill] sm:$0xff] }
 0x73b   :  { %8864 = vmatpush.msra.mxu0 %v17995_v17  ;;  %9025 = vmatpush.msra.mxu3 %v17961_v20  ;;  %v18004_v20 = vld [vmem:[#allocation68_spill] sm:$0xff]  ;;  %v7498_v7 = vpop.f32.mrf.mxu0  ;;  %v7701_v17 = vpop.f32.mrf.mxu3 }
 0x73c   :  { %9107 = vmatpush.msrb.mxu1 %v17996_v13  ;;  %8970 = vmatpush.msra.mxu2 %v17997_v61  ;;  %v18012_v13 = vld [vmem:[#allocation130_spill] sm:$0xff] }
 0x73d   :  { %8867 = vmatpush.msra.mxu0 %v17998_v22  ;;  %9027 = vmatpush.msra.mxu3 %v17964_v52  ;;  %v18005_v52 = vld [vmem:[#allocation116_spill] sm:$0xff]  ;;  %v18013_v22 = vld [vmem:[#allocation133_spill] sm:$0xff] }
 0x73e   :  { %9113 = vmatpush.msrb.mxu1 %v17999_v29  ;;  %8974 = vmatpush.msra.mxu2 %v18000_v9  ;;  %v7603_v61 = vpop.f32.mrf.mxu1  ;;  %v18014_v29 = vld [vmem:[#allocation135_spill] sm:$0xff] }
 0x73f   :  { %8870 = vmatpush.msra.mxu0 %v18001_v48  ;;  %9029 = vmatpush.msra.mxu3 %v17970_v18  ;;  %v7657_v18 = vpop.f32.mrf.mxu2  ;;  %v7604_v53 = vadd.f32 %v7603_v61, %v7498_v7  ;;  %v7444_v7 = vld [vmem:[#allocation3 + $0x9c] sm:$0xff] }
 0x740   :  { %9119 = vmatpush.msrb.mxu1 %v18002_v60  ;;  %8978 = vmatpush.msra.mxu2 %v18004_v20  ;;  %v18015_v60 = vld [vmem:[#allocation137_spill] sm:$0xff] }
 0x741   :  { %9042 = vmatpush.msrb.mxu0 %v11705_v25  ;;  %9031 = vmatpush.msra.mxu3 %v17972_v10  ;;  %v18011_v10 = vld [vmem:[#allocation125_spill] sm:$0xff] }
 0x742   :  { %9125 = vmatpush.msrb.mxu1 %v18003_v4  ;;  %8982 = vmatpush.msra.mxu2 %v18006_v33  ;;  %v18016_v4 = vld [vmem:[#allocation138_spill] sm:$0xff] }
 0x743   :  { %9044 = vmatpush.msrb.mxu0 %v11712_v30  ;;  %v7707_v20 = vpop.f32.mrf.mxu3 }
 0x744   :  { %9131 = vmatpush.msrb.mxu1 %v18005_v52  ;;  %8986 = vmatpush.msra.mxu2 %v18008_v32  ;;  %v18017_v52 = vld [vmem:[#allocation139_spill] sm:$0xff] }
 0x745   :  { %9046 = vmatpush.msrb.mxu0 %v11759_v28  ;;  %v7776_v48 = vpop.f32.mrf.mxu0 }
 0x746   :  { %9137 = vmatpush.msrb.mxu1 %v18007_v56  ;;  %8990 = vmatpush.msra.mxu2 %v18010_v24  ;;  %v7817_v33 = vpop.f32.mrf.mxu1 }
 0x747   :  { %9048 = vmatpush.msrb.mxu0 %v11775_v31  ;;  %v7662_v9 = vpop.f32.mrf.mxu2 }
 0x748   :  { %9143 = vmatpush.msrb.mxu1 %v18009_v39 }
 0x749   :  { %9050 = vmatpush.msrb.mxu0 %v16958_v42 }
 0x74a   :  { %9149 = vmatpush.msrb.mxu1 %v18011_v10 }
 0x74b   :  { %9052 = vmatpush.msrb.mxu0 %v16961_v5  ;;  %v7971_v39 = vpop.f32.mrf.mxu3 }
 0x74c   :  { %9155 = vmatpush.msrb.mxu1 %v18012_v13 }
 0x74d   :  { %9054 = vmatpush.msrb.mxu0 %v16964_v57 }
 0x74e   :  { %9161 = vmatpush.msrb.mxu1 %v18013_v22  ;;  %v7821_v24 = vpop.f32.mrf.mxu1  ;;  %v7600_v22 = vadd.f32 %v7599_v51, %v7490_v40 }
 0x74f   :  { %9056 = vmatpush.msrb.mxu0 %v16967_v36  ;;  %v7862_v56 = vpop.f32.mrf.mxu2  ;;  %v7780_v32 = vpop.f32.mrf.mxu0 }
 0x750   :  { %9167 = vmatpush.msrb.mxu1 %v18014_v29  ;;  %v7972_v29 = vadd.f32 %v7971_v39, %v7862_v56 }
 0x751   :  { %9058 = vmatpush.msrb.mxu0 %v16970_v3 }
 0x752   :  { %9173 = vmatpush.msrb.mxu1 %v18015_v60 }
 0x753   :  { %9060 = vmatpush.msrb.mxu0 %v16973_v14  ;;  %v7975_v60 = vpop.f32.mrf.mxu3 }
 0x754   :  { %9179 = vmatpush.msrb.mxu1 %v18016_v4  ;;  %v7658_v4 = vadd.f32 %v7657_v18, %v7600_v22 }
 0x755   :  { %9062 = vmatpush.msrb.mxu0 %v17852_v23 }
 0x756   :  { %9185 = vmatpush.msrb.mxu1 %v18017_v52  ;;  %v8073_v34 = vpop.f32.mrf.mxu1  ;;  %v7702_v59 = vadd.f32 %v7701_v17, %v7658_v4 }
 0x757   :  { %9064 = vmatpush.msrb.mxu0 %v17855_v37  ;;  %v7870_v10 = vpop.f32.mrf.mxu2 }
 0x758   :  { %v7777_v44 = vadd.f32 %v7776_v48, %v7702_v59  ;;  %v7449_v59 = vunpack.c.l.bf16 %v7444_v7 }
 0x759   :  { %9066 = vmatpush.msrb.mxu0 %v17858_v21  ;;  %v7663_v21 = vadd.f32 %v7662_v9, %v7604_v53 }
 0x75a   :  { %v7818_v62 = vadd.f32 %v7817_v33, %v7777_v44 }
 0x75b   :  { %9068 = vmatpush.msrb.mxu0 %v17861_v45  ;;  %v7976_v45 = vadd.f32 %v7975_v60, %v7870_v10  ;;  %v7708_v51 = vadd.f32 %v7707_v20, %v7663_v21 }
 0x75c   :  { %v8029_v13 = vpop.f32.mrf.mxu0 }
 0x75d   :  { %9070 = vmatpush.msrb.mxu0 %v17864_v8  ;;  %v8030_v52 = vadd.f32 %v8029_v13, %v7972_v29  ;;  %v7442_v8 = vld [vmem:[#allocation3 + $0x90] sm:$0xff]  ;;  %v8189_v58 = vpop.f32.mrf.mxu3  ;;  %v7781_v13 = vadd.f32 %v7780_v32, %v7708_v51 }
 0x75e   :  { %v7446_v23 = vunpack.c.l.bf16 %v7442_v8  ;;  %v8079_v40 = vpop.f32.mrf.mxu1  ;;  %v7447_v56 = vunpack.c.h.bf16 %v7442_v8 }
 0x75f   :  { %9072 = vmatpush.msrb.mxu0 %v17867_v26  ;;  %v8074_v41 = vadd.f32 %v8073_v34, %v8030_v52  ;;  %v8148_v0 = vpop.f32.mrf.mxu2  ;;  %v7822_v48 = vadd.f32 %v7821_v24, %v7781_v13 }
 0x760   :  { %v8568_v17 = vadd.f32 %v7818_v62, %v7446_v23 }
 0x761   :  { %v8149_v37 = vadd.f32 %v8148_v0, %v8074_v41  ;;  %v8571_v0 = vadd.f32 %v7822_v48, %v7449_v59 }
 0x762   :  { %v11147_v10 = vmul.f32 -1.442695, %v8568_v17 }
 0x763   :  { %v8190_v18 = vadd.f32 %v8189_v58, %v8149_v37  ;;  %v11148_v8 = vmul.f32 -1.442695, %v8571_v0 }
 0x764   :  { %11322 = vpow2.f32 %v11147_v10 }
 0x765   :  { %v8034_v12 = vpop.f32.mrf.mxu0  ;;  %v8569_v61 = vadd.f32 %v8190_v18, %v7447_v56 }
 0x766   :  { %v8035_v26 = vadd.f32 %v8034_v12, %v7976_v45  ;;  %v7450_v45 = vunpack.c.h.bf16 %v7444_v7 }
 0x767   :  { %v8152_v34 = vpop.f32.mrf.mxu2  ;;  %v8193_v53 = vpop.f32.mrf.mxu3  ;;  %v11149_v41 = vmul.f32 -1.442695, %v8569_v61  ;;  %v7443_v61 = vld [vmem:[#allocation3 + $0x98] sm:$0xf] }
 0x768   :  { %v8080_v39 = vadd.f32 %v8079_v40, %v8035_v26 }
 0x769   :  { %11324 = vpow2.f32 %v11149_v41 }
 0x76a   :  { %v8153_v22 = vadd.f32 %v8152_v34, %v8080_v39  ;;  %v11323_v58 = vpop.eup %11322  ;;  %11326 = vpow2.f32 %v11148_v8 }
 0x76b   :  { %v15099_v23 = vadd.f32 1.0, %v11323_v58 }
 0x76c   :  { %v8194_v12 = vadd.f32 %v8193_v53, %v8153_v22 }
 0x76d   :  { %vm8587_vm1 = vweird.f32 %v15099_v23 }
 0x76e   :  { %v8572_v21 = vadd.f32 %v8194_v12, %v7450_v45  ;;  %v7448_v12 = vunpack.c.l.bf16 %v7443_v61 }
 0x76f   :  { %v11325_v26 = vpop.eup %11324 }
 0x770   :  { %v11150_v37 = vmul.f32 -1.442695, %v8572_v21  ;;  %v15101_v62 = vadd.f32 1.0, %v11325_v26  ;;  %v11327_v20 = vpop.eup %11326 }
 0x771   :  { %v15105_v32 = vadd.f32 1.0, %v11327_v20 }
 0x772   :  { %11328 = vpow2.f32 %v11150_v37  ;;  %vm8625_vm4 = vweird.f32 %v15101_v62 }
 0x773   :  { %11330 = vrcp.f32 %v15099_v23  ;;  %vm8602_vm7 = vweird.f32 %v15105_v32 }
 0x774   :  { %v8343_v44 = vpop.f32.mrf.mxu1  ;;  %11332 = vrcp.f32 %v15101_v62 }
 0x775   :  { %11334 = vrcp.f32 %v15105_v32 }
 0x778   :  { %v11329_v33 = vpop.eup %11328 }
 0x779   :  { %v11331_v24 = vpop.eup %11330  ;;  %v15107_v29 = vadd.f32 1.0, %v11329_v33  ;;  %v8593_v33 = vand.u32 2147483648, %v15099_v23 }
 0x77a   :  { %v15109_v60 = vpop.eup %11332  ;;  %v8583_v40 = vmul.f32 %v11331_v24, %v15099_v23  ;;  %vm8588_vm0 = vweird.f32 %v11331_v24 }
 0x77b   :  { %11336 = vrcp.f32 %v15107_v29  ;;  %v8621_v18 = vmul.f32 %v15109_v60, %v15101_v62  ;;  %v15116_v7 = vpop.eup %11334  ;;  %vm8626_vm2 = vweird.f32 %v15109_v60  ;;  %vm15131_vm3 = vmor %vm8587_vm1, %vm8588_vm0  ;;  %vm8640_vm12 = vweird.f32 %v15107_v29 }
 0x77c   :  { %v8347_v52 = vpop.f32.mrf.mxu1  ;;  %v8401_v51 = vpop.f32.mrf.mxu2  ;;  %v8584_v13 = vsub.f32 1.0, %v8583_v40  ;;  %v8598_v10 = vmul.f32 %v15116_v7, %v15105_v32  ;;  %v8591_v40 = vand.u32 2147483647, %v15099_v23  ;;  %vm15140_vm5 = vmor %vm8625_vm4, %vm8626_vm2  ;;  %vm8603_vm8 = vweird.f32 %v15116_v7 }
 0x77d   :  { %v8234_v9 = vpop.f32.mrf.mxu0  ;;  %v8622_v34 = vsub.f32 1.0, %v8621_v18  ;;  %v8631_v18 = vand.u32 2147483648, %v15101_v62  ;;  %vm8604_vm11 = vmor %vm8602_vm7, %vm8603_vm8 }
 0x77e   :  { %v8344_v4 = vadd.f32 %v8343_v44, %v8234_v9  ;;  %v8585_v45 = vmul.f32 %v11331_v24, %v8584_v13  ;;  %v8599_v44 = vsub.f32 1.0, %v8598_v10  ;;  %vm8592_vm6 = vcmp.eq.f32.partialorder %v8591_v40, 8.507059e+37 }
 0x77f   :  { %v8445_v17 = vpop.f32.mrf.mxu3  ;;  %v8623_v21 = vmul.f32 %v15109_v60, %v8622_v34  ;;  %v8629_v34 = vand.u32 2147483647, %v15101_v62  ;;  %v8644_v40 = vand.u32 2147483647, %v15107_v29 }
 0x780   :  { %v8402_v39 = vadd.f32 %v8401_v51, %v8344_v4  ;;  %v8586_v9 = vadd.f32 %v11331_v24, %v8585_v45 }
 0x781   :  { %v15118_v22 = vpop.eup %11336  ;;  %v8624_v51 = vadd.f32 %v15109_v60, %v8623_v21  ;;  %vm8630_vm9 = vcmp.eq.f32.partialorder %v8629_v34, 8.507059e+37  ;;  %vm8645_vm15 = vcmp.eq.f32.partialorder %v8644_v40, 8.507059e+37  ;;  %v18065_v40 = vld [vmem:[#allocation187_spill] sm:$0xff] }
 0x782   :  { %v8446_v59 = vadd.f32 %v8445_v17, %v8402_v39  ;;  %v8636_v8 = vmul.f32 %v15118_v22, %v15107_v29  ;;  %v8600_v17 = vmul.f32 %v15116_v7, %v8599_v44  ;;  %v8590_v23 = vsel %vm15131_vm3, %v11331_v24, %v8586_v9 }
 0x783   :  { %v8628_v45 = vsel %vm15140_vm5, %v15109_v60, %v8624_v51  ;;  %v8632_v24 = vor.u32 1.1754944e-38, %v8631_v18  ;;  %v8606_v44 = vand.u32 2147483647, %v15105_v32  ;;  %vm8641_vm10 = vweird.f32 %v15118_v22 }
 0x784   :  { %v8406_v58 = vpop.f32.mrf.mxu2  ;;  %v8637_v4 = vsub.f32 1.0, %v8636_v8  ;;  %v8601_v62 = vadd.f32 %v15116_v7, %v8600_v17  ;;  %vm8642_vm13 = vmor %vm8640_vm12, %vm8641_vm10 }
 0x785   :  { %v8242_v56 = vpop.f32.mrf.mxu0  ;;  %vm8607_vm14 = vcmp.eq.f32.partialorder %v8606_v44, 8.507059e+37  ;;  %v18059_v44 = vld [vmem:[#allocation180_spill] sm:$0xff] }
 0x786   :  { %v8348_v48 = vadd.f32 %v8347_v52, %v8242_v56  ;;  %v7445_v56 = vld [vmem:[#allocation3 + $0xa4] sm:$0xf] }
 0x787   :  { %v8451_v52 = vpop.f32.mrf.mxu3  ;;  %v7451_v10 = vunpack.c.l.bf16 %v7445_v56 }
 0x788   :  { %v8407_v37 = vadd.f32 %v8406_v58, %v8348_v48  ;;  %v8608_v58 = vand.u32 2147483648, %v15105_v32  ;;  %v18045_v48 = vld [vmem:[#allocation164_spill] sm:$0xff] }
 0x78a   :  { %v8452_v39 = vadd.f32 %v8451_v52, %v8407_v37  ;;  %v8633_v37 = vsel %vm8630_vm9, %v8632_v24, %v8628_v45  ;;  %v8605_v52 = vsel %vm8604_vm11, %v15116_v7, %v8601_v62  ;;  %v8609_v51 = vor.u32 1.1754944e-38, %v8608_v58  ;;  %v18049_v45 = vld [vmem:[#allocation167_spill] sm:$0xff]  ;;  %v18052_v24 = vld [vmem:[#allocation132_spill] sm:$0xff]  ;;  %v18054_v62 = vld [vmem:[#allocation150_spill] sm:$0xff] }
 0x78b   :  { %v18056_v58 = vld [vmem:[#allocation176_spill] sm:$0xff] }
 0x78c   :  { %v8610_v56 = vsel %vm8607_vm14, %v8609_v51, %v8605_v52  ;;  %v9899_v52 = vld [vmem:[#allocation8 + $0x1f0] sm:$0xff]  ;;  %v18066_v51 = vld [vmem:[#allocation165_spill] sm:$0xff] }
 0x794   :  { %v8561_v53 = vpop.f32.mrf.mxu1 }
 0x79d   :  { %v8520_v41 = vpop.f32.mrf.mxu0 }
 0x79e   :  { %v8521_v0 = vadd.f32 %v8520_v41, %v8446_v59  ;;  %v8594_v59 = vor.u32 1.1754944e-38, %v8593_v33  ;;  %v8638_v41 = vmul.f32 %v15118_v22, %v8637_v4  ;;  %v8646_v33 = vand.u32 2147483648, %v15107_v29 }
 0x79f   :  { %v8653_v29 = vmul.f32 %v8610_v56, %v14760_v27  ;;  %v9898_v56 = vld [vmem:[#allocation8 + $0x1d0] sm:$0xff] }
 0x7a0   :  { %v8562_v26 = vadd.f32 %v8561_v53, %v8521_v0  ;;  %v8595_v0 = vsel %vm8592_vm6, %v8594_v59, %v8590_v23  ;;  %v8647_v18 = vor.u32 1.1754944e-38, %v8646_v33  ;;  %v18044_v59 = vld [vmem:[#allocation127_spill] sm:$0xff]  ;;  %v18063_v33 = vld [vmem:[#allocation162_spill] sm:$0xff] }
 0x7a1   :  { %v8652_v60 = vmul.f32 %v8595_v0, %v14738_v63  ;;  %v18051_v0 = vld [vmem:[#allocation141_spill] sm:$0xff] }
 0x7a2   :  { %v8570_v20 = vadd.f32 %v8562_v26, %v7448_v12  ;;  %v8565_v12 = vpop.f32.mrf.mxu1 }
 0x7a4   :  { %11338 = vtanh.f32 %v8570_v20  ;;  %v8639_v20 = vadd.f32 %v15118_v22, %v8638_v41  ;;  %v18048_v41 = vld [vmem:[#allocation129_spill] sm:$0xff] }
 0x7a5   :  { %v8524_v61 = vpop.f32.mrf.mxu0 }
 0x7a6   :  { %v8525_v53 = vadd.f32 %v8524_v61, %v8452_v39  ;;  %v8643_v63 = vsel %vm8642_vm13, %v15118_v22, %v8639_v20  ;;  %v18062_v20 = vld [vmem:[#allocation183_spill] sm:$0xff] }
 0x7a7   :  { %v8648_v17 = vsel %vm8645_vm15, %v8647_v18, %v8643_v63  ;;  %v18067_v63 = vld [vmem:[#allocation154_spill] sm:$0xff]  ;;  %v18068_v18 = vld [vmem:[#allocation193_spill] sm:$0xff] }
 0x7a8   :  { %v8566_v21 = vadd.f32 %v8565_v12, %v8525_v53  ;;  %v18047_v53 = vld [vmem:[#allocation140_spill] sm:$0xff] }
 0x7a9   :  { %v18050_v12 = vld [vmem:[#allocation148_spill] sm:$0xff] }
 0x7aa   :  { %v11339_v8 = vpop.eup %11338  ;;  %v8573_v26 = vadd.f32 %v8566_v21, %v7451_v10  ;;  %v18046_v10 = vld [vmem:[#allocation145_spill] sm:$0xff]  ;;  %v18053_v21 = vld [vmem:[#allocation170_spill] sm:$0xff] }
 0x7ab   :  { %v8654_v9 = vmul.f32 %v11339_v8, %v8633_v37  ;;  %v18055_v8 = vld [vmem:[#allocation143_spill] sm:$0xff]  ;;  %v18057_v37 = vld [vmem:[#allocation153_spill] sm:$0xff] }
 0x7ac   :  { %11340 = vtanh.f32 %v8573_v26  ;;  %v18058_v26 = vld [vmem:[#allocation144_spill] sm:$0xff] }
 0x7ad   :  { %v8656_v4 = vsub.f32 %v8652_v60, %v8654_v9  ;;  %v18060_v60 = vld [vmem:[#allocation157_spill] sm:$0xff]  ;;  %v18061_v9 = vld [vmem:[#allocation147_spill] sm:$0xff] }
 0x7af   :  { %v15160_v32 = vand.u32 4294901760, %v8656_v4 }
 0x7b1   :  { %v15164_v39 = vsub.f32 %v8656_v4, %v15160_v32  ;;  %8815 = vmatmul.f32.vlgmr.msrb.gmra.mxu3 %v15160_v32  ;;  %v18064_v4 = vld [vmem:[#allocation151_spill] sm:$0xff] }
 0x7b2   :  { %v11341_v13 = vpop.eup %11340  ;;  %9255 = vmatpush.msrb.mxu3 %v11705_v25 }
 0x7b3   :  { %v8655_v7 = vmul.f32 %v11341_v13, %v8648_v17  ;;  %8873 = vmatmul.f32.vlgmr.msra.gmra.mxu0 %v15164_v39  ;;  %v15171_v23 = vand.u32 4294901760, %v15164_v39  ;;  %v15305_v13 = vand.u32 4294901760, %v9899_v52  ;;  %v18069_v17 = vld [vmem:[#allocation169_spill] sm:$0xff] }
 0x7b4   :  { %9257 = vmatpush.msrb.mxu3 %v11712_v30  ;;  %9302 = vmatpush.msra.mxu0 %v17005_v47 }
 0x7b5   :  { %v8657_v22 = vsub.f32 %v8653_v29, %v8655_v7  ;;  %8917 = vmatmul.f32.vlgmr.msra.gmra.mxu1 %v15171_v23  ;;  %v8704_v34 = vsub.f32 %v15164_v39, %v15171_v23  ;;  %v18070_v29 = vld [vmem:[#allocation158_spill] sm:$0xff]  ;;  %v18071_v7 = vld [vmem:[#allocation196_spill] sm:$0xff] }
 0x7b6   :  { %9259 = vmatpush.msrb.mxu3 %v11759_v28  ;;  %9306 = vmatpush.msra.mxu0 %v17006_v46 }
 0x7b7   :  { %v15180_v27 = vand.u32 4294901760, %v8657_v22  ;;  %9373 = vmatpush.msra.mxu1 %v11705_v25  ;;  %v15183_v61 = vand.u32 4294901760, %v8704_v34  ;;  %v18072_v34 = vld [vmem:[#allocation173_spill] sm:$0xff] }
 0x7b8   :  { %9261 = vmatpush.msrb.mxu3 %v11775_v31  ;;  %9310 = vmatpush.msra.mxu0 %v17007_v16  ;;  %v18028_v16 = vld [vmem:[#allocation115_spill] sm:$0xff] }
 0x7b9   :  { %v15188_v47 = vsub.f32 %v8657_v22, %v15180_v27  ;;  %9375 = vmatpush.msra.mxu1 %v11712_v30  ;;  %8706 = vmatmul.f32.vlgmr.msrb.gmra.mxu2 %v15183_v61  ;;  %v15311_v22 = vand.u32 4294901760, %v9898_v56 }
 0x7ba   :  { %8819 = vmatmul.f32.gmra.mxu3 %v15180_v27  ;;  %9197 = vmatpush.msrb.mxu2 %v17008_v49  ;;  %v18029_v49 = vld [vmem:[#allocation123_spill] sm:$0xff] }
 0x7bb   :  { %9263 = vmatpush.msrb.mxu3 %v16958_v42  ;;  %9314 = vmatpush.msra.mxu0 %v17009_v35  ;;  %v15197_v25 = vand.u32 4294901760, %v15188_v47  ;;  %v18031_v35 = vld [vmem:[#allocation120_spill] sm:$0xff] }
 0x7bc   :  { %9377 = vmatpush.msra.mxu1 %v11759_v28  ;;  %8878 = vmatmul.f32.gmra.mxu0 %v15188_v47  ;;  %v18022_v28 = vld [vmem:[#allocation108_spill] sm:$0xff] }
 0x7bd   :  { %9200 = vmatpush.msrb.mxu2 %v17010_v55  ;;  %9265 = vmatpush.msrb.mxu3 %v16961_v5  ;;  %v8712_v30 = vsub.f32 %v15188_v47, %v15197_v25  ;;  %v18032_v55 = vld [vmem:[#allocation126_spill] sm:$0xff] }
 0x7be   :  { %9318 = vmatpush.msra.mxu0 %v17011_v11  ;;  %9379 = vmatpush.msra.mxu1 %v11775_v31  ;;  %v18023_v31 = vld [vmem:[#allocation113_spill] sm:$0xff]  ;;  %v18034_v11 = vld [vmem:[#allocation124_spill] sm:$0xff] }
 0x7bf   :  { %8923 = vmatmul.f32.gmra.mxu1 %v15197_v25  ;;  %9203 = vmatpush.msrb.mxu2 %v17012_v54  ;;  %v15209_v46 = vand.u32 4294901760, %v8712_v30  ;;  %v18035_v54 = vld [vmem:[#allocation131_spill] sm:$0xff]  ;;  %v18073_v30 = vld [vmem:[#allocation161_spill] sm:$0xff] }
 0x7c0   :  { %9267 = vmatpush.msrb.mxu3 %v16964_v57  ;;  %9322 = vmatpush.msra.mxu0 %v17013_v43  ;;  %v18036_v43 = vld [vmem:[#allocation117_spill] sm:$0xff] }
 0x7c1   :  { %9381 = vmatpush.msra.mxu1 %v16958_v42  ;;  %9206 = vmatpush.msrb.mxu2 %v17014_v2  ;;  %v18026_v42 = vld [vmem:[#allocation119_spill] sm:$0xff]  ;;  %v18037_v2 = vld [vmem:[#allocation128_spill] sm:$0xff] }
 0x7c2   :  { %9269 = vmatpush.msrb.mxu3 %v16967_v36  ;;  %9326 = vmatpush.msra.mxu0 %v17015_v50  ;;  %v18038_v50 = vld [vmem:[#allocation134_spill] sm:$0xff] }
 0x7c3   :  { %9383 = vmatpush.msra.mxu1 %v16961_v5  ;;  %8714 = vmatmul.f32.gmra.mxu2 %v15209_v46  ;;  %v18025_v5 = vld [vmem:[#allocation111_spill] sm:$0xff] }
 0x7c4   :  { %9033 = vmatmul.f32.vlgmr.msra.gmra.mxu3 %v15160_v32  ;;  %9209 = vmatpush.msrb.mxu2 %v17016_v19  ;;  %v18039_v19 = vld [vmem:[#allocation156_spill] sm:$0xff] }
 0x7c5   :  { %9271 = vmatpush.msrb.mxu3 %v16970_v3  ;;  %9330 = vmatpush.msra.mxu0 %v17017_v6  ;;  %v18040_v6 = vld [vmem:[#allocation121_spill] sm:$0xff] }
 0x7c6   :  { %9385 = vmatpush.msra.mxu1 %v16964_v57  ;;  %9078 = vmatmul.f32.vlgmr.msrb.gmra.mxu0 %v15183_v61  ;;  %v18024_v57 = vld [vmem:[#allocation102_spill] sm:$0xff] }
 0x7c7   :  { %9212 = vmatpush.msrb.mxu2 %v17018_v1  ;;  %9273 = vmatpush.msrb.mxu3 %v16973_v14  ;;  %v18041_v1 = vld [vmem:[#allocation136_spill] sm:$0xff] }
 0x7c8   :  { %9334 = vmatpush.msra.mxu0 %v17019_v15  ;;  %9387 = vmatpush.msra.mxu1 %v16967_v36  ;;  %v18027_v36 = vld [vmem:[#allocation106_spill] sm:$0xff]  ;;  %v18042_v15 = vld [vmem:[#allocation160_spill] sm:$0xff] }
 0x7c9   :  { %9187 = vmatmul.f32.vlgmr.msrb.gmra.mxu1 %v15160_v32  ;;  %9215 = vmatpush.msrb.mxu2 %v17020_v38  ;;  %v18043_v38 = vld [vmem:[#allocation142_spill] sm:$0xff] }
 0x7ca   :  { %9275 = vmatpush.msrb.mxu3 %v18022_v28  ;;  %9338 = vmatpush.msra.mxu0 %v18023_v31  ;;  %v18074_v31 = vld [vmem:[#allocation198_spill] sm:$0xff] }
 0x7cb   :  { %9389 = vmatpush.msra.mxu1 %v16970_v3  ;;  %9218 = vmatpush.msrb.mxu2 %v18024_v57  ;;  %v18030_v3 = vld [vmem:[#allocation109_spill] sm:$0xff]  ;;  %v15318_v57 = vsub.f32 %v9899_v52, %v15305_v13  ;;  %v18090_v52 = vld [vmem:[#allocation184_spill] sm:$0xff] }
 0x7cc   :  { %9277 = vmatpush.msrb.mxu3 %v18025_v5  ;;  %9342 = vmatpush.msra.mxu0 %v18026_v42  ;;  %v18076_v42 = vld [vmem:[#allocation166_spill] sm:$0xff] }
 0x7cd   :  { %9391 = vmatpush.msra.mxu1 %v16973_v14  ;;  %8992 = vmatmul.f32.vlgmr.msra.gmra.mxu2 %v15160_v32  ;;  %v18033_v14 = vld [vmem:[#allocation114_spill] sm:$0xff] }
 0x7ce   :  { %9037 = vmatmul.f32.gmra.mxu3 %v15180_v27  ;;  %9221 = vmatpush.msrb.mxu2 %v18027_v36  ;;  %v9896_v36 = vld [vmem:[#allocation8 + $0x190] sm:$0xff] }
 0x7cf   :  { %9279 = vmatpush.msrb.mxu3 %v18028_v16  ;;  %9346 = vmatpush.msra.mxu0 %v18029_v49 }
 0x7d0   :  { %9393 = vmatpush.msra.mxu1 %v18022_v28  ;;  %9086 = vmatmul.f32.gmra.mxu0 %v15209_v46  ;;  %v9897_v28 = vld [vmem:[#allocation8 + $0x1b0] sm:$0xff] }
 0x7d1   :  { %9224 = vmatpush.msrb.mxu2 %v18030_v3  ;;  %9281 = vmatpush.msrb.mxu3 %v18031_v35  ;;  %v15324_v49 = vand.u32 4294901760, %v9897_v28  ;;  %v15327_v3 = vsub.f32 %v9898_v56, %v15311_v22 }
 0x7d2   :  { %9350 = vmatpush.msra.mxu0 %v18032_v55  ;;  %9395 = vmatpush.msra.mxu1 %v18025_v5  ;;  %v18075_v5 = vld [vmem:[#allocation178_spill] sm:$0xff]  ;;  %v18079_v55 = vld [vmem:[#allocation171_spill] sm:$0xff] }
 0x7d3   :  { %9191 = vmatmul.f32.gmra.mxu1 %v15180_v27  ;;  %9227 = vmatpush.msrb.mxu2 %v18033_v14  ;;  %v9895_v14 = vld [vmem:[#allocation8 + $0x170] sm:$0xff] }
 0x7d4   :  { %9283 = vmatpush.msrb.mxu3 %v18034_v11  ;;  %9354 = vmatpush.msra.mxu0 %v18035_v54  ;;  %v9951_v54 = vand.u32 4294901760, %v15318_v57 }
 0x7d5   :  { %9397 = vmatpush.msra.mxu1 %v18028_v16  ;;  %9230 = vmatpush.msrb.mxu2 %v18036_v43  ;;  %v18077_v16 = vld [vmem:[#allocation200_spill] sm:$0xff]  ;;  %v15334_v43 = vand.u32 4294901760, %v9896_v36 }
 0x7d6   :  { %9285 = vmatpush.msrb.mxu3 %v18037_v2  ;;  %9358 = vmatpush.msra.mxu0 %v18038_v50  ;;  %v18082_v50 = vld [vmem:[#allocation174_spill] sm:$0xff] }
 0x7d7   :  { %9399 = vmatpush.msra.mxu1 %v18031_v35  ;;  %8996 = vmatmul.f32.gmra.mxu2 %v15180_v27  ;;  %v18078_v35 = vld [vmem:[#allocation182_spill] sm:$0xff] }
 0x7d8   :  { %9467 = vmatpush.msra.mxu3 %v18039_v19  ;;  %9233 = vmatpush.msrb.mxu2 %v18040_v6  ;;  %v9894_v19 = vld [vmem:[#allocation8 + $0x150] sm:$0xff]  ;;  %v18083_v6 = vld [vmem:[#allocation202_spill] sm:$0xff] }
 0x7d9   :  { %9289 = vmatmul.f32.vlgmr.msrb.gmra.mxu3 %v15171_v23  ;;  %9362 = vmatpush.msra.mxu0 %v18041_v1  ;;  %v9957_v1 = vand.u32 4294901760, %v15327_v3 }
 0x7da   :  { %9401 = vmatpush.msra.mxu1 %v18034_v11  ;;  %9473 = vmatpush.msra.mxu3 %v18042_v15  ;;  %v18080_v11 = vld [vmem:[#allocation201_spill] sm:$0xff]  ;;  %v15342_v15 = vsub.f32 %v9897_v28, %v15324_v49 }
 0x7db   :  { %9569 = vmatpush.msrb.mxu0 %v18043_v38  ;;  %9236 = vmatpush.msrb.mxu2 %v18044_v59  ;;  %v15344_v38 = vand.u32 4294901760, %v9895_v14  ;;  %v18084_v59 = vld [vmem:[#allocation190_spill] sm:$0xff] }
 0x7dc   :  { %9364 = vmatmul.f32.vlgmr.msra.gmra.mxu0 %v15160_v32  ;;  %9403 = vmatpush.msra.mxu1 %v18037_v2  ;;  %v18081_v2 = vld [vmem:[#allocation186_spill] sm:$0xff] }
 0x7dd   :  { %9479 = vmatpush.msra.mxu3 %v18045_v48  ;;  %9572 = vmatpush.msrb.mxu0 %v18046_v10  ;;  %v18085_v48 = vld [vmem:[#allocation177_spill] sm:$0xff]  ;;  %v18086_v10 = vld [vmem:[#allocation203_spill] sm:$0xff] }
 0x7de   :  { %9627 = vmatpush.msrb.mxu1 %v18047_v53  ;;  %9239 = vmatpush.msrb.mxu2 %v18048_v41  ;;  %v9952_v41 = vsub.f32 %v15318_v57, %v9951_v54 }
 0x7df   :  { %9405 = vmatmul.f32.vlgmr.msra.gmra.mxu1 %v15160_v32  ;;  %9485 = vmatpush.msra.mxu3 %v18049_v45  ;;  %v15354_v45 = vsub.f32 %v9896_v36, %v15334_v43 }
 0x7e0   :  { %9575 = vmatpush.msrb.mxu0 %v18050_v12  ;;  %9629 = vmatpush.msrb.mxu1 %v18051_v0  ;;  %v15356_v12 = vand.u32 4294901760, %v9894_v19 }
 0x7e1   :  { %9242 = vmatpush.msrb.mxu2 %v18052_v24  ;;  %9491 = vmatpush.msra.mxu3 %v18053_v21  ;;  %v9893_v24 = vld [vmem:[#allocation8 + $0x130] sm:$0xff] }
 0x7e2   :  { %9578 = vmatpush.msrb.mxu0 %v18054_v62  ;;  %9631 = vmatpush.msrb.mxu1 %v18055_v8  ;;  %v18087_v21 = vld [vmem:[#allocation192_spill] sm:$0xff]  ;;  %v18088_v62 = vld [vmem:[#allocation181_spill] sm:$0xff]  ;;  %v15377_v56 = vsub.f32 %v9894_v19, %v15356_v12 }
 0x7e3   :  { %9414 = vmatpush.msra.mxu2 %v18047_v53  ;;  %9295 = vmatmul.f32.gmra.mxu3 %v15197_v25  ;;  %v9888_v19 = vld [vmem:[#allocation8 + $0x90] sm:$0xff] }
 0x7e4   :  { %9245 = vmatmul.f32.vlgmr.msrb.gmra.mxu2 %v15164_v39  ;;  %9497 = vmatpush.msra.mxu3 %v18056_v58  ;;  %v9958_v58 = vsub.f32 %v15327_v3, %v9957_v1 }
 0x7e5   :  { %9416 = vmatpush.msra.mxu2 %v18051_v0  ;;  %9581 = vmatpush.msrb.mxu0 %v18057_v37  ;;  %v9963_v37 = vand.u32 4294901760, %v15342_v15 }
 0x7e6   :  { %9633 = vmatpush.msrb.mxu1 %v18058_v26  ;;  %9368 = vmatmul.f32.gmra.mxu0 %v15180_v27 }
 0x7e7   :  { %9418 = vmatpush.msra.mxu2 %v18055_v8  ;;  %9503 = vmatpush.msra.mxu3 %v18059_v44  ;;  %v15367_v44 = vsub.f32 %v9895_v14, %v15344_v38 }
 0x7e8   :  { %9584 = vmatpush.msrb.mxu0 %v18060_v60  ;;  %9635 = vmatpush.msrb.mxu1 %v18061_v9  ;;  %v9892_v60 = vld [vmem:[#allocation8 + $0x110] sm:$0xff] }
 0x7e9   :  { %9409 = vmatmul.f32.gmra.mxu1 %v15180_v27  ;;  %9420 = vmatpush.msra.mxu2 %v18058_v26  ;;  %v16724_v28 = vand.u32 4294901760, %v15367_v44 }
 0x7ea   :  { %9509 = vmatpush.msra.mxu3 %v18062_v20  ;;  %9587 = vmatpush.msrb.mxu0 %v18063_v33  ;;  %v18089_v20 = vld [vmem:[#allocation195_spill] sm:$0xff]  ;;  %v15371_v33 = vand.u32 4294901760, %v9893_v24 }
 0x7eb   :  { %9637 = vmatpush.msrb.mxu1 %v18064_v4  ;;  %9422 = vmatpush.msra.mxu2 %v18061_v9 }
 0x7ec   :  { %9515 = vmatpush.msra.mxu3 %v18065_v40  ;;  %9590 = vmatpush.msrb.mxu0 %v18066_v51  ;;  %v9953_v40 = vand.u32 4294901760, %v9952_v41  ;;  %v9969_v51 = vand.u32 4294901760, %v15354_v45 }
 0x7ed   :  { %9639 = vmatpush.msrb.mxu1 %v18067_v63  ;;  %9250 = vmatmul.f32.gmra.mxu2 %v15188_v47 }
 0x7ee   :  { %9424 = vmatpush.msra.mxu2 %v18064_v4  ;;  %9521 = vmatpush.msra.mxu3 %v18068_v18  ;;  %v9891_v18 = vld [vmem:[#allocation8 + $0xf0] sm:$0xff]  ;;  %v9970_v36 = vsub.f32 %v15354_v45, %v9969_v51 }
 0x7ef   :  { %9593 = vmatpush.msrb.mxu0 %v18069_v17  ;;  %9641 = vmatpush.msrb.mxu1 %v18070_v29  ;;  %v18091_v17 = vld [vmem:[#allocation188_spill] sm:$0xff] }
 0x7f0   :  { %9426 = vmatpush.msra.mxu2 %v18067_v63  ;;  %9527 = vmatpush.msra.mxu3 %v18071_v7  ;;  %v9959_v7 = vand.u32 4294901760, %v9958_v58 }
 0x7f1   :  { %9596 = vmatpush.msrb.mxu0 %v18072_v34  ;;  %9643 = vmatpush.msrb.mxu1 %v18073_v30  ;;  %v9964_v34 = vsub.f32 %v15342_v15, %v9963_v37 }
 0x7f2   :  { %9428 = vmatpush.msra.mxu2 %v18070_v29  ;;  %9533 = vmatpush.msra.mxu3 %v18074_v31  ;;  %v9890_v31 = vld [vmem:[#allocation8 + $0xd0] sm:$0xff] }
 0x7f3   :  { %9599 = vmatpush.msrb.mxu0 %v18075_v5  ;;  %9645 = vmatpush.msrb.mxu1 %v18076_v42  ;;  %v15394_v5 = vand.u32 4294901760, %v9891_v18  ;;  %v15406_v14 = vand.u32 4294901760, %v9890_v31 }
 0x7f4   :  { %9430 = vmatpush.msra.mxu2 %v18073_v30  ;;  %9539 = vmatpush.msra.mxu3 %v18077_v16  ;;  %v16721_v16 = vand.u32 4294901760, %v15377_v56 }
 0x7f5   :  { %9602 = vmatpush.msrb.mxu0 %v18078_v35  ;;  %9647 = vmatpush.msrb.mxu1 %v18079_v55  ;;  %v9889_v35 = vld [vmem:[#allocation8 + $0xb0] sm:$0xff] }
 0x7f6   :  { %9432 = vmatpush.msra.mxu2 %v18076_v42  ;;  %9545 = vmatpush.msra.mxu3 %v18080_v11  ;;  %v9965_v11 = vand.u32 4294901760, %v9964_v34  ;;  %v9982_v41 = vsub.f32 %v15377_v56, %v16721_v16  ;;  %v9884_v16 = vld [vmem:[#allocation8 + $0x10] sm:$0xff] }
 0x7f7   :  { %9605 = vmatpush.msrb.mxu0 %v18081_v2  ;;  %9649 = vmatpush.msrb.mxu1 %v18082_v50  ;;  %v9976_v2 = vsub.f32 %v15367_v44, %v16724_v28  ;;  %v18097_v28 = vld [vmem:[#allocation163_spill] sm:$0xff] }
 0x7f8   :  { %9434 = vmatpush.msra.mxu2 %v18079_v55  ;;  %9551 = vmatpush.msra.mxu3 %v18083_v6  ;;  %v15416_v6 = vsub.f32 %v9891_v18, %v15394_v5  ;;  %v18093_v18 = vld [vmem:[#allocation149_spill] sm:$0xff] }
 0x7f9   :  { %9608 = vmatpush.msrb.mxu0 %v18084_v59  ;;  %9651 = vmatpush.msrb.mxu1 %v18085_v48  ;;  %v15418_v59 = vand.u32 4294901760, %v9889_v35 }
 0x7fa   :  { %9436 = vmatpush.msra.mxu2 %v18082_v50  ;;  %9557 = vmatpush.msra.mxu3 %v18086_v10  ;;  %v9971_v10 = vand.u32 4294901760, %v9970_v36  ;;  %v16722_v34 = vand.u32 4294901760, %v15416_v6 }
 0x7fb   :  { %9611 = vmatpush.msrb.mxu0 %v18087_v21  ;;  %9653 = vmatpush.msrb.mxu1 %v18088_v62  ;;  %v18092_v21 = vld [vmem:[#allocation146_spill] sm:$0xff] }
 0x7fc   :  { %9559 = vmatmul.f32.vlgmr.msra.gmra.mxu3 %v15160_v32  ;;  %9438 = vmatpush.msra.mxu2 %v18085_v48 }
 0x7fd   :  { %9745 = vmatpush.msrb.mxu3 %v18047_v53  ;;  %9614 = vmatpush.msrb.mxu0 %v18089_v20  ;;  %v15381_v53 = vand.u32 4294901760, %v9892_v60  ;;  %v15431_v20 = vand.u32 4294901760, %v9888_v19 }
 0x7fe   :  { %9655 = vmatpush.msrb.mxu1 %v18090_v52  ;;  %9617 = vmatmul.f32.vlgmr.msrb.gmra.mxu0 %v15164_v39 }
 0x7ff   :  { %9747 = vmatpush.msrb.mxu3 %v18051_v0  ;;  %9901 = vmatpush.msra.mxu0 %v15305_v13  ;;  %v15392_v0 = vsub.f32 %v9893_v24, %v15371_v33  ;;  %v9887_v24 = vld [vmem:[#allocation8 + $0x70] sm:$0xff] }
 0x800   :  { %9440 = vmatpush.msra.mxu2 %v18088_v62  ;;  %9657 = vmatpush.msrb.mxu1 %v18091_v17  ;;  %v15443_v36 = vand.u32 4294901760, %v9887_v24 }
 0x801   :  { %9661 = vmatmul.f32.vlgmr.msrb.gmra.mxu1 %v15171_v23  ;;  %9749 = vmatpush.msrb.mxu3 %v18055_v8  ;;  %v15404_v8 = vsub.f32 %v9892_v60, %v15381_v53  ;;  %v15429_v60 = vsub.f32 %v9890_v31, %v15406_v14  ;;  %v15441_v31 = vsub.f32 %v9889_v35, %v15418_v59 }
 0x802   :  { %9903 = vmatpush.msra.mxu0 %v15311_v22  ;;  %9954 = vmatpush.msra.mxu1 %v9953_v40  ;;  %v9886_v40 = vld [vmem:[#allocation8 + $0x50] sm:$0xff] }
 0x803   :  { %9442 = vmatpush.msra.mxu2 %v18090_v52  ;;  %9751 = vmatpush.msrb.mxu3 %v18058_v26  ;;  %v16719_v26 = vand.u32 4294901760, %v15392_v0  ;;  %v16720_v58 = vand.u32 4294901760, %v15404_v8  ;;  %v15455_v35 = vand.u32 4294901760, %v9886_v40 }
 0x804   :  { %9905 = vmatpush.msra.mxu0 %v15324_v49  ;;  %9960 = vmatpush.msra.mxu1 %v9959_v7 }
 0x805   :  { %9444 = vmatpush.msra.mxu2 %v18091_v17  ;;  %9563 = vmatmul.f32.gmra.mxu3 %v15180_v27  ;;  %v9988_v7 = vsub.f32 %v15392_v0, %v16719_v26  ;;  %v9885_v26 = vld [vmem:[#allocation8 + $0x30] sm:$0xff] }
 0x806   :  { %9450 = vmatmul.f32.vlgmr.msra.gmra.mxu2 %v15183_v61  ;;  %9753 = vmatpush.msrb.mxu3 %v18061_v9  ;;  %v9977_v9 = vand.u32 4294901760, %v9976_v2  ;;  %v18094_v2 = vld [vmem:[#allocation152_spill] sm:$0xff] }
 0x807   :  { %9674 = vmatpush.msrb.mxu2 %v18092_v21  ;;  %9907 = vmatpush.msra.mxu0 %v15334_v43  ;;  %v16723_v21 = vand.u32 4294901760, %v15429_v60 }
 0x808   :  { %9966 = vmatpush.msra.mxu1 %v9965_v11  ;;  %9622 = vmatmul.f32.gmra.mxu0 %v15188_v47  ;;  %v9983_v11 = vand.u32 4294901760, %v9982_v41  ;;  %v9989_v41 = vand.u32 4294901760, %v9988_v7 }
 0x809   :  { %9678 = vmatpush.msrb.mxu2 %v18093_v18  ;;  %9755 = vmatpush.msrb.mxu3 %v18064_v4  ;;  %v9994_v4 = vsub.f32 %v15404_v8, %v16720_v58  ;;  %v15453_v18 = vsub.f32 %v9888_v19, %v15431_v20  ;;  %v10011_v58 = vand.u32 4294901760, %v15441_v31  ;;  %v15465_v19 = vsub.f32 %v9887_v24, %v15443_v36 }
 0x80a   :  { %9909 = vmatpush.msra.mxu0 %v15344_v38  ;;  %9972 = vmatpush.msra.mxu1 %v9971_v10  ;;  %v18095_v10 = vld [vmem:[#allocation155_spill] sm:$0xff]  ;;  %v10006_v7 = vsub.f32 %v15429_v60, %v16723_v21  ;;  %v15477_v24 = vsub.f32 %v9886_v40, %v15455_v35 }
 0x80b   :  { %9667 = vmatmul.f32.gmra.mxu1 %v15197_v25  ;;  %9682 = vmatpush.msrb.mxu2 %v18094_v2  ;;  %v10000_v2 = vsub.f32 %v15416_v6, %v16722_v34  ;;  %v18096_v34 = vld [vmem:[#allocation159_spill] sm:$0xff]  ;;  %v10023_v21 = vand.u32 4294901760, %v15465_v19 }
 0x80c   :  { %9757 = vmatpush.msrb.mxu3 %v18067_v63  ;;  %9911 = vmatpush.msra.mxu0 %v15356_v12  ;;  %v15469_v63 = vand.u32 4294901760, %v9885_v26 }
 0x80d   :  { %9978 = vmatpush.msra.mxu1 %v9977_v9  ;;  %9686 = vmatpush.msrb.mxu2 %v18095_v10  ;;  %v9995_v9 = vand.u32 4294901760, %v9994_v4  ;;  %v10017_v10 = vand.u32 4294901760, %v15453_v18  ;;  %v10012_v4 = vsub.f32 %v15441_v31, %v10011_v58 }
 0x80e   :  { %9759 = vmatpush.msrb.mxu3 %v18070_v29  ;;  %9913 = vmatpush.msra.mxu0 %v15371_v33  ;;  %v15481_v29 = vand.u32 4294901760, %v9884_v16  ;;  %v15491_v40 = vsub.f32 %v9885_v26, %v15469_v63  ;;  %v10024_v26 = vsub.f32 %v15465_v19, %v10023_v21 }
 0x80f   :  { %9984 = vmatpush.msra.mxu1 %v9983_v11  ;;  %9458 = vmatmul.f32.gmra.mxu2 %v15209_v46  ;;  %v10001_v11 = vand.u32 4294901760, %v10000_v2  ;;  %v18098_v2 = vld [vmem:[#allocation168_spill] sm:$0xff] }
 0x810   :  { %9690 = vmatpush.msrb.mxu2 %v18096_v34  ;;  %9761 = vmatpush.msrb.mxu3 %v18073_v30  ;;  %v10007_v30 = vand.u32 4294901760, %v10006_v7  ;;  %v10018_v34 = vsub.f32 %v15453_v18, %v10017_v10  ;;  %v10035_v7 = vand.u32 4294901760, %v15491_v40 }
 0x811   :  { %9915 = vmatpush.msra.mxu0 %v15381_v53  ;;  %9990 = vmatpush.msra.mxu1 %v9989_v41  ;;  %v10029_v41 = vand.u32 4294901760, %v15477_v24 }
 0x812   :  { %9694 = vmatpush.msrb.mxu2 %v18097_v28  ;;  %9763 = vmatpush.msrb.mxu3 %v18076_v42  ;;  %v15501_v28 = vsub.f32 %v9884_v16, %v15481_v29  ;;  %v10013_v42 = vand.u32 4294901760, %v10012_v4 }
 0x813   :  { %9917 = vmatpush.msra.mxu0 %v15394_v5  ;;  %9996 = vmatpush.msra.mxu1 %v9995_v9  ;;  %v18099_v9 = vld [vmem:[#allocation172_spill] sm:$0xff]  ;;  %v10030_v16 = vsub.f32 %v15477_v24, %v10029_v41 }
 0x814   :  { %9698 = vmatpush.msrb.mxu2 %v18098_v2  ;;  %9765 = vmatpush.msrb.mxu3 %v18079_v55  ;;  %v10019_v55 = vand.u32 4294901760, %v10018_v34  ;;  %v10041_v4 = vand.u32 4294901760, %v15501_v28  ;;  %v18101_v2 = vld [vmem:[#allocation179_spill] sm:$0xff] }
 0x815   :  { %9919 = vmatpush.msra.mxu0 %v15406_v14  ;;  %10002 = vmatpush.msra.mxu1 %v10001_v11  ;;  %v18100_v11 = vld [vmem:[#allocation175_spill] sm:$0xff]  ;;  %v10031_v34 = vand.u32 4294901760, %v10030_v16  ;;  %v18111_v16 = vand.u32 4294901760, %v15404_v8 }
 0x816   :  { %9702 = vmatpush.msrb.mxu2 %v18099_v9  ;;  %9767 = vmatpush.msrb.mxu3 %v18082_v50  ;;  %v10025_v50 = vand.u32 4294901760, %v10024_v26  ;;  %v18102_v9 = vld [vmem:[#allocation185_spill] sm:$0xff]  ;;  %v18104_v26 = vld [vmem:[#allocation191_spill] sm:$0xff] }
 0x817   :  { %9921 = vmatpush.msra.mxu0 %v15418_v59  ;;  %10008 = vmatpush.msra.mxu1 %v10007_v30  ;;  %v10036_v30 = vsub.f32 %v15491_v40, %v10035_v7 }
 0x818   :  { %9706 = vmatpush.msrb.mxu2 %v18100_v11  ;;  %9769 = vmatpush.msrb.mxu3 %v18085_v48  ;;  %v10042_v48 = vsub.f32 %v15501_v28, %v10041_v4 }
 0x819   :  { %9923 = vmatpush.msra.mxu0 %v15431_v20  ;;  %10014 = vmatpush.msra.mxu1 %v10013_v42  ;;  %v10037_v42 = vand.u32 4294901760, %v10036_v30  ;;  %v18113_v30 = vand.u32 4294901760, %v15429_v60 }
 0x81a   :  { %9710 = vmatpush.msrb.mxu2 %v18101_v2  ;;  %9771 = vmatpush.msrb.mxu3 %v18088_v62  ;;  %v18103_v62 = vld [vmem:[#allocation189_spill] sm:$0xff] }
 0x81b   :  { %9925 = vmatpush.msra.mxu0 %v15443_v36  ;;  %10020 = vmatpush.msra.mxu1 %v10019_v55  ;;  %v18106_v55 = vld [vmem:[#allocation197_spill] sm:$0xff] }
 0x81c   :  { %9714 = vmatpush.msrb.mxu2 %v18102_v9  ;;  %9773 = vmatpush.msrb.mxu3 %v18090_v52  ;;  %v10043_v52 = vand.u32 4294901760, %v10042_v48 }
 0x81d   :  { %9927 = vmatpush.msra.mxu0 %v15455_v35  ;;  %10026 = vmatpush.msra.mxu1 %v10025_v50 }
 0x81e   :  { %9718 = vmatpush.msrb.mxu2 %v18103_v62  ;;  %9775 = vmatpush.msrb.mxu3 %v18091_v17  ;;  %v18105_v17 = vld [vmem:[#allocation194_spill] sm:$0xff] }
 0x81f   :  { %9929 = vmatpush.msra.mxu0 %v15469_v63  ;;  %10032 = vmatpush.msra.mxu1 %v10031_v34 }
 0x820   :  { %9777 = vmatmul.f32.vlgmr.msrb.gmra.mxu3 %v15160_v32  ;;  %9722 = vmatpush.msrb.mxu2 %v18104_v26 }
 0x821   :  { %10114 = vmatpush.msra.mxu3 %v15305_v13  ;;  %9931 = vmatpush.msra.mxu0 %v15481_v29 }
 0x822   :  { %10038 = vmatpush.msra.mxu1 %v10037_v42  ;;  %9937 = vmatmul.f32.vlgmr.msra.gmra.mxu0 %v15183_v61 }
 0x823   :  { %10116 = vmatpush.msra.mxu3 %v15311_v22  ;;  %10161 = vmatpush.msrb.mxu0 %v9951_v54  ;;  %v18107_v54 = vld [vmem:[#allocation199_spill] sm:$0xff] }
 0x824   :  { %9726 = vmatpush.msrb.mxu2 %v18105_v17  ;;  %10044 = vmatpush.msra.mxu1 %v10043_v52  ;;  %v10284_v17 = vld [vmem:[#allocation8 + $0x118] sm:$0xff] }
 0x825   :  { %10046 = vmatmul.f32.vlgmr.msra.gmra.mxu1 %v15160_v32  ;;  %10118 = vmatpush.msra.mxu3 %v15324_v49 }
 0x826   :  { %10165 = vmatpush.msrb.mxu0 %v9957_v1  ;;  %10232 = vmatpush.msrb.mxu1 %v15305_v13  ;;  %v18108_v13 = vand.u32 4294901760, %v15367_v44 }
 0x827   :  { %9730 = vmatpush.msrb.mxu2 %v18106_v55  ;;  %10120 = vmatpush.msra.mxu3 %v15334_v43 }
 0x828   :  { %10169 = vmatpush.msrb.mxu0 %v9963_v37  ;;  %10234 = vmatpush.msrb.mxu1 %v15311_v22  ;;  %v10291_v22 = vld [vmem:[#allocation8 + $0x1f8] sm:$0xff] }
 0x829   :  { %9734 = vmatpush.msrb.mxu2 %v18107_v54  ;;  %9781 = vmatmul.f32.gmra.mxu3 %v15180_v27  ;;  %v10289_v37 = vld [vmem:[#allocation8 + $0x1b8] sm:$0xff]  ;;  %v15658_v54 = vand.u32 4294901760, %v10284_v17 }
 0x82a   :  { %9736 = vmatmul.f32.vlgmr.msrb.gmra.mxu2 %v15160_v32  ;;  %10122 = vmatpush.msra.mxu3 %v15344_v38  ;;  %v15590_v50 = vand.u32 4294901760, %v10289_v37 }
 0x82b   :  { %10056 = vmatpush.msra.mxu2 %v15318_v57  ;;  %10173 = vmatpush.msrb.mxu0 %v9969_v51  ;;  %v18109_v57 = vand.u32 4294901760, %v15377_v56 }
 0x82c   :  { %10236 = vmatpush.msrb.mxu1 %v15324_v49  ;;  %9945 = vmatmul.f32.gmra.mxu0 %v15209_v46  ;;  %v10290_v49 = vld [vmem:[#allocation8 + $0x1d8] sm:$0xff]  ;;  %v15609_v34 = vsub.f32 %v10289_v37, %v15590_v50 }
 0x82d   :  { %10059 = vmatpush.msra.mxu2 %v15327_v3  ;;  %10124 = vmatpush.msra.mxu3 %v15356_v12  ;;  %v15573_v3 = vand.u32 4294901760, %v10291_v22  ;;  %v15580_v51 = vand.u32 4294901760, %v10290_v49 }
 0x82e   :  { %10177 = vmatpush.msrb.mxu0 %v18108_v13  ;;  %10238 = vmatpush.msrb.mxu1 %v15334_v43  ;;  %v18110_v43 = vand.u32 4294901760, %v15392_v0  ;;  %v10283_v13 = vld [vmem:[#allocation8 + $0xf8] sm:$0xff] }
 0x82f   :  { %10050 = vmatmul.f32.gmra.mxu1 %v15180_v27  ;;  %10062 = vmatpush.msra.mxu2 %v15342_v15  ;;  %v15588_v11 = vsub.f32 %v10291_v22, %v15573_v3 }
 0x830   :  { %10126 = vmatpush.msra.mxu3 %v15371_v33  ;;  %10181 = vmatpush.msrb.mxu0 %v18109_v57  ;;  %v8874_v1 = vpop.f32.mrf.mxu0  ;;  %v10282_v57 = vld [vmem:[#allocation8 + $0xd8] sm:$0xff] }
 0x831   :  { %10240 = vmatpush.msrb.mxu1 %v15344_v38  ;;  %10065 = vmatpush.msra.mxu2 %v15354_v45  ;;  %v10288_v38 = vld [vmem:[#allocation8 + $0x198] sm:$0xff]  ;;  %v15680_v1 = vsub.f32 %v10284_v17, %v15658_v54  ;;  %v15687_v37 = vand.u32 4294901760, %v10282_v57 }
 0x832   :  { %10128 = vmatpush.msra.mxu3 %v15381_v53  ;;  %10185 = vmatpush.msrb.mxu0 %v18110_v43  ;;  %v8918_v15 = vpop.f32.mrf.mxu1  ;;  %v15600_v2 = vand.u32 4294901760, %v10288_v38  ;;  %v10281_v43 = vld [vmem:[#allocation8 + $0xb8] sm:$0xff] }
 0x833   :  { %10242 = vmatpush.msrb.mxu1 %v15356_v12  ;;  %9740 = vmatmul.f32.gmra.mxu2 %v15180_v27  ;;  %v18112_v12 = vand.u32 4294901760, %v15416_v6 }
 0x834   :  { %10068 = vmatpush.msra.mxu2 %v15367_v44  ;;  %10130 = vmatpush.msra.mxu3 %v15394_v5  ;;  %v8816_v45 = vpop.f32.mrf.mxu3  ;;  %v15598_v44 = vsub.f32 %v10290_v49, %v15580_v51  ;;  %v15620_v48 = vsub.f32 %v10288_v38, %v15600_v2 }
 0x835   :  { %10189 = vmatpush.msrb.mxu0 %v18111_v16  ;;  %10244 = vmatpush.msrb.mxu1 %v15371_v33  ;;  %v10287_v33 = vld [vmem:[#allocation8 + $0x178] sm:$0xff] }
 0x836   :  { %10071 = vmatpush.msra.mxu2 %v15377_v56  ;;  %10132 = vmatpush.msra.mxu3 %v15406_v14  ;;  %v10343_v56 = vand.u32 4294901760, %v15588_v11  ;;  %v15613_v9 = vand.u32 4294901760, %v10287_v33  ;;  %v10280_v16 = vld [vmem:[#allocation8 + $0x98] sm:$0xff] }
 0x837   :  { %10193 = vmatpush.msrb.mxu0 %v18112_v12  ;;  %10246 = vmatpush.msrb.mxu1 %v15381_v53 }
 0x838   :  { %10074 = vmatpush.msra.mxu2 %v15392_v0  ;;  %10134 = vmatpush.msra.mxu3 %v15418_v59  ;;  %v10286_v0 = vld [vmem:[#allocation8 + $0x158] sm:$0xff] }
 0x839   :  { %10197 = vmatpush.msrb.mxu0 %v18113_v30  ;;  %10248 = vmatpush.msrb.mxu1 %v15394_v5  ;;  %v8879_v53 = vpop.f32.mrf.mxu0  ;;  %v10349_v5 = vand.u32 4294901760, %v15598_v44  ;;  %v15631_v26 = vand.u32 4294901760, %v10286_v0 }
 0x83a   :  { %10077 = vmatpush.msra.mxu2 %v15404_v8  ;;  %10136 = vmatpush.msra.mxu3 %v15431_v20  ;;  %v10285_v8 = vld [vmem:[#allocation8 + $0x138] sm:$0xff]  ;;  %v10385_v53 = vand.u32 4294901760, %v15680_v1 }
 0x83b   :  { %10201 = vmatpush.msrb.mxu0 %v10011_v58  ;;  %10250 = vmatpush.msrb.mxu1 %v15406_v14  ;;  %v10344_v14 = vsub.f32 %v15588_v11, %v10343_v56  ;;  %v10355_v58 = vand.u32 4294901760, %v15609_v34  ;;  %v15645_v55 = vand.u32 4294901760, %v10285_v8 }
 0x83c   :  { %10080 = vmatpush.msra.mxu2 %v15416_v6  ;;  %10138 = vmatpush.msra.mxu3 %v15443_v36  ;;  %v8924_v62 = vpop.f32.mrf.mxu1  ;;  %v8707_v42 = vpop.f32.mrf.mxu2  ;;  %v15636_v6 = vsub.f32 %v10287_v33, %v15613_v9  ;;  %v15696_v33 = vand.u32 4294901760, %v10281_v43 }
 0x83d   :  { %10205 = vmatpush.msrb.mxu0 %v10017_v10  ;;  %10252 = vmatpush.msrb.mxu1 %v15418_v59  ;;  %v8820_v52 = vpop.f32.mrf.mxu3  ;;  %v10350_v59 = vsub.f32 %v15598_v44, %v10349_v5  ;;  %v10361_v10 = vand.u32 4294901760, %v15620_v48  ;;  %v15670_v22 = vsub.f32 %v10285_v8, %v15645_v55  ;;  %v15708_v8 = vand.u32 4294901760, %v10280_v16  ;;  %v10278_v42 = vld [vmem:[#allocation8 + $0x58] sm:$0xff] }
 0x83e   :  { %10083 = vmatpush.msra.mxu2 %v15429_v60  ;;  %10140 = vmatpush.msra.mxu3 %v15455_v35  ;;  %v10345_v60 = vand.u32 4294901760, %v10344_v14  ;;  %v15718_v52 = vsub.f32 %v10281_v43, %v15696_v33 }
 0x83f   :  { %10209 = vmatpush.msrb.mxu0 %v10023_v21  ;;  %10254 = vmatpush.msrb.mxu1 %v15431_v20  ;;  %v10356_v20 = vsub.f32 %v15609_v34, %v10355_v58  ;;  %v15656_v21 = vsub.f32 %v10286_v0, %v15631_v26  ;;  %v10379_v45 = vand.u32 4294901760, %v15670_v22  ;;  %v10279_v0 = vld [vmem:[#allocation8 + $0x78] sm:$0xff] }
 0x840   :  { %10086 = vmatpush.msra.mxu2 %v15441_v31  ;;  %10142 = vmatpush.msra.mxu3 %v15469_v63  ;;  %v10367_v31 = vand.u32 4294901760, %v15636_v6  ;;  %v15720_v17 = vand.u32 4294901760, %v10279_v0 }
 0x841   :  { %10213 = vmatpush.msrb.mxu0 %v10029_v41  ;;  %10256 = vmatpush.msrb.mxu1 %v15443_v36  ;;  %v10351_v36 = vand.u32 4294901760, %v10350_v59  ;;  %v10362_v41 = vsub.f32 %v15620_v48, %v10361_v10  ;;  %v10380_v62 = vsub.f32 %v15670_v22, %v10379_v45  ;;  %v10386_v59 = vsub.f32 %v15680_v1, %v10385_v53 }
 0x842   :  { %10089 = vmatpush.msra.mxu2 %v15453_v18  ;;  %10144 = vmatpush.msra.mxu3 %v15481_v29  ;;  %v15674_v18 = vand.u32 4294901760, %v10283_v13  ;;  %v15743_v43 = vsub.f32 %v10279_v0, %v15720_v17 }
 0x843   :  { %10217 = vmatpush.msrb.mxu0 %v10035_v7  ;;  %10258 = vmatpush.msrb.mxu1 %v15455_v35  ;;  %v9079_v49 = vpop.f32.mrf.mxu0  ;;  %v10357_v35 = vand.u32 4294901760, %v10356_v20  ;;  %v10373_v7 = vand.u32 4294901760, %v15656_v21  ;;  %v10277_v20 = vld [vmem:[#allocation8 + $0x38] sm:$0xff] }
 0x844   :  { %10148 = vmatmul.f32.vlgmr.msra.gmra.mxu3 %v15171_v23  ;;  %10092 = vmatpush.msra.mxu2 %v15465_v19  ;;  %v10368_v19 = vsub.f32 %v15636_v6, %v10367_v31 }
 0x845   :  { %10346 = vmatpush.msrb.mxu3 %v10345_v60  ;;  %10221 = vmatpush.msrb.mxu0 %v10041_v4  ;;  %v10363_v4 = vand.u32 4294901760, %v10362_v41  ;;  %v10374_v30 = vsub.f32 %v15656_v21, %v10373_v7  ;;  %v15732_v41 = vand.u32 4294901760, %v10278_v42 }
 0x846   :  { %10260 = vmatpush.msrb.mxu1 %v15469_v63  ;;  %10223 = vmatmul.f32.vlgmr.msrb.gmra.mxu0 %v15160_v32  ;;  %v9188_v15 = vpop.f32.mrf.mxu1  ;;  %v8715_v38 = vpop.f32.mrf.mxu2  ;;  %v15694_v63 = vsub.f32 %v10283_v13, %v15674_v18 }
 0x847   :  { %10352 = vmatpush.msrb.mxu3 %v10351_v36  ;;  %10448 = vmatpush.msra.mxu0 %v15588_v11  ;;  %v9034_v12 = vpop.f32.mrf.mxu3  ;;  %v15730_v36 = vsub.f32 %v10280_v16, %v15708_v8  ;;  %v15755_v0 = vsub.f32 %v10278_v42, %v15732_v41  ;;  %v18114_v11 = vand.u32 4294901760, %v15743_v43 }
 0x848   :  { %10095 = vmatpush.msra.mxu2 %v15477_v24  ;;  %10262 = vmatpush.msrb.mxu1 %v15481_v29  ;;  %v10369_v24 = vand.u32 4294901760, %v10368_v19  ;;  %v15706_v29 = vsub.f32 %v10282_v57, %v15687_v37  ;;  %v10391_v14 = vand.u32 4294901760, %v15694_v63  ;;  %v10276_v57 = vld [vmem:[#allocation8 + $0x18] sm:$0xff]  ;;  %v15745_v19 = vand.u32 4294901760, %v10277_v20 }
 0x849   :  { %10264 = vmatmul.f32.vlgmr.msrb.gmra.mxu1 %v15160_v32  ;;  %10358 = vmatpush.msrb.mxu3 %v10357_v35  ;;  %v10403_v35 = vand.u32 4294901760, %v15718_v52 }
 0x84a   :  { %10451 = vmatpush.msra.mxu0 %v15598_v44  ;;  %10506 = vmatpush.msra.mxu1 %v15573_v3  ;;  %v10397_v13 = vand.u32 4294901760, %v15706_v29  ;;  %v10392_v49 = vsub.f32 %v15694_v63, %v10391_v14 }
 0x84b   :  { %10098 = vmatpush.msra.mxu2 %v15491_v40  ;;  %10364 = vmatpush.msrb.mxu3 %v10363_v4  ;;  %v10375_v40 = vand.u32 4294901760, %v10374_v30  ;;  %v10387_v4 = vand.u32 4294901760, %v10386_v59  ;;  %v10409_v30 = vand.u32 4294901760, %v15730_v36  ;;  %v16725_v59 = vand.u32 4294901760, %v15743_v43 }
 0x84c   :  { %10454 = vmatpush.msra.mxu0 %v15609_v34  ;;  %10508 = vmatpush.msra.mxu1 %v15580_v51  ;;  %v10398_v12 = vsub.f32 %v15706_v29, %v10397_v13 }
 0x84d   :  { %10101 = vmatpush.msra.mxu2 %v15501_v28  ;;  %10154 = vmatmul.f32.gmra.mxu3 %v15197_v25  ;;  %v9087_v60 = vpop.f32.mrf.mxu0  ;;  %v10381_v28 = vand.u32 4294901760, %v10380_v62  ;;  %v10393_v62 = vand.u32 4294901760, %v10392_v49  ;;  %v16726_v49 = vand.u32 4294901760, %v15755_v0 }
 0x84e   :  { %10104 = vmatmul.f32.vlgmr.msra.gmra.mxu2 %v15164_v39  ;;  %10370 = vmatpush.msrb.mxu3 %v10369_v24  ;;  %v15757_v24 = vand.u32 4294901760, %v10276_v57  ;;  %v15767_v60 = vsub.f32 %v10277_v20, %v15745_v19  ;;  %v10399_v42 = vand.u32 4294901760, %v10398_v12 }
 0x84f   :  { %10293 = vmatpush.msrb.mxu2 %v15573_v3  ;;  %10457 = vmatpush.msra.mxu0 %v15620_v48  ;;  %v10422_v12 = vsub.f32 %v15755_v0, %v16726_v49 }
 0x850   :  { %10510 = vmatpush.msra.mxu1 %v15590_v50  ;;  %10227 = vmatmul.f32.gmra.mxu0 %v15180_v27  ;;  %v9192_v15 = vpop.f32.mrf.mxu1  ;;  %v8993_v38 = vpop.f32.mrf.mxu2 }
 0x851   :  { %10295 = vmatpush.msrb.mxu2 %v15580_v51  ;;  %10376 = vmatpush.msrb.mxu3 %v10375_v40  ;;  %v9038_v16 = vpop.f32.mrf.mxu3  ;;  %v10404_v40 = vsub.f32 %v15718_v52, %v10403_v35  ;;  %v15777_v15 = vsub.f32 %v10276_v57, %v15757_v24  ;;  %v10416_v38 = vsub.f32 %v15743_v43, %v16725_v59  ;;  %v10423_v49 = vand.u32 4294901760, %v10422_v12 }
 0x852   :  { %10460 = vmatpush.msra.mxu0 %v15636_v6  ;;  %10512 = vmatpush.msra.mxu1 %v15600_v2 }
 0x853   :  { %10268 = vmatmul.f32.gmra.mxu1 %v15180_v27  ;;  %10297 = vmatpush.msrb.mxu2 %v15590_v50  ;;  %v10405_v20 = vand.u32 4294901760, %v10404_v40 }
 0x854   :  { %10382 = vmatpush.msrb.mxu3 %v10381_v28  ;;  %10463 = vmatpush.msra.mxu0 %v15656_v21  ;;  %v10410_v28 = vsub.f32 %v15730_v36, %v10409_v30 }
 0x855   :  { %10514 = vmatpush.msra.mxu1 %v15613_v9  ;;  %10299 = vmatpush.msrb.mxu2 %v15600_v2 }
 0x856   :  { %10388 = vmatpush.msrb.mxu3 %v10387_v4  ;;  %10466 = vmatpush.msra.mxu0 %v15670_v22  ;;  %v10427_v4 = vand.u32 4294901760, %v15767_v60  ;;  %v10411_v16 = vand.u32 4294901760, %v10410_v28 }
 0x857   :  { %10516 = vmatpush.msra.mxu1 %v15631_v26  ;;  %10109 = vmatmul.f32.gmra.mxu2 %v15188_v47 }
 0x858   :  { %10301 = vmatpush.msrb.mxu2 %v15613_v9  ;;  %10394 = vmatpush.msrb.mxu3 %v10393_v62  ;;  %v10433_v62 = vand.u32 4294901760, %v15777_v15 }
 0x859   :  { %10469 = vmatpush.msra.mxu0 %v15680_v1  ;;  %10518 = vmatpush.msra.mxu1 %v15645_v55  ;;  %v9365_v57 = vpop.f32.mrf.mxu0  ;;  %v10719_v1 = vld [vmem:[#allocation9 + $0x58] sm:$0xff] }
 0x85a   :  { %10303 = vmatpush.msrb.mxu2 %v15631_v26  ;;  %10400 = vmatpush.msrb.mxu3 %v10399_v42  ;;  %v8997_v40 = vpop.f32.mrf.mxu2  ;;  %v10417_v57 = vand.u32 4294901760, %v10416_v38  ;;  %v10428_v42 = vsub.f32 %v15767_v60, %v10427_v4 }
 0x85b   :  { %10472 = vmatpush.msra.mxu0 %v15694_v63  ;;  %10520 = vmatpush.msra.mxu1 %v15658_v54 }
 0x85c   :  { %v9290_v59 = vpop.f32.mrf.mxu3  ;;  %10305 = vmatpush.msrb.mxu2 %v15645_v55  ;;  %10406 = vmatpush.msrb.mxu3 %v10405_v20  ;;  %v9406_v28 = vpop.f32.mrf.mxu1  ;;  %v10429_v20 = vand.u32 4294901760, %v10428_v42 }
 0x85d   :  { %10475 = vmatpush.msra.mxu0 %v15706_v29  ;;  %10522 = vmatpush.msra.mxu1 %v15674_v18  ;;  %v10434_v59 = vsub.f32 %v15777_v15, %v10433_v62  ;;  %v15917_v29 = vand.u32 4294901760, %v10719_v1 }
 0x85e   :  { %10307 = vmatpush.msrb.mxu2 %v15658_v54  ;;  %10412 = vmatpush.msrb.mxu3 %v10411_v16 }
 0x85f   :  { %10478 = vmatpush.msra.mxu0 %v15718_v52  ;;  %10524 = vmatpush.msra.mxu1 %v15687_v37  ;;  %v10435_v38 = vand.u32 4294901760, %v10434_v59 }
 0x860   :  { %10309 = vmatpush.msrb.mxu2 %v15674_v18  ;;  %10418 = vmatpush.msrb.mxu3 %v10417_v57 }
 0x861   :  { %10481 = vmatpush.msra.mxu0 %v15730_v36  ;;  %10526 = vmatpush.msra.mxu1 %v15696_v33  ;;  %v10802_v36 = vsub.f32 %v10719_v1, %v15917_v29 }
 0x862   :  { %10311 = vmatpush.msrb.mxu2 %v15687_v37  ;;  %10424 = vmatpush.msrb.mxu3 %v10423_v49 }
 0x863   :  { %10484 = vmatpush.msra.mxu0 %v15743_v43  ;;  %10528 = vmatpush.msra.mxu1 %v15708_v8  ;;  %v9369_v16 = vpop.f32.mrf.mxu0 }
 0x864   :  { %10313 = vmatpush.msrb.mxu2 %v15696_v33  ;;  %10430 = vmatpush.msrb.mxu3 %v10429_v20  ;;  %v10715_v20 = vld [vmem:[#allocation9 + $0x38] sm:$0xff] }
 0x865   :  { %10487 = vmatpush.msra.mxu0 %v15755_v0  ;;  %10530 = vmatpush.msra.mxu1 %v15720_v17 }
 0x866   :  { %10315 = vmatpush.msrb.mxu2 %v15708_v8  ;;  %10436 = vmatpush.msrb.mxu3 %v10435_v38  ;;  %v9410_v12 = vpop.f32.mrf.mxu1  ;;  %v9296_v49 = vpop.f32.mrf.mxu3 }
 0x867   :  { %v9246_v40 = vpop.f32.mrf.mxu2  ;;  %10490 = vmatpush.msra.mxu0 %v15767_v60  ;;  %10532 = vmatpush.msra.mxu1 %v15732_v41  ;;  %v15936_v60 = vand.u32 4294901760, %v10802_v36 }
 0x868   :  { %10438 = vmatmul.f32.vlgmr.msrb.gmra.mxu3 %v15160_v32  ;;  %10317 = vmatpush.msrb.mxu2 %v15720_v17  ;;  %v15953_v40 = vand.u32 4294901760, %v10715_v20 }
 0x869   :  { %10624 = vmatpush.msra.mxu3 %v15573_v3  ;;  %10493 = vmatpush.msra.mxu0 %v15777_v15  ;;  %v10716_v15 = vld [vmem:[#allocation9 + $0x40] sm:$0xff]  ;;  %v10804_v59 = vsub.f32 %v10802_v36, %v15936_v60 }
 0x86a   :  { %10534 = vmatpush.msra.mxu1 %v15745_v19  ;;  %10496 = vmatmul.f32.vlgmr.msra.gmra.mxu0 %v15164_v39  ;;  %v15944_v28 = vand.u32 4294901760, %v10716_v15 }
 0x86b   :  { %10626 = vmatpush.msra.mxu3 %v15580_v51  ;;  %10319 = vmatpush.msrb.mxu2 %v15732_v41  ;;  %v10805_v49 = vand.u32 4294901760, %v10804_v59 }
 0x86c   :  { %10536 = vmatpush.msra.mxu1 %v15757_v24  ;;  %v10820_v12 = vsub.f32 %v10716_v15, %v15944_v28  ;;  %v10709_v15 = vld [vmem:[#allocation9 + $0x8] sm:$0xff] }
 0x86d   :  { %10540 = vmatmul.f32.vlgmr.msra.gmra.mxu1 %v15171_v23  ;;  %10628 = vmatpush.msra.mxu3 %v15590_v50  ;;  %v18115_v50 = vand.u32 4294901760, %v15755_v0 }
 0x86e   :  { %10321 = vmatpush.msrb.mxu2 %v15745_v19 }
 0x86f   :  { %10630 = vmatpush.msra.mxu3 %v15600_v2 }
 0x870   :  { %10323 = vmatpush.msrb.mxu2 %v15757_v24  ;;  %10442 = vmatmul.f32.gmra.mxu3 %v15180_v27  ;;  %v9251_v3 = vpop.f32.mrf.mxu2 }
 0x871   :  { %10329 = vmatmul.f32.vlgmr.msrb.gmra.mxu2 %v15183_v61  ;;  %10632 = vmatpush.msra.mxu3 %v15613_v9  ;;  %v10714_v3 = vld [vmem:[#allocation9 + $0x30] sm:$0xff] }
 0x872   :  { %10553 = vmatpush.msra.mxu2 %v10343_v56  ;;  %10501 = vmatmul.f32.gmra.mxu0 %v15188_v47 }
 0x873   :  { %10634 = vmatpush.msra.mxu3 %v15631_v26 }
 0x874   :  { %10557 = vmatpush.msra.mxu2 %v10349_v5  ;;  %v10723_v5 = vld [vmem:[#allocation9 + $0x78] sm:$0xff] }
 0x875   :  { %10546 = vmatmul.f32.gmra.mxu1 %v15197_v25  ;;  %10636 = vmatpush.msra.mxu3 %v15645_v55  ;;  %v15886_v48 = vand.u32 4294901760, %v10723_v5 }
 0x876   :  { %10561 = vmatpush.msra.mxu2 %v10355_v58  ;;  %v10722_v58 = vld [vmem:[#allocation9 + $0x70] sm:$0xff] }
 0x877   :  { %10638 = vmatpush.msra.mxu3 %v15658_v54  ;;  %v10778_v26 = vsub.f32 %v10723_v5, %v15886_v48  ;;  %v15889_v6 = vand.u32 4294901760, %v10722_v58  ;;  %10729 = vmatpush.msrb.mxu0 %v15886_v48  ;;  %v10720_v54 = vld [vmem:[#allocation9 + $0x60] sm:$0xff] }
 0x878   :  { %10565 = vmatpush.msra.mxu2 %v10361_v10 }
 0x879   :  { %10337 = vmatmul.f32.gmra.mxu2 %v15209_v46  ;;  %10640 = vmatpush.msra.mxu3 %v15674_v18  ;;  %v10784_v55 = vsub.f32 %v10722_v58, %v15889_v6 }
 0x87a   :  { %10569 = vmatpush.msra.mxu2 %v10367_v31  ;;  %10731 = vmatpush.msrb.mxu0 %v15889_v6 }
 0x87b   :  { %10642 = vmatpush.msra.mxu3 %v15687_v37  ;;  %v9618_v39 = vpop.f32.mrf.mxu0  ;;  %v15903_v22 = vand.u32 4294901760, %v10784_v55 }
 0x87c   :  { %10573 = vmatpush.msra.mxu2 %v10373_v7  ;;  %v15906_v7 = vand.u32 4294901760, %v10720_v54 }
 0x87d   :  { %10644 = vmatpush.msra.mxu3 %v15696_v33 }
 0x87e   :  { %10577 = vmatpush.msra.mxu2 %v10379_v45  ;;  %v9662_v23 = vpop.f32.mrf.mxu1  ;;  %v10786_v45 = vsub.f32 %v10784_v55, %v15903_v22  ;;  %v10796_v33 = vsub.f32 %v10720_v54, %v15906_v7 }
 0x87f   :  { %10646 = vmatpush.msra.mxu3 %v15708_v8  ;;  %v9560_v61 = vpop.f32.mrf.mxu3  ;;  %v10718_v8 = vld [vmem:[#allocation9 + $0x50] sm:$0xff] }
 0x880   :  { %10581 = vmatpush.msra.mxu2 %v10385_v53  ;;  %v15958_v61 = vand.u32 4294901760, %v10820_v12 }
 0x881   :  { %10648 = vmatpush.msra.mxu3 %v15720_v17  ;;  %v15921_v17 = vand.u32 4294901760, %v10796_v33 }
 0x882   :  { %10585 = vmatpush.msra.mxu2 %v10391_v14  ;;  %v10787_v14 = vand.u32 4294901760, %v10786_v45 }
 0x883   :  { %10650 = vmatpush.msra.mxu3 %v15732_v41  ;;  %v10717_v41 = vld [vmem:[#allocation9 + $0x48] sm:$0xff]  ;;  %v10798_v43 = vsub.f32 %v10796_v33, %v15921_v17 }
 0x884   :  { %10589 = vmatpush.msra.mxu2 %v10397_v13  ;;  %v15923_v13 = vand.u32 4294901760, %v10718_v8 }
 0x885   :  { %10652 = vmatpush.msra.mxu3 %v15745_v19  ;;  %v9623_v47 = vpop.f32.mrf.mxu0 }
 0x886   :  { %10593 = vmatpush.msra.mxu2 %v10403_v35  ;;  %v10808_v19 = vsub.f32 %v10718_v8, %v15923_v13 }
 0x887   :  { %10654 = vmatpush.msra.mxu3 %v15757_v24 }
 0x888   :  { %10597 = vmatpush.msra.mxu2 %v10409_v30  ;;  %10656 = vmatmul.f32.vlgmr.msra.gmra.mxu3 %v15160_v32  ;;  %v9668_v25 = vpop.f32.mrf.mxu1  ;;  %v9564_v46 = vpop.f32.mrf.mxu3  ;;  %v15930_v30 = vand.u32 4294901760, %v10717_v41  ;;  %v15941_v57 = vand.u32 4294901760, %v10808_v19 }
 0x889   :  { %v9451_v51 = vpop.f32.mrf.mxu2  ;;  %10942 = vmatpush.msrb.mxu3 %v15886_v48  ;;  %v10826_v25 = vsub.f32 %v10715_v20, %v15953_v40  ;;  %v15964_v46 = vand.u32 4294901760, %v10714_v3 }
 0x88a   :  { %10601 = vmatpush.msra.mxu2 %v18114_v11  ;;  %v10814_v42 = vsub.f32 %v10717_v41, %v15930_v30  ;;  %v10810_v38 = vsub.f32 %v10808_v19, %v15941_v57  ;;  %v10713_v51 = vld [vmem:[#allocation9 + $0x28] sm:$0xff] }
 0x88b   :  { %10944 = vmatpush.msrb.mxu3 %v15889_v6 }
 0x88c   :  { %10605 = vmatpush.msra.mxu2 %v18115_v50  ;;  %v15950_v16 = vand.u32 4294901760, %v10814_v42  ;;  %v10811_v39 = vand.u32 4294901760, %v10810_v38  ;;  %v10822_v50 = vsub.f32 %v10820_v12, %v15958_v61  ;;  %v16012_v38 = vand.u32 4294901760, %v10709_v15 }
 0x88e   :  { %10609 = vmatpush.msra.mxu2 %v10427_v4  ;;  %v10816_v23 = vsub.f32 %v10814_v42, %v15950_v16  ;;  %v10823_v5 = vand.u32 4294901760, %v10822_v50 }
 0x890   :  { %10613 = vmatpush.msra.mxu2 %v10433_v62  ;;  %10660 = vmatmul.f32.gmra.mxu3 %v15180_v27  ;;  %v10799_v62 = vand.u32 4294901760, %v10798_v43  ;;  %v10817_v11 = vand.u32 4294901760, %v10816_v23 }
 0x891   :  { %10615 = vmatmul.f32.vlgmr.msra.gmra.mxu2 %v15160_v32  ;;  %v10721_v32 = vld [vmem:[#allocation9 + $0x68] sm:$0xff] }
 0x892   :  { %v9459_v44 = vpop.f32.mrf.mxu2  ;;  %10884 = vmatpush.msrb.mxu2 %v10778_v26  ;;  %v15898_v21 = vand.u32 4294901760, %v10721_v32 }
 0x893   :  { %v15967_v44 = vand.u32 4294901760, %v10713_v51 }
 0x894   :  { %v10790_v18 = vsub.f32 %v10721_v32, %v15898_v21  ;;  %10887 = vmatpush.msrb.mxu2 %v10784_v55  ;;  %10946 = vmatpush.msrb.mxu3 %v15898_v21 }
 0x895   :  { %10733 = vmatpush.msrb.mxu0 %v15898_v21  ;;  %v10838_v58 = vsub.f32 %v10713_v51, %v15967_v44 }
 0x896   :  { %v15911_v63 = vand.u32 4294901760, %v10790_v18  ;;  %10890 = vmatpush.msrb.mxu2 %v10790_v18  ;;  %10948 = vmatpush.msrb.mxu3 %v15906_v7 }
 0x897   :  { %10735 = vmatpush.msrb.mxu0 %v15906_v7  ;;  %v15988_v1 = vand.u32 4294901760, %v10838_v58 }
 0x898   :  { %v10792_v52 = vsub.f32 %v10790_v18, %v15911_v63  ;;  %10893 = vmatpush.msrb.mxu2 %v10796_v33  ;;  %10950 = vmatpush.msrb.mxu3 %v15917_v29  ;;  %v10711_v18 = vld [vmem:[#allocation9 + $0x18] sm:$0xff] }
 0x899   :  { %10619 = vmatmul.f32.gmra.mxu2 %v15180_v27  ;;  %v15895_v27 = vand.u32 4294901760, %v10778_v26  ;;  %10737 = vmatpush.msrb.mxu0 %v15917_v29  ;;  %v15991_v45 = vand.u32 4294901760, %v10711_v18 }
 0x89a   :  { %v10793_v35 = vand.u32 4294901760, %v10792_v52  ;;  %10896 = vmatpush.msrb.mxu2 %v10802_v36  ;;  %10952 = vmatpush.msrb.mxu3 %v15923_v13  ;;  %v10840_v52 = vsub.f32 %v10838_v58, %v15988_v1 }
 0x89b   :  { %v10780_v31 = vsub.f32 %v10778_v26, %v15895_v27  ;;  %10739 = vmatpush.msrb.mxu0 %v15923_v13  ;;  %v10850_v41 = vsub.f32 %v10711_v18, %v15991_v45 }
 0x89c   :  { %10899 = vmatpush.msrb.mxu2 %v10808_v19  ;;  %10954 = vmatpush.msrb.mxu3 %v15930_v30 }
 0x89d   :  { %v10781_v37 = vand.u32 4294901760, %v10780_v31  ;;  %10741 = vmatpush.msrb.mxu0 %v15930_v30  ;;  %v16007_v59 = vand.u32 4294901760, %v10850_v41 }
 0x89e   :  { %10902 = vmatpush.msrb.mxu2 %v10814_v42  ;;  %10956 = vmatpush.msrb.mxu3 %v15944_v28 }
 0x89f   :  { %v15893_v10 = vpop.f32.mrf.mxu0  ;;  %10782 = vmatpush.msrb.mxu1 %v10781_v37  ;;  %10743 = vmatpush.msrb.mxu0 %v15944_v28 }
 0x8a0   :  { %10905 = vmatpush.msrb.mxu2 %v10820_v12  ;;  %10958 = vmatpush.msrb.mxu3 %v15953_v40  ;;  %v10708_v12 = vld [vmem:[#allocation9] sm:$0xff] }
 0x8a1   :  { %10788 = vmatpush.msrb.mxu1 %v10787_v14  ;;  %10745 = vmatpush.msrb.mxu0 %v15953_v40  ;;  %v10710_v14 = vld [vmem:[#allocation9 + $0x10] sm:$0xff] }
 0x8a2   :  { %v15915_v53 = vpop.f32.mrf.mxu1  ;;  %10908 = vmatpush.msrb.mxu2 %v10826_v25  ;;  %10960 = vmatpush.msrb.mxu3 %v15964_v46  ;;  %v16004_v19 = vand.u32 4294901760, %v10710_v14 }
 0x8a3   :  { %v9778_v2 = vpop.f32.mrf.mxu3  ;;  %10794 = vmatpush.msrb.mxu1 %v10793_v35  ;;  %10747 = vmatpush.msrb.mxu0 %v15964_v46 }
 0x8a4   :  { %v15971_v2 = vand.u32 4294901760, %v10826_v25  ;;  %10962 = vmatpush.msrb.mxu3 %v15967_v44  ;;  %v10856_v20 = vsub.f32 %v10710_v14, %v16004_v19 }
 0x8a5   :  { %10800 = vmatpush.msrb.mxu1 %v10799_v62  ;;  %10749 = vmatpush.msrb.mxu0 %v15967_v44  ;;  %v10841_v62 = vand.u32 4294901760, %v10840_v52 }
 0x8a6   :  { %v10828_v54 = vsub.f32 %v10826_v25, %v15971_v2  ;;  %v16019_v51 = vand.u32 4294901760, %v10856_v20 }
 0x8a7   :  { %10806 = vmatpush.msrb.mxu1 %v10805_v49 }
 0x8a8   :  { %v10829_v33 = vand.u32 4294901760, %v10828_v54 }
 0x8a9   :  { %v15939_v4 = vpop.f32.mrf.mxu0  ;;  %10812 = vmatpush.msrb.mxu1 %v10811_v39  ;;  %v16015_v39 = vand.u32 4294901760, %v10708_v12 }
 0x8ab   :  { %10818 = vmatpush.msrb.mxu1 %v10817_v11  ;;  %v10862_v11 = vsub.f32 %v10709_v15, %v16012_v38 }
 0x8ac   :  { %v9782_v56 = vpop.f32.mrf.mxu3  ;;  %v15961_v47 = vpop.f32.mrf.mxu1 }
 0x8ad   :  { %v9737_v34 = vpop.f32.mrf.mxu2  ;;  %v10832_v56 = vsub.f32 %v10714_v3, %v15964_v46  ;;  %10824 = vmatpush.msrb.mxu1 %v10823_v5  ;;  %v10852_v3 = vsub.f32 %v10850_v41, %v16007_v59  ;;  %v10858_v5 = vsub.f32 %v10856_v20, %v16019_v51 }
 0x8ae   :  { %v10712_v34 = vld [vmem:[#allocation9 + $0x20] sm:$0xff] }
 0x8af   :  { %v15977_v26 = vand.u32 4294901760, %v10712_v34  ;;  %v15986_v31 = vand.u32 4294901760, %v10832_v56  ;;  %10911 = vmatpush.msrb.mxu2 %v10832_v56  ;;  %10830 = vmatpush.msrb.mxu1 %v10829_v33  ;;  %v10859_v18 = vand.u32 4294901760, %v10858_v5 }
 0x8b1   :  { %v10844_v37 = vsub.f32 %v10712_v34, %v15977_v26  ;;  %v10834_v8 = vsub.f32 %v10832_v56, %v15986_v31  ;;  %10914 = vmatpush.msrb.mxu2 %v10838_v58  ;;  %10964 = vmatpush.msrb.mxu3 %v15977_v26  ;;  %v10853_v56 = vand.u32 4294901760, %v10852_v3  ;;  %v10868_v34 = vsub.f32 %v10708_v12, %v16015_v39 }
 0x8b2   :  { %10751 = vmatpush.msrb.mxu0 %v15977_v26  ;;  %v16028_v58 = vand.u32 4294901760, %v10862_v11 }
 0x8b3   :  { %v15997_v36 = vand.u32 4294901760, %v10844_v37  ;;  %v10835_v43 = vand.u32 4294901760, %v10834_v8  ;;  %10917 = vmatpush.msrb.mxu2 %v10844_v37  ;;  %10966 = vmatpush.msrb.mxu3 %v15991_v45  ;;  %v16030_v54 = vand.u32 4294901760, %v10868_v34 }
 0x8b4   :  { %10753 = vmatpush.msrb.mxu0 %v15991_v45 }
 0x8b5   :  { %v10846_v42 = vsub.f32 %v10844_v37, %v15997_v36  ;;  %10836 = vmatpush.msrb.mxu1 %v10835_v43  ;;  %10920 = vmatpush.msrb.mxu2 %v10850_v41  ;;  %v10864_v37 = vsub.f32 %v10862_v11, %v16028_v58  ;;  %v10870_v33 = vsub.f32 %v10868_v34, %v16030_v54 }
 0x8b6   :  { %v9741_v9 = vpop.f32.mrf.mxu2  ;;  %10968 = vmatpush.msrb.mxu3 %v16004_v19  ;;  %10755 = vmatpush.msrb.mxu0 %v16004_v19 }
 0x8b7   :  { %v10847_v49 = vand.u32 4294901760, %v10846_v42  ;;  %10842 = vmatpush.msrb.mxu1 %v10841_v62  ;;  %10923 = vmatpush.msrb.mxu2 %v10856_v20  ;;  %v10865_v14 = vand.u32 4294901760, %v10864_v37  ;;  %v10871_v52 = vand.u32 4294901760, %v10870_v33  ;;  %v10274_v42 = vld [vmem:[#allocation6] sm:$0xff] }
 0x8b8   :  { %10970 = vmatpush.msrb.mxu3 %v16012_v38  ;;  %10757 = vmatpush.msrb.mxu0 %v16012_v38 }
 0x8b9   :  { %10848 = vmatpush.msrb.mxu1 %v10847_v49  ;;  %10926 = vmatpush.msrb.mxu2 %v10862_v11 }
 0x8ba   :  { %10972 = vmatpush.msrb.mxu3 %v16015_v39  ;;  %10759 = vmatpush.msrb.mxu0 %v16015_v39 }
 0x8bb   :  { %10854 = vmatpush.msrb.mxu1 %v10853_v56  ;;  %10929 = vmatpush.msrb.mxu2 %v10868_v34 }
 0x8bc   :  { %11173 = vmatpush.msra.mxu3 %v15886_v48  ;;  %10989 = vmatpush.msra.mxu0 %v15895_v27 }
 0x8bd   :  { %11157 = vmatpush.msra.mxu2 %v15895_v27  ;;  %10860 = vmatpush.msrb.mxu1 %v10859_v18 }
 0x8be   :  { %11174 = vmatpush.msra.mxu3 %v15889_v6  ;;  %10993 = vmatpush.msra.mxu0 %v15903_v22 }
 0x8bf   :  { %11158 = vmatpush.msra.mxu2 %v15903_v22  ;;  %10866 = vmatpush.msrb.mxu1 %v10865_v14 }
 0x8c0   :  { %11175 = vmatpush.msra.mxu3 %v15898_v21  ;;  %10997 = vmatpush.msra.mxu0 %v15911_v63 }
 0x8c1   :  { %11159 = vmatpush.msra.mxu2 %v15911_v63  ;;  %10872 = vmatpush.msrb.mxu1 %v10871_v52 }
 0x8c2   :  { %11176 = vmatpush.msra.mxu3 %v15906_v7  ;;  %11001 = vmatpush.msra.mxu0 %v15921_v17 }
 0x8c3   :  { %v15974_v9 = vpop.f32.mrf.mxu0  ;;  %11060 = vmatpush.msra.mxu1 %v15886_v48  ;;  %11160 = vmatpush.msra.mxu2 %v15921_v17 }
 0x8c4   :  { %11177 = vmatpush.msra.mxu3 %v15917_v29  ;;  %11005 = vmatpush.msra.mxu0 %v15936_v60 }
 0x8c5   :  { %11062 = vmatpush.msra.mxu1 %v15889_v6  ;;  %11161 = vmatpush.msra.mxu2 %v15936_v60 }
 0x8c6   :  { %v16002_v35 = vpop.f32.mrf.mxu1  ;;  %11178 = vmatpush.msra.mxu3 %v15923_v13  ;;  %11009 = vmatpush.msra.mxu0 %v15941_v57 }
 0x8c7   :  { %v15932_v0 = vpop.f32.mrf.mxu3  ;;  %11064 = vmatpush.msra.mxu1 %v15898_v21  ;;  %11162 = vmatpush.msra.mxu2 %v15941_v57 }
 0x8c8   :  { %11179 = vmatpush.msra.mxu3 %v15930_v30  ;;  %11013 = vmatpush.msra.mxu0 %v15950_v16 }
 0x8c9   :  { %11066 = vmatpush.msra.mxu1 %v15906_v7  ;;  %11163 = vmatpush.msra.mxu2 %v15950_v16 }
 0x8ca   :  { %11180 = vmatpush.msra.mxu3 %v15944_v28  ;;  %11017 = vmatpush.msra.mxu0 %v15958_v61 }
 0x8cb   :  { %11068 = vmatpush.msra.mxu1 %v15917_v29  ;;  %11164 = vmatpush.msra.mxu2 %v15958_v61  ;;  %v10048_v29 = vadd.f32 %v15915_v53, %v15893_v10 }
 0x8cc   :  { %11181 = vmatpush.msra.mxu3 %v15953_v40  ;;  %11021 = vmatpush.msra.mxu0 %v15971_v2 }
 0x8cd   :  { %v16022_v50 = vpop.f32.mrf.mxu0  ;;  %11070 = vmatpush.msra.mxu1 %v15923_v13  ;;  %11165 = vmatpush.msra.mxu2 %v15971_v2 }
 0x8ce   :  { %11182 = vmatpush.msra.mxu3 %v15964_v46  ;;  %11025 = vmatpush.msra.mxu0 %v15986_v31 }
 0x8cf   :  { %11072 = vmatpush.msra.mxu1 %v15930_v30  ;;  %11166 = vmatpush.msra.mxu2 %v15986_v31  ;;  %v10275_v30 = vld [vmem:[#allocation6 + $0x8] sm:$0xff]  ;;  %v10052_v31 = vadd.f32 %v15961_v47, %v15939_v4  ;;  %v9880_v4 = vld [vmem:[#allocation3 + $0xb0] sm:$0xf] }
 0x8d0   :  { %v15981_v32 = vpop.f32.mrf.mxu3  ;;  %v16038_v8 = vpop.f32.mrf.mxu1  ;;  %11183 = vmatpush.msra.mxu3 %v15967_v44  ;;  %11029 = vmatpush.msra.mxu0 %v15988_v1  ;;  %v9882_v47 = vunpack.c.l.bf16 %v9880_v4 }
 0x8d1   :  { %v15934_v24 = vpop.f32.mrf.mxu2  ;;  %11074 = vmatpush.msra.mxu1 %v15944_v28  ;;  %11167 = vmatpush.msra.mxu2 %v15988_v1 }
 0x8d2   :  { %v10106_v2 = vadd.f32 %v15934_v24, %v10048_v29  ;;  %11184 = vmatpush.msra.mxu3 %v15977_v26  ;;  %11033 = vmatpush.msra.mxu0 %v15997_v36 }
 0x8d3   :  { %11076 = vmatpush.msra.mxu1 %v15953_v40  ;;  %11168 = vmatpush.msra.mxu2 %v15997_v36 }
 0x8d4   :  { %v10150_v24 = vadd.f32 %v15932_v0, %v10106_v2  ;;  %11185 = vmatpush.msra.mxu3 %v15991_v45  ;;  %11037 = vmatpush.msra.mxu0 %v16007_v59 }
 0x8d5   :  { %11078 = vmatpush.msra.mxu1 %v15964_v46  ;;  %11169 = vmatpush.msra.mxu2 %v16007_v59 }
 0x8d6   :  { %11186 = vmatpush.msra.mxu3 %v16004_v19  ;;  %11041 = vmatpush.msra.mxu0 %v16019_v51  ;;  %v10225_v0 = vadd.f32 %v15974_v9, %v10150_v24 }
 0x8d7   :  { %11080 = vmatpush.msra.mxu1 %v15967_v44  ;;  %11170 = vmatpush.msra.mxu2 %v16019_v51 }
 0x8d8   :  { %11187 = vmatpush.msra.mxu3 %v16012_v38  ;;  %11045 = vmatpush.msra.mxu0 %v16028_v58  ;;  %v10266_v9 = vadd.f32 %v16002_v35, %v10225_v0 }
 0x8d9   :  { %11082 = vmatpush.msra.mxu1 %v15977_v26  ;;  %11171 = vmatpush.msra.mxu2 %v16028_v58 }
 0x8da   :  { %v15983_v55 = vpop.f32.mrf.mxu2  ;;  %11188 = vmatpush.msra.mxu3 %v16015_v39  ;;  %11049 = vmatpush.msra.mxu0 %v16030_v54  ;;  %v10272_v59 = vadd.f32 %v10266_v9, %v9882_v47 }
 0x8db   :  { %v10111_v36 = vadd.f32 %v15983_v55, %v10052_v31  ;;  %11084 = vmatpush.msra.mxu1 %v15991_v45  ;;  %11172 = vmatpush.msra.mxu2 %v16030_v54 }
 0x8dd   :  { %11086 = vmatpush.msra.mxu1 %v16004_v19  ;;  %v10156_v26 = vadd.f32 %v15981_v32, %v10111_v36 }
 0x8df   :  { %11088 = vmatpush.msra.mxu1 %v16012_v38  ;;  %v10229_v49 = vadd.f32 %v16022_v50, %v10156_v26 }
 0x8e1   :  { %11090 = vmatpush.msra.mxu1 %v16015_v39  ;;  %v10270_v35 = vadd.f32 %v16038_v8, %v10229_v49 }
 0x8e7   :  { %v10497_v41 = vpop.f32.mrf.mxu0 }
 0x8ea   :  { %v10541_v22 = vpop.f32.mrf.mxu1 }
 0x8eb   :  { %v10439_v23 = vpop.f32.mrf.mxu3 }
 0x8ef   :  { %v10502_v21 = vpop.f32.mrf.mxu0 }
 0x8f2   :  { %v10547_v20 = vpop.f32.mrf.mxu1 }
 0x8f3   :  { %v10443_v15 = vpop.f32.mrf.mxu3 }
 0x8f4   :  { %v10330_v25 = vpop.f32.mrf.mxu2 }
 0x8f5   :  { %v10440_v43 = vadd.f32 %v10439_v23, %v10330_v25  ;;  %v9881_v23 = vld [vmem:[#allocation3 + $0xbc] sm:$0xf] }
 0x8f6   :  { %v9883_v19 = vunpack.c.l.bf16 %v9881_v23 }
 0x8f7   :  { %v10498_v27 = vadd.f32 %v10497_v41, %v10440_v43 }
 0x8f8   :  { %v10273_v34 = vadd.f32 %v10270_v35, %v9883_v19 }
 0x8f9   :  { %v10542_v63 = vadd.f32 %v10541_v22, %v10498_v27 }
 0x8fc   :  { %v10338_v62 = vpop.f32.mrf.mxu2 }
 0x8fd   :  { %v10444_v48 = vadd.f32 %v10443_v15, %v10338_v62 }
 0x8ff   :  { %v10503_v7 = vadd.f32 %v10502_v21, %v10444_v48 }
 0x901   :  { %v10548_v61 = vadd.f32 %v10547_v20, %v10503_v7  ;;  %v11201_v20 = vld [vmem:[%s16127_s4] ss:$0 sm:$0xff]  ;;  %s11106_s4 = sshll.u32 %s11493_s17, 4  ;;  %s11107_s4 = int_to_ptr.vmem [resolvable:$true] %s11106_s4 }
 0x90b   :  { %v10657_v6 = vpop.f32.mrf.mxu3 }
 0x913   :  { %v10661_v53 = vpop.f32.mrf.mxu3 }
 0x914   :  { %v10616_v17 = vpop.f32.mrf.mxu2 }
 0x915   :  { %v10617_v60 = vadd.f32 %v10616_v17, %v10542_v63 }
 0x917   :  { %v10658_v57 = vadd.f32 %v10657_v6, %v10617_v60 }
 0x919   :  { %v10664_v16 = vadd.f32 %v10658_v57, %v10274_v42 }
 0x91b   :  { %v11155_v13 = vmul.f32 -1.442695, %v10664_v16 }
 0x91c   :  { %v10620_v12 = vpop.f32.mrf.mxu2 }
 0x91d   :  { %11342 = vpow2.f32 %v11155_v13  ;;  %v10621_v10 = vadd.f32 %v10620_v12, %v10548_v61 }
 0x91f   :  { %v10662_v28 = vadd.f32 %v10661_v53, %v10621_v10 }
 0x921   :  { %v10665_v40 = vadd.f32 %v10662_v28, %v10275_v30 }
 0x923   :  { %v11343_v46 = vpop.eup %11342  ;;  %v11156_v1 = vmul.f32 -1.442695, %v10665_v40 }
 0x924   :  { %v10674_v44 = vadd.f32 1.0, %v11343_v46 }
 0x925   :  { %11344 = vpow2.f32 %v11156_v1 }
 0x926   :  { %11346 = vrcp.f32 %v10674_v44  ;;  %v10687_v11 = vand.u32 2147483648, %v10674_v44  ;;  %v10685_v38 = vand.u32 2147483647, %v10674_v44  ;;  %vm10681_vm1 = vweird.f32 %v10674_v44 }
 0x928   :  { %v10688_v5 = vor.u32 1.1754944e-38, %v10687_v11  ;;  %vm10686_vm3 = vcmp.eq.f32.partialorder %v10685_v38, 8.507059e+37 }
 0x92b   :  { %v11345_v55 = vpop.eup %11344 }
 0x92c   :  { %v11347_v45 = vpop.eup %11346  ;;  %v10675_v3 = vadd.f32 1.0, %v11345_v55 }
 0x92d   :  { %v10677_v25 = vmul.f32 %v11347_v45, %v10674_v44  ;;  %vm10682_vm0 = vweird.f32 %v11347_v45 }
 0x92e   :  { %11348 = vrcp.f32 %v10675_v3  ;;  %vm10683_vm2 = vmor %vm10681_vm1, %vm10682_vm0  ;;  %v10702_v14 = vand.u32 2147483648, %v10675_v3  ;;  %v10700_v41 = vand.u32 2147483647, %v10675_v3  ;;  %vm10696_vm5 = vweird.f32 %v10675_v3 }
 0x92f   :  { %v10678_v51 = vsub.f32 1.0, %v10677_v25  ;;  %11350 = vtanh.f32 %v10272_v59 }
 0x930   :  { %11352 = vtanh.f32 %v10273_v34  ;;  %v10703_v62 = vor.u32 1.1754944e-38, %v10702_v14  ;;  %vm10701_vm7 = vcmp.eq.f32.partialorder %v10700_v41, 8.507059e+37 }
 0x931   :  { %v10679_v32 = vmul.f32 %v11347_v45, %v10678_v51 }
 0x933   :  { %v10680_v56 = vadd.f32 %v11347_v45, %v10679_v32 }
 0x934   :  { %v11349_v39 = vpop.eup %11348 }
 0x935   :  { %v10692_v50 = vmul.f32 %v11349_v39, %v10675_v3  ;;  %v10684_v58 = vsel %vm10683_vm2, %v11347_v45, %v10680_v56  ;;  %v11351_v54 = vpop.eup %11350  ;;  %vm10697_vm4 = vweird.f32 %v11349_v39 }
 0x936   :  { %v10689_v18 = vsel %vm10686_vm3, %v10688_v5, %v10684_v58  ;;  %vm10698_vm6 = vmor %vm10696_vm5, %vm10697_vm4  ;;  %v11353_v48 = vpop.eup %11352 }
 0x937   :  { %v10693_v37 = vsub.f32 1.0, %v10692_v50  ;;  %v10706_v33 = vmul.f32 %v11351_v54, %v10689_v18 }
 0x939   :  { %v10760_v8 = vand.u32 4294901760, %v10706_v33  ;;  %v10694_v52 = vmul.f32 %v11349_v39, %v10693_v37 }
 0x93b   :  { %10874 = vmatmul.f32.vlgmr.msrb.gmra.mxu1 %v10760_v8  ;;  %v10761_v43 = vsub.f32 %v10706_v33, %v10760_v8  ;;  %v10695_v15 = vadd.f32 %v11349_v39, %v10694_v52 }
 0x93d   :  { %10932 = vmatmul.f32.vlgmr.msrb.gmra.mxu2 %v10761_v43  ;;  %v10762_v27 = vand.u32 4294901760, %v10761_v43  ;;  %v10699_v22 = vsel %vm10698_vm6, %v11349_v39, %v10695_v15 }
 0x93e   :  { %v10704_v63 = vsel %vm10701_vm7, %v10703_v62, %v10699_v22 }
 0x93f   :  { %10976 = vmatmul.f32.vlgmr.msrb.gmra.mxu3 %v10762_v27  ;;  %v10763_v6 = vsub.f32 %v10761_v43, %v10762_v27  ;;  %v10707_v17 = vmul.f32 %v11353_v48, %v10704_v63 }
 0x941   :  { %v10764_v60 = vand.u32 4294901760, %v10763_v6  ;;  %v10768_v21 = vand.u32 4294901760, %v10707_v17 }
 0x943   :  { %10765 = vmatmul.f32.vlgmr.msrb.gmra.mxu0 %v10764_v60  ;;  %10878 = vmatmul.f32.gmra.mxu1 %v10768_v21  ;;  %v10769_v42 = vsub.f32 %v10707_v17, %v10768_v21 }
 0x945   :  { %10937 = vmatmul.f32.gmra.mxu2 %v10769_v42  ;;  %v10770_v7 = vand.u32 4294901760, %v10769_v42 }
 0x947   :  { %10982 = vmatmul.f32.gmra.mxu3 %v10770_v7  ;;  %v10771_v57 = vsub.f32 %v10769_v42, %v10770_v7 }
 0x949   :  { %v10772_v16 = vand.u32 4294901760, %v10771_v57 }
 0x94b   :  { %10773 = vmatmul.f32.gmra.mxu0 %v10772_v16  ;;  %11092 = vmatmul.f32.vlgmr.msra.gmra.mxu1 %v10760_v8 }
 0x94d   :  { %11055 = vmatmul.f32.vlgmr.msra.gmra.mxu2 %v10768_v21 }
 0x94f   :  { %11096 = vmatmul.f32.vlgmr.msra.gmra.mxu3 %v10768_v21 }
 0x953   :  { %11051 = vmatmul.f32.vlgmr.msra.gmra.mxu0 %v10760_v8 }
 0x9b8   :  { %v10875_v29 = vpop.f32.mrf.mxu1 }
 0x9c0   :  { %v10766_v13 = vpop.f32.mrf.mxu0  ;;  %v10933_v61 = vpop.f32.mrf.mxu2 }
 0x9c1   :  { %v10767_v12 = vadd.f32 %v11201_v20, %v10766_v13  ;;  %v10879_v53 = vpop.f32.mrf.mxu1 }
 0x9c2   :  { %v10977_v2 = vpop.f32.mrf.mxu3 }
 0x9c3   :  { %v10876_v10 = vadd.f32 %v10875_v29, %v10767_v12 }
 0x9c5   :  { %v10934_v31 = vadd.f32 %v10933_v61, %v10876_v10 }
 0x9c7   :  { %v10978_v0 = vadd.f32 %v10977_v2, %v10934_v31 }
 0x9c8   :  { %v10774_v30 = vpop.f32.mrf.mxu0  ;;  %v10938_v24 = vpop.f32.mrf.mxu2 }
 0x9c9   :  { %v10775_v28 = vadd.f32 %v11201_v20, %v10774_v30  ;;  %v11093_v9 = vpop.f32.mrf.mxu1 }
 0x9ca   :  { %v10983_v40 = vpop.f32.mrf.mxu3 }
 0x9cb   :  { %v10880_v46 = vadd.f32 %v10879_v53, %v10775_v28 }
 0x9cd   :  { %v10939_v1 = vadd.f32 %v10938_v24, %v10880_v46 }
 0x9cf   :  { %v10984_v36 = vadd.f32 %v10983_v40, %v10939_v1 }
 0x9d0   :  { %v11052_v44 = vpop.f32.mrf.mxu0  ;;  %v11056_v47 = vpop.f32.mrf.mxu2 }
 0x9d1   :  { %v11053_v4 = vadd.f32 %v11052_v44, %v10978_v0  ;;  %v11057_v26 = vadd.f32 %v11056_v47, %v10984_v36 }
 0x9d2   :  { %v11097_v55 = vpop.f32.mrf.mxu3 }
 0x9d3   :  { %v11094_v45 = vadd.f32 %v11093_v9, %v11053_v4  ;;  %v11098_v59 = vadd.f32 %v11097_v55, %v11057_v26 }
 0x9d5   :  { %11100 = vst [vmem:[#allocation11] sm:$0xff] %v11094_v45 }
 0x9d6   :  { %11101 = vst [vmem:[#allocation11 + $0x8] sm:$0xff] %v11098_v59 }
 0x9d7   :  { %11114 = dma.vmem_to_hbm [thread:$0]  %s11107_s4, 256, %s11109_s20, [#allocation5], %s11483_s26, %s11483_s26, %s11484_s27  }
 0x9d8   :  { %11480 = dma.done.wait [#allocation5], 256  }
 0x9d9   :  { %11481 = vsyncadd [#allocation5], 4294967040 }
 0x9da   :  { %11119 = vsyncpa [#allocation4], 1 }
 0x9db   :  { %11120 = vsyncpa [#allocation7], 1 }
 0x9dc   :  { %11121 = vsyncpa [#allocation10], 1 }
 0x9dd   :  { %11122 = vsyncpa [#allocation5], 1 }

</bundles_post_ra>
